<compile_context>
chip_gen: v7x
topology: tpu7x:2x2x1
jax: 0.10.0
libtpu: 0.0.40
codegen_flags: <defaults>
</compile_context>

<pallas_src>
import functools

import numpy as np
import jax
import jax.numpy as jnp
from jax import lax
from jax.experimental import pallas as pl
from jax.experimental.pallas import tpu as pltpu


def _round_up(x, m):
    return (x + m - 1) // m * m


# ---------------------------------------------------------------------------
# Fused kernel: conv1..3 (+deferred bias/ReLU, 2x2 maxpool) + fc1(+ReLU) + fc2.
# One grid step == one image; the grid axis is 'parallel'.
# ---------------------------------------------------------------------------
def _fused_cnn_kernel(x1_ref, w1_ref, b1_ref, w2_ref, b2_ref, w3_ref, b3_ref,
                      wf1_hbm_ref, bf1_ref, wf2_ref, bf2_ref,
                      out_ref,
                      y1_ref, x2_ref, y2_ref, x3_ref, y3_ref, x4_ref,
                      wf1_vmem_ref, wf1_sem, *, geom):
    """Activation layout ('flat rows'): row = flat (y, x) index of the
    spatially zero-padded HxW map, channels on lanes, plus `margin` zero rows
    on both ends so every 3x3 tap is a contiguous row window at a static
    offset.  Border/garbage rows are never read by the pools."""
    (wp1, m1, a1r), (wp2, m2, a2r), (wp3, m3, a3r) = geom

    # Stream fc1 weights HBM -> VMEM now; wait only right before fc1 so the
    # transfer is hidden behind all three conv layers.
    wf1_copy = pltpu.make_async_copy(wf1_hbm_ref, wf1_vmem_ref, wf1_sem)
    wf1_copy.start()

    def conv(x_ref, w_ref, y_ref, wp, margin, a_round):
        # 3x3 'same' conv as 9 accumulating MXU matmuls (bf16 in, f32 acc)
        # from row windows of the padded input.  No im2col patch buffer.
        # (On v6e/v7x one could instead build the K=9*Cin im2col for
        #  conv2/conv3 to feed the 256-deep MXU; per-tap is kept everywhere
        #  for simplicity and to avoid masked sub-lane stores.)
        for dy in range(3):
            for dx in range(3):
                t = dy * 3 + dx
                off = (dy - 1) * wp + (dx - 1)
                d = jnp.dot(x_ref[pl.ds(margin + off, a_round), :], w_ref[t],
                            preferred_element_type=jnp.float32)
                if t == 0:
                    y_ref[...] = d
                else:
                    y_ref[...] += d

    def pool_pad(y_ref, b_ref, dst_ref, wp_src, m_dst, wp_dst):
        # 2x2/stride-2 max-pool + deferred bias + ReLU, written straight into
        # the next layer's zero-padded flat-row buffer.  Pure strided VPU
        # work; only valid interior conv rows are read.
        ho = wo = (wp_src - 2) // 2
        b = b_ref[...]
        for pi in range(ho):
            v = None
            for r in range(2):
                for c in range(2):
                    src = (2 * pi + r + 1) * wp_src + (c + 1)
                    s = y_ref[pl.ds(src, wo, stride=2), :]
                    v = s if v is None else jnp.maximum(v, s)
            v = jnp.maximum(v + b, 0.0).astype(dst_ref.dtype)
            dst_ref[pl.ds(m_dst + (pi + 1) * wp_dst + 1, wo), :] = v

    def pool_flat(y_ref, b_ref, dst_ref, wp_src):
        # Final pool: write each pooled pixel's channels at its HWC lane
        # offset of the (1, feat) fc1 input row -> the flatten costs no
        # in-kernel transpose and fc1 becomes one large-K matmul.
        ho = wo = (wp_src - 2) // 2
        cout = y_ref.shape[1]
        b = b_ref[...]
        for pi in range(ho):
            for pj in range(wo):
                v = None
                for r in range(2):
                    for c in range(2):
                        src = (2 * pi + r + 1) * wp_src + (2 * pj + c + 1)
                        s = y_ref[pl.ds(src, 1), :]
                        v = s if v is None else jnp.maximum(v, s)
                v = jnp.maximum(v + b, 0.0).astype(dst_ref.dtype)
                dst_ref[:, pl.ds((pi * wo + pj) * cout, cout)] = v

    # Next-layer input buffers must be zero outside the written interior
    # (spatial zero-padding + tap-window margins).
    x2_ref[...] = jnp.zeros_like(x2_ref)
    x3_ref[...] = jnp.zeros_like(x3_ref)

    conv(x1_ref, w1_ref, y1_ref, wp1, m1, a1r)
    pool_pad(y1_ref, b1_ref, x2_ref, wp1, m2, wp2)
    conv(x2_ref, w2_ref, y2_ref, wp2, m2, a2r)
    pool_pad(y2_ref, b2_ref, x3_ref, wp2, m3, wp3)
    conv(x3_ref, w3_ref, y3_ref, wp3, m3, a3r)
    pool_flat(y3_ref, b3_ref, x4_ref, wp3)

    # fc1: one large-K (1, feat) x (feat, 512) bf16 MXU matmul, f32 acc.
    wf1_copy.wait()
    h = jnp.dot(x4_ref[...], wf1_vmem_ref[...],
                preferred_element_type=jnp.float32) + bf1_ref[...]
    h = jnp.maximum(h, 0.0)
    # TODO(synk): nn.Dropout(0.5) is stochastic only in training mode; here it
    # is the inference-mode identity.
    out_ref[...] = (jnp.dot(h.astype(jnp.bfloat16), wf2_ref[...],
                            preferred_element_type=jnp.float32)
                    + bf2_ref[...])


# ---------------------------------------------------------------------------
# Pure-JAX reference (f32) for a tolerance-checked comparison.
# ---------------------------------------------------------------------------
def _reference_forward(params, x_nchw):
    x = jnp.transpose(x_nchw, (0, 2, 3, 1))                       # NHWC
    for w, b in zip(params["conv_w"], params["conv_b"]):
        x = lax.conv_general_dilated(
            x, w, window_strides=(1, 1), padding="SAME",
            dimension_numbers=("NHWC", "HWIO", "NHWC"),
            precision=lax.Precision.HIGHEST)
        x = jnp.maximum(x + b, 0.0)
        n, hh, ww, c = x.shape
        x = x.reshape(n, hh // 2, 2, ww // 2, 2, c).max(axis=(2, 4))
    x = x.reshape(x.shape[0], -1)                                 # HWC flatten
    h = jnp.maximum(jnp.dot(x, params["fc1_w"],
                            precision=lax.Precision.HIGHEST) + params["fc1_b"],
                    0.0)
    return jnp.dot(h, params["fc2_w"],
                   precision=lax.Precision.HIGHEST) + params["fc2_b"]


# ---------------------------------------------------------------------------
# Model construction: synthetic weights + kernel operands + forward fn.
# ---------------------------------------------------------------------------
def build_simple_cnn(key, batch, hw=16, num_classes=4):
    assert hw % 8 == 0, "demo geometry assumes three clean 2x2 pools"
    chans = [3, 32, 64, 128]
    c1p = 8                      # conv1 Cin zero-padded 3->8 (aligned K)
    fc1_out = 512

    # Per-layer flat-row geometry: padded width, margin rows, rounded M.
    layers = []
    h = hw
    for _ in range(3):
        hp = h + 2
        area = hp * hp
        a_round = _round_up(area, 8)                 # matmul M, sublane-aligned
        margin = _round_up(hp + 1 + (a_round - area), 8)
        layers.append({"hp": hp, "area": area, "a_round": a_round,
                       "margin": margin, "rows": area + 2 * margin})
        h //= 2
    geom = tuple((l["hp"], l["margin"], l["a_round"]) for l in layers)
    (hp1, m1, a1r), (hp2, m2, a2r), (hp3, m3, a3r) = geom
    rows1, rows2, rows3 = [l["rows"] for l in layers]
    feat = chans[3] * (hw // 8) ** 2

    # Synthetic parameters (same shapes as the PyTorch reference).
    keys = jax.random.split(key, 12)
    conv_w, conv_b = [], []
    for i in range(3):
        cin, cout = chans[i], chans[i + 1]
        conv_w.append(jax.random.normal(keys[2 * i], (3, 3, cin, cout),
                                        jnp.float32) / np.sqrt(9.0 * cin))
        conv_b.append(0.1 * jax.random.normal(keys[2 * i + 1], (cout,),
                                              jnp.float32))
    fc1_w = jax.random.normal(keys[6], (feat, fc1_out), jnp.float32) / np.sqrt(feat)
    fc1_b = 0.1 * jax.random.normal(keys[7], (fc1_out,), jnp.float32)
    fc2_w = (jax.random.normal(keys[8], (fc1_out, num_classes), jnp.float32)
             / np.sqrt(float(fc1_out)))
    fc2_b = 0.1 * jax.random.normal(keys[9], (num_classes,), jnp.float32)
    params = {"conv_w": conv_w, "conv_b": conv_b, "fc1_w": fc1_w,
              "fc1_b": fc1_b, "fc2_w": fc2_w, "fc2_b": fc2_b}

    # Kernel operands: bf16 matmul operands as (9, cin, cout) taps, f32 biases.
    w1p = jnp.pad(conv_w[0], ((0, 0), (0, 0), (0, c1p - chans[0]), (0, 0)))
    ops = {
        "w1": w1p.reshape(9, c1p, chans[1]).astype(jnp.bfloat16),
        "w2": conv_w[1].reshape(9, chans[1], chans[2]).astype(jnp.bfloat16),
        "w3": conv_w[2].reshape(9, chans[2], chans[3]).astype(jnp.bfloat16),
        "b1": conv_b[0].reshape(1, -1),
        "b2": conv_b[1].reshape(1, -1),
        "b3": conv_b[2].reshape(1, -1),
        "wf1": fc1_w.astype(jnp.bfloat16),
        "bf1": fc1_b.reshape(1, -1),
        "wf2": fc2_w.astype(jnp.bfloat16),
        "bf2": fc2_b.reshape(1, -1),
    }

    # Advisory cost estimate for XLA's scheduler around the custom call.
    conv_cins = [c1p, chans[1], chans[2]]
    flops = 0
    for lay, cin, cout in zip(layers, conv_cins, chans[1:]):
        flops += 2 * lay["a_round"] * 9 * cin * cout
    flops += 2 * feat * fc1_out + 2 * fc1_out * num_classes
    flops *= batch
    w_bytes = sum(int(np.prod(v.shape)) * v.dtype.itemsize for v in ops.values())
    cost = pl.CostEstimate(
        flops=flops, transcendentals=0,
        bytes_accessed=batch * rows1 * c1p * 2 + w_bytes
        + batch * num_classes * 4)

    grid_spec = pltpu.PrefetchScalarGridSpec(
        num_scalar_prefetch=0,
        grid=(batch,),                                   # one image per step
        in_specs=[
            pl.BlockSpec((None, rows1, c1p), lambda n: (n, 0, 0)),    # x
            pl.BlockSpec((9, c1p, chans[1]), lambda n: (0, 0, 0)),    # w1
            pl.BlockSpec((1, chans[1]), lambda n: (0, 0)),            # b1
            pl.BlockSpec((9, chans[1], chans[2]), lambda n: (0, 0, 0)),
            pl.BlockSpec((1, chans[2]), lambda n: (0, 0)),
            pl.BlockSpec((9, chans[2], chans[3]), lambda n: (0, 0, 0)),
            pl.BlockSpec((1, chans[3]), lambda n: (0, 0)),
            pl.BlockSpec(memory_space=pl.ANY),            # wf1: manual DMA
            pl.BlockSpec((1, fc1_out), lambda n: (0, 0)),             # bf1
            pl.BlockSpec((fc1_out, num_classes), lambda n: (0, 0)),   # wf2
            pl.BlockSpec((1, num_classes), lambda n: (0, 0)),         # bf2
        ],
        out_specs=pl.BlockSpec((None, 1, num_classes), lambda n: (n, 0, 0)),
        scratch_shapes=[
            pltpu.VMEM((a1r, chans[1]), jnp.float32),     # conv1 raw output
            pltpu.VMEM((rows2, chans[1]), jnp.bfloat16),  # layer-2 padded input
            pltpu.VMEM((a2r, chans[2]), jnp.float32),     # conv2 raw output
            pltpu.VMEM((rows3, chans[2]), jnp.bfloat16),  # layer-3 padded input
            pltpu.VMEM((a3r, chans[3]), jnp.float32),     # conv3 raw output
            pltpu.VMEM((1, feat), jnp.bfloat16),          # fc1 input row
            pltpu.VMEM((feat, fc1_out), jnp.bfloat16),    # prefetched fc1 W
            pltpu.SemaphoreType.DMA,                      # fc1-weight DMA sem
        ],
    )

    fused = pl.pallas_call(
        functools.partial(_fused_cnn_kernel, geom=geom),
        out_shape=jax.ShapeDtypeStruct((batch, 1, num_classes), jnp.float32),
        grid_spec=grid_spec,
        compiler_params=pltpu.CompilerParams(
            dimension_semantics=("parallel",),            # megacore on v7x
            vmem_limit_bytes=32 * 1024 * 1024),
        cost_estimate=cost,
    )

    def forward(operands, x_nchw):
        # NCHW -> per-image zero-padded flat-row layout (bf16): NHWC,
        # channels padded 3->8, spatial pad 1, margin rows top/bottom.
        x = jnp.transpose(x_nchw, (0, 2, 3, 1)).astype(jnp.float32)
        x = jnp.pad(x, ((0, 0), (1, 1), (1, 1), (0, c1p - chans[0])))
        x = x.reshape(batch, hp1 * hp1, c1p)
        x = jnp.pad(x, ((0, 0), (m1, m1), (0, 0))).astype(jnp.bfloat16)
        out = fused(x,
                    operands["w1"], operands["b1"],
                    operands["w2"], operands["b2"],
                    operands["w3"], operands["b3"],
                    operands["wf1"], operands["bf1"],
                    operands["wf2"], operands["bf2"])
        return out[:, 0, :]

    return ops, params, jax.jit(forward)


if __name__ == "__main__":
    key = jax.random.PRNGKey(0)
    pkey, xkey = jax.random.split(key)
    batch, hw, num_classes = 2, 16, 4

    operands, params, forward = build_simple_cnn(pkey, batch, hw=hw,
                                                 num_classes=num_classes)
    x = jax.random.normal(xkey, (batch, 3, hw, hw), jnp.float32)   # NCHW input

    out = forward(operands, x)
    jax.block_until_ready(out)
    assert out.shape == (batch, num_classes) and out.dtype == jnp.float32
    assert bool(jnp.all(jnp.isfinite(out)))

    # Tolerance-checked comparison against a pure-JAX f32 reference
    # (kernel runs activations/weights in bf16 with f32 accumulation).
    ref = _reference_forward(params, x)
    np.testing.assert_allclose(np.asarray(out), np.asarray(ref),
                               rtol=5e-2, atol=5e-2)
    print("KERNEL_OK")
</pallas_src>

<mosaic_0001>
module attributes {stable_mosaic.version = 11 : i64} {
  func.func @_fused_cnn_kernel(%arg0: i32, %arg1: memref<1x372x8xbf16, #tpu.memory_space<vmem>>, %arg2: memref<9x8x32xbf16, #tpu.memory_space<vmem>>, %arg3: memref<1x32xf32, #tpu.memory_space<vmem>>, %arg4: memref<9x32x64xbf16, #tpu.memory_space<vmem>>, %arg5: memref<1x64xf32, #tpu.memory_space<vmem>>, %arg6: memref<9x64x128xbf16, #tpu.memory_space<vmem>>, %arg7: memref<1x128xf32, #tpu.memory_space<vmem>>, %arg8: memref<512x512xbf16, #tpu.memory_space<any>>, %arg9: memref<1x512xf32, #tpu.memory_space<vmem>>, %arg10: memref<512x4xbf16, #tpu.memory_space<vmem>>, %arg11: memref<1x4xf32, #tpu.memory_space<vmem>>, %arg12: memref<1x1x4xf32, #tpu.memory_space<vmem>>, %arg13: memref<328x32xf32, #tpu.memory_space<vmem>>, %arg14: memref<132x32xbf16, #tpu.memory_space<vmem>>, %arg15: memref<104x64xf32, #tpu.memory_space<vmem>>, %arg16: memref<68x64xbf16, #tpu.memory_space<vmem>>, %arg17: memref<40x128xf32, #tpu.memory_space<vmem>>, %arg18: memref<1x512xbf16, #tpu.memory_space<vmem>>, %arg19: memref<512x512xbf16, #tpu.memory_space<vmem>>, %arg20: memref<!tpu.dma_semaphore, #tpu.memory_space<semaphore_mem>>) attributes {dimension_semantics = [#tpu.dimension_semantics<parallel>], iteration_bounds = array<i64: 2>, scalar_prefetch = 0 : i64, scratch_operands = 8 : i64, tpu.core_type = #tpu.core_type<tc>, window_params = [{transform_indices = @transform_0, window_bounds = array<i64: 1, 372, 8>}, {pipeline_mode = #tpu.pipeline_mode<synchronous>, transform_indices = @transform_1, window_bounds = array<i64: 9, 8, 32>}, {pipeline_mode = #tpu.pipeline_mode<synchronous>, transform_indices = @transform_2, window_bounds = array<i64: 1, 32>}, {pipeline_mode = #tpu.pipeline_mode<synchronous>, transform_indices = @transform_3, window_bounds = array<i64: 9, 32, 64>}, {pipeline_mode = #tpu.pipeline_mode<synchronous>, transform_indices = @transform_4, window_bounds = array<i64: 1, 64>}, {pipeline_mode = #tpu.pipeline_mode<synchronous>, transform_indices = @transform_5, window_bounds = array<i64: 9, 64, 128>}, {pipeline_mode = #tpu.pipeline_mode<synchronous>, transform_indices = @transform_6, window_bounds = array<i64: 1, 128>}, {}, {pipeline_mode = #tpu.pipeline_mode<synchronous>, transform_indices = @transform_8, window_bounds = array<i64: 1, 512>}, {pipeline_mode = #tpu.pipeline_mode<synchronous>, transform_indices = @transform_9, window_bounds = array<i64: 512, 4>}, {pipeline_mode = #tpu.pipeline_mode<synchronous>, transform_indices = @transform_10, window_bounds = array<i64: 1, 4>}, {transform_indices = @transform_11, window_bounds = array<i64: 1, 1, 4>}]} {
    tpu.enqueue_dma source(%arg8 : memref<512x512xbf16, #tpu.memory_space<any>>) target(%arg19 : memref<512x512xbf16, #tpu.memory_space<vmem>>) target_semaphore(%arg20 : memref<!tpu.dma_semaphore, #tpu.memory_space<semaphore_mem>>)
    %cst = arith.constant 0.000000e+00 : bf16
    %0 = vector.broadcast %cst : bf16 to vector<132x32xbf16>
    %c0 = arith.constant 0 : index
    %c0_0 = arith.constant 0 : index
    %1 = vector.load %arg14[%c0, %c0_0] : memref<132x32xbf16, #tpu.memory_space<vmem>>, vector<132x32xbf16>
    tpu.vector_store %arg14[%c0, %c0_0], %0 {strides = array<i32>} : memref<132x32xbf16, #tpu.memory_space<vmem>>, vector<132x32xbf16>,
    %cst_1 = arith.constant 0.000000e+00 : bf16
    %2 = vector.broadcast %cst_1 : bf16 to vector<68x64xbf16>
    %c0_2 = arith.constant 0 : index
    %c0_3 = arith.constant 0 : index
    %3 = vector.load %arg16[%c0_2, %c0_3] : memref<68x64xbf16, #tpu.memory_space<vmem>>, vector<68x64xbf16>
    tpu.vector_store %arg16[%c0_2, %c0_3], %2 {strides = array<i32>} : memref<68x64xbf16, #tpu.memory_space<vmem>>, vector<68x64xbf16>,
    %c0_4 = arith.constant 0 : index
    %c5 = arith.constant 5 : index
    %c0_5 = arith.constant 0 : index
    %4 = vector.load %arg1[%c0_4, %c5, %c0_5] : memref<1x372x8xbf16, #tpu.memory_space<vmem>>, vector<1x328x8xbf16>
    %5 = vector.shape_cast %4 : vector<1x328x8xbf16> to vector<328x8xbf16>
    %c0_6 = arith.constant 0 : index
    %c0_7 = arith.constant 0 : index
    %c0_8 = arith.constant 0 : index
    %6 = vector.load %arg2[%c0_6, %c0_7, %c0_8] : memref<9x8x32xbf16, #tpu.memory_space<vmem>>, vector<1x8x32xbf16>
    %7 = vector.shape_cast %6 : vector<1x8x32xbf16> to vector<8x32xbf16>
    %cst_9 = arith.constant dense<0.000000e+00> : vector<328x32xf32>
    %8 = tpu.matmul %5, %7, %cst_9 {dimension_numbers = #tpu.dot_dimension_numbers<[1], [0], [0], [1], [0, 0, 1, 1], [], []>} : vector<328x8xbf16>, vector<8x32xbf16>, vector<328x32xf32> -> vector<328x32xf32>
    %c0_10 = arith.constant 0 : index
    %c0_11 = arith.constant 0 : index
    %9 = vector.load %arg13[%c0_10, %c0_11] : memref<328x32xf32, #tpu.memory_space<vmem>>, vector<328x32xf32>
    tpu.vector_store %arg13[%c0_10, %c0_11], %8 {strides = array<i32>} : memref<328x32xf32, #tpu.memory_space<vmem>>, vector<328x32xf32>,
    %c0_12 = arith.constant 0 : index
    %c6 = arith.constant 6 : index
    %c0_13 = arith.constant 0 : index
    %10 = vector.load %arg1[%c0_12, %c6, %c0_13] : memref<1x372x8xbf16, #tpu.memory_space<vmem>>, vector<1x328x8xbf16>
    %11 = vector.shape_cast %10 : vector<1x328x8xbf16> to vector<328x8xbf16>
    %c1 = arith.constant 1 : index
    %c0_14 = arith.constant 0 : index
    %c0_15 = arith.constant 0 : index
    %12 = vector.load %arg2[%c1, %c0_14, %c0_15] : memref<9x8x32xbf16, #tpu.memory_space<vmem>>, vector<1x8x32xbf16>
    %13 = vector.shape_cast %12 : vector<1x8x32xbf16> to vector<8x32xbf16>
    %cst_16 = arith.constant dense<0.000000e+00> : vector<328x32xf32>
    %14 = tpu.matmul %11, %13, %cst_16 {dimension_numbers = #tpu.dot_dimension_numbers<[1], [0], [0], [1], [0, 0, 1, 1], [], []>} : vector<328x8xbf16>, vector<8x32xbf16>, vector<328x32xf32> -> vector<328x32xf32>
    %c0_17 = arith.constant 0 : index
    %c0_18 = arith.constant 0 : index
    %15 = vector.load %arg13[%c0_17, %c0_18] : memref<328x32xf32, #tpu.memory_space<vmem>>, vector<328x32xf32>
    %16 = arith.addf %15, %14 : vector<328x32xf32>
    %c0_19 = arith.constant 0 : index
    %c0_20 = arith.constant 0 : index
    %17 = vector.load %arg13[%c0_19, %c0_20] : memref<328x32xf32, #tpu.memory_space<vmem>>, vector<328x32xf32>
    tpu.vector_store %arg13[%c0_19, %c0_20], %16 {strides = array<i32>} : memref<328x32xf32, #tpu.memory_space<vmem>>, vector<328x32xf32>,
    %c0_21 = arith.constant 0 : index
    %c7 = arith.constant 7 : index
    %c0_22 = arith.constant 0 : index
    %18 = vector.load %arg1[%c0_21, %c7, %c0_22] : memref<1x372x8xbf16, #tpu.memory_space<vmem>>, vector<1x328x8xbf16>
    %19 = vector.shape_cast %18 : vector<1x328x8xbf16> to vector<328x8xbf16>
    %c2 = arith.constant 2 : index
    %c0_23 = arith.constant 0 : index
    %c0_24 = arith.constant 0 : index
    %20 = vector.load %arg2[%c2, %c0_23, %c0_24] : memref<9x8x32xbf16, #tpu.memory_space<vmem>>, vector<1x8x32xbf16>
    %21 = vector.shape_cast %20 : vector<1x8x32xbf16> to vector<8x32xbf16>
    %cst_25 = arith.constant dense<0.000000e+00> : vector<328x32xf32>
    %22 = tpu.matmul %19, %21, %cst_25 {dimension_numbers = #tpu.dot_dimension_numbers<[1], [0], [0], [1], [0, 0, 1, 1], [], []>} : vector<328x8xbf16>, vector<8x32xbf16>, vector<328x32xf32> -> vector<328x32xf32>
    %c0_26 = arith.constant 0 : index
    %c0_27 = arith.constant 0 : index
    %23 = vector.load %arg13[%c0_26, %c0_27] : memref<328x32xf32, #tpu.memory_space<vmem>>, vector<328x32xf32>
    %24 = arith.addf %23, %22 : vector<328x32xf32>
    %c0_28 = arith.constant 0 : index
    %c0_29 = arith.constant 0 : index
    %25 = vector.load %arg13[%c0_28, %c0_29] : memref<328x32xf32, #tpu.memory_space<vmem>>, vector<328x32xf32>
    tpu.vector_store %arg13[%c0_28, %c0_29], %24 {strides = array<i32>} : memref<328x32xf32, #tpu.memory_space<vmem>>, vector<328x32xf32>,
    %c0_30 = arith.constant 0 : index
    %c23 = arith.constant 23 : index
    %c0_31 = arith.constant 0 : index
    %26 = vector.load %arg1[%c0_30, %c23, %c0_31] : memref<1x372x8xbf16, #tpu.memory_space<vmem>>, vector<1x328x8xbf16>
    %27 = vector.shape_cast %26 : vector<1x328x8xbf16> to vector<328x8xbf16>
    %c3 = arith.constant 3 : index
    %c0_32 = arith.constant 0 : index
    %c0_33 = arith.constant 0 : index
    %28 = vector.load %arg2[%c3, %c0_32, %c0_33] : memref<9x8x32xbf16, #tpu.memory_space<vmem>>, vector<1x8x32xbf16>
    %29 = vector.shape_cast %28 : vector<1x8x32xbf16> to vector<8x32xbf16>
    %cst_34 = arith.constant dense<0.000000e+00> : vector<328x32xf32>
    %30 = tpu.matmul %27, %29, %cst_34 {dimension_numbers = #tpu.dot_dimension_numbers<[1], [0], [0], [1], [0, 0, 1, 1], [], []>} : vector<328x8xbf16>, vector<8x32xbf16>, vector<328x32xf32> -> vector<328x32xf32>
    %c0_35 = arith.constant 0 : index
    %c0_36 = arith.constant 0 : index
    %31 = vector.load %arg13[%c0_35, %c0_36] : memref<328x32xf32, #tpu.memory_space<vmem>>, vector<328x32xf32>
    %32 = arith.addf %31, %30 : vector<328x32xf32>
    %c0_37 = arith.constant 0 : index
    %c0_38 = arith.constant 0 : index
    %33 = vector.load %arg13[%c0_37, %c0_38] : memref<328x32xf32, #tpu.memory_space<vmem>>, vector<328x32xf32>
    tpu.vector_store %arg13[%c0_37, %c0_38], %32 {strides = array<i32>} : memref<328x32xf32, #tpu.memory_space<vmem>>, vector<328x32xf32>,
    %c0_39 = arith.constant 0 : index
    %c24 = arith.constant 24 : index
    %c0_40 = arith.constant 0 : index
    %34 = vector.load %arg1[%c0_39, %c24, %c0_40] : memref<1x372x8xbf16, #tpu.memory_space<vmem>>, vector<1x328x8xbf16>
    %35 = vector.shape_cast %34 : vector<1x328x8xbf16> to vector<328x8xbf16>
    %c4 = arith.constant 4 : index
    %c0_41 = arith.constant 0 : index
    %c0_42 = arith.constant 0 : index
    %36 = vector.load %arg2[%c4, %c0_41, %c0_42] : memref<9x8x32xbf16, #tpu.memory_space<vmem>>, vector<1x8x32xbf16>
    %37 = vector.shape_cast %36 : vector<1x8x32xbf16> to vector<8x32xbf16>
    %cst_43 = arith.constant dense<0.000000e+00> : vector<328x32xf32>
    %38 = tpu.matmul %35, %37, %cst_43 {dimension_numbers = #tpu.dot_dimension_numbers<[1], [0], [0], [1], [0, 0, 1, 1], [], []>} : vector<328x8xbf16>, vector<8x32xbf16>, vector<328x32xf32> -> vector<328x32xf32>
    %c0_44 = arith.constant 0 : index
    %c0_45 = arith.constant 0 : index
    %39 = vector.load %arg13[%c0_44, %c0_45] : memref<328x32xf32, #tpu.memory_space<vmem>>, vector<328x32xf32>
    %40 = arith.addf %39, %38 : vector<328x32xf32>
    %c0_46 = arith.constant 0 : index
    %c0_47 = arith.constant 0 : index
    %41 = vector.load %arg13[%c0_46, %c0_47] : memref<328x32xf32, #tpu.memory_space<vmem>>, vector<328x32xf32>
    tpu.vector_store %arg13[%c0_46, %c0_47], %40 {strides = array<i32>} : memref<328x32xf32, #tpu.memory_space<vmem>>, vector<328x32xf32>,
    %c0_48 = arith.constant 0 : index
    %c25 = arith.constant 25 : index
    %c0_49 = arith.constant 0 : index
    %42 = vector.load %arg1[%c0_48, %c25, %c0_49] : memref<1x372x8xbf16, #tpu.memory_space<vmem>>, vector<1x328x8xbf16>
    %43 = vector.shape_cast %42 : vector<1x328x8xbf16> to vector<328x8xbf16>
    %c5_50 = arith.constant 5 : index
    %c0_51 = arith.constant 0 : index
    %c0_52 = arith.constant 0 : index
    %44 = vector.load %arg2[%c5_50, %c0_51, %c0_52] : memref<9x8x32xbf16, #tpu.memory_space<vmem>>, vector<1x8x32xbf16>
    %45 = vector.shape_cast %44 : vector<1x8x32xbf16> to vector<8x32xbf16>
    %cst_53 = arith.constant dense<0.000000e+00> : vector<328x32xf32>
    %46 = tpu.matmul %43, %45, %cst_53 {dimension_numbers = #tpu.dot_dimension_numbers<[1], [0], [0], [1], [0, 0, 1, 1], [], []>} : vector<328x8xbf16>, vector<8x32xbf16>, vector<328x32xf32> -> vector<328x32xf32>
    %c0_54 = arith.constant 0 : index
    %c0_55 = arith.constant 0 : index
    %47 = vector.load %arg13[%c0_54, %c0_55] : memref<328x32xf32, #tpu.memory_space<vmem>>, vector<328x32xf32>
    %48 = arith.addf %47, %46 : vector<328x32xf32>
    %c0_56 = arith.constant 0 : index
    %c0_57 = arith.constant 0 : index
    %49 = vector.load %arg13[%c0_56, %c0_57] : memref<328x32xf32, #tpu.memory_space<vmem>>, vector<328x32xf32>
    tpu.vector_store %arg13[%c0_56, %c0_57], %48 {strides = array<i32>} : memref<328x32xf32, #tpu.memory_space<vmem>>, vector<328x32xf32>,
    %c0_58 = arith.constant 0 : index
    %c41 = arith.constant 41 : index
    %c0_59 = arith.constant 0 : index
    %50 = vector.load %arg1[%c0_58, %c41, %c0_59] : memref<1x372x8xbf16, #tpu.memory_space<vmem>>, vector<1x328x8xbf16>
    %51 = vector.shape_cast %50 : vector<1x328x8xbf16> to vector<328x8xbf16>
    %c6_60 = arith.constant 6 : index
    %c0_61 = arith.constant 0 : index
    %c0_62 = arith.constant 0 : index
    %52 = vector.load %arg2[%c6_60, %c0_61, %c0_62] : memref<9x8x32xbf16, #tpu.memory_space<vmem>>, vector<1x8x32xbf16>
    %53 = vector.shape_cast %52 : vector<1x8x32xbf16> to vector<8x32xbf16>
    %cst_63 = arith.constant dense<0.000000e+00> : vector<328x32xf32>
    %54 = tpu.matmul %51, %53, %cst_63 {dimension_numbers = #tpu.dot_dimension_numbers<[1], [0], [0], [1], [0, 0, 1, 1], [], []>} : vector<328x8xbf16>, vector<8x32xbf16>, vector<328x32xf32> -> vector<328x32xf32>
    %c0_64 = arith.constant 0 : index
    %c0_65 = arith.constant 0 : index
    %55 = vector.load %arg13[%c0_64, %c0_65] : memref<328x32xf32, #tpu.memory_space<vmem>>, vector<328x32xf32>
    %56 = arith.addf %55, %54 : vector<328x32xf32>
    %c0_66 = arith.constant 0 : index
    %c0_67 = arith.constant 0 : index
    %57 = vector.load %arg13[%c0_66, %c0_67] : memref<328x32xf32, #tpu.memory_space<vmem>>, vector<328x32xf32>
    tpu.vector_store %arg13[%c0_66, %c0_67], %56 {strides = array<i32>} : memref<328x32xf32, #tpu.memory_space<vmem>>, vector<328x32xf32>,
    %c0_68 = arith.constant 0 : index
    %c42 = arith.constant 42 : index
    %c0_69 = arith.constant 0 : index
    %58 = vector.load %arg1[%c0_68, %c42, %c0_69] : memref<1x372x8xbf16, #tpu.memory_space<vmem>>, vector<1x328x8xbf16>
    %59 = vector.shape_cast %58 : vector<1x328x8xbf16> to vector<328x8xbf16>
    %c7_70 = arith.constant 7 : index
    %c0_71 = arith.constant 0 : index
    %c0_72 = arith.constant 0 : index
    %60 = vector.load %arg2[%c7_70, %c0_71, %c0_72] : memref<9x8x32xbf16, #tpu.memory_space<vmem>>, vector<1x8x32xbf16>
    %61 = vector.shape_cast %60 : vector<1x8x32xbf16> to vector<8x32xbf16>
    %cst_73 = arith.constant dense<0.000000e+00> : vector<328x32xf32>
    %62 = tpu.matmul %59, %61, %cst_73 {dimension_numbers = #tpu.dot_dimension_numbers<[1], [0], [0], [1], [0, 0, 1, 1], [], []>} : vector<328x8xbf16>, vector<8x32xbf16>, vector<328x32xf32> -> vector<328x32xf32>
    %c0_74 = arith.constant 0 : index
    %c0_75 = arith.constant 0 : index
    %63 = vector.load %arg13[%c0_74, %c0_75] : memref<328x32xf32, #tpu.memory_space<vmem>>, vector<328x32xf32>
    %64 = arith.addf %63, %62 : vector<328x32xf32>
    %c0_76 = arith.constant 0 : index
    %c0_77 = arith.constant 0 : index
    %65 = vector.load %arg13[%c0_76, %c0_77] : memref<328x32xf32, #tpu.memory_space<vmem>>, vector<328x32xf32>
    tpu.vector_store %arg13[%c0_76, %c0_77], %64 {strides = array<i32>} : memref<328x32xf32, #tpu.memory_space<vmem>>, vector<328x32xf32>,
    %c0_78 = arith.constant 0 : index
    %c43 = arith.constant 43 : index
    %c0_79 = arith.constant 0 : index
    %66 = vector.load %arg1[%c0_78, %c43, %c0_79] : memref<1x372x8xbf16, #tpu.memory_space<vmem>>, vector<1x328x8xbf16>
    %67 = vector.shape_cast %66 : vector<1x328x8xbf16> to vector<328x8xbf16>
    %c8 = arith.constant 8 : index
    %c0_80 = arith.constant 0 : index
    %c0_81 = arith.constant 0 : index
    %68 = vector.load %arg2[%c8, %c0_80, %c0_81] : memref<9x8x32xbf16, #tpu.memory_space<vmem>>, vector<1x8x32xbf16>
    %69 = vector.shape_cast %68 : vector<1x8x32xbf16> to vector<8x32xbf16>
    %cst_82 = arith.constant dense<0.000000e+00> : vector<328x32xf32>
    %70 = tpu.matmul %67, %69, %cst_82 {dimension_numbers = #tpu.dot_dimension_numbers<[1], [0], [0], [1], [0, 0, 1, 1], [], []>} : vector<328x8xbf16>, vector<8x32xbf16>, vector<328x32xf32> -> vector<328x32xf32>
    %c0_83 = arith.constant 0 : index
    %c0_84 = arith.constant 0 : index
    %71 = vector.load %arg13[%c0_83, %c0_84] : memref<328x32xf32, #tpu.memory_space<vmem>>, vector<328x32xf32>
    %72 = arith.addf %71, %70 : vector<328x32xf32>
    %c0_85 = arith.constant 0 : index
    %c0_86 = arith.constant 0 : index
    %73 = vector.load %arg13[%c0_85, %c0_86] : memref<328x32xf32, #tpu.memory_space<vmem>>, vector<328x32xf32>
    tpu.vector_store %arg13[%c0_85, %c0_86], %72 {strides = array<i32>} : memref<328x32xf32, #tpu.memory_space<vmem>>, vector<328x32xf32>,
    %c0_87 = arith.constant 0 : index
    %c0_88 = arith.constant 0 : index
    %74 = vector.load %arg3[%c0_87, %c0_88] : memref<1x32xf32, #tpu.memory_space<vmem>>, vector<1x32xf32>
    %c19 = arith.constant 19 : index
    %c0_89 = arith.constant 0 : index
    %75 = tpu.strided_load %arg13[%c19, %c0_89] {strides = array<i32: 2, 1>} : memref<328x32xf32, #tpu.memory_space<vmem>>, vector<8x32xf32>
    %c20 = arith.constant 20 : index
    %c0_90 = arith.constant 0 : index
    %76 = tpu.strided_load %arg13[%c20, %c0_90] {strides = array<i32: 2, 1>} : memref<328x32xf32, #tpu.memory_space<vmem>>, vector<8x32xf32>
    %77 = arith.maximumf %75, %76 : vector<8x32xf32>
    %c37 = arith.constant 37 : index
    %c0_91 = arith.constant 0 : index
    %78 = tpu.strided_load %arg13[%c37, %c0_91] {strides = array<i32: 2, 1>} : memref<328x32xf32, #tpu.memory_space<vmem>>, vector<8x32xf32>
    %79 = arith.maximumf %77, %78 : vector<8x32xf32>
    %c38 = arith.constant 38 : index
    %c0_92 = arith.constant 0 : index
    %80 = tpu.strided_load %arg13[%c38, %c0_92] {strides = array<i32: 2, 1>} : memref<328x32xf32, #tpu.memory_space<vmem>>, vector<8x32xf32>
    %81 = arith.maximumf %79, %80 : vector<8x32xf32>
    %82 = vector.broadcast %74 : vector<1x32xf32> to vector<8x32xf32>
    %83 = arith.addf %81, %82 : vector<8x32xf32>
    %cst_93 = arith.constant 0.000000e+00 : f32
    %84 = vector.broadcast %cst_93 : f32 to vector<8x32xf32>
    %85 = arith.maximumf %83, %84 : vector<8x32xf32>
    %86 = arith.truncf %85 : vector<8x32xf32> to vector<8x32xbf16>
    %c27 = arith.constant 27 : index
    %c0_94 = arith.constant 0 : index
    %87 = vector.load %arg14[%c27, %c0_94] : memref<132x32xbf16, #tpu.memory_space<vmem>>, vector<8x32xbf16>
    tpu.vector_store %arg14[%c27, %c0_94], %86 {strides = array<i32>} : memref<132x32xbf16, #tpu.memory_space<vmem>>, vector<8x32xbf16>,
    %c55 = arith.constant 55 : index
    %c0_95 = arith.constant 0 : index
    %88 = tpu.strided_load %arg13[%c55, %c0_95] {strides = array<i32: 2, 1>} : memref<328x32xf32, #tpu.memory_space<vmem>>, vector<8x32xf32>
    %c56 = arith.constant 56 : index
    %c0_96 = arith.constant 0 : index
    %89 = tpu.strided_load %arg13[%c56, %c0_96] {strides = array<i32: 2, 1>} : memref<328x32xf32, #tpu.memory_space<vmem>>, vector<8x32xf32>
    %90 = arith.maximumf %88, %89 : vector<8x32xf32>
    %c73 = arith.constant 73 : index
    %c0_97 = arith.constant 0 : index
    %91 = tpu.strided_load %arg13[%c73, %c0_97] {strides = array<i32: 2, 1>} : memref<328x32xf32, #tpu.memory_space<vmem>>, vector<8x32xf32>
    %92 = arith.maximumf %90, %91 : vector<8x32xf32>
    %c74 = arith.constant 74 : index
    %c0_98 = arith.constant 0 : index
    %93 = tpu.strided_load %arg13[%c74, %c0_98] {strides = array<i32: 2, 1>} : memref<328x32xf32, #tpu.memory_space<vmem>>, vector<8x32xf32>
    %94 = arith.maximumf %92, %93 : vector<8x32xf32>
    %95 = vector.broadcast %74 : vector<1x32xf32> to vector<8x32xf32>
    %96 = arith.addf %94, %95 : vector<8x32xf32>
    %cst_99 = arith.constant 0.000000e+00 : f32
    %97 = vector.broadcast %cst_99 : f32 to vector<8x32xf32>
    %98 = arith.maximumf %96, %97 : vector<8x32xf32>
    %99 = arith.truncf %98 : vector<8x32xf32> to vector<8x32xbf16>
    %c37_100 = arith.constant 37 : index
    %c0_101 = arith.constant 0 : index
    %100 = vector.load %arg14[%c37_100, %c0_101] : memref<132x32xbf16, #tpu.memory_space<vmem>>, vector<8x32xbf16>
    tpu.vector_store %arg14[%c37_100, %c0_101], %99 {strides = array<i32>} : memref<132x32xbf16, #tpu.memory_space<vmem>>, vector<8x32xbf16>,
    %c91 = arith.constant 91 : index
    %c0_102 = arith.constant 0 : index
    %101 = tpu.strided_load %arg13[%c91, %c0_102] {strides = array<i32: 2, 1>} : memref<328x32xf32, #tpu.memory_space<vmem>>, vector<8x32xf32>
    %c92 = arith.constant 92 : index
    %c0_103 = arith.constant 0 : index
    %102 = tpu.strided_load %arg13[%c92, %c0_103] {strides = array<i32: 2, 1>} : memref<328x32xf32, #tpu.memory_space<vmem>>, vector<8x32xf32>
    %103 = arith.maximumf %101, %102 : vector<8x32xf32>
    %c109 = arith.constant 109 : index
    %c0_104 = arith.constant 0 : index
    %104 = tpu.strided_load %arg13[%c109, %c0_104] {strides = array<i32: 2, 1>} : memref<328x32xf32, #tpu.memory_space<vmem>>, vector<8x32xf32>
    %105 = arith.maximumf %103, %104 : vector<8x32xf32>
    %c110 = arith.constant 110 : index
    %c0_105 = arith.constant 0 : index
    %106 = tpu.strided_load %arg13[%c110, %c0_105] {strides = array<i32: 2, 1>} : memref<328x32xf32, #tpu.memory_space<vmem>>, vector<8x32xf32>
    %107 = arith.maximumf %105, %106 : vector<8x32xf32>
    %108 = vector.broadcast %74 : vector<1x32xf32> to vector<8x32xf32>
    %109 = arith.addf %107, %108 : vector<8x32xf32>
    %cst_106 = arith.constant 0.000000e+00 : f32
    %110 = vector.broadcast %cst_106 : f32 to vector<8x32xf32>
    %111 = arith.maximumf %109, %110 : vector<8x32xf32>
    %112 = arith.truncf %111 : vector<8x32xf32> to vector<8x32xbf16>
    %c47 = arith.constant 47 : index
    %c0_107 = arith.constant 0 : index
    %113 = vector.load %arg14[%c47, %c0_107] : memref<132x32xbf16, #tpu.memory_space<vmem>>, vector<8x32xbf16>
    tpu.vector_store %arg14[%c47, %c0_107], %112 {strides = array<i32>} : memref<132x32xbf16, #tpu.memory_space<vmem>>, vector<8x32xbf16>,
    %c127 = arith.constant 127 : index
    %c0_108 = arith.constant 0 : index
    %114 = tpu.strided_load %arg13[%c127, %c0_108] {strides = array<i32: 2, 1>} : memref<328x32xf32, #tpu.memory_space<vmem>>, vector<8x32xf32>
    %c128 = arith.constant 128 : index
    %c0_109 = arith.constant 0 : index
    %115 = tpu.strided_load %arg13[%c128, %c0_109] {strides = array<i32: 2, 1>} : memref<328x32xf32, #tpu.memory_space<vmem>>, vector<8x32xf32>
    %116 = arith.maximumf %114, %115 : vector<8x32xf32>
    %c145 = arith.constant 145 : index
    %c0_110 = arith.constant 0 : index
    %117 = tpu.strided_load %arg13[%c145, %c0_110] {strides = array<i32: 2, 1>} : memref<328x32xf32, #tpu.memory_space<vmem>>, vector<8x32xf32>
    %118 = arith.maximumf %116, %117 : vector<8x32xf32>
    %c146 = arith.constant 146 : index
    %c0_111 = arith.constant 0 : index
    %119 = tpu.strided_load %arg13[%c146, %c0_111] {strides = array<i32: 2, 1>} : memref<328x32xf32, #tpu.memory_space<vmem>>, vector<8x32xf32>
    %120 = arith.maximumf %118, %119 : vector<8x32xf32>
    %121 = vector.broadcast %74 : vector<1x32xf32> to vector<8x32xf32>
    %122 = arith.addf %120, %121 : vector<8x32xf32>
    %cst_112 = arith.constant 0.000000e+00 : f32
    %123 = vector.broadcast %cst_112 : f32 to vector<8x32xf32>
    %124 = arith.maximumf %122, %123 : vector<8x32xf32>
    %125 = arith.truncf %124 : vector<8x32xf32> to vector<8x32xbf16>
    %c57 = arith.constant 57 : index
    %c0_113 = arith.constant 0 : index
    %126 = vector.load %arg14[%c57, %c0_113] : memref<132x32xbf16, #tpu.memory_space<vmem>>, vector<8x32xbf16>
    tpu.vector_store %arg14[%c57, %c0_113], %125 {strides = array<i32>} : memref<132x32xbf16, #tpu.memory_space<vmem>>, vector<8x32xbf16>,
    %c163 = arith.constant 163 : index
    %c0_114 = arith.constant 0 : index
    %127 = tpu.strided_load %arg13[%c163, %c0_114] {strides = array<i32: 2, 1>} : memref<328x32xf32, #tpu.memory_space<vmem>>, vector<8x32xf32>
    %c164 = arith.constant 164 : index
    %c0_115 = arith.constant 0 : index
    %128 = tpu.strided_load %arg13[%c164, %c0_115] {strides = array<i32: 2, 1>} : memref<328x32xf32, #tpu.memory_space<vmem>>, vector<8x32xf32>
    %129 = arith.maximumf %127, %128 : vector<8x32xf32>
    %c181 = arith.constant 181 : index
    %c0_116 = arith.constant 0 : index
    %130 = tpu.strided_load %arg13[%c181, %c0_116] {strides = array<i32: 2, 1>} : memref<328x32xf32, #tpu.memory_space<vmem>>, vector<8x32xf32>
    %131 = arith.maximumf %129, %130 : vector<8x32xf32>
    %c182 = arith.constant 182 : index
    %c0_117 = arith.constant 0 : index
    %132 = tpu.strided_load %arg13[%c182, %c0_117] {strides = array<i32: 2, 1>} : memref<328x32xf32, #tpu.memory_space<vmem>>, vector<8x32xf32>
    %133 = arith.maximumf %131, %132 : vector<8x32xf32>
    %134 = vector.broadcast %74 : vector<1x32xf32> to vector<8x32xf32>
    %135 = arith.addf %133, %134 : vector<8x32xf32>
    %cst_118 = arith.constant 0.000000e+00 : f32
    %136 = vector.broadcast %cst_118 : f32 to vector<8x32xf32>
    %137 = arith.maximumf %135, %136 : vector<8x32xf32>
    %138 = arith.truncf %137 : vector<8x32xf32> to vector<8x32xbf16>
    %c67 = arith.constant 67 : index
    %c0_119 = arith.constant 0 : index
    %139 = vector.load %arg14[%c67, %c0_119] : memref<132x32xbf16, #tpu.memory_space<vmem>>, vector<8x32xbf16>
    tpu.vector_store %arg14[%c67, %c0_119], %138 {strides = array<i32>} : memref<132x32xbf16, #tpu.memory_space<vmem>>, vector<8x32xbf16>,
    %c199 = arith.constant 199 : index
    %c0_120 = arith.constant 0 : index
    %140 = tpu.strided_load %arg13[%c199, %c0_120] {strides = array<i32: 2, 1>} : memref<328x32xf32, #tpu.memory_space<vmem>>, vector<8x32xf32>
    %c200 = arith.constant 200 : index
    %c0_121 = arith.constant 0 : index
    %141 = tpu.strided_load %arg13[%c200, %c0_121] {strides = array<i32: 2, 1>} : memref<328x32xf32, #tpu.memory_space<vmem>>, vector<8x32xf32>
    %142 = arith.maximumf %140, %141 : vector<8x32xf32>
    %c217 = arith.constant 217 : index
    %c0_122 = arith.constant 0 : index
    %143 = tpu.strided_load %arg13[%c217, %c0_122] {strides = array<i32: 2, 1>} : memref<328x32xf32, #tpu.memory_space<vmem>>, vector<8x32xf32>
    %144 = arith.maximumf %142, %143 : vector<8x32xf32>
    %c218 = arith.constant 218 : index
    %c0_123 = arith.constant 0 : index
    %145 = tpu.strided_load %arg13[%c218, %c0_123] {strides = array<i32: 2, 1>} : memref<328x32xf32, #tpu.memory_space<vmem>>, vector<8x32xf32>
    %146 = arith.maximumf %144, %145 : vector<8x32xf32>
    %147 = vector.broadcast %74 : vector<1x32xf32> to vector<8x32xf32>
    %148 = arith.addf %146, %147 : vector<8x32xf32>
    %cst_124 = arith.constant 0.000000e+00 : f32
    %149 = vector.broadcast %cst_124 : f32 to vector<8x32xf32>
    %150 = arith.maximumf %148, %149 : vector<8x32xf32>
    %151 = arith.truncf %150 : vector<8x32xf32> to vector<8x32xbf16>
    %c77 = arith.constant 77 : index
    %c0_125 = arith.constant 0 : index
    %152 = vector.load %arg14[%c77, %c0_125] : memref<132x32xbf16, #tpu.memory_space<vmem>>, vector<8x32xbf16>
    tpu.vector_store %arg14[%c77, %c0_125], %151 {strides = array<i32>} : memref<132x32xbf16, #tpu.memory_space<vmem>>, vector<8x32xbf16>,
    %c235 = arith.constant 235 : index
    %c0_126 = arith.constant 0 : index
    %153 = tpu.strided_load %arg13[%c235, %c0_126] {strides = array<i32: 2, 1>} : memref<328x32xf32, #tpu.memory_space<vmem>>, vector<8x32xf32>
    %c236 = arith.constant 236 : index
    %c0_127 = arith.constant 0 : index
    %154 = tpu.strided_load %arg13[%c236, %c0_127] {strides = array<i32: 2, 1>} : memref<328x32xf32, #tpu.memory_space<vmem>>, vector<8x32xf32>
    %155 = arith.maximumf %153, %154 : vector<8x32xf32>
    %c253 = arith.constant 253 : index
    %c0_128 = arith.constant 0 : index
    %156 = tpu.strided_load %arg13[%c253, %c0_128] {strides = array<i32: 2, 1>} : memref<328x32xf32, #tpu.memory_space<vmem>>, vector<8x32xf32>
    %157 = arith.maximumf %155, %156 : vector<8x32xf32>
    %c254 = arith.constant 254 : index
    %c0_129 = arith.constant 0 : index
    %158 = tpu.strided_load %arg13[%c254, %c0_129] {strides = array<i32: 2, 1>} : memref<328x32xf32, #tpu.memory_space<vmem>>, vector<8x32xf32>
    %159 = arith.maximumf %157, %158 : vector<8x32xf32>
    %160 = vector.broadcast %74 : vector<1x32xf32> to vector<8x32xf32>
    %161 = arith.addf %159, %160 : vector<8x32xf32>
    %cst_130 = arith.constant 0.000000e+00 : f32
    %162 = vector.broadcast %cst_130 : f32 to vector<8x32xf32>
    %163 = arith.maximumf %161, %162 : vector<8x32xf32>
    %164 = arith.truncf %163 : vector<8x32xf32> to vector<8x32xbf16>
    %c87 = arith.constant 87 : index
    %c0_131 = arith.constant 0 : index
    %165 = vector.load %arg14[%c87, %c0_131] : memref<132x32xbf16, #tpu.memory_space<vmem>>, vector<8x32xbf16>
    tpu.vector_store %arg14[%c87, %c0_131], %164 {strides = array<i32>} : memref<132x32xbf16, #tpu.memory_space<vmem>>, vector<8x32xbf16>,
    %c271 = arith.constant 271 : index
    %c0_132 = arith.constant 0 : index
    %166 = tpu.strided_load %arg13[%c271, %c0_132] {strides = array<i32: 2, 1>} : memref<328x32xf32, #tpu.memory_space<vmem>>, vector<8x32xf32>
    %c272 = arith.constant 272 : index
    %c0_133 = arith.constant 0 : index
    %167 = tpu.strided_load %arg13[%c272, %c0_133] {strides = array<i32: 2, 1>} : memref<328x32xf32, #tpu.memory_space<vmem>>, vector<8x32xf32>
    %168 = arith.maximumf %166, %167 : vector<8x32xf32>
    %c289 = arith.constant 289 : index
    %c0_134 = arith.constant 0 : index
    %169 = tpu.strided_load %arg13[%c289, %c0_134] {strides = array<i32: 2, 1>} : memref<328x32xf32, #tpu.memory_space<vmem>>, vector<8x32xf32>
    %170 = arith.maximumf %168, %169 : vector<8x32xf32>
    %c290 = arith.constant 290 : index
    %c0_135 = arith.constant 0 : index
    %171 = tpu.strided_load %arg13[%c290, %c0_135] {strides = array<i32: 2, 1>} : memref<328x32xf32, #tpu.memory_space<vmem>>, vector<8x32xf32>
    %172 = arith.maximumf %170, %171 : vector<8x32xf32>
    %173 = vector.broadcast %74 : vector<1x32xf32> to vector<8x32xf32>
    %174 = arith.addf %172, %173 : vector<8x32xf32>
    %cst_136 = arith.constant 0.000000e+00 : f32
    %175 = vector.broadcast %cst_136 : f32 to vector<8x32xf32>
    %176 = arith.maximumf %174, %175 : vector<8x32xf32>
    %177 = arith.truncf %176 : vector<8x32xf32> to vector<8x32xbf16>
    %c97 = arith.constant 97 : index
    %c0_137 = arith.constant 0 : index
    %178 = vector.load %arg14[%c97, %c0_137] : memref<132x32xbf16, #tpu.memory_space<vmem>>, vector<8x32xbf16>
    tpu.vector_store %arg14[%c97, %c0_137], %177 {strides = array<i32>} : memref<132x32xbf16, #tpu.memory_space<vmem>>, vector<8x32xbf16>,
    %c5_138 = arith.constant 5 : index
    %c0_139 = arith.constant 0 : index
    %179 = vector.load %arg14[%c5_138, %c0_139] : memref<132x32xbf16, #tpu.memory_space<vmem>>, vector<104x32xbf16>
    %c0_140 = arith.constant 0 : index
    %c0_141 = arith.constant 0 : index
    %c0_142 = arith.constant 0 : index
    %180 = vector.load %arg4[%c0_140, %c0_141, %c0_142] : memref<9x32x64xbf16, #tpu.memory_space<vmem>>, vector<1x32x64xbf16>
    %181 = vector.shape_cast %180 : vector<1x32x64xbf16> to vector<32x64xbf16>
    %cst_143 = arith.constant dense<0.000000e+00> : vector<104x64xf32>
    %182 = tpu.matmul %179, %181, %cst_143 {dimension_numbers = #tpu.dot_dimension_numbers<[1], [0], [0], [1], [0, 0, 1, 1], [], []>} : vector<104x32xbf16>, vector<32x64xbf16>, vector<104x64xf32> -> vector<104x64xf32>
    %c0_144 = arith.constant 0 : index
    %c0_145 = arith.constant 0 : index
    %183 = vector.load %arg15[%c0_144, %c0_145] : memref<104x64xf32, #tpu.memory_space<vmem>>, vector<104x64xf32>
    tpu.vector_store %arg15[%c0_144, %c0_145], %182 {strides = array<i32>} : memref<104x64xf32, #tpu.memory_space<vmem>>, vector<104x64xf32>,
    %c6_146 = arith.constant 6 : index
    %c0_147 = arith.constant 0 : index
    %184 = vector.load %arg14[%c6_146, %c0_147] : memref<132x32xbf16, #tpu.memory_space<vmem>>, vector<104x32xbf16>
    %c1_148 = arith.constant 1 : index
    %c0_149 = arith.constant 0 : index
    %c0_150 = arith.constant 0 : index
    %185 = vector.load %arg4[%c1_148, %c0_149, %c0_150] : memref<9x32x64xbf16, #tpu.memory_space<vmem>>, vector<1x32x64xbf16>
    %186 = vector.shape_cast %185 : vector<1x32x64xbf16> to vector<32x64xbf16>
    %cst_151 = arith.constant dense<0.000000e+00> : vector<104x64xf32>
    %187 = tpu.matmul %184, %186, %cst_151 {dimension_numbers = #tpu.dot_dimension_numbers<[1], [0], [0], [1], [0, 0, 1, 1], [], []>} : vector<104x32xbf16>, vector<32x64xbf16>, vector<104x64xf32> -> vector<104x64xf32>
    %c0_152 = arith.constant 0 : index
    %c0_153 = arith.constant 0 : index
    %188 = vector.load %arg15[%c0_152, %c0_153] : memref<104x64xf32, #tpu.memory_space<vmem>>, vector<104x64xf32>
    %189 = arith.addf %188, %187 : vector<104x64xf32>
    %c0_154 = arith.constant 0 : index
    %c0_155 = arith.constant 0 : index
    %190 = vector.load %arg15[%c0_154, %c0_155] : memref<104x64xf32, #tpu.memory_space<vmem>>, vector<104x64xf32>
    tpu.vector_store %arg15[%c0_154, %c0_155], %189 {strides = array<i32>} : memref<104x64xf32, #tpu.memory_space<vmem>>, vector<104x64xf32>,
    %c7_156 = arith.constant 7 : index
    %c0_157 = arith.constant 0 : index
    %191 = vector.load %arg14[%c7_156, %c0_157] : memref<132x32xbf16, #tpu.memory_space<vmem>>, vector<104x32xbf16>
    %c2_158 = arith.constant 2 : index
    %c0_159 = arith.constant 0 : index
    %c0_160 = arith.constant 0 : index
    %192 = vector.load %arg4[%c2_158, %c0_159, %c0_160] : memref<9x32x64xbf16, #tpu.memory_space<vmem>>, vector<1x32x64xbf16>
    %193 = vector.shape_cast %192 : vector<1x32x64xbf16> to vector<32x64xbf16>
    %cst_161 = arith.constant dense<0.000000e+00> : vector<104x64xf32>
    %194 = tpu.matmul %191, %193, %cst_161 {dimension_numbers = #tpu.dot_dimension_numbers<[1], [0], [0], [1], [0, 0, 1, 1], [], []>} : vector<104x32xbf16>, vector<32x64xbf16>, vector<104x64xf32> -> vector<104x64xf32>
    %c0_162 = arith.constant 0 : index
    %c0_163 = arith.constant 0 : index
    %195 = vector.load %arg15[%c0_162, %c0_163] : memref<104x64xf32, #tpu.memory_space<vmem>>, vector<104x64xf32>
    %196 = arith.addf %195, %194 : vector<104x64xf32>
    %c0_164 = arith.constant 0 : index
    %c0_165 = arith.constant 0 : index
    %197 = vector.load %arg15[%c0_164, %c0_165] : memref<104x64xf32, #tpu.memory_space<vmem>>, vector<104x64xf32>
    tpu.vector_store %arg15[%c0_164, %c0_165], %196 {strides = array<i32>} : memref<104x64xf32, #tpu.memory_space<vmem>>, vector<104x64xf32>,
    %c15 = arith.constant 15 : index
    %c0_166 = arith.constant 0 : index
    %198 = vector.load %arg14[%c15, %c0_166] : memref<132x32xbf16, #tpu.memory_space<vmem>>, vector<104x32xbf16>
    %c3_167 = arith.constant 3 : index
    %c0_168 = arith.constant 0 : index
    %c0_169 = arith.constant 0 : index
    %199 = vector.load %arg4[%c3_167, %c0_168, %c0_169] : memref<9x32x64xbf16, #tpu.memory_space<vmem>>, vector<1x32x64xbf16>
    %200 = vector.shape_cast %199 : vector<1x32x64xbf16> to vector<32x64xbf16>
    %cst_170 = arith.constant dense<0.000000e+00> : vector<104x64xf32>
    %201 = tpu.matmul %198, %200, %cst_170 {dimension_numbers = #tpu.dot_dimension_numbers<[1], [0], [0], [1], [0, 0, 1, 1], [], []>} : vector<104x32xbf16>, vector<32x64xbf16>, vector<104x64xf32> -> vector<104x64xf32>
    %c0_171 = arith.constant 0 : index
    %c0_172 = arith.constant 0 : index
    %202 = vector.load %arg15[%c0_171, %c0_172] : memref<104x64xf32, #tpu.memory_space<vmem>>, vector<104x64xf32>
    %203 = arith.addf %202, %201 : vector<104x64xf32>
    %c0_173 = arith.constant 0 : index
    %c0_174 = arith.constant 0 : index
    %204 = vector.load %arg15[%c0_173, %c0_174] : memref<104x64xf32, #tpu.memory_space<vmem>>, vector<104x64xf32>
    tpu.vector_store %arg15[%c0_173, %c0_174], %203 {strides = array<i32>} : memref<104x64xf32, #tpu.memory_space<vmem>>, vector<104x64xf32>,
    %c16 = arith.constant 16 : index
    %c0_175 = arith.constant 0 : index
    %205 = vector.load %arg14[%c16, %c0_175] : memref<132x32xbf16, #tpu.memory_space<vmem>>, vector<104x32xbf16>
    %c4_176 = arith.constant 4 : index
    %c0_177 = arith.constant 0 : index
    %c0_178 = arith.constant 0 : index
    %206 = vector.load %arg4[%c4_176, %c0_177, %c0_178] : memref<9x32x64xbf16, #tpu.memory_space<vmem>>, vector<1x32x64xbf16>
    %207 = vector.shape_cast %206 : vector<1x32x64xbf16> to vector<32x64xbf16>
    %cst_179 = arith.constant dense<0.000000e+00> : vector<104x64xf32>
    %208 = tpu.matmul %205, %207, %cst_179 {dimension_numbers = #tpu.dot_dimension_numbers<[1], [0], [0], [1], [0, 0, 1, 1], [], []>} : vector<104x32xbf16>, vector<32x64xbf16>, vector<104x64xf32> -> vector<104x64xf32>
    %c0_180 = arith.constant 0 : index
    %c0_181 = arith.constant 0 : index
    %209 = vector.load %arg15[%c0_180, %c0_181] : memref<104x64xf32, #tpu.memory_space<vmem>>, vector<104x64xf32>
    %210 = arith.addf %209, %208 : vector<104x64xf32>
    %c0_182 = arith.constant 0 : index
    %c0_183 = arith.constant 0 : index
    %211 = vector.load %arg15[%c0_182, %c0_183] : memref<104x64xf32, #tpu.memory_space<vmem>>, vector<104x64xf32>
    tpu.vector_store %arg15[%c0_182, %c0_183], %210 {strides = array<i32>} : memref<104x64xf32, #tpu.memory_space<vmem>>, vector<104x64xf32>,
    %c17 = arith.constant 17 : index
    %c0_184 = arith.constant 0 : index
    %212 = vector.load %arg14[%c17, %c0_184] : memref<132x32xbf16, #tpu.memory_space<vmem>>, vector<104x32xbf16>
    %c5_185 = arith.constant 5 : index
    %c0_186 = arith.constant 0 : index
    %c0_187 = arith.constant 0 : index
    %213 = vector.load %arg4[%c5_185, %c0_186, %c0_187] : memref<9x32x64xbf16, #tpu.memory_space<vmem>>, vector<1x32x64xbf16>
    %214 = vector.shape_cast %213 : vector<1x32x64xbf16> to vector<32x64xbf16>
    %cst_188 = arith.constant dense<0.000000e+00> : vector<104x64xf32>
    %215 = tpu.matmul %212, %214, %cst_188 {dimension_numbers = #tpu.dot_dimension_numbers<[1], [0], [0], [1], [0, 0, 1, 1], [], []>} : vector<104x32xbf16>, vector<32x64xbf16>, vector<104x64xf32> -> vector<104x64xf32>
    %c0_189 = arith.constant 0 : index
    %c0_190 = arith.constant 0 : index
    %216 = vector.load %arg15[%c0_189, %c0_190] : memref<104x64xf32, #tpu.memory_space<vmem>>, vector<104x64xf32>
    %217 = arith.addf %216, %215 : vector<104x64xf32>
    %c0_191 = arith.constant 0 : index
    %c0_192 = arith.constant 0 : index
    %218 = vector.load %arg15[%c0_191, %c0_192] : memref<104x64xf32, #tpu.memory_space<vmem>>, vector<104x64xf32>
    tpu.vector_store %arg15[%c0_191, %c0_192], %217 {strides = array<i32>} : memref<104x64xf32, #tpu.memory_space<vmem>>, vector<104x64xf32>,
    %c25_193 = arith.constant 25 : index
    %c0_194 = arith.constant 0 : index
    %219 = vector.load %arg14[%c25_193, %c0_194] : memref<132x32xbf16, #tpu.memory_space<vmem>>, vector<104x32xbf16>
    %c6_195 = arith.constant 6 : index
    %c0_196 = arith.constant 0 : index
    %c0_197 = arith.constant 0 : index
    %220 = vector.load %arg4[%c6_195, %c0_196, %c0_197] : memref<9x32x64xbf16, #tpu.memory_space<vmem>>, vector<1x32x64xbf16>
    %221 = vector.shape_cast %220 : vector<1x32x64xbf16> to vector<32x64xbf16>
    %cst_198 = arith.constant dense<0.000000e+00> : vector<104x64xf32>
    %222 = tpu.matmul %219, %221, %cst_198 {dimension_numbers = #tpu.dot_dimension_numbers<[1], [0], [0], [1], [0, 0, 1, 1], [], []>} : vector<104x32xbf16>, vector<32x64xbf16>, vector<104x64xf32> -> vector<104x64xf32>
    %c0_199 = arith.constant 0 : index
    %c0_200 = arith.constant 0 : index
    %223 = vector.load %arg15[%c0_199, %c0_200] : memref<104x64xf32, #tpu.memory_space<vmem>>, vector<104x64xf32>
    %224 = arith.addf %223, %222 : vector<104x64xf32>
    %c0_201 = arith.constant 0 : index
    %c0_202 = arith.constant 0 : index
    %225 = vector.load %arg15[%c0_201, %c0_202] : memref<104x64xf32, #tpu.memory_space<vmem>>, vector<104x64xf32>
    tpu.vector_store %arg15[%c0_201, %c0_202], %224 {strides = array<i32>} : memref<104x64xf32, #tpu.memory_space<vmem>>, vector<104x64xf32>,
    %c26 = arith.constant 26 : index
    %c0_203 = arith.constant 0 : index
    %226 = vector.load %arg14[%c26, %c0_203] : memref<132x32xbf16, #tpu.memory_space<vmem>>, vector<104x32xbf16>
    %c7_204 = arith.constant 7 : index
    %c0_205 = arith.constant 0 : index
    %c0_206 = arith.constant 0 : index
    %227 = vector.load %arg4[%c7_204, %c0_205, %c0_206] : memref<9x32x64xbf16, #tpu.memory_space<vmem>>, vector<1x32x64xbf16>
    %228 = vector.shape_cast %227 : vector<1x32x64xbf16> to vector<32x64xbf16>
    %cst_207 = arith.constant dense<0.000000e+00> : vector<104x64xf32>
    %229 = tpu.matmul %226, %228, %cst_207 {dimension_numbers = #tpu.dot_dimension_numbers<[1], [0], [0], [1], [0, 0, 1, 1], [], []>} : vector<104x32xbf16>, vector<32x64xbf16>, vector<104x64xf32> -> vector<104x64xf32>
    %c0_208 = arith.constant 0 : index
    %c0_209 = arith.constant 0 : index
    %230 = vector.load %arg15[%c0_208, %c0_209] : memref<104x64xf32, #tpu.memory_space<vmem>>, vector<104x64xf32>
    %231 = arith.addf %230, %229 : vector<104x64xf32>
    %c0_210 = arith.constant 0 : index
    %c0_211 = arith.constant 0 : index
    %232 = vector.load %arg15[%c0_210, %c0_211] : memref<104x64xf32, #tpu.memory_space<vmem>>, vector<104x64xf32>
    tpu.vector_store %arg15[%c0_210, %c0_211], %231 {strides = array<i32>} : memref<104x64xf32, #tpu.memory_space<vmem>>, vector<104x64xf32>,
    %c27_212 = arith.constant 27 : index
    %c0_213 = arith.constant 0 : index
    %233 = vector.load %arg14[%c27_212, %c0_213] : memref<132x32xbf16, #tpu.memory_space<vmem>>, vector<104x32xbf16>
    %c8_214 = arith.constant 8 : index
    %c0_215 = arith.constant 0 : index
    %c0_216 = arith.constant 0 : index
    %234 = vector.load %arg4[%c8_214, %c0_215, %c0_216] : memref<9x32x64xbf16, #tpu.memory_space<vmem>>, vector<1x32x64xbf16>
    %235 = vector.shape_cast %234 : vector<1x32x64xbf16> to vector<32x64xbf16>
    %cst_217 = arith.constant dense<0.000000e+00> : vector<104x64xf32>
    %236 = tpu.matmul %233, %235, %cst_217 {dimension_numbers = #tpu.dot_dimension_numbers<[1], [0], [0], [1], [0, 0, 1, 1], [], []>} : vector<104x32xbf16>, vector<32x64xbf16>, vector<104x64xf32> -> vector<104x64xf32>
    %c0_218 = arith.constant 0 : index
    %c0_219 = arith.constant 0 : index
    %237 = vector.load %arg15[%c0_218, %c0_219] : memref<104x64xf32, #tpu.memory_space<vmem>>, vector<104x64xf32>
    %238 = arith.addf %237, %236 : vector<104x64xf32>
    %c0_220 = arith.constant 0 : index
    %c0_221 = arith.constant 0 : index
    %239 = vector.load %arg15[%c0_220, %c0_221] : memref<104x64xf32, #tpu.memory_space<vmem>>, vector<104x64xf32>
    tpu.vector_store %arg15[%c0_220, %c0_221], %238 {strides = array<i32>} : memref<104x64xf32, #tpu.memory_space<vmem>>, vector<104x64xf32>,
    %c0_222 = arith.constant 0 : index
    %c0_223 = arith.constant 0 : index
    %240 = vector.load %arg5[%c0_222, %c0_223] : memref<1x64xf32, #tpu.memory_space<vmem>>, vector<1x64xf32>
    %c11 = arith.constant 11 : index
    %c0_224 = arith.constant 0 : index
    %241 = tpu.strided_load %arg15[%c11, %c0_224] {strides = array<i32: 2, 1>} : memref<104x64xf32, #tpu.memory_space<vmem>>, vector<4x64xf32>
    %c12 = arith.constant 12 : index
    %c0_225 = arith.constant 0 : index
    %242 = tpu.strided_load %arg15[%c12, %c0_225] {strides = array<i32: 2, 1>} : memref<104x64xf32, #tpu.memory_space<vmem>>, vector<4x64xf32>
    %243 = arith.maximumf %241, %242 : vector<4x64xf32>
    %c21 = arith.constant 21 : index
    %c0_226 = arith.constant 0 : index
    %244 = tpu.strided_load %arg15[%c21, %c0_226] {strides = array<i32: 2, 1>} : memref<104x64xf32, #tpu.memory_space<vmem>>, vector<4x64xf32>
    %245 = arith.maximumf %243, %244 : vector<4x64xf32>
    %c22 = arith.constant 22 : index
    %c0_227 = arith.constant 0 : index
    %246 = tpu.strided_load %arg15[%c22, %c0_227] {strides = array<i32: 2, 1>} : memref<104x64xf32, #tpu.memory_space<vmem>>, vector<4x64xf32>
    %247 = arith.maximumf %245, %246 : vector<4x64xf32>
    %248 = vector.broadcast %240 : vector<1x64xf32> to vector<4x64xf32>
    %249 = arith.addf %247, %248 : vector<4x64xf32>
    %cst_228 = arith.constant 0.000000e+00 : f32
    %250 = vector.broadcast %cst_228 : f32 to vector<4x64xf32>
    %251 = arith.maximumf %249, %250 : vector<4x64xf32>
    %252 = arith.truncf %251 : vector<4x64xf32> to vector<4x64xbf16>
    %c23_229 = arith.constant 23 : index
    %c0_230 = arith.constant 0 : index
    %253 = vector.load %arg16[%c23_229, %c0_230] : memref<68x64xbf16, #tpu.memory_space<vmem>>, vector<4x64xbf16>
    tpu.vector_store %arg16[%c23_229, %c0_230], %252 {strides = array<i32>} : memref<68x64xbf16, #tpu.memory_space<vmem>>, vector<4x64xbf16>,
    %c31 = arith.constant 31 : index
    %c0_231 = arith.constant 0 : index
    %254 = tpu.strided_load %arg15[%c31, %c0_231] {strides = array<i32: 2, 1>} : memref<104x64xf32, #tpu.memory_space<vmem>>, vector<4x64xf32>
    %c32 = arith.constant 32 : index
    %c0_232 = arith.constant 0 : index
    %255 = tpu.strided_load %arg15[%c32, %c0_232] {strides = array<i32: 2, 1>} : memref<104x64xf32, #tpu.memory_space<vmem>>, vector<4x64xf32>
    %256 = arith.maximumf %254, %255 : vector<4x64xf32>
    %c41_233 = arith.constant 41 : index
    %c0_234 = arith.constant 0 : index
    %257 = tpu.strided_load %arg15[%c41_233, %c0_234] {strides = array<i32: 2, 1>} : memref<104x64xf32, #tpu.memory_space<vmem>>, vector<4x64xf32>
    %258 = arith.maximumf %256, %257 : vector<4x64xf32>
    %c42_235 = arith.constant 42 : index
    %c0_236 = arith.constant 0 : index
    %259 = tpu.strided_load %arg15[%c42_235, %c0_236] {strides = array<i32: 2, 1>} : memref<104x64xf32, #tpu.memory_space<vmem>>, vector<4x64xf32>
    %260 = arith.maximumf %258, %259 : vector<4x64xf32>
    %261 = vector.broadcast %240 : vector<1x64xf32> to vector<4x64xf32>
    %262 = arith.addf %260, %261 : vector<4x64xf32>
    %cst_237 = arith.constant 0.000000e+00 : f32
    %263 = vector.broadcast %cst_237 : f32 to vector<4x64xf32>
    %264 = arith.maximumf %262, %263 : vector<4x64xf32>
    %265 = arith.truncf %264 : vector<4x64xf32> to vector<4x64xbf16>
    %c29 = arith.constant 29 : index
    %c0_238 = arith.constant 0 : index
    %266 = vector.load %arg16[%c29, %c0_238] : memref<68x64xbf16, #tpu.memory_space<vmem>>, vector<4x64xbf16>
    tpu.vector_store %arg16[%c29, %c0_238], %265 {strides = array<i32>} : memref<68x64xbf16, #tpu.memory_space<vmem>>, vector<4x64xbf16>,
    %c51 = arith.constant 51 : index
    %c0_239 = arith.constant 0 : index
    %267 = tpu.strided_load %arg15[%c51, %c0_239] {strides = array<i32: 2, 1>} : memref<104x64xf32, #tpu.memory_space<vmem>>, vector<4x64xf32>
    %c52 = arith.constant 52 : index
    %c0_240 = arith.constant 0 : index
    %268 = tpu.strided_load %arg15[%c52, %c0_240] {strides = array<i32: 2, 1>} : memref<104x64xf32, #tpu.memory_space<vmem>>, vector<4x64xf32>
    %269 = arith.maximumf %267, %268 : vector<4x64xf32>
    %c61 = arith.constant 61 : index
    %c0_241 = arith.constant 0 : index
    %270 = tpu.strided_load %arg15[%c61, %c0_241] {strides = array<i32: 2, 1>} : memref<104x64xf32, #tpu.memory_space<vmem>>, vector<4x64xf32>
    %271 = arith.maximumf %269, %270 : vector<4x64xf32>
    %c62 = arith.constant 62 : index
    %c0_242 = arith.constant 0 : index
    %272 = tpu.strided_load %arg15[%c62, %c0_242] {strides = array<i32: 2, 1>} : memref<104x64xf32, #tpu.memory_space<vmem>>, vector<4x64xf32>
    %273 = arith.maximumf %271, %272 : vector<4x64xf32>
    %274 = vector.broadcast %240 : vector<1x64xf32> to vector<4x64xf32>
    %275 = arith.addf %273, %274 : vector<4x64xf32>
    %cst_243 = arith.constant 0.000000e+00 : f32
    %276 = vector.broadcast %cst_243 : f32 to vector<4x64xf32>
    %277 = arith.maximumf %275, %276 : vector<4x64xf32>
    %278 = arith.truncf %277 : vector<4x64xf32> to vector<4x64xbf16>
    %c35 = arith.constant 35 : index
    %c0_244 = arith.constant 0 : index
    %279 = vector.load %arg16[%c35, %c0_244] : memref<68x64xbf16, #tpu.memory_space<vmem>>, vector<4x64xbf16>
    tpu.vector_store %arg16[%c35, %c0_244], %278 {strides = array<i32>} : memref<68x64xbf16, #tpu.memory_space<vmem>>, vector<4x64xbf16>,
    %c71 = arith.constant 71 : index
    %c0_245 = arith.constant 0 : index
    %280 = tpu.strided_load %arg15[%c71, %c0_245] {strides = array<i32: 2, 1>} : memref<104x64xf32, #tpu.memory_space<vmem>>, vector<4x64xf32>
    %c72 = arith.constant 72 : index
    %c0_246 = arith.constant 0 : index
    %281 = tpu.strided_load %arg15[%c72, %c0_246] {strides = array<i32: 2, 1>} : memref<104x64xf32, #tpu.memory_space<vmem>>, vector<4x64xf32>
    %282 = arith.maximumf %280, %281 : vector<4x64xf32>
    %c81 = arith.constant 81 : index
    %c0_247 = arith.constant 0 : index
    %283 = tpu.strided_load %arg15[%c81, %c0_247] {strides = array<i32: 2, 1>} : memref<104x64xf32, #tpu.memory_space<vmem>>, vector<4x64xf32>
    %284 = arith.maximumf %282, %283 : vector<4x64xf32>
    %c82 = arith.constant 82 : index
    %c0_248 = arith.constant 0 : index
    %285 = tpu.strided_load %arg15[%c82, %c0_248] {strides = array<i32: 2, 1>} : memref<104x64xf32, #tpu.memory_space<vmem>>, vector<4x64xf32>
    %286 = arith.maximumf %284, %285 : vector<4x64xf32>
    %287 = vector.broadcast %240 : vector<1x64xf32> to vector<4x64xf32>
    %288 = arith.addf %286, %287 : vector<4x64xf32>
    %cst_249 = arith.constant 0.000000e+00 : f32
    %289 = vector.broadcast %cst_249 : f32 to vector<4x64xf32>
    %290 = arith.maximumf %288, %289 : vector<4x64xf32>
    %291 = arith.truncf %290 : vector<4x64xf32> to vector<4x64xbf16>
    %c41_250 = arith.constant 41 : index
    %c0_251 = arith.constant 0 : index
    %292 = vector.load %arg16[%c41_250, %c0_251] : memref<68x64xbf16, #tpu.memory_space<vmem>>, vector<4x64xbf16>
    tpu.vector_store %arg16[%c41_250, %c0_251], %291 {strides = array<i32>} : memref<68x64xbf16, #tpu.memory_space<vmem>>, vector<4x64xbf16>,
    %c9 = arith.constant 9 : index
    %c0_252 = arith.constant 0 : index
    %293 = vector.load %arg16[%c9, %c0_252] : memref<68x64xbf16, #tpu.memory_space<vmem>>, vector<40x64xbf16>
    %c0_253 = arith.constant 0 : index
    %c0_254 = arith.constant 0 : index
    %c0_255 = arith.constant 0 : index
    %294 = vector.load %arg6[%c0_253, %c0_254, %c0_255] : memref<9x64x128xbf16, #tpu.memory_space<vmem>>, vector<1x64x128xbf16>
    %295 = vector.shape_cast %294 : vector<1x64x128xbf16> to vector<64x128xbf16>
    %cst_256 = arith.constant dense<0.000000e+00> : vector<40x128xf32>
    %296 = tpu.matmul %293, %295, %cst_256 {dimension_numbers = #tpu.dot_dimension_numbers<[1], [0], [0], [1], [0, 0, 1, 1], [], []>} : vector<40x64xbf16>, vector<64x128xbf16>, vector<40x128xf32> -> vector<40x128xf32>
    %c0_257 = arith.constant 0 : index
    %c0_258 = arith.constant 0 : index
    %297 = vector.load %arg17[%c0_257, %c0_258] : memref<40x128xf32, #tpu.memory_space<vmem>>, vector<40x128xf32>
    tpu.vector_store %arg17[%c0_257, %c0_258], %296 {strides = array<i32>} : memref<40x128xf32, #tpu.memory_space<vmem>>, vector<40x128xf32>,
    %c10 = arith.constant 10 : index
    %c0_259 = arith.constant 0 : index
    %298 = vector.load %arg16[%c10, %c0_259] : memref<68x64xbf16, #tpu.memory_space<vmem>>, vector<40x64xbf16>
    %c1_260 = arith.constant 1 : index
    %c0_261 = arith.constant 0 : index
    %c0_262 = arith.constant 0 : index
    %299 = vector.load %arg6[%c1_260, %c0_261, %c0_262] : memref<9x64x128xbf16, #tpu.memory_space<vmem>>, vector<1x64x128xbf16>
    %300 = vector.shape_cast %299 : vector<1x64x128xbf16> to vector<64x128xbf16>
    %cst_263 = arith.constant dense<0.000000e+00> : vector<40x128xf32>
    %301 = tpu.matmul %298, %300, %cst_263 {dimension_numbers = #tpu.dot_dimension_numbers<[1], [0], [0], [1], [0, 0, 1, 1], [], []>} : vector<40x64xbf16>, vector<64x128xbf16>, vector<40x128xf32> -> vector<40x128xf32>
    %c0_264 = arith.constant 0 : index
    %c0_265 = arith.constant 0 : index
    %302 = vector.load %arg17[%c0_264, %c0_265] : memref<40x128xf32, #tpu.memory_space<vmem>>, vector<40x128xf32>
    %303 = arith.addf %302, %301 : vector<40x128xf32>
    %c0_266 = arith.constant 0 : index
    %c0_267 = arith.constant 0 : index
    %304 = vector.load %arg17[%c0_266, %c0_267] : memref<40x128xf32, #tpu.memory_space<vmem>>, vector<40x128xf32>
    tpu.vector_store %arg17[%c0_266, %c0_267], %303 {strides = array<i32>} : memref<40x128xf32, #tpu.memory_space<vmem>>, vector<40x128xf32>,
    %c11_268 = arith.constant 11 : index
    %c0_269 = arith.constant 0 : index
    %305 = vector.load %arg16[%c11_268, %c0_269] : memref<68x64xbf16, #tpu.memory_space<vmem>>, vector<40x64xbf16>
    %c2_270 = arith.constant 2 : index
    %c0_271 = arith.constant 0 : index
    %c0_272 = arith.constant 0 : index
    %306 = vector.load %arg6[%c2_270, %c0_271, %c0_272] : memref<9x64x128xbf16, #tpu.memory_space<vmem>>, vector<1x64x128xbf16>
    %307 = vector.shape_cast %306 : vector<1x64x128xbf16> to vector<64x128xbf16>
    %cst_273 = arith.constant dense<0.000000e+00> : vector<40x128xf32>
    %308 = tpu.matmul %305, %307, %cst_273 {dimension_numbers = #tpu.dot_dimension_numbers<[1], [0], [0], [1], [0, 0, 1, 1], [], []>} : vector<40x64xbf16>, vector<64x128xbf16>, vector<40x128xf32> -> vector<40x128xf32>
    %c0_274 = arith.constant 0 : index
    %c0_275 = arith.constant 0 : index
    %309 = vector.load %arg17[%c0_274, %c0_275] : memref<40x128xf32, #tpu.memory_space<vmem>>, vector<40x128xf32>
    %310 = arith.addf %309, %308 : vector<40x128xf32>
    %c0_276 = arith.constant 0 : index
    %c0_277 = arith.constant 0 : index
    %311 = vector.load %arg17[%c0_276, %c0_277] : memref<40x128xf32, #tpu.memory_space<vmem>>, vector<40x128xf32>
    tpu.vector_store %arg17[%c0_276, %c0_277], %310 {strides = array<i32>} : memref<40x128xf32, #tpu.memory_space<vmem>>, vector<40x128xf32>,
    %c15_278 = arith.constant 15 : index
    %c0_279 = arith.constant 0 : index
    %312 = vector.load %arg16[%c15_278, %c0_279] : memref<68x64xbf16, #tpu.memory_space<vmem>>, vector<40x64xbf16>
    %c3_280 = arith.constant 3 : index
    %c0_281 = arith.constant 0 : index
    %c0_282 = arith.constant 0 : index
    %313 = vector.load %arg6[%c3_280, %c0_281, %c0_282] : memref<9x64x128xbf16, #tpu.memory_space<vmem>>, vector<1x64x128xbf16>
    %314 = vector.shape_cast %313 : vector<1x64x128xbf16> to vector<64x128xbf16>
    %cst_283 = arith.constant dense<0.000000e+00> : vector<40x128xf32>
    %315 = tpu.matmul %312, %314, %cst_283 {dimension_numbers = #tpu.dot_dimension_numbers<[1], [0], [0], [1], [0, 0, 1, 1], [], []>} : vector<40x64xbf16>, vector<64x128xbf16>, vector<40x128xf32> -> vector<40x128xf32>
    %c0_284 = arith.constant 0 : index
    %c0_285 = arith.constant 0 : index
    %316 = vector.load %arg17[%c0_284, %c0_285] : memref<40x128xf32, #tpu.memory_space<vmem>>, vector<40x128xf32>
    %317 = arith.addf %316, %315 : vector<40x128xf32>
    %c0_286 = arith.constant 0 : index
    %c0_287 = arith.constant 0 : index
    %318 = vector.load %arg17[%c0_286, %c0_287] : memref<40x128xf32, #tpu.memory_space<vmem>>, vector<40x128xf32>
    tpu.vector_store %arg17[%c0_286, %c0_287], %317 {strides = array<i32>} : memref<40x128xf32, #tpu.memory_space<vmem>>, vector<40x128xf32>,
    %c16_288 = arith.constant 16 : index
    %c0_289 = arith.constant 0 : index
    %319 = vector.load %arg16[%c16_288, %c0_289] : memref<68x64xbf16, #tpu.memory_space<vmem>>, vector<40x64xbf16>
    %c4_290 = arith.constant 4 : index
    %c0_291 = arith.constant 0 : index
    %c0_292 = arith.constant 0 : index
    %320 = vector.load %arg6[%c4_290, %c0_291, %c0_292] : memref<9x64x128xbf16, #tpu.memory_space<vmem>>, vector<1x64x128xbf16>
    %321 = vector.shape_cast %320 : vector<1x64x128xbf16> to vector<64x128xbf16>
    %cst_293 = arith.constant dense<0.000000e+00> : vector<40x128xf32>
    %322 = tpu.matmul %319, %321, %cst_293 {dimension_numbers = #tpu.dot_dimension_numbers<[1], [0], [0], [1], [0, 0, 1, 1], [], []>} : vector<40x64xbf16>, vector<64x128xbf16>, vector<40x128xf32> -> vector<40x128xf32>
    %c0_294 = arith.constant 0 : index
    %c0_295 = arith.constant 0 : index
    %323 = vector.load %arg17[%c0_294, %c0_295] : memref<40x128xf32, #tpu.memory_space<vmem>>, vector<40x128xf32>
    %324 = arith.addf %323, %322 : vector<40x128xf32>
    %c0_296 = arith.constant 0 : index
    %c0_297 = arith.constant 0 : index
    %325 = vector.load %arg17[%c0_296, %c0_297] : memref<40x128xf32, #tpu.memory_space<vmem>>, vector<40x128xf32>
    tpu.vector_store %arg17[%c0_296, %c0_297], %324 {strides = array<i32>} : memref<40x128xf32, #tpu.memory_space<vmem>>, vector<40x128xf32>,
    %c17_298 = arith.constant 17 : index
    %c0_299 = arith.constant 0 : index
    %326 = vector.load %arg16[%c17_298, %c0_299] : memref<68x64xbf16, #tpu.memory_space<vmem>>, vector<40x64xbf16>
    %c5_300 = arith.constant 5 : index
    %c0_301 = arith.constant 0 : index
    %c0_302 = arith.constant 0 : index
    %327 = vector.load %arg6[%c5_300, %c0_301, %c0_302] : memref<9x64x128xbf16, #tpu.memory_space<vmem>>, vector<1x64x128xbf16>
    %328 = vector.shape_cast %327 : vector<1x64x128xbf16> to vector<64x128xbf16>
    %cst_303 = arith.constant dense<0.000000e+00> : vector<40x128xf32>
    %329 = tpu.matmul %326, %328, %cst_303 {dimension_numbers = #tpu.dot_dimension_numbers<[1], [0], [0], [1], [0, 0, 1, 1], [], []>} : vector<40x64xbf16>, vector<64x128xbf16>, vector<40x128xf32> -> vector<40x128xf32>
    %c0_304 = arith.constant 0 : index
    %c0_305 = arith.constant 0 : index
    %330 = vector.load %arg17[%c0_304, %c0_305] : memref<40x128xf32, #tpu.memory_space<vmem>>, vector<40x128xf32>
    %331 = arith.addf %330, %329 : vector<40x128xf32>
    %c0_306 = arith.constant 0 : index
    %c0_307 = arith.constant 0 : index
    %332 = vector.load %arg17[%c0_306, %c0_307] : memref<40x128xf32, #tpu.memory_space<vmem>>, vector<40x128xf32>
    tpu.vector_store %arg17[%c0_306, %c0_307], %331 {strides = array<i32>} : memref<40x128xf32, #tpu.memory_space<vmem>>, vector<40x128xf32>,
    %c21_308 = arith.constant 21 : index
    %c0_309 = arith.constant 0 : index
    %333 = vector.load %arg16[%c21_308, %c0_309] : memref<68x64xbf16, #tpu.memory_space<vmem>>, vector<40x64xbf16>
    %c6_310 = arith.constant 6 : index
    %c0_311 = arith.constant 0 : index
    %c0_312 = arith.constant 0 : index
    %334 = vector.load %arg6[%c6_310, %c0_311, %c0_312] : memref<9x64x128xbf16, #tpu.memory_space<vmem>>, vector<1x64x128xbf16>
    %335 = vector.shape_cast %334 : vector<1x64x128xbf16> to vector<64x128xbf16>
    %cst_313 = arith.constant dense<0.000000e+00> : vector<40x128xf32>
    %336 = tpu.matmul %333, %335, %cst_313 {dimension_numbers = #tpu.dot_dimension_numbers<[1], [0], [0], [1], [0, 0, 1, 1], [], []>} : vector<40x64xbf16>, vector<64x128xbf16>, vector<40x128xf32> -> vector<40x128xf32>
    %c0_314 = arith.constant 0 : index
    %c0_315 = arith.constant 0 : index
    %337 = vector.load %arg17[%c0_314, %c0_315] : memref<40x128xf32, #tpu.memory_space<vmem>>, vector<40x128xf32>
    %338 = arith.addf %337, %336 : vector<40x128xf32>
    %c0_316 = arith.constant 0 : index
    %c0_317 = arith.constant 0 : index
    %339 = vector.load %arg17[%c0_316, %c0_317] : memref<40x128xf32, #tpu.memory_space<vmem>>, vector<40x128xf32>
    tpu.vector_store %arg17[%c0_316, %c0_317], %338 {strides = array<i32>} : memref<40x128xf32, #tpu.memory_space<vmem>>, vector<40x128xf32>,
    %c22_318 = arith.constant 22 : index
    %c0_319 = arith.constant 0 : index
    %340 = vector.load %arg16[%c22_318, %c0_319] : memref<68x64xbf16, #tpu.memory_space<vmem>>, vector<40x64xbf16>
    %c7_320 = arith.constant 7 : index
    %c0_321 = arith.constant 0 : index
    %c0_322 = arith.constant 0 : index
    %341 = vector.load %arg6[%c7_320, %c0_321, %c0_322] : memref<9x64x128xbf16, #tpu.memory_space<vmem>>, vector<1x64x128xbf16>
    %342 = vector.shape_cast %341 : vector<1x64x128xbf16> to vector<64x128xbf16>
    %cst_323 = arith.constant dense<0.000000e+00> : vector<40x128xf32>
    %343 = tpu.matmul %340, %342, %cst_323 {dimension_numbers = #tpu.dot_dimension_numbers<[1], [0], [0], [1], [0, 0, 1, 1], [], []>} : vector<40x64xbf16>, vector<64x128xbf16>, vector<40x128xf32> -> vector<40x128xf32>
    %c0_324 = arith.constant 0 : index
    %c0_325 = arith.constant 0 : index
    %344 = vector.load %arg17[%c0_324, %c0_325] : memref<40x128xf32, #tpu.memory_space<vmem>>, vector<40x128xf32>
    %345 = arith.addf %344, %343 : vector<40x128xf32>
    %c0_326 = arith.constant 0 : index
    %c0_327 = arith.constant 0 : index
    %346 = vector.load %arg17[%c0_326, %c0_327] : memref<40x128xf32, #tpu.memory_space<vmem>>, vector<40x128xf32>
    tpu.vector_store %arg17[%c0_326, %c0_327], %345 {strides = array<i32>} : memref<40x128xf32, #tpu.memory_space<vmem>>, vector<40x128xf32>,
    %c23_328 = arith.constant 23 : index
    %c0_329 = arith.constant 0 : index
    %347 = vector.load %arg16[%c23_328, %c0_329] : memref<68x64xbf16, #tpu.memory_space<vmem>>, vector<40x64xbf16>
    %c8_330 = arith.constant 8 : index
    %c0_331 = arith.constant 0 : index
    %c0_332 = arith.constant 0 : index
    %348 = vector.load %arg6[%c8_330, %c0_331, %c0_332] : memref<9x64x128xbf16, #tpu.memory_space<vmem>>, vector<1x64x128xbf16>
    %349 = vector.shape_cast %348 : vector<1x64x128xbf16> to vector<64x128xbf16>
    %cst_333 = arith.constant dense<0.000000e+00> : vector<40x128xf32>
    %350 = tpu.matmul %347, %349, %cst_333 {dimension_numbers = #tpu.dot_dimension_numbers<[1], [0], [0], [1], [0, 0, 1, 1], [], []>} : vector<40x64xbf16>, vector<64x128xbf16>, vector<40x128xf32> -> vector<40x128xf32>
    %c0_334 = arith.constant 0 : index
    %c0_335 = arith.constant 0 : index
    %351 = vector.load %arg17[%c0_334, %c0_335] : memref<40x128xf32, #tpu.memory_space<vmem>>, vector<40x128xf32>
    %352 = arith.addf %351, %350 : vector<40x128xf32>
    %c0_336 = arith.constant 0 : index
    %c0_337 = arith.constant 0 : index
    %353 = vector.load %arg17[%c0_336, %c0_337] : memref<40x128xf32, #tpu.memory_space<vmem>>, vector<40x128xf32>
    tpu.vector_store %arg17[%c0_336, %c0_337], %352 {strides = array<i32>} : memref<40x128xf32, #tpu.memory_space<vmem>>, vector<40x128xf32>,
    %c0_338 = arith.constant 0 : index
    %c0_339 = arith.constant 0 : index
    %354 = vector.load %arg7[%c0_338, %c0_339] : memref<1x128xf32, #tpu.memory_space<vmem>>, vector<1x128xf32>
    %c7_340 = arith.constant 7 : index
    %c0_341 = arith.constant 0 : index
    %355 = vector.load %arg17[%c7_340, %c0_341] : memref<40x128xf32, #tpu.memory_space<vmem>>, vector<1x128xf32>
    %c8_342 = arith.constant 8 : index
    %c0_343 = arith.constant 0 : index
    %356 = vector.load %arg17[%c8_342, %c0_343] : memref<40x128xf32, #tpu.memory_space<vmem>>, vector<1x128xf32>
    %357 = arith.maximumf %355, %356 : vector<1x128xf32>
    %c13 = arith.constant 13 : index
    %c0_344 = arith.constant 0 : index
    %358 = vector.load %arg17[%c13, %c0_344] : memref<40x128xf32, #tpu.memory_space<vmem>>, vector<1x128xf32>
    %359 = arith.maximumf %357, %358 : vector<1x128xf32>
    %c14 = arith.constant 14 : index
    %c0_345 = arith.constant 0 : index
    %360 = vector.load %arg17[%c14, %c0_345] : memref<40x128xf32, #tpu.memory_space<vmem>>, vector<1x128xf32>
    %361 = arith.maximumf %359, %360 : vector<1x128xf32>
    %362 = arith.addf %361, %354 : vector<1x128xf32>
    %cst_346 = arith.constant 0.000000e+00 : f32
    %363 = vector.broadcast %cst_346 : f32 to vector<1x128xf32>
    %364 = arith.maximumf %362, %363 : vector<1x128xf32>
    %365 = arith.truncf %364 : vector<1x128xf32> to vector<1x128xbf16>
    %c0_347 = arith.constant 0 : index
    %c0_348 = arith.constant 0 : index
    %366 = vector.load %arg18[%c0_347, %c0_348] : memref<1x512xbf16, #tpu.memory_space<vmem>>, vector<1x128xbf16>
    tpu.vector_store %arg18[%c0_347, %c0_348], %365 {strides = array<i32>} : memref<1x512xbf16, #tpu.memory_space<vmem>>, vector<1x128xbf16>,
    %c9_349 = arith.constant 9 : index
    %c0_350 = arith.constant 0 : index
    %367 = vector.load %arg17[%c9_349, %c0_350] : memref<40x128xf32, #tpu.memory_space<vmem>>, vector<1x128xf32>
    %c10_351 = arith.constant 10 : index
    %c0_352 = arith.constant 0 : index
    %368 = vector.load %arg17[%c10_351, %c0_352] : memref<40x128xf32, #tpu.memory_space<vmem>>, vector<1x128xf32>
    %369 = arith.maximumf %367, %368 : vector<1x128xf32>
    %c15_353 = arith.constant 15 : index
    %c0_354 = arith.constant 0 : index
    %370 = vector.load %arg17[%c15_353, %c0_354] : memref<40x128xf32, #tpu.memory_space<vmem>>, vector<1x128xf32>
    %371 = arith.maximumf %369, %370 : vector<1x128xf32>
    %c16_355 = arith.constant 16 : index
    %c0_356 = arith.constant 0 : index
    %372 = vector.load %arg17[%c16_355, %c0_356] : memref<40x128xf32, #tpu.memory_space<vmem>>, vector<1x128xf32>
    %373 = arith.maximumf %371, %372 : vector<1x128xf32>
    %374 = arith.addf %373, %354 : vector<1x128xf32>
    %cst_357 = arith.constant 0.000000e+00 : f32
    %375 = vector.broadcast %cst_357 : f32 to vector<1x128xf32>
    %376 = arith.maximumf %374, %375 : vector<1x128xf32>
    %377 = arith.truncf %376 : vector<1x128xf32> to vector<1x128xbf16>
    %c0_358 = arith.constant 0 : index
    %c128_359 = arith.constant 128 : index
    %378 = vector.load %arg18[%c0_358, %c128_359] : memref<1x512xbf16, #tpu.memory_space<vmem>>, vector<1x128xbf16>
    tpu.vector_store %arg18[%c0_358, %c128_359], %377 {strides = array<i32>} : memref<1x512xbf16, #tpu.memory_space<vmem>>, vector<1x128xbf16>,
    %c19_360 = arith.constant 19 : index
    %c0_361 = arith.constant 0 : index
    %379 = vector.load %arg17[%c19_360, %c0_361] : memref<40x128xf32, #tpu.memory_space<vmem>>, vector<1x128xf32>
    %c20_362 = arith.constant 20 : index
    %c0_363 = arith.constant 0 : index
    %380 = vector.load %arg17[%c20_362, %c0_363] : memref<40x128xf32, #tpu.memory_space<vmem>>, vector<1x128xf32>
    %381 = arith.maximumf %379, %380 : vector<1x128xf32>
    %c25_364 = arith.constant 25 : index
    %c0_365 = arith.constant 0 : index
    %382 = vector.load %arg17[%c25_364, %c0_365] : memref<40x128xf32, #tpu.memory_space<vmem>>, vector<1x128xf32>
    %383 = arith.maximumf %381, %382 : vector<1x128xf32>
    %c26_366 = arith.constant 26 : index
    %c0_367 = arith.constant 0 : index
    %384 = vector.load %arg17[%c26_366, %c0_367] : memref<40x128xf32, #tpu.memory_space<vmem>>, vector<1x128xf32>
    %385 = arith.maximumf %383, %384 : vector<1x128xf32>
    %386 = arith.addf %385, %354 : vector<1x128xf32>
    %cst_368 = arith.constant 0.000000e+00 : f32
    %387 = vector.broadcast %cst_368 : f32 to vector<1x128xf32>
    %388 = arith.maximumf %386, %387 : vector<1x128xf32>
    %389 = arith.truncf %388 : vector<1x128xf32> to vector<1x128xbf16>
    %c0_369 = arith.constant 0 : index
    %c256 = arith.constant 256 : index
    %390 = vector.load %arg18[%c0_369, %c256] : memref<1x512xbf16, #tpu.memory_space<vmem>>, vector<1x128xbf16>
    tpu.vector_store %arg18[%c0_369, %c256], %389 {strides = array<i32>} : memref<1x512xbf16, #tpu.memory_space<vmem>>, vector<1x128xbf16>,
    %c21_370 = arith.constant 21 : index
    %c0_371 = arith.constant 0 : index
    %391 = vector.load %arg17[%c21_370, %c0_371] : memref<40x128xf32, #tpu.memory_space<vmem>>, vector<1x128xf32>
    %c22_372 = arith.constant 22 : index
    %c0_373 = arith.constant 0 : index
    %392 = vector.load %arg17[%c22_372, %c0_373] : memref<40x128xf32, #tpu.memory_space<vmem>>, vector<1x128xf32>
    %393 = arith.maximumf %391, %392 : vector<1x128xf32>
    %c27_374 = arith.constant 27 : index
    %c0_375 = arith.constant 0 : index
    %394 = vector.load %arg17[%c27_374, %c0_375] : memref<40x128xf32, #tpu.memory_space<vmem>>, vector<1x128xf32>
    %395 = arith.maximumf %393, %394 : vector<1x128xf32>
    %c28 = arith.constant 28 : index
    %c0_376 = arith.constant 0 : index
    %396 = vector.load %arg17[%c28, %c0_376] : memref<40x128xf32, #tpu.memory_space<vmem>>, vector<1x128xf32>
    %397 = arith.maximumf %395, %396 : vector<1x128xf32>
    %398 = arith.addf %397, %354 : vector<1x128xf32>
    %cst_377 = arith.constant 0.000000e+00 : f32
    %399 = vector.broadcast %cst_377 : f32 to vector<1x128xf32>
    %400 = arith.maximumf %398, %399 : vector<1x128xf32>
    %401 = arith.truncf %400 : vector<1x128xf32> to vector<1x128xbf16>
    %c0_378 = arith.constant 0 : index
    %c384 = arith.constant 384 : index
    %402 = vector.load %arg18[%c0_378, %c384] : memref<1x512xbf16, #tpu.memory_space<vmem>>, vector<1x128xbf16>
    tpu.vector_store %arg18[%c0_378, %c384], %401 {strides = array<i32>} : memref<1x512xbf16, #tpu.memory_space<vmem>>, vector<1x128xbf16>,
    tpu.wait_dma2 semaphore(%arg20 : memref<!tpu.dma_semaphore, #tpu.memory_space<semaphore_mem>>) src(%arg8 : memref<512x512xbf16, #tpu.memory_space<any>>) dst(%arg19 : memref<512x512xbf16, #tpu.memory_space<vmem>>)
    %c0_379 = arith.constant 0 : index
    %c0_380 = arith.constant 0 : index
    %403 = vector.load %arg18[%c0_379, %c0_380] : memref<1x512xbf16, #tpu.memory_space<vmem>>, vector<1x512xbf16>
    %c0_381 = arith.constant 0 : index
    %c0_382 = arith.constant 0 : index
    %404 = vector.load %arg19[%c0_381, %c0_382] : memref<512x512xbf16, #tpu.memory_space<vmem>>, vector<512x512xbf16>
    %cst_383 = arith.constant dense<0.000000e+00> : vector<1x512xf32>
    %405 = tpu.matmul %403, %404, %cst_383 {dimension_numbers = #tpu.dot_dimension_numbers<[1], [0], [0], [1], [0, 0, 1, 1], [], []>} : vector<1x512xbf16>, vector<512x512xbf16>, vector<1x512xf32> -> vector<1x512xf32>
    %c0_384 = arith.constant 0 : index
    %c0_385 = arith.constant 0 : index
    %406 = vector.load %arg9[%c0_384, %c0_385] : memref<1x512xf32, #tpu.memory_space<vmem>>, vector<1x512xf32>
    %407 = arith.addf %405, %406 : vector<1x512xf32>
    %cst_386 = arith.constant 0.000000e+00 : f32
    %408 = vector.broadcast %cst_386 : f32 to vector<1x512xf32>
    %409 = arith.maximumf %407, %408 : vector<1x512xf32>
    %410 = arith.truncf %409 : vector<1x512xf32> to vector<1x512xbf16>
    %c0_387 = arith.constant 0 : index
    %c0_388 = arith.constant 0 : index
    %411 = vector.load %arg10[%c0_387, %c0_388] : memref<512x4xbf16, #tpu.memory_space<vmem>>, vector<512x4xbf16>
    %cst_389 = arith.constant dense<0.000000e+00> : vector<1x4xf32>
    %412 = tpu.matmul %410, %411, %cst_389 {dimension_numbers = #tpu.dot_dimension_numbers<[1], [0], [0], [1], [0, 0, 1, 1], [], []>} : vector<1x512xbf16>, vector<512x4xbf16>, vector<1x4xf32> -> vector<1x4xf32>
    %c0_390 = arith.constant 0 : index
    %c0_391 = arith.constant 0 : index
    %413 = vector.load %arg11[%c0_390, %c0_391] : memref<1x4xf32, #tpu.memory_space<vmem>>, vector<1x4xf32>
    %414 = arith.addf %412, %413 : vector<1x4xf32>
    %c0_392 = arith.constant 0 : index
    %c0_393 = arith.constant 0 : index
    %c0_394 = arith.constant 0 : index
    %415 = vector.load %arg12[%c0_392, %c0_393, %c0_394] : memref<1x1x4xf32, #tpu.memory_space<vmem>>, vector<1x1x4xf32>
    %416 = vector.shape_cast %415 : vector<1x1x4xf32> to vector<1x4xf32>
    %417 = vector.shape_cast %414 : vector<1x4xf32> to vector<1x1x4xf32>
    tpu.vector_store %arg12[%c0_392, %c0_393, %c0_394], %417 {strides = array<i32>} : memref<1x1x4xf32, #tpu.memory_space<vmem>>, vector<1x1x4xf32>,
    return
  }
  func.func @transform_0(%arg0: i32) -> (i32, i32, i32) {
    %c0_i32 = arith.constant 0 : i32
    %c0_i32_0 = arith.constant 0 : i32
    %c0_i32_1 = arith.constant 0 : i32
    return %arg0, %c0_i32, %c0_i32_0 : i32, i32, i32
  }
  func.func @transform_1(%arg0: i32) -> (i32, i32, i32) {
    %c0_i32 = arith.constant 0 : i32
    %c0_i32_0 = arith.constant 0 : i32
    %c0_i32_1 = arith.constant 0 : i32
    %c0_i32_2 = arith.constant 0 : i32
    return %c0_i32, %c0_i32_0, %c0_i32_1 : i32, i32, i32
  }
  func.func @transform_2(%arg0: i32) -> (i32, i32) {
    %c0_i32 = arith.constant 0 : i32
    %c0_i32_0 = arith.constant 0 : i32
    %c0_i32_1 = arith.constant 0 : i32
    return %c0_i32, %c0_i32_0 : i32, i32
  }
  func.func @transform_3(%arg0: i32) -> (i32, i32, i32) {
    %c0_i32 = arith.constant 0 : i32
    %c0_i32_0 = arith.constant 0 : i32
    %c0_i32_1 = arith.constant 0 : i32
    %c0_i32_2 = arith.constant 0 : i32
    return %c0_i32, %c0_i32_0, %c0_i32_1 : i32, i32, i32
  }
  func.func @transform_4(%arg0: i32) -> (i32, i32) {
    %c0_i32 = arith.constant 0 : i32
    %c0_i32_0 = arith.constant 0 : i32
    %c0_i32_1 = arith.constant 0 : i32
    return %c0_i32, %c0_i32_0 : i32, i32
  }
  func.func @transform_5(%arg0: i32) -> (i32, i32, i32) {
    %c0_i32 = arith.constant 0 : i32
    %c0_i32_0 = arith.constant 0 : i32
    %c0_i32_1 = arith.constant 0 : i32
    %c0_i32_2 = arith.constant 0 : i32
    return %c0_i32, %c0_i32_0, %c0_i32_1 : i32, i32, i32
  }
  func.func @transform_6(%arg0: i32) -> (i32, i32) {
    %c0_i32 = arith.constant 0 : i32
    %c0_i32_0 = arith.constant 0 : i32
    %c0_i32_1 = arith.constant 0 : i32
    return %c0_i32, %c0_i32_0 : i32, i32
  }
  func.func @transform_8(%arg0: i32) -> (i32, i32) {
    %c0_i32 = arith.constant 0 : i32
    %c0_i32_0 = arith.constant 0 : i32
    %c0_i32_1 = arith.constant 0 : i32
    return %c0_i32, %c0_i32_0 : i32, i32
  }
  func.func @transform_9(%arg0: i32) -> (i32, i32) {
    %c0_i32 = arith.constant 0 : i32
    %c0_i32_0 = arith.constant 0 : i32
    %c0_i32_1 = arith.constant 0 : i32
    return %c0_i32, %c0_i32_0 : i32, i32
  }
  func.func @transform_10(%arg0: i32) -> (i32, i32) {
    %c0_i32 = arith.constant 0 : i32
    %c0_i32_0 = arith.constant 0 : i32
    %c0_i32_1 = arith.constant 0 : i32
    return %c0_i32, %c0_i32_0 : i32, i32
  }
  func.func @transform_11(%arg0: i32) -> (i32, i32, i32) {
    %c0_i32 = arith.constant 0 : i32
    %c0_i32_0 = arith.constant 0 : i32
    %c0_i32_1 = arith.constant 0 : i32
    return %arg0, %c0_i32, %c0_i32_0 : i32, i32, i32
  }
}

</mosaic_0001>

<bundles_post_ra>
// kernel: forward.1
= control target key start
LH: loop header
LB: loop body
LE: loop exit
PB: predicated region body
PF: predicated region fallthrough
CT: control target
= control target key end

     0   :  { %16 = vsyncpa [#allocation11], 0  ;;  %s18726_s0 = inlined_call_operand.vmem [shape: bf16[2,372,8], index: 0, kind: input, shape index: {}]   ;;  %s18727_s1 = inlined_call_operand.vmem [shape: bf16[9,8,32], index: 1, kind: input, shape index: {}]   ;;  %s18728_s2 = inlined_call_operand.vmem [shape: f32[1,32], index: 2, kind: input, shape index: {}]   ;;  %s18729_s3 = inlined_call_operand.vmem [shape: bf16[9,32,64], index: 3, kind: input, shape index: {}]   ;;  %s18730_s4 = inlined_call_operand.vmem [shape: f32[1,64], index: 4, kind: input, shape index: {}]   ;;  %s18731_s5 = inlined_call_operand.vmem [shape: bf16[9,64,128], index: 5, kind: input, shape index: {}]   ;;  %s18732_s6 = inlined_call_operand.vmem [shape: f32[1,128], index: 6, kind: input, shape index: {}]   ;;  %s18733_s7 = inlined_call_operand.vmem [shape: bf16[512,512], index: 7, kind: input, shape index: {}]   ;;  %s18734_s8 = inlined_call_operand.vmem [shape: f32[1,512], index: 8, kind: input, shape index: {}]   ;;  %s18735_s9 = inlined_call_operand.vmem [shape: bf16[512,4], index: 9, kind: input, shape index: {}]   ;;  %s18736_s10 = inlined_call_operand.vmem [shape: f32[1,4], index: 10, kind: input, shape index: {}]   ;;  %s18737_s11 = inlined_call_operand.hbm [shape: f32[2,1,4], index: 11, kind: output, shape index: {}]  }
   0x1   :  { %18 = vsyncpa [#allocation11 + $0x1], 0  ;;  %s15371_s17 = smov 0   ;;  %s15373_s18 = smov 0  }
   0x2   :  { %s15375_s19 = smov 0   ;;  %s15377_s20 = smov 0  }
   0x3 LB: > { %s15392_s21 = sadd.s32 4294967295, %s15304_s20   ;;  %s12311_s22 = sadd.s32 4294967294, %s15304_s20   ;;  %s15304_s20 = sphi %s15377_s20, %s18816_s20   ;;  %s15300_s19 = sphi %s15375_s19, %s18815_s19   ;;  %s15296_s18 = sphi %s15373_s18, %s18814_s18   ;;  %s15292_s17 = sphi %s15371_s17, %s18813_s17  }
   0x4   : > { %s15396_s23 = sadd.s32 1, %s15304_s20   ;;  %s246_s24 = sadd.s32 1, %s15300_s19 }
   0x5   : > { %s243_s25 = ssub.s32 %s15304_s20, %s15396_s23  ;;  %p256_p0 = scmp.ne.s32.totalorder %s15300_s19, %s15296_s18 }
   0x6   : > { %p244_p1 = scmp.eq.s32.totalorder %s243_s25, 0  ;;  %p257_p2 = scmp.eq.s32.totalorder %s15392_s21, 1 }
   0x7   : > { %p262_p3 = scmp.ne.s32.totalorder %s15296_s18, %s15292_s17  ;;  %p263_p4 = scmp.eq.s32.totalorder %s12311_s22, 1 }
   0x8   : > { %s15407_s26 = scalar_select %p244_p1, %s15300_s19, %s246_s24  }
   0x9   : > { %p15409_p5 = por %p257_p2, %p256_p0  ;;  %p15413_p6 = por %p263_p4, %p262_p3 }
   0xa   : > { %18745 = sst [smem:[#allocation15_spill]] %s15407_s26  ;;  %p12314_p7 = scmp.ge.s32.totalorder %s15304_s20, 1 }
   0xb   : > { %p316_p8 = scmp.lt.s32.totalorder %s15304_s20, 3 }
   0xd   : > { %p317_p9 = pnand %p12314_p7, %p316_p8 }
   0xe   : > { %p353_p10 = scmp.lt.s32.totalorder (!%p317_p9), %s15392_s21, 1  ;;  %v376_v0 = vld [vmem:[%s18733_s7] sm:$0xf] (!%p317_p9)  ;;  %v378_v1 = vld [vmem:[%s18733_s7 + $0x10] sm:$0xf] (!%p317_p9) }
   0xf   : > { %320 = sbr.rel (%p317_p9) target bundleno = 2910 (0xb5e), region = 60  ;;  %377 = vst [vmem:[#allocation8] sm:$0xf] (!%p317_p9), %v376_v0  ;;  %379 = vst [vmem:[#allocation8 + $0x4] sm:$0xf] (!%p317_p9), %v378_v1  ;;  %v390_v4 = vld [vmem:[%s18733_s7 + $0x1c] sm:$0xff] (!%p317_p9)  }
  0x10   : > { %v380_v2 = vld [vmem:[%s18733_s7 + $0x4] sm:$0xf] (!%p317_p9)  ;;  %v382_v3 = vld [vmem:[%s18733_s7 + $0x14] sm:$0xf] (!%p317_p9)  ;;  %v384_v5 = vld [vmem:[%s18733_s7 + $0x8] sm:$0xf] (!%p317_p9) }
  0x11   : > { %381 = vst [vmem:[#allocation8 + $0x8] sm:$0xf] (!%p317_p9), %v380_v2  ;;  %383 = vst [vmem:[#allocation8 + $0xc] sm:$0xf] (!%p317_p9), %v382_v3  ;;  %v386_v6 = vld [vmem:[%s18733_s7 + $0x18] sm:$0xf] (!%p317_p9) }
  0x12   : > { %391 = vst [vmem:[#allocation8 + $0x1c] sm:$0xff] (!%p317_p9), %v390_v4   ;;  %v406_v7 = vld [vmem:[%s18733_s7 + $0x3c] sm:$0xff] (!%p317_p9)   ;;  %385 = vst [vmem:[#allocation8 + $0x10] sm:$0xf] (!%p317_p9), %v384_v5  ;;  %v388_v8 = vld [vmem:[%s18733_s7 + $0xc] sm:$0xf] (!%p317_p9) }
  0x13   : > { %387 = vst [vmem:[#allocation8 + $0x14] sm:$0xf] (!%p317_p9), %v386_v6  ;;  %v394_v9 = vld [vmem:[%s18733_s7 + $0x30] sm:$0xf] (!%p317_p9)  ;;  %v396_v10 = vld [vmem:[%s18733_s7 + $0x24] sm:$0xf] (!%p317_p9) }
  0x14   : > { %407 = vst [vmem:[#allocation8 + $0x3c] sm:$0xff] (!%p317_p9), %v406_v7   ;;  %389 = vst [vmem:[#allocation8 + $0x18] sm:$0xf] (!%p317_p9), %v388_v8  ;;  %v398_v11 = vld [vmem:[%s18733_s7 + $0x34] sm:$0xf] (!%p317_p9)  ;;  %v422_v13 = vld [vmem:[%s18733_s7 + $0x5c] sm:$0xff] (!%p317_p9)  }
  0x15   : > { %395 = vst [vmem:[#allocation8 + $0x24] sm:$0xf] (!%p317_p9), %v394_v9  ;;  %397 = vst [vmem:[#allocation8 + $0x28] sm:$0xf] (!%p317_p9), %v396_v10  ;;  %v400_v12 = vld [vmem:[%s18733_s7 + $0x28] sm:$0xf] (!%p317_p9) }
  0x16   : > { %s354_s30 = scalar_select %p353_p10, %s15392_s21, 1  ;;  %399 = vst [vmem:[#allocation8 + $0x2c] sm:$0xf] %v398_v11  ;;  %401 = vst [vmem:[#allocation8 + $0x30] sm:$0xf] %v400_v12  ;;  %v438_v28 = vld [vmem:[%s18733_s7 + $0x7c] sm:$0xff]  }
  0x17   : > { %v402_v14 = vld [vmem:[%s18733_s7 + $0x38] sm:$0xf]  ;;  %v404_v15 = vld [vmem:[%s18733_s7 + $0x2c] sm:$0xf]  ;;  %v410_v16 = vld [vmem:[%s18733_s7 + $0x50] sm:$0xf] }
  0x18   : > { %s14831_s26 = smul.u32 188, %s354_s30  ;;  %423 = vst [vmem:[#allocation8 + $0x5c] sm:$0xff] %v422_v13   ;;  %403 = vst [vmem:[#allocation8 + $0x34] sm:$0xf] %v402_v14  ;;  %v412_v17 = vld [vmem:[%s18733_s7 + $0x44] sm:$0xf] }
  0x19   : > { %405 = vst [vmem:[#allocation8 + $0x38] sm:$0xf] %v404_v15  ;;  %411 = vst [vmem:[#allocation8 + $0x44] sm:$0xf] %v410_v16  ;;  %v414_v18 = vld [vmem:[%s18733_s7 + $0x54] sm:$0xf] }
  0x1a   : > { %s15476_s22 = scalar_lea.vmem %s18726_s0, %s14831_s26  ;;  %v416_v19 = vld [vmem:[%s18733_s7 + $0x48] sm:$0xf]  ;;  %413 = vst [vmem:[#allocation8 + $0x48] sm:$0xf] %v412_v17  ;;  %415 = vst [vmem:[#allocation8 + $0x4c] sm:$0xf] %v414_v18 }
  0x1b   : > { %417 = vst [vmem:[#allocation8 + $0x50] sm:$0xf] %v416_v19  ;;  %v418_v20 = vld [vmem:[%s18733_s7 + $0x58] sm:$0xf]  ;;  %v420_v21 = vld [vmem:[%s18733_s7 + $0x4c] sm:$0xf] }
  0x1c   : > { %v426_v22 = vld [vmem:[%s18733_s7 + $0x70] sm:$0xf]  ;;  %419 = vst [vmem:[#allocation8 + $0x54] sm:$0xf] %v418_v20  ;;  %421 = vst [vmem:[#allocation8 + $0x58] sm:$0xf] %v420_v21 }
  0x1d   : > { %427 = vst [vmem:[#allocation8 + $0x64] sm:$0xf] %v426_v22  ;;  %v428_v23 = vld [vmem:[%s18733_s7 + $0x64] sm:$0xf]  ;;  %v430_v24 = vld [vmem:[%s18733_s7 + $0x74] sm:$0xf] }
  0x1e   : > { %v432_v25 = vld [vmem:[%s18733_s7 + $0x68] sm:$0xf]  ;;  %429 = vst [vmem:[#allocation8 + $0x68] sm:$0xf] %v428_v23  ;;  %431 = vst [vmem:[#allocation8 + $0x6c] sm:$0xf] %v430_v24 }
  0x1f   : > { %433 = vst [vmem:[#allocation8 + $0x70] sm:$0xf] %v432_v25  ;;  %v434_v26 = vld [vmem:[%s18733_s7 + $0x78] sm:$0xf]  ;;  %v436_v27 = vld [vmem:[%s18733_s7 + $0x6c] sm:$0xf] }
  0x20   : > { %435 = vst [vmem:[#allocation8 + $0x74] sm:$0xf] %v434_v26  ;;  %437 = vst [vmem:[#allocation8 + $0x78] sm:$0xf] %v436_v27  ;;  %v442_v29 = vld [vmem:[%s18733_s7 + $0x90] sm:$0xf] }
  0x21   : > { %439 = vst [vmem:[#allocation8 + $0x7c] sm:$0xff] %v438_v28   ;;  %v444_v30 = vld [vmem:[%s18733_s7 + $0x84] sm:$0xf]  ;;  %v446_v31 = vld [vmem:[%s18733_s7 + $0x94] sm:$0xf]  ;;  %v454_v35 = vld [vmem:[%s18733_s7 + $0x9c] sm:$0xff]  }
  0x22   : > { %443 = vst [vmem:[#allocation8 + $0x84] sm:$0xf] %v442_v29  ;;  %445 = vst [vmem:[#allocation8 + $0x88] sm:$0xf] %v444_v30  ;;  %v448_v32 = vld [vmem:[%s18733_s7 + $0x88] sm:$0xf] }
  0x23   : > { %447 = vst [vmem:[#allocation8 + $0x8c] sm:$0xf] %v446_v31  ;;  %v450_v33 = vld [vmem:[%s18733_s7 + $0x98] sm:$0xf]  ;;  %v452_v34 = vld [vmem:[%s18733_s7 + $0x8c] sm:$0xf] }
  0x24   : > { %449 = vst [vmem:[#allocation8 + $0x90] sm:$0xf] %v448_v32  ;;  %451 = vst [vmem:[#allocation8 + $0x94] sm:$0xf] %v450_v33  ;;  %v458_v36 = vld [vmem:[%s18733_s7 + $0xb0] sm:$0xf] }
  0x25   : > { %453 = vst [vmem:[#allocation8 + $0x98] sm:$0xf] %v452_v34  ;;  %v460_v37 = vld [vmem:[%s18733_s7 + $0xa4] sm:$0xf]  ;;  %455 = vst [vmem:[#allocation8 + $0x9c] sm:$0xff] %v454_v35   ;;  %v470_v42 = vld [vmem:[%s18733_s7 + $0xbc] sm:$0xff]  }
  0x26   : > { %459 = vst [vmem:[#allocation8 + $0xa4] sm:$0xf] %v458_v36  ;;  %461 = vst [vmem:[#allocation8 + $0xa8] sm:$0xf] %v460_v37  ;;  %v462_v38 = vld [vmem:[%s18733_s7 + $0xb4] sm:$0xf] }
  0x27   : > { %v464_v39 = vld [vmem:[%s18733_s7 + $0xa8] sm:$0xf]  ;;  %v466_v40 = vld [vmem:[%s18733_s7 + $0xb8] sm:$0xf]  ;;  %463 = vst [vmem:[#allocation8 + $0xac] sm:$0xf] %v462_v38 }
  0x28   : > { %465 = vst [vmem:[#allocation8 + $0xb0] sm:$0xf] %v464_v39  ;;  %467 = vst [vmem:[#allocation8 + $0xb4] sm:$0xf] %v466_v40  ;;  %v468_v41 = vld [vmem:[%s18733_s7 + $0xac] sm:$0xf] }
  0x29   : > { %v474_v43 = vld [vmem:[%s18733_s7 + $0xd0] sm:$0xf]  ;;  %469 = vst [vmem:[#allocation8 + $0xb8] sm:$0xf] %v468_v41  ;;  %471 = vst [vmem:[#allocation8 + $0xbc] sm:$0xff] %v470_v42   ;;  %v486_v49 = vld [vmem:[%s18733_s7 + $0xdc] sm:$0xff]  }
  0x2a   : > { %475 = vst [vmem:[#allocation8 + $0xc4] sm:$0xf] %v474_v43  ;;  %v476_v44 = vld [vmem:[%s18733_s7 + $0xc4] sm:$0xf]  ;;  %v478_v45 = vld [vmem:[%s18733_s7 + $0xd4] sm:$0xf] }
  0x2b   : > { %v480_v46 = vld [vmem:[%s18733_s7 + $0xc8] sm:$0xf]  ;;  %477 = vst [vmem:[#allocation8 + $0xc8] sm:$0xf] %v476_v44  ;;  %479 = vst [vmem:[#allocation8 + $0xcc] sm:$0xf] %v478_v45 }
  0x2c   : > { %481 = vst [vmem:[#allocation8 + $0xd0] sm:$0xf] %v480_v46  ;;  %v482_v47 = vld [vmem:[%s18733_s7 + $0xd8] sm:$0xf]  ;;  %v484_v48 = vld [vmem:[%s18733_s7 + $0xcc] sm:$0xf] }
  0x2d   : > { %483 = vst [vmem:[#allocation8 + $0xd4] sm:$0xf] %v482_v47  ;;  %485 = vst [vmem:[#allocation8 + $0xd8] sm:$0xf] %v484_v48  ;;  %v490_v50 = vld [vmem:[%s18733_s7 + $0xf0] sm:$0xf] }
  0x2e   : > { %487 = vst [vmem:[#allocation8 + $0xdc] sm:$0xff] %v486_v49   ;;  %v492_v51 = vld [vmem:[%s18733_s7 + $0xe4] sm:$0xf]  ;;  %v494_v52 = vld [vmem:[%s18733_s7 + $0xf4] sm:$0xf]  ;;  %v502_v56 = vld [vmem:[%s18733_s7 + $0xfc] sm:$0xff]  }
  0x2f   : > { %491 = vst [vmem:[#allocation8 + $0xe4] sm:$0xf] %v490_v50  ;;  %493 = vst [vmem:[#allocation8 + $0xe8] sm:$0xf] %v492_v51  ;;  %v496_v53 = vld [vmem:[%s18733_s7 + $0xe8] sm:$0xf] }
  0x30   : > { %495 = vst [vmem:[#allocation8 + $0xec] sm:$0xf] %v494_v52  ;;  %v498_v54 = vld [vmem:[%s18733_s7 + $0xf8] sm:$0xf]  ;;  %v500_v55 = vld [vmem:[%s18733_s7 + $0xec] sm:$0xf] }
  0x31   : > { %497 = vst [vmem:[#allocation8 + $0xf0] sm:$0xf] %v496_v53  ;;  %499 = vst [vmem:[#allocation8 + $0xf4] sm:$0xf] %v498_v54  ;;  %v506_v57 = vld [vmem:[%s18733_s7 + $0x110] sm:$0xf] }
  0x32   : > { %501 = vst [vmem:[#allocation8 + $0xf8] sm:$0xf] %v500_v55  ;;  %v508_v58 = vld [vmem:[%s18733_s7 + $0x104] sm:$0xf]  ;;  %503 = vst [vmem:[#allocation8 + $0xfc] sm:$0xff] %v502_v56   ;;  %v518_v63 = vld [vmem:[%s18733_s7 + $0x11c] sm:$0xff]  }
  0x33   : > { %507 = vst [vmem:[#allocation8 + $0x104] sm:$0xf] %v506_v57  ;;  %509 = vst [vmem:[#allocation8 + $0x108] sm:$0xf] %v508_v58  ;;  %v510_v59 = vld [vmem:[%s18733_s7 + $0x114] sm:$0xf] }
  0x34   : > { %v512_v60 = vld [vmem:[%s18733_s7 + $0x108] sm:$0xf]  ;;  %v514_v61 = vld [vmem:[%s18733_s7 + $0x118] sm:$0xf]  ;;  %511 = vst [vmem:[#allocation8 + $0x10c] sm:$0xf] %v510_v59 }
  0x35   : > { %513 = vst [vmem:[#allocation8 + $0x110] sm:$0xf] %v512_v60  ;;  %515 = vst [vmem:[#allocation8 + $0x114] sm:$0xf] %v514_v61  ;;  %v516_v62 = vld [vmem:[%s18733_s7 + $0x10c] sm:$0xf] }
  0x36   : > { %v522_v0 = vld [vmem:[%s18733_s7 + $0x130] sm:$0xf]  ;;  %517 = vst [vmem:[#allocation8 + $0x118] sm:$0xf] %v516_v62  ;;  %519 = vst [vmem:[#allocation8 + $0x11c] sm:$0xff] %v518_v63   ;;  %v534_v6 = vld [vmem:[%s18733_s7 + $0x13c] sm:$0xff]  }
  0x37   : > { %523 = vst [vmem:[#allocation8 + $0x124] sm:$0xf] %v522_v0  ;;  %v524_v1 = vld [vmem:[%s18733_s7 + $0x124] sm:$0xf]  ;;  %v526_v2 = vld [vmem:[%s18733_s7 + $0x134] sm:$0xf] }
  0x38   : > { %v528_v3 = vld [vmem:[%s18733_s7 + $0x128] sm:$0xf]  ;;  %525 = vst [vmem:[#allocation8 + $0x128] sm:$0xf] %v524_v1  ;;  %527 = vst [vmem:[#allocation8 + $0x12c] sm:$0xf] %v526_v2 }
  0x39   : > { %529 = vst [vmem:[#allocation8 + $0x130] sm:$0xf] %v528_v3  ;;  %v530_v4 = vld [vmem:[%s18733_s7 + $0x138] sm:$0xf]  ;;  %v532_v5 = vld [vmem:[%s18733_s7 + $0x12c] sm:$0xf] }
  0x3a   : > { %531 = vst [vmem:[#allocation8 + $0x134] sm:$0xf] %v530_v4  ;;  %533 = vst [vmem:[#allocation8 + $0x138] sm:$0xf] %v532_v5  ;;  %v538_v7 = vld [vmem:[%s18733_s7 + $0x150] sm:$0xf] }
  0x3b   : > { %535 = vst [vmem:[#allocation8 + $0x13c] sm:$0xff] %v534_v6   ;;  %v540_v8 = vld [vmem:[%s18733_s7 + $0x144] sm:$0xf]  ;;  %v542_v9 = vld [vmem:[%s18733_s7 + $0x154] sm:$0xf]  ;;  %v550_v13 = vld [vmem:[%s18733_s7 + $0x15c] sm:$0xff]  }
  0x3c   : > { %539 = vst [vmem:[#allocation8 + $0x144] sm:$0xf] %v538_v7  ;;  %541 = vst [vmem:[#allocation8 + $0x148] sm:$0xf] %v540_v8  ;;  %v544_v10 = vld [vmem:[%s18733_s7 + $0x148] sm:$0xf] }
  0x3d   : > { %543 = vst [vmem:[#allocation8 + $0x14c] sm:$0xf] %v542_v9  ;;  %v546_v11 = vld [vmem:[%s18733_s7 + $0x158] sm:$0xf]  ;;  %v548_v12 = vld [vmem:[%s18733_s7 + $0x14c] sm:$0xf] }
  0x3e   : > { %545 = vst [vmem:[#allocation8 + $0x150] sm:$0xf] %v544_v10  ;;  %547 = vst [vmem:[#allocation8 + $0x154] sm:$0xf] %v546_v11  ;;  %v554_v14 = vld [vmem:[%s18733_s7 + $0x170] sm:$0xf] }
  0x3f   : > { %549 = vst [vmem:[#allocation8 + $0x158] sm:$0xf] %v548_v12  ;;  %v556_v15 = vld [vmem:[%s18733_s7 + $0x164] sm:$0xf]  ;;  %551 = vst [vmem:[#allocation8 + $0x15c] sm:$0xff] %v550_v13   ;;  %v566_v20 = vld [vmem:[%s18733_s7 + $0x17c] sm:$0xff]  }
  0x40   : > { %555 = vst [vmem:[#allocation8 + $0x164] sm:$0xf] %v554_v14  ;;  %557 = vst [vmem:[#allocation8 + $0x168] sm:$0xf] %v556_v15  ;;  %v558_v16 = vld [vmem:[%s18733_s7 + $0x174] sm:$0xf] }
  0x41   : > { %v560_v17 = vld [vmem:[%s18733_s7 + $0x168] sm:$0xf]  ;;  %v562_v18 = vld [vmem:[%s18733_s7 + $0x178] sm:$0xf]  ;;  %559 = vst [vmem:[#allocation8 + $0x16c] sm:$0xf] %v558_v16 }
  0x42   : > { %561 = vst [vmem:[#allocation8 + $0x170] sm:$0xf] %v560_v17  ;;  %563 = vst [vmem:[#allocation8 + $0x174] sm:$0xf] %v562_v18  ;;  %v564_v19 = vld [vmem:[%s18733_s7 + $0x16c] sm:$0xf] }
  0x43   : > { %v570_v21 = vld [vmem:[%s18733_s7 + $0x190] sm:$0xf]  ;;  %565 = vst [vmem:[#allocation8 + $0x178] sm:$0xf] %v564_v19  ;;  %567 = vst [vmem:[#allocation8 + $0x17c] sm:$0xff] %v566_v20   ;;  %v582_v27 = vld [vmem:[%s18733_s7 + $0x19c] sm:$0xff]  }
  0x44   : > { %571 = vst [vmem:[#allocation8 + $0x184] sm:$0xf] %v570_v21  ;;  %v572_v22 = vld [vmem:[%s18733_s7 + $0x184] sm:$0xf]  ;;  %v574_v23 = vld [vmem:[%s18733_s7 + $0x194] sm:$0xf] }
  0x45   : > { %v576_v24 = vld [vmem:[%s18733_s7 + $0x188] sm:$0xf]  ;;  %573 = vst [vmem:[#allocation8 + $0x188] sm:$0xf] %v572_v22  ;;  %575 = vst [vmem:[#allocation8 + $0x18c] sm:$0xf] %v574_v23 }
  0x46   : > { %577 = vst [vmem:[#allocation8 + $0x190] sm:$0xf] %v576_v24  ;;  %v578_v25 = vld [vmem:[%s18733_s7 + $0x198] sm:$0xf]  ;;  %v580_v26 = vld [vmem:[%s18733_s7 + $0x18c] sm:$0xf] }
  0x47   : > { %579 = vst [vmem:[#allocation8 + $0x194] sm:$0xf] %v578_v25  ;;  %581 = vst [vmem:[#allocation8 + $0x198] sm:$0xf] %v580_v26  ;;  %v586_v28 = vld [vmem:[%s18733_s7 + $0x1b0] sm:$0xf] }
  0x48   : > { %583 = vst [vmem:[#allocation8 + $0x19c] sm:$0xff] %v582_v27   ;;  %v588_v29 = vld [vmem:[%s18733_s7 + $0x1a4] sm:$0xf]  ;;  %v590_v30 = vld [vmem:[%s18733_s7 + $0x1b4] sm:$0xf]  ;;  %v598_v34 = vld [vmem:[%s18733_s7 + $0x1bc] sm:$0xff]  }
  0x49   : > { %587 = vst [vmem:[#allocation8 + $0x1a4] sm:$0xf] %v586_v28  ;;  %589 = vst [vmem:[#allocation8 + $0x1a8] sm:$0xf] %v588_v29  ;;  %v592_v31 = vld [vmem:[%s18733_s7 + $0x1a8] sm:$0xf] }
  0x4a   : > { %591 = vst [vmem:[#allocation8 + $0x1ac] sm:$0xf] %v590_v30  ;;  %v594_v32 = vld [vmem:[%s18733_s7 + $0x1b8] sm:$0xf]  ;;  %v596_v33 = vld [vmem:[%s18733_s7 + $0x1ac] sm:$0xf] }
  0x4b   : > { %593 = vst [vmem:[#allocation8 + $0x1b0] sm:$0xf] %v592_v31  ;;  %595 = vst [vmem:[#allocation8 + $0x1b4] sm:$0xf] %v594_v32  ;;  %v602_v35 = vld [vmem:[%s18733_s7 + $0x1d0] sm:$0xf] }
  0x4c   : > { %597 = vst [vmem:[#allocation8 + $0x1b8] sm:$0xf] %v596_v33  ;;  %v604_v36 = vld [vmem:[%s18733_s7 + $0x1c4] sm:$0xf]  ;;  %599 = vst [vmem:[#allocation8 + $0x1bc] sm:$0xff] %v598_v34   ;;  %v614_v41 = vld [vmem:[%s18733_s7 + $0x1dc] sm:$0xff]  }
  0x4d   : > { %603 = vst [vmem:[#allocation8 + $0x1c4] sm:$0xf] %v602_v35  ;;  %605 = vst [vmem:[#allocation8 + $0x1c8] sm:$0xf] %v604_v36  ;;  %v606_v37 = vld [vmem:[%s18733_s7 + $0x1d4] sm:$0xf] }
  0x4e   : > { %v608_v38 = vld [vmem:[%s18733_s7 + $0x1c8] sm:$0xf]  ;;  %v610_v39 = vld [vmem:[%s18733_s7 + $0x1d8] sm:$0xf]  ;;  %607 = vst [vmem:[#allocation8 + $0x1cc] sm:$0xf] %v606_v37 }
  0x4f   : > { %609 = vst [vmem:[#allocation8 + $0x1d0] sm:$0xf] %v608_v38  ;;  %611 = vst [vmem:[#allocation8 + $0x1d4] sm:$0xf] %v610_v39  ;;  %v612_v40 = vld [vmem:[%s18733_s7 + $0x1cc] sm:$0xf] }
  0x50   : > { %v618_v42 = vld [vmem:[%s18733_s7 + $0x1f0] sm:$0xf]  ;;  %613 = vst [vmem:[#allocation8 + $0x1d8] sm:$0xf] %v612_v40  ;;  %615 = vst [vmem:[#allocation8 + $0x1dc] sm:$0xff] %v614_v41   ;;  %v630_v48 = vld [vmem:[%s18733_s7 + $0x1fc] sm:$0xff]  }
  0x51   : > { %619 = vst [vmem:[#allocation8 + $0x1e4] sm:$0xf] %v618_v42  ;;  %v620_v43 = vld [vmem:[%s18733_s7 + $0x1e4] sm:$0xf]  ;;  %v622_v44 = vld [vmem:[%s18733_s7 + $0x1f4] sm:$0xf] }
  0x52   : > { %v624_v45 = vld [vmem:[%s18733_s7 + $0x1e8] sm:$0xf]  ;;  %621 = vst [vmem:[#allocation8 + $0x1e8] sm:$0xf] %v620_v43  ;;  %623 = vst [vmem:[#allocation8 + $0x1ec] sm:$0xf] %v622_v44 }
  0x53   : > { %625 = vst [vmem:[#allocation8 + $0x1f0] sm:$0xf] %v624_v45  ;;  %v626_v46 = vld [vmem:[%s18733_s7 + $0x1f8] sm:$0xf]  ;;  %v628_v47 = vld [vmem:[%s18733_s7 + $0x1ec] sm:$0xf] }
  0x54   : > { %627 = vst [vmem:[#allocation8 + $0x1f4] sm:$0xf] %v626_v46  ;;  %629 = vst [vmem:[#allocation8 + $0x1f8] sm:$0xf] %v628_v47  ;;  %v634_v49 = vld [vmem:[%s18733_s7 + $0x210] sm:$0xf] }
  0x55   : > { %631 = vst [vmem:[#allocation8 + $0x1fc] sm:$0xff] %v630_v48   ;;  %v636_v50 = vld [vmem:[%s18733_s7 + $0x204] sm:$0xf]  ;;  %v638_v51 = vld [vmem:[%s18733_s7 + $0x214] sm:$0xf]  ;;  %v646_v55 = vld [vmem:[%s18733_s7 + $0x21c] sm:$0xff]  }
  0x56   : > { %635 = vst [vmem:[#allocation8 + $0x204] sm:$0xf] %v634_v49  ;;  %637 = vst [vmem:[#allocation8 + $0x208] sm:$0xf] %v636_v50  ;;  %v640_v52 = vld [vmem:[%s18733_s7 + $0x208] sm:$0xf] }
  0x57   : > { %639 = vst [vmem:[#allocation8 + $0x20c] sm:$0xf] %v638_v51  ;;  %v642_v53 = vld [vmem:[%s18733_s7 + $0x218] sm:$0xf]  ;;  %v644_v54 = vld [vmem:[%s18733_s7 + $0x20c] sm:$0xf] }
  0x58   : > { %641 = vst [vmem:[#allocation8 + $0x210] sm:$0xf] %v640_v52  ;;  %643 = vst [vmem:[#allocation8 + $0x214] sm:$0xf] %v642_v53  ;;  %v650_v56 = vld [vmem:[%s18733_s7 + $0x230] sm:$0xf] }
  0x59   : > { %645 = vst [vmem:[#allocation8 + $0x218] sm:$0xf] %v644_v54  ;;  %v652_v57 = vld [vmem:[%s18733_s7 + $0x224] sm:$0xf]  ;;  %647 = vst [vmem:[#allocation8 + $0x21c] sm:$0xff] %v646_v55   ;;  %v662_v62 = vld [vmem:[%s18733_s7 + $0x23c] sm:$0xff]  }
  0x5a   : > { %651 = vst [vmem:[#allocation8 + $0x224] sm:$0xf] %v650_v56  ;;  %653 = vst [vmem:[#allocation8 + $0x228] sm:$0xf] %v652_v57  ;;  %v654_v58 = vld [vmem:[%s18733_s7 + $0x234] sm:$0xf] }
  0x5b   : > { %v656_v59 = vld [vmem:[%s18733_s7 + $0x228] sm:$0xf]  ;;  %v658_v60 = vld [vmem:[%s18733_s7 + $0x238] sm:$0xf]  ;;  %655 = vst [vmem:[#allocation8 + $0x22c] sm:$0xf] %v654_v58 }
  0x5c   : > { %657 = vst [vmem:[#allocation8 + $0x230] sm:$0xf] %v656_v59  ;;  %659 = vst [vmem:[#allocation8 + $0x234] sm:$0xf] %v658_v60  ;;  %v660_v61 = vld [vmem:[%s18733_s7 + $0x22c] sm:$0xf] }
  0x5d   : > { %v666_v63 = vld [vmem:[%s18733_s7 + $0x250] sm:$0xf]  ;;  %661 = vst [vmem:[#allocation8 + $0x238] sm:$0xf] %v660_v61  ;;  %663 = vst [vmem:[#allocation8 + $0x23c] sm:$0xff] %v662_v62   ;;  %v678_v5 = vld [vmem:[%s18733_s7 + $0x25c] sm:$0xff]  }
  0x5e   : > { %667 = vst [vmem:[#allocation8 + $0x244] sm:$0xf] %v666_v63  ;;  %v668_v0 = vld [vmem:[%s18733_s7 + $0x244] sm:$0xf]  ;;  %v670_v1 = vld [vmem:[%s18733_s7 + $0x254] sm:$0xf] }
  0x5f   : > { %v672_v2 = vld [vmem:[%s18733_s7 + $0x248] sm:$0xf]  ;;  %669 = vst [vmem:[#allocation8 + $0x248] sm:$0xf] %v668_v0  ;;  %671 = vst [vmem:[#allocation8 + $0x24c] sm:$0xf] %v670_v1 }
  0x60   : > { %673 = vst [vmem:[#allocation8 + $0x250] sm:$0xf] %v672_v2  ;;  %v674_v3 = vld [vmem:[%s18733_s7 + $0x258] sm:$0xf]  ;;  %v676_v4 = vld [vmem:[%s18733_s7 + $0x24c] sm:$0xf] }
  0x61   : > { %675 = vst [vmem:[#allocation8 + $0x254] sm:$0xf] %v674_v3  ;;  %677 = vst [vmem:[#allocation8 + $0x258] sm:$0xf] %v676_v4  ;;  %v682_v6 = vld [vmem:[%s18733_s7 + $0x270] sm:$0xf] }
  0x62   : > { %679 = vst [vmem:[#allocation8 + $0x25c] sm:$0xff] %v678_v5   ;;  %v684_v7 = vld [vmem:[%s18733_s7 + $0x264] sm:$0xf]  ;;  %v686_v8 = vld [vmem:[%s18733_s7 + $0x274] sm:$0xf]  ;;  %v694_v12 = vld [vmem:[%s18733_s7 + $0x27c] sm:$0xff]  }
  0x63   : > { %683 = vst [vmem:[#allocation8 + $0x264] sm:$0xf] %v682_v6  ;;  %685 = vst [vmem:[#allocation8 + $0x268] sm:$0xf] %v684_v7  ;;  %v688_v9 = vld [vmem:[%s18733_s7 + $0x268] sm:$0xf] }
  0x64   : > { %687 = vst [vmem:[#allocation8 + $0x26c] sm:$0xf] %v686_v8  ;;  %v690_v10 = vld [vmem:[%s18733_s7 + $0x278] sm:$0xf]  ;;  %v692_v11 = vld [vmem:[%s18733_s7 + $0x26c] sm:$0xf] }
  0x65   : > { %689 = vst [vmem:[#allocation8 + $0x270] sm:$0xf] %v688_v9  ;;  %691 = vst [vmem:[#allocation8 + $0x274] sm:$0xf] %v690_v10  ;;  %v698_v13 = vld [vmem:[%s18733_s7 + $0x290] sm:$0xf] }
  0x66   : > { %693 = vst [vmem:[#allocation8 + $0x278] sm:$0xf] %v692_v11  ;;  %v700_v14 = vld [vmem:[%s18733_s7 + $0x284] sm:$0xf]  ;;  %695 = vst [vmem:[#allocation8 + $0x27c] sm:$0xff] %v694_v12   ;;  %v710_v19 = vld [vmem:[%s18733_s7 + $0x29c] sm:$0xff]  }
  0x67   : > { %699 = vst [vmem:[#allocation8 + $0x284] sm:$0xf] %v698_v13  ;;  %701 = vst [vmem:[#allocation8 + $0x288] sm:$0xf] %v700_v14  ;;  %v702_v15 = vld [vmem:[%s18733_s7 + $0x294] sm:$0xf] }
  0x68   : > { %v704_v16 = vld [vmem:[%s18733_s7 + $0x288] sm:$0xf]  ;;  %v706_v17 = vld [vmem:[%s18733_s7 + $0x298] sm:$0xf]  ;;  %703 = vst [vmem:[#allocation8 + $0x28c] sm:$0xf] %v702_v15 }
  0x69   : > { %705 = vst [vmem:[#allocation8 + $0x290] sm:$0xf] %v704_v16  ;;  %707 = vst [vmem:[#allocation8 + $0x294] sm:$0xf] %v706_v17  ;;  %v708_v18 = vld [vmem:[%s18733_s7 + $0x28c] sm:$0xf] }
  0x6a   : > { %v714_v20 = vld [vmem:[%s18733_s7 + $0x2b0] sm:$0xf]  ;;  %709 = vst [vmem:[#allocation8 + $0x298] sm:$0xf] %v708_v18  ;;  %711 = vst [vmem:[#allocation8 + $0x29c] sm:$0xff] %v710_v19   ;;  %v726_v26 = vld [vmem:[%s18733_s7 + $0x2bc] sm:$0xff]  }
  0x6b   : > { %715 = vst [vmem:[#allocation8 + $0x2a4] sm:$0xf] %v714_v20  ;;  %v716_v21 = vld [vmem:[%s18733_s7 + $0x2a4] sm:$0xf]  ;;  %v718_v22 = vld [vmem:[%s18733_s7 + $0x2b4] sm:$0xf] }
  0x6c   : > { %v720_v23 = vld [vmem:[%s18733_s7 + $0x2a8] sm:$0xf]  ;;  %717 = vst [vmem:[#allocation8 + $0x2a8] sm:$0xf] %v716_v21  ;;  %719 = vst [vmem:[#allocation8 + $0x2ac] sm:$0xf] %v718_v22 }
  0x6d   : > { %721 = vst [vmem:[#allocation8 + $0x2b0] sm:$0xf] %v720_v23  ;;  %v722_v24 = vld [vmem:[%s18733_s7 + $0x2b8] sm:$0xf]  ;;  %v724_v25 = vld [vmem:[%s18733_s7 + $0x2ac] sm:$0xf] }
  0x6e   : > { %723 = vst [vmem:[#allocation8 + $0x2b4] sm:$0xf] %v722_v24  ;;  %725 = vst [vmem:[#allocation8 + $0x2b8] sm:$0xf] %v724_v25  ;;  %v730_v27 = vld [vmem:[%s18733_s7 + $0x2d0] sm:$0xf] }
  0x6f   : > { %727 = vst [vmem:[#allocation8 + $0x2bc] sm:$0xff] %v726_v26   ;;  %v732_v28 = vld [vmem:[%s18733_s7 + $0x2c4] sm:$0xf]  ;;  %v734_v29 = vld [vmem:[%s18733_s7 + $0x2d4] sm:$0xf]  ;;  %v742_v33 = vld [vmem:[%s18733_s7 + $0x2dc] sm:$0xff]  }
  0x70   : > { %731 = vst [vmem:[#allocation8 + $0x2c4] sm:$0xf] %v730_v27  ;;  %733 = vst [vmem:[#allocation8 + $0x2c8] sm:$0xf] %v732_v28  ;;  %v736_v30 = vld [vmem:[%s18733_s7 + $0x2c8] sm:$0xf] }
  0x71   : > { %735 = vst [vmem:[#allocation8 + $0x2cc] sm:$0xf] %v734_v29  ;;  %v738_v31 = vld [vmem:[%s18733_s7 + $0x2d8] sm:$0xf]  ;;  %v740_v32 = vld [vmem:[%s18733_s7 + $0x2cc] sm:$0xf] }
  0x72   : > { %737 = vst [vmem:[#allocation8 + $0x2d0] sm:$0xf] %v736_v30  ;;  %739 = vst [vmem:[#allocation8 + $0x2d4] sm:$0xf] %v738_v31  ;;  %v746_v34 = vld [vmem:[%s18733_s7 + $0x2f0] sm:$0xf] }
  0x73   : > { %741 = vst [vmem:[#allocation8 + $0x2d8] sm:$0xf] %v740_v32  ;;  %v748_v35 = vld [vmem:[%s18733_s7 + $0x2e4] sm:$0xf]  ;;  %743 = vst [vmem:[#allocation8 + $0x2dc] sm:$0xff] %v742_v33   ;;  %v758_v40 = vld [vmem:[%s18733_s7 + $0x2fc] sm:$0xff]  }
  0x74   : > { %747 = vst [vmem:[#allocation8 + $0x2e4] sm:$0xf] %v746_v34  ;;  %749 = vst [vmem:[#allocation8 + $0x2e8] sm:$0xf] %v748_v35  ;;  %v750_v36 = vld [vmem:[%s18733_s7 + $0x2f4] sm:$0xf] }
  0x75   : > { %v752_v37 = vld [vmem:[%s18733_s7 + $0x2e8] sm:$0xf]  ;;  %v754_v38 = vld [vmem:[%s18733_s7 + $0x2f8] sm:$0xf]  ;;  %751 = vst [vmem:[#allocation8 + $0x2ec] sm:$0xf] %v750_v36 }
  0x76   : > { %753 = vst [vmem:[#allocation8 + $0x2f0] sm:$0xf] %v752_v37  ;;  %755 = vst [vmem:[#allocation8 + $0x2f4] sm:$0xf] %v754_v38  ;;  %v756_v39 = vld [vmem:[%s18733_s7 + $0x2ec] sm:$0xf] }
  0x77   : > { %v762_v41 = vld [vmem:[%s18733_s7 + $0x310] sm:$0xf]  ;;  %757 = vst [vmem:[#allocation8 + $0x2f8] sm:$0xf] %v756_v39  ;;  %759 = vst [vmem:[#allocation8 + $0x2fc] sm:$0xff] %v758_v40   ;;  %v774_v47 = vld [vmem:[%s18733_s7 + $0x31c] sm:$0xff]  }
  0x78   : > { %763 = vst [vmem:[#allocation8 + $0x304] sm:$0xf] %v762_v41  ;;  %v764_v42 = vld [vmem:[%s18733_s7 + $0x304] sm:$0xf]  ;;  %v766_v43 = vld [vmem:[%s18733_s7 + $0x314] sm:$0xf] }
  0x79   : > { %v768_v44 = vld [vmem:[%s18733_s7 + $0x308] sm:$0xf]  ;;  %765 = vst [vmem:[#allocation8 + $0x308] sm:$0xf] %v764_v42  ;;  %767 = vst [vmem:[#allocation8 + $0x30c] sm:$0xf] %v766_v43 }
  0x7a   : > { %769 = vst [vmem:[#allocation8 + $0x310] sm:$0xf] %v768_v44  ;;  %v770_v45 = vld [vmem:[%s18733_s7 + $0x318] sm:$0xf]  ;;  %v772_v46 = vld [vmem:[%s18733_s7 + $0x30c] sm:$0xf] }
  0x7b   : > { %771 = vst [vmem:[#allocation8 + $0x314] sm:$0xf] %v770_v45  ;;  %773 = vst [vmem:[#allocation8 + $0x318] sm:$0xf] %v772_v46  ;;  %v778_v48 = vld [vmem:[%s18733_s7 + $0x330] sm:$0xf] }
  0x7c   : > { %775 = vst [vmem:[#allocation8 + $0x31c] sm:$0xff] %v774_v47   ;;  %v780_v49 = vld [vmem:[%s18733_s7 + $0x324] sm:$0xf]  ;;  %v782_v50 = vld [vmem:[%s18733_s7 + $0x334] sm:$0xf]  ;;  %v790_v54 = vld [vmem:[%s18733_s7 + $0x33c] sm:$0xff]  }
  0x7d   : > { %779 = vst [vmem:[#allocation8 + $0x324] sm:$0xf] %v778_v48  ;;  %781 = vst [vmem:[#allocation8 + $0x328] sm:$0xf] %v780_v49  ;;  %v784_v51 = vld [vmem:[%s18733_s7 + $0x328] sm:$0xf] }
  0x7e   : > { %783 = vst [vmem:[#allocation8 + $0x32c] sm:$0xf] %v782_v50  ;;  %v786_v52 = vld [vmem:[%s18733_s7 + $0x338] sm:$0xf]  ;;  %v788_v53 = vld [vmem:[%s18733_s7 + $0x32c] sm:$0xf] }
  0x7f   : > { %785 = vst [vmem:[#allocation8 + $0x330] sm:$0xf] %v784_v51  ;;  %787 = vst [vmem:[#allocation8 + $0x334] sm:$0xf] %v786_v52  ;;  %v794_v55 = vld [vmem:[%s18733_s7 + $0x350] sm:$0xf] }
  0x80   : > { %789 = vst [vmem:[#allocation8 + $0x338] sm:$0xf] %v788_v53  ;;  %v796_v56 = vld [vmem:[%s18733_s7 + $0x344] sm:$0xf]  ;;  %791 = vst [vmem:[#allocation8 + $0x33c] sm:$0xff] %v790_v54   ;;  %v806_v61 = vld [vmem:[%s18733_s7 + $0x35c] sm:$0xff]  }
  0x81   : > { %795 = vst [vmem:[#allocation8 + $0x344] sm:$0xf] %v794_v55  ;;  %797 = vst [vmem:[#allocation8 + $0x348] sm:$0xf] %v796_v56  ;;  %v798_v57 = vld [vmem:[%s18733_s7 + $0x354] sm:$0xf] }
  0x82   : > { %v800_v58 = vld [vmem:[%s18733_s7 + $0x348] sm:$0xf]  ;;  %v802_v59 = vld [vmem:[%s18733_s7 + $0x358] sm:$0xf]  ;;  %799 = vst [vmem:[#allocation8 + $0x34c] sm:$0xf] %v798_v57 }
  0x83   : > { %801 = vst [vmem:[#allocation8 + $0x350] sm:$0xf] %v800_v58  ;;  %803 = vst [vmem:[#allocation8 + $0x354] sm:$0xf] %v802_v59  ;;  %v804_v60 = vld [vmem:[%s18733_s7 + $0x34c] sm:$0xf] }
  0x84   : > { %v810_v62 = vld [vmem:[%s18733_s7 + $0x370] sm:$0xf]  ;;  %805 = vst [vmem:[#allocation8 + $0x358] sm:$0xf] %v804_v60  ;;  %807 = vst [vmem:[#allocation8 + $0x35c] sm:$0xff] %v806_v61   ;;  %v822_v4 = vld [vmem:[%s18733_s7 + $0x37c] sm:$0xff]  }
  0x85   : > { %811 = vst [vmem:[#allocation8 + $0x364] sm:$0xf] %v810_v62  ;;  %v812_v63 = vld [vmem:[%s18733_s7 + $0x364] sm:$0xf]  ;;  %v814_v0 = vld [vmem:[%s18733_s7 + $0x374] sm:$0xf] }
  0x86   : > { %v816_v1 = vld [vmem:[%s18733_s7 + $0x368] sm:$0xf]  ;;  %813 = vst [vmem:[#allocation8 + $0x368] sm:$0xf] %v812_v63  ;;  %815 = vst [vmem:[#allocation8 + $0x36c] sm:$0xf] %v814_v0 }
  0x87   : > { %817 = vst [vmem:[#allocation8 + $0x370] sm:$0xf] %v816_v1  ;;  %v818_v2 = vld [vmem:[%s18733_s7 + $0x378] sm:$0xf]  ;;  %v820_v3 = vld [vmem:[%s18733_s7 + $0x36c] sm:$0xf] }
  0x88   : > { %819 = vst [vmem:[#allocation8 + $0x374] sm:$0xf] %v818_v2  ;;  %821 = vst [vmem:[#allocation8 + $0x378] sm:$0xf] %v820_v3  ;;  %v826_v5 = vld [vmem:[%s18733_s7 + $0x390] sm:$0xf] }
  0x89   : > { %823 = vst [vmem:[#allocation8 + $0x37c] sm:$0xff] %v822_v4   ;;  %v828_v6 = vld [vmem:[%s18733_s7 + $0x384] sm:$0xf]  ;;  %v830_v7 = vld [vmem:[%s18733_s7 + $0x394] sm:$0xf]  ;;  %v838_v11 = vld [vmem:[%s18733_s7 + $0x39c] sm:$0xff]  }
  0x8a   : > { %827 = vst [vmem:[#allocation8 + $0x384] sm:$0xf] %v826_v5  ;;  %829 = vst [vmem:[#allocation8 + $0x388] sm:$0xf] %v828_v6  ;;  %v832_v8 = vld [vmem:[%s18733_s7 + $0x388] sm:$0xf] }
  0x8b   : > { %831 = vst [vmem:[#allocation8 + $0x38c] sm:$0xf] %v830_v7  ;;  %v834_v9 = vld [vmem:[%s18733_s7 + $0x398] sm:$0xf]  ;;  %v836_v10 = vld [vmem:[%s18733_s7 + $0x38c] sm:$0xf] }
  0x8c   : > { %833 = vst [vmem:[#allocation8 + $0x390] sm:$0xf] %v832_v8  ;;  %835 = vst [vmem:[#allocation8 + $0x394] sm:$0xf] %v834_v9  ;;  %v842_v12 = vld [vmem:[%s18733_s7 + $0x3b0] sm:$0xf] }
  0x8d   : > { %837 = vst [vmem:[#allocation8 + $0x398] sm:$0xf] %v836_v10  ;;  %v844_v13 = vld [vmem:[%s18733_s7 + $0x3a4] sm:$0xf]  ;;  %839 = vst [vmem:[#allocation8 + $0x39c] sm:$0xff] %v838_v11   ;;  %v854_v18 = vld [vmem:[%s18733_s7 + $0x3bc] sm:$0xff]  }
  0x8e   : > { %843 = vst [vmem:[#allocation8 + $0x3a4] sm:$0xf] %v842_v12  ;;  %845 = vst [vmem:[#allocation8 + $0x3a8] sm:$0xf] %v844_v13  ;;  %v846_v14 = vld [vmem:[%s18733_s7 + $0x3b4] sm:$0xf] }
  0x8f   : > { %v848_v15 = vld [vmem:[%s18733_s7 + $0x3a8] sm:$0xf]  ;;  %v850_v16 = vld [vmem:[%s18733_s7 + $0x3b8] sm:$0xf]  ;;  %847 = vst [vmem:[#allocation8 + $0x3ac] sm:$0xf] %v846_v14 }
  0x90   : > { %849 = vst [vmem:[#allocation8 + $0x3b0] sm:$0xf] %v848_v15  ;;  %851 = vst [vmem:[#allocation8 + $0x3b4] sm:$0xf] %v850_v16  ;;  %v852_v17 = vld [vmem:[%s18733_s7 + $0x3ac] sm:$0xf] }
  0x91   : > { %v858_v19 = vld [vmem:[%s18733_s7 + $0x3d0] sm:$0xf]  ;;  %853 = vst [vmem:[#allocation8 + $0x3b8] sm:$0xf] %v852_v17  ;;  %855 = vst [vmem:[#allocation8 + $0x3bc] sm:$0xff] %v854_v18   ;;  %v870_v25 = vld [vmem:[%s18733_s7 + $0x3dc] sm:$0xff]  }
  0x92   : > { %859 = vst [vmem:[#allocation8 + $0x3c4] sm:$0xf] %v858_v19  ;;  %v860_v20 = vld [vmem:[%s18733_s7 + $0x3c4] sm:$0xf]  ;;  %v862_v21 = vld [vmem:[%s18733_s7 + $0x3d4] sm:$0xf] }
  0x93   : > { %v864_v22 = vld [vmem:[%s18733_s7 + $0x3c8] sm:$0xf]  ;;  %861 = vst [vmem:[#allocation8 + $0x3c8] sm:$0xf] %v860_v20  ;;  %863 = vst [vmem:[#allocation8 + $0x3cc] sm:$0xf] %v862_v21 }
  0x94   : > { %865 = vst [vmem:[#allocation8 + $0x3d0] sm:$0xf] %v864_v22  ;;  %v866_v23 = vld [vmem:[%s18733_s7 + $0x3d8] sm:$0xf]  ;;  %v868_v24 = vld [vmem:[%s18733_s7 + $0x3cc] sm:$0xf] }
  0x95   : > { %867 = vst [vmem:[#allocation8 + $0x3d4] sm:$0xf] %v866_v23  ;;  %869 = vst [vmem:[#allocation8 + $0x3d8] sm:$0xf] %v868_v24  ;;  %v874_v26 = vld [vmem:[%s18733_s7 + $0x3f0] sm:$0xf] }
  0x96   : > { %871 = vst [vmem:[#allocation8 + $0x3dc] sm:$0xff] %v870_v25   ;;  %v876_v27 = vld [vmem:[%s18733_s7 + $0x3e4] sm:$0xf]  ;;  %v878_v28 = vld [vmem:[%s18733_s7 + $0x3f4] sm:$0xf]  ;;  %s18748_s26 = sand.u32 1, %s15296_s18  }
  0x97   : > { %875 = vst [vmem:[#allocation8 + $0x3e4] sm:$0xf] %v874_v26  ;;  %877 = vst [vmem:[#allocation8 + $0x3e8] sm:$0xf] %v876_v27  ;;  %v880_v29 = vld [vmem:[%s18733_s7 + $0x3e8] sm:$0xf] }
  0x98   : > { %879 = vst [vmem:[#allocation8 + $0x3ec] sm:$0xf] %v878_v28  ;;  %v882_v30 = vld [vmem:[%s18733_s7 + $0x3f8] sm:$0xf]  ;;  %v884_v31 = vld [vmem:[%s18733_s7 + $0x3ec] sm:$0xf] }
  0x99   : > { %881 = vst [vmem:[#allocation8 + $0x3f0] sm:$0xf] %v880_v29  ;;  %883 = vst [vmem:[#allocation8 + $0x3f4] sm:$0xf] %v882_v30  ;;  %v886_v32 = vld [vmem:[%s18733_s7 + $0x3fc] sm:$0xf] }
  0x9a   : > { %885 = vst [vmem:[#allocation8 + $0x3f8] sm:$0xf] %v884_v31  ;;  %887 = vst [vmem:[#allocation8 + $0x3fc] sm:$0xf] %v886_v32  ;;  %s16104_s15 = scalar_lea.vmem [#allocation10], %s18748_s26 }
  0x9b   : > { %1430 = vsyncadd [#allocation9], 16384  ;;  %v1503_v33 = vld [vmem:[%s18727_s1] sm:$0xf]  ;;  %vm1862_vm0 = vcmask 1043456   ;;  %v15306_v34 = vmov 0.0  }
  0x9c   : > { %13481 = vmatprep.subr.bf16.mxu0 %v15306_v34  ;;  %v1864_v35 = vsel %vm1862_vm0, %v1503_v33, 0  ;;  %13567 = vmatprep.subr.bf16.mxu1 %v15306_v34  ;;  %vm15307_vm1 = vmmov 0   ;;  %v14875_v36 = vld [vmem:[%s15476_s22] sm:$0xfc]   ;;  %v14876_v37 = vld [vmem:[%s15476_s22 + $0x8] sm:$0xff]   ;;  %vm1798_vm3 = vcmask 64512  }
  0x9d   : > { %13482 = vmatpush3.bf16.msra.mxu0 %v1864_v35  ;;  %13483 = vmatprep.mubr.msk.bf16.mxu0 %vm15307_vm1, %v15306_v34  ;;  %vm1609_vm2 = vsmask.f32 5376  ;;  %v12401_v38 = vld [vmem:[%s18727_s1 + $0x8] sm:$0xf]  ;;  %v1611_v39 = vshrl.u32 %v14875_v36, 16  ;;  %v1614_v40 = vshll.u32 %v14875_v36, 16 }
  0x9e   : > { %13653 = vmatprep.subr.bf16.mxu0 %v15306_v34  ;;  %13569 = vmatprep.mubr.msk.bf16.mxu1 %vm15307_vm1, %v15306_v34  ;;  %v12358_v41 = vld [vmem:[%s18727_s1 + $0x4] sm:$0xf]  ;;  %v14877_v42 = vld [vmem:[%s15476_s22 + $0x10] sm:$0xff]   ;;  %v1619_v43 = vshrl.u32 %v14876_v37, 16  ;;  %v1622_v44 = vshll.u32 %v14876_v37, 16  ;;  %v14879_v46 = vld [vmem:[%s15476_s22 + $0x8] sm:$0xff]  }
  0x9f   : > { %v2363_v45 = vsel %vm1862_vm0, %v12358_v41, 0  ;;  %v1613_v47 = vrot.slane %v1611_v39, 2  ;;  %v1616_v48 = vrot.slane %v1614_v40, 3  ;;  %v1628_v49 = vshrl.u32 %v14877_v42, 16  ;;  %v14878_v58 = vld [vmem:[%s15476_s22] sm:$0xf8]  }
  0xa0   : > { %13568 = vmatpush3.bf16.msra.mxu1 %v2363_v45  ;;  %v1631_v50 = vshll.u32 %v14877_v42, 16  ;;  %v1621_v51 = vrot.slane %v1619_v43, 2  ;;  %v1624_v52 = vrot.slane %v1622_v44, 3  ;;  %v3090_v54 = vsel %vm1862_vm0, %v12401_v38, 0  ;;  %v14880_v60 = vld [vmem:[%s15476_s22 + $0x18] sm:$0xff]   ;;  %v14881_v63 = vld [vmem:[%s15476_s22 + $0x10] sm:$0xff]  }
  0xa1   : > { %13739 = vmatprep.subr.bf16.mxu1 %v15306_v34  ;;  %v1617_v53 = vor.u32 %v1616_v48, %v1613_v47  ;;  %v1630_v55 = vrot.slane %v1628_v49, 2  ;;  %v2259_v59 = vrot.slane %v14879_v46, 3  ;;  %vm18744_vm4 = vcmask 1044480   ;;  %v14882_v8 = vld [vmem:[%s15476_s22 + $0x20] sm:$0xff]   ;;  %v14883_v10 = vld [vmem:[%s15476_s22 + $0x18] sm:$0xff]   ;;  %v14884_v15 = vld [vmem:[%s15476_s22 + $0x28] sm:$0xff]  }
  0xa2   : > { %v1625_v56 = vor.u32 %v1624_v52, %v1621_v51  ;;  %v1633_v57 = vrot.slane %v1631_v50, 3  ;;  %v2258_v62 = vrot.slane %v14878_v58, 3  ;;  %v1637_v2 = vshrl.u32 %v14880_v60, 16  ;;  %v14885_v20 = vld [vmem:[%s15476_s22 + $0x20] sm:$0xff]   ;;  %v14886_v28 = vld [vmem:[%s15476_s22 + $0x30] sm:$0xff]   ;;  %v14887_v30 = vld [vmem:[%s15476_s22 + $0x28] sm:$0xff]  }
  0xa3   : > { %v1640_v3 = vshll.u32 %v14880_v60, 16  ;;  %v2261_v4 = vrot.slane %v14881_v63, 3  ;;  %v1646_v12 = vshrl.u32 %v14882_v8, 16  ;;  %v1649_v13 = vshll.u32 %v14882_v8, 16  ;;  %v14888_v39 = vld [vmem:[%s15476_s22 + $0x38] sm:$0xff]   ;;  %v14889_v41 = vld [vmem:[%s15476_s22 + $0x30] sm:$0xff]  }
  0xa4   : > { %v1626_v61 = vsel %vm1609_vm2, %v1617_v53, %v1625_v56  ;;  %v1634_v0 = vor.u32 %v1633_v57, %v1630_v55  ;;  %v2260_v1 = vsel %vm18744_vm4, %v2258_v62, %v2259_v59  ;;  %v1639_v6 = vrot.slane %v1637_v2, 2  ;;  %v14890_v49 = vld [vmem:[%s15476_s22 + $0x40] sm:$0xff]   ;;  %v14891_v51 = vld [vmem:[%s15476_s22 + $0x38] sm:$0xff]   ;;  %v14892_v57 = vld [vmem:[%s15476_s22 + $0x48] sm:$0xff]  }
  0xa5   : > { %13484 = vmatmul.mubr.msk.bf16.vlgmr.msra.gmra.mrb[0].mxu0 %vm1798_vm3, %v1626_v61  ;;  %13570 = vmatmul.mubr.msk.bf16.vlgmr.msra.gmra.mrb[0].mxu1 %vm1798_vm3, %v2260_v1  ;;  %v1642_v7 = vrot.slane %v1640_v3, 3  ;;  %v2262_v9 = vsel %vm18744_vm4, %v2259_v59, %v2261_v4  ;;  %v2263_v14 = vrot.slane %v14883_v10, 3  ;;  %v1648_v17 = vrot.slane %v1646_v12, 2  ;;  %v14893_v63 = vld [vmem:[%s15476_s22 + $0x40] sm:$0xff]  }
  0xa6   : > { %13654 = vmatpush3.bf16.msra.mxu0 %v3090_v54  ;;  %13487 = vmatprep.mubr.msk.bf16.mxu0 %vm15307_vm1, %v15306_v34  ;;  %v1635_v5 = vsel %vm1609_vm2, %v1625_v56, %v1634_v0  ;;  %v1651_v18 = vrot.slane %v1649_v13, 3  ;;  %v1655_v21 = vshrl.u32 %v14884_v15, 16  ;;  %v1658_v23 = vshll.u32 %v14884_v15, 16  ;;  %v12444_v56 = vld [vmem:[%s18727_s1 + $0xc] sm:$0xf] }
  0xa7   : > { %13825 = vmatprep.subr.bf16.mxu0 %v15306_v34  ;;  %13573 = vmatprep.mubr.msk.bf16.mxu1 %vm15307_vm1, %v15306_v34  ;;  %v1643_v11 = vor.u32 %v1642_v7, %v1639_v6  ;;  %v2264_v19 = vsel %vm18744_vm4, %v2261_v4, %v2263_v14  ;;  %v2265_v24 = vrot.slane %v14885_v20, 3  ;;  %v1664_v32 = vshrl.u32 %v14886_v28, 16  ;;  %v14894_v4 = vld [vmem:[%s15476_s22 + $0x50] sm:$0xff]  }
  0xa8   : > { %v1652_v22 = vor.u32 %v1651_v18, %v1648_v17  ;;  %v1657_v25 = vrot.slane %v1655_v21, 2  ;;  %v1660_v27 = vrot.slane %v1658_v23, 3  ;;  %v1667_v33 = vshll.u32 %v14886_v28, 16 }
  0xa9   : > { %v1644_v16 = vsel %vm1609_vm2, %v1634_v0, %v1643_v11  ;;  %v2266_v29 = vsel %vm18744_vm4, %v2263_v14, %v2265_v24  ;;  %v2267_v35 = vrot.slane %v14887_v30, 3  ;;  %v1666_v37 = vrot.slane %v1664_v32, 2 }
  0xaa   : > { %v1653_v26 = vsel %vm1609_vm2, %v1643_v11, %v1652_v22  ;;  %v1661_v31 = vor.u32 %v1660_v27, %v1657_v25  ;;  %v1669_v38 = vrot.slane %v1667_v33, 3  ;;  %v1673_v43 = vshrl.u32 %v14888_v39, 16 }
  0xab   : > { %v2268_v40 = vsel %vm18744_vm4, %v2265_v24, %v2267_v35  ;;  %v1676_v44 = vshll.u32 %v14888_v39, 16  ;;  %v2269_v45 = vrot.slane %v14889_v41, 3  ;;  %v1682_v53 = vshrl.u32 %v14890_v49, 16  ;;  %v14898_v24 = vld [vmem:[%s15476_s22 + $0x60] sm:$0xff]  }
  0xac   : > { %v1662_v36 = vsel %vm1609_vm2, %v1652_v22, %v1661_v31  ;;  %v1670_v42 = vor.u32 %v1669_v38, %v1666_v37  ;;  %v1675_v47 = vrot.slane %v1673_v43, 2  ;;  %v1685_v54 = vshll.u32 %v14890_v49, 16 }
  0xad   : > { %13488 = vmatmul.mubr.msk.bf16.gmra.mrb[4].mxu0 %vm1798_vm3, %v1635_v5  ;;  %13574 = vmatmul.mubr.msk.bf16.gmra.mrb[4].mxu1 %vm1798_vm3, %v2262_v9  ;;  %v1678_v48 = vrot.slane %v1676_v44, 3  ;;  %v2270_v50 = vsel %vm18744_vm4, %v2267_v35, %v2269_v45  ;;  %v2271_v55 = vrot.slane %v14891_v51, 3  ;;  %v3816_v58 = vsel %vm1862_vm0, %v12444_v56, 0  ;;  %v14895_v9 = vld [vmem:[%s15476_s22 + $0x48] sm:$0xff]  }
  0xae   : > { %13491 = vmatprep.mubr.msk.bf16.mxu0 %vm15307_vm1, %v15306_v34  ;;  %13577 = vmatprep.mubr.msk.bf16.mxu1 %vm15307_vm1, %v15306_v34  ;;  %v1671_v46 = vsel %vm1609_vm2, %v1661_v31, %v1670_v42  ;;  %v1684_v60 = vrot.slane %v1682_v53, 2  ;;  %v1687_v61 = vrot.slane %v1685_v54, 3  ;;  %v1691_v1 = vshrl.u32 %v14892_v57, 16  ;;  %v14900_v35 = vld [vmem:[%s15476_s22 + $0x68] sm:$0xff]  }
  0xaf   : > { %v1679_v52 = vor.u32 %v1678_v48, %v1675_v47  ;;  %13740 = vmatpush3.bf16.msra.mxu1 %v3816_v58  ;;  %v2272_v62 = vsel %vm18744_vm4, %v2269_v45, %v2271_v55  ;;  %v1694_v2 = vshll.u32 %v14892_v57, 16  ;;  %v2273_v3 = vrot.slane %v14893_v63, 3  ;;  %v14902_v45 = vld [vmem:[%s15476_s22 + $0x70] sm:$0xff]   ;;  %v14903_v51 = vld [vmem:[%s15476_s22 + $0x68] sm:$0xff]   ;;  %v14904_v58 = vld [vmem:[%s15476_s22 + $0x78] sm:$0xff]  }
  0xb0   : > { %13911 = vmatprep.subr.bf16.mxu1 %v15306_v34  ;;  %v1688_v0 = vor.u32 %v1687_v61, %v1684_v60  ;;  %v1693_v6 = vrot.slane %v1691_v1, 2  ;;  %v1700_v10 = vshrl.u32 %v14894_v4, 16  ;;  %v1703_v11 = vshll.u32 %v14894_v4, 16  ;;  %v14905_v60 = vld [vmem:[%s15476_s22 + $0x70] sm:$0xff]   ;;  %v14906_v1 = vld [vmem:[%s15476_s22 + $0x80] sm:$0xff]  }
  0xb1   : > { %v1680_v59 = vsel %vm1609_vm2, %v1670_v42, %v1679_v52  ;;  %v1696_v7 = vrot.slane %v1694_v2, 3  ;;  %v2274_v8 = vsel %vm18744_vm4, %v2271_v55, %v2273_v3  ;;  %v2275_v13 = vrot.slane %v14895_v9, 3 }
  0xb2   : > { %v1689_v5 = vsel %vm1609_vm2, %v1679_v52, %v1688_v0  ;;  %v1702_v14 = vrot.slane %v1700_v10, 2  ;;  %v1705_v15 = vrot.slane %v1703_v11, 3  ;;  %v1718_v31 = vshrl.u32 %v14898_v24, 16  ;;  %v14908_v11 = vld [vmem:[%s15476_s22 + $0x88] sm:$0xff]  }
  0xb3   : > { %v1697_v12 = vor.u32 %v1696_v7, %v1693_v6  ;;  %v2276_v18 = vsel %vm18744_vm4, %v2273_v3, %v2275_v13  ;;  %v1721_v32 = vshll.u32 %v14898_v24, 16  ;;  %v1727_v42 = vshrl.u32 %v14900_v35, 16  ;;  %v14907_v6 = vld [vmem:[%s15476_s22 + $0x78] sm:$0xff]  }
  0xb4   : > { %v1706_v20 = vor.u32 %v1705_v15, %v1702_v14  ;;  %v1720_v37 = vrot.slane %v1718_v31, 2  ;;  %v1730_v43 = vshll.u32 %v14900_v35, 16  ;;  %v1739_v53 = vshll.u32 %v14902_v45, 16 }
  0xb5   : > { %13492 = vmatmul.mubr.msk.bf16.gmra.mrb[8].mxu0 %vm1798_vm3, %v1644_v16  ;;  %13578 = vmatmul.mubr.msk.bf16.gmra.mrb[8].mxu1 %vm1798_vm3, %v2264_v19  ;;  %v14896_v16 = vld [vmem:[%s15476_s22 + $0x58] sm:$0xff]   ;;  %v1698_v17 = vsel %vm1609_vm2, %v1688_v0, %v1697_v12  ;;  %v14897_v19 = vld [vmem:[%s15476_s22 + $0x50] sm:$0xff]   ;;  %v1723_v38 = vrot.slane %v1721_v32, 3  ;;  %v1729_v47 = vrot.slane %v1727_v42, 2  ;;  %v2283_v55 = vrot.slane %v14903_v51, 3 }
  0xb6   : > { %13495 = vmatprep.mubr.msk.bf16.mxu0 %vm15307_vm1, %v15306_v34  ;;  %13581 = vmatprep.mubr.msk.bf16.mxu1 %vm15307_vm1, %v15306_v34  ;;  %v1709_v21 = vshrl.u32 %v14896_v16, 16  ;;  %v1712_v22 = vshll.u32 %v14896_v16, 16  ;;  %v2277_v23 = vrot.slane %v14897_v19, 3  ;;  %v1707_v25 = vsel %vm1609_vm2, %v1697_v12, %v1706_v20  ;;  %v14909_v16 = vld [vmem:[%s15476_s22 + $0x80] sm:$0xff]   ;;  %v14912_v32 = vld [vmem:[%s15476_s22 + $0x98] sm:$0xff]  }
  0xb7   : > { %v1724_v41 = vor.u32 %v1723_v38, %v1720_v37  ;;  %v1732_v48 = vrot.slane %v1730_v43, 3  ;;  %v1741_v57 = vrot.slane %v1739_v53, 3  ;;  %v1748_v63 = vshll.u32 %v14904_v58, 16  ;;  %v14916_v51 = vld [vmem:[%s15476_s22 + $0xa0] sm:$0x7f]  }
  0xb8   : > { %v1714_v27 = vrot.slane %v1712_v22, 3  ;;  %v2278_v28 = vsel %vm18744_vm4, %v2275_v13, %v2277_v23  ;;  %v2285_v0 = vrot.slane %v14905_v60, 3  ;;  %v1757_v9 = vshll.u32 %v14906_v1, 16 }
  0xb9   : > { %v1733_v52 = vor.u32 %v1732_v48, %v1729_v47  ;;  %v1750_v4 = vrot.slane %v1748_v63, 3  ;;  %v2287_v10 = vrot.slane %v14907_v6, 3  ;;  %v1766_v19 = vshll.u32 %v14908_v11, 16 }
  0xba   : > { %v1759_v14 = vrot.slane %v1757_v9, 3  ;;  %v1781_v38 = vshrl.u32 %v14912_v32, 16  ;;  %vm2837_vm5 = vsmask.f32 4352  ;;  %vm2066_vm6 = vcmask 261120  }
  0xbb   : > { %v1734_v56 = vsel %vm1609_vm2, %v1724_v41, %v1733_v52  ;;  %v2288_v15 = vsel %vm18744_vm4, %v2285_v0, %v2287_v10  ;;  %v1768_v24 = vrot.slane %v1766_v19, 3  ;;  %vm18743_vm7 = vsmask.f32 7424 }
  0xbc   : > { %v1783_v42 = vrot.slane %v1781_v38, 2  ;;  %vm18742_vm8 = vcmask 1046528   ;;  %vm18739_vm9 = vsmask.f32 6400  ;;  %vm1431_vm10 = vcmask 257024  }
  0xbd   : > { %13496 = vmatmul.mubr.msk.bf16.gmra.mrb[12].mxu0 %vm1798_vm3, %v1653_v26  ;;  %13582 = vmatmul.mubr.msk.bf16.gmra.mrb[12].mxu1 %vm1798_vm3, %v2266_v29  ;;  %v1711_v26 = vrot.slane %v1709_v21, 2  ;;  %v14899_v29 = vld [vmem:[%s15476_s22 + $0x58] sm:$0xff]   ;;  %v14910_v21 = vld [vmem:[%s15476_s22 + $0x90] sm:$0xff]   ;;  %vm1448_vm11 = vcmask 254976   ;;  %vm7429_vm12 = vcmask 257025  }
  0xbe   : > { %13499 = vmatprep.mubr.msk.bf16.mxu0 %vm15307_vm1, %v15306_v34  ;;  %13585 = vmatprep.mubr.msk.bf16.mxu1 %vm15307_vm1, %v15306_v34  ;;  %v2279_v33 = vrot.slane %v14899_v29, 3  ;;  %v1775_v29 = vshll.u32 %v14910_v21, 16  ;;  %vm7430_vm13 = vsmask.f32 7942  ;;  %vm18738_vm14 = vsmask.f32 1280 }
  0xbf   : > { %v1715_v30 = vor.u32 %v1714_v27, %v1711_v26  ;;  %v1772_v26 = vshrl.u32 %v14910_v21, 16  ;;  %v14911_v27 = vld [vmem:[%s15476_s22 + $0x88] sm:$0xff]   ;;  %v14923_v21 = vld [vmem:[%s15476_s22 + $0x18] sm:$0xff]   ;;  %vm17605_vm15 = vmand %vm7429_vm12, %vm7430_vm13  ;;  %vm7475_vm12 = vcmask 256000   ;;  %vm7476_vm13 = vsmask.f32 2304 }
  0xc0   : > { %v2280_v39 = vsel %vm18744_vm4, %v2277_v23, %v2279_v33  ;;  %v2291_v31 = vrot.slane %v14911_v27, 3  ;;  %v1777_v35 = vrot.slane %v1775_v29, 3  ;;  %v3582_v29 = vshrl.u32 %v14923_v21, 16 }
  0xc5   : > { %13500 = vmatmul.mubr.msk.bf16.gmra.mrb[16].mxu0 %vm1798_vm3, %v1662_v36  ;;  %13586 = vmatmul.mubr.msk.bf16.gmra.mrb[16].mxu1 %vm1798_vm3, %v2268_v40  ;;  %v1716_v36 = vsel %vm1609_vm2, %v1706_v20, %v1715_v30  ;;  %v14901_v40 = vld [vmem:[%s15476_s22 + $0x60] sm:$0xff]   ;;  %v2289_v20 = vrot.slane %v14909_v16, 3 }
  0xc6   : > { %13503 = vmatprep.mubr.msk.bf16.mxu0 %vm15307_vm1, %v15306_v34  ;;  %13589 = vmatprep.mubr.msk.bf16.mxu1 %vm15307_vm1, %v15306_v34  ;;  %v2281_v44 = vrot.slane %v14901_v40, 3 }
  0xc7   : > { %v2292_v37 = vsel %vm18744_vm4, %v2289_v20, %v2291_v31 }
  0xc8   : > { %v2282_v49 = vsel %vm18744_vm4, %v2279_v33, %v2281_v44 }
  0xcd   : > { %13504 = vmatmul.mubr.msk.bf16.gmra.mrb[20].mxu0 %vm1798_vm3, %v1671_v46  ;;  %13590 = vmatmul.mubr.msk.bf16.gmra.mrb[20].mxu1 %vm1798_vm3, %v2270_v50  ;;  %v1725_v46 = vsel %vm1609_vm2, %v1715_v30, %v1724_v41  ;;  %v1736_v50 = vshrl.u32 %v14902_v45, 16  ;;  %v1774_v30 = vrot.slane %v1772_v26, 2  ;;  %v14914_v41 = vld [vmem:[%s15476_s22 + $0xa0] sm:$0x7f]   ;;  %v14915_v45 = vld [vmem:[%s15476_s22 + $0x98] sm:$0xff]  }
  0xce   : > { %13507 = vmatprep.mubr.msk.bf16.mxu0 %vm15307_vm1, %v15306_v34  ;;  %13593 = vmatprep.mubr.msk.bf16.mxu1 %vm15307_vm1, %v15306_v34  ;;  %v1790_v48 = vshrl.u32 %v14914_v41, 16 }
  0xcf   : > { %v1738_v54 = vrot.slane %v1736_v50, 2  ;;  %v1778_v40 = vor.u32 %v1777_v35, %v1774_v30  ;;  %v3585_v30 = vshll.u32 %v14923_v21, 16 }
  0xd0   : > { %v1792_v53 = vrot.slane %v1790_v48, 2  ;;  %v14927_v48 = vld [vmem:[%s15476_s22 + $0x28] sm:$0xff]  }
  0xd1   : > { %v1742_v61 = vor.u32 %v1741_v57, %v1738_v54  ;;  %v2295_v54 = vrot.slane %v14915_v45, 3 }
  0xd3   : > { %v1743_v2 = vsel %vm1609_vm2, %v1733_v52, %v1742_v61 }
  0xd5   : > { %13508 = vmatmul.mubr.msk.bf16.gmra.mrb[24].mxu0 %vm1798_vm3, %v1680_v59  ;;  %13594 = vmatmul.mubr.msk.bf16.gmra.mrb[24].mxu1 %vm1798_vm3, %v2272_v62  ;;  %v2284_v59 = vsel %vm18744_vm4, %v2281_v44, %v2283_v55  ;;  %v1745_v62 = vshrl.u32 %v14904_v58, 16  ;;  %v2297_v58 = vrot.slane %v14916_v51, 3 }
  0xd6   : > { %13511 = vmatprep.mubr.msk.bf16.mxu0 %vm15307_vm1, %v15306_v34  ;;  %13597 = vmatprep.mubr.msk.bf16.mxu1 %vm15307_vm1, %v15306_v34 }
  0xd7   : > { %v1747_v3 = vrot.slane %v1745_v62, 2 }
  0xd9   : > { %v1751_v7 = vor.u32 %v1750_v4, %v1747_v3 }
  0xdb   : > { %v1752_v12 = vsel %vm1609_vm2, %v1742_v61, %v1751_v7 }
  0xdd   : > { %13512 = vmatmul.mubr.msk.bf16.gmra.mrb[28].mxu0 %vm1798_vm3, %v1689_v5  ;;  %13598 = vmatmul.mubr.msk.bf16.gmra.mrb[28].mxu1 %vm1798_vm3, %v2274_v8  ;;  %v2286_v5 = vsel %vm18744_vm4, %v2283_v55, %v2285_v0  ;;  %v1754_v8 = vshrl.u32 %v14906_v1, 16  ;;  %v12487_v0 = vld [vmem:[%s18727_s1 + $0x10] sm:$0xf] }
  0xde   : > { %13515 = vmatprep.mubr.msk.bf16.mxu0 %vm15307_vm1, %v15306_v34  ;;  %13601 = vmatprep.mubr.msk.bf16.mxu1 %vm15307_vm1, %v15306_v34  ;;  %v4351_v6 = vsel %vm1862_vm0, %v12487_v0, 0 }
  0xdf   : > { %v1756_v13 = vrot.slane %v1754_v8, 2  ;;  %v14921_v8 = vld [vmem:[%s15476_s22 + $0x10] sm:$0xff]  }
  0xe0   : > { %v3573_v16 = vshrl.u32 %v14921_v8, 16 }
  0xe5   : > { %13516 = vmatmul.mubr.msk.bf16.gmra.mrb[32].mxu0 %vm1798_vm3, %v1698_v17  ;;  %13602 = vmatmul.mubr.msk.bf16.gmra.mrb[32].mxu1 %vm1798_vm3, %v2276_v18  ;;  %v1760_v17 = vor.u32 %v1759_v14, %v1756_v13  ;;  %v1763_v18 = vshrl.u32 %v14908_v11, 16  ;;  %v14922_v11 = vld [vmem:[%s15476_s22 + $0x18] sm:$0xff]   ;;  %v14920_v13 = vld [vmem:[%s15476_s22 + $0x8] sm:$0xf8]  }
  0xe6   : > { %13519 = vmatprep.mubr.msk.bf16.mxu0 %vm15307_vm1, %v15306_v34  ;;  %13605 = vmatprep.mubr.msk.bf16.mxu1 %vm15307_vm1, %v15306_v34  ;;  %v3568_v19 = vshll.u32 %v14920_v13, 16  ;;  %v2868_v35 = vshll.u32 %v14922_v11, 16 }
  0xe7   : > { %v1761_v22 = vsel %vm1609_vm2, %v1751_v7, %v1760_v17  ;;  %v1765_v23 = vrot.slane %v1763_v18, 2  ;;  %v3565_v18 = vshrl.u32 %v14920_v13, 16 }
  0xe8   : > { %v2870_v45 = vrot.slane %v2868_v35, 4 }
  0xed   : > { %13520 = vmatmul.mubr.msk.bf16.gmra.mrb[36].mxu0 %vm1798_vm3, %v1707_v25  ;;  %13606 = vmatmul.mubr.msk.bf16.gmra.mrb[36].mxu1 %vm1798_vm3, %v2278_v28  ;;  %v2290_v25 = vsel %vm18744_vm4, %v2287_v10, %v2289_v20  ;;  %v1769_v28 = vor.u32 %v1768_v24, %v1765_v23  ;;  %v2865_v20 = vshrl.u32 %v14922_v11, 16  ;;  %v3567_v24 = vrot.slane %v3565_v18, 3 }
  0xee   : > { %13523 = vmatprep.mubr.msk.bf16.mxu0 %vm15307_vm1, %v15306_v34  ;;  %13609 = vmatprep.mubr.msk.bf16.mxu1 %vm15307_vm1, %v15306_v34 }
  0xef   : > { %v1770_v33 = vsel %vm1609_vm2, %v1760_v17, %v1769_v28  ;;  %v1779_v47 = vsel %vm1609_vm2, %v1769_v28, %v1778_v40  ;;  %v3576_v17 = vshll.u32 %v14921_v8, 16 }
  0xf1   : > { %v3578_v23 = vrot.slane %v3576_v17, 4 }
  0xf5   : > { %13524 = vmatmul.mubr.msk.bf16.gmra.mrb[40].mxu0 %vm1798_vm3, %v1716_v36  ;;  %13610 = vmatmul.mubr.msk.bf16.gmra.mrb[40].mxu1 %vm1798_vm3, %v2280_v39  ;;  %v14913_v36 = vld [vmem:[%s15476_s22 + $0x90] sm:$0xff]   ;;  %v1784_v39 = vshll.u32 %v14912_v32, 16 }
  0xf6   : > { %13527 = vmatprep.mubr.msk.bf16.mxu0 %vm15307_vm1, %v15306_v34  ;;  %13613 = vmatprep.mubr.msk.bf16.mxu1 %vm15307_vm1, %v15306_v34  ;;  %v2293_v44 = vrot.slane %v14913_v36, 3  ;;  %v14924_v36 = vld [vmem:[%s15476_s22 + $0x20] sm:$0xff]  }
  0xf7   : > { %v1786_v43 = vrot.slane %v1784_v39, 3  ;;  %v3584_v39 = vrot.slane %v3582_v29, 3 }
  0xf8   : > { %v2294_v50 = vsel %vm18744_vm4, %v2291_v31, %v2293_v44  ;;  %v2296_v63 = vsel %vm18744_vm4, %v2293_v44, %v2295_v54 }
  0xf9   : > { %v1787_v52 = vor.u32 %v1786_v43, %v1783_v42 }
  0xfb   : > { %v1788_v60 = vsel %vm1609_vm2, %v1778_v40, %v1787_v52  ;;  %v3587_v40 = vrot.slane %v3585_v30, 4 }
  0xfd   : > { %13528 = vmatmul.mubr.msk.bf16.gmra.mrb[44].mxu0 %vm1798_vm3, %v1725_v46  ;;  %13614 = vmatmul.mubr.msk.bf16.gmra.mrb[44].mxu1 %vm1798_vm3, %v2282_v49  ;;  %v14918_v46 = vld [vmem:[%s15476_s22 + $0x8] sm:$0xff]   ;;  %v1793_v49 = vshll.u32 %v14914_v41, 16 }
  0xfe   : > { %13531 = vmatprep.mubr.msk.bf16.mxu0 %vm15307_vm1, %v15306_v34  ;;  %13617 = vmatprep.mubr.msk.bf16.mxu1 %vm15307_vm1, %v15306_v34  ;;  %v2847_v55 = vshrl.u32 %v14918_v46, 16  ;;  %v2850_v61 = vshll.u32 %v14918_v46, 16  ;;  %v2874_v46 = vshrl.u32 %v14924_v36, 16 }
  0xff   : > { %v1795_v57 = vrot.slane %v1793_v49, 3  ;;  %v3588_v49 = vor.u32 %v3587_v40, %v3584_v39  ;;  %v14932_v40 = vld [vmem:[%s15476_s22 + $0x40] sm:$0xff]  }
 0x100   : > { %v2849_v4 = vrot.slane %v2847_v55, 3  ;;  %v3600_v55 = vshrl.u32 %v14927_v48, 16 }
 0x101   : > { %v1796_v1 = vor.u32 %v1795_v57, %v1792_v53  ;;  %v3603_v57 = vshll.u32 %v14927_v48, 16  ;;  %v2913_v48 = vshll.u32 %v14932_v40, 16 }
 0x103   : > { %v1797_v9 = vsel %vm1609_vm2, %v1787_v52, %v1796_v1 }
 0x105   : > { %13532 = vmatmul.mubr.msk.bf16.gmra.mrb[48].mxu0 %vm1798_vm3, %v1734_v56  ;;  %13618 = vmatmul.mubr.msk.bf16.gmra.mrb[48].mxu1 %vm1798_vm3, %v2284_v59  ;;  %v14919_v56 = vld [vmem:[%s15476_s22 + $0x10] sm:$0xff]   ;;  %v14917_v59 = vld [vmem:[%s15476_s22] sm:$0xf8]  }
 0x106   : > { %13535 = vmatprep.mubr.msk.bf16.mxu0 %vm15307_vm1, %v15306_v34  ;;  %13621 = vmatprep.mubr.msk.bf16.mxu1 %vm15307_vm1, %v15306_v34  ;;  %v2856_v62 = vshrl.u32 %v14919_v56, 16  ;;  %v2842_v3 = vshll.u32 %v14917_v59, 16  ;;  %v2859_v10 = vshll.u32 %v14919_v56, 16 }
 0x108   : > { %v2858_v7 = vrot.slane %v2856_v62, 3  ;;  %v2861_v28 = vrot.slane %v2859_v10, 4 }
 0x10a   : > { %v2862_v44 = vor.u32 %v2861_v28, %v2858_v7  ;;  %v14930_v7 = vld [vmem:[%s15476_s22 + $0x38] sm:$0xff]  }
 0x10d   : > { %13536 = vmatmul.mubr.msk.bf16.gmra.mrb[52].mxu0 %vm1798_vm3, %v1743_v2  ;;  %13622 = vmatmul.mubr.msk.bf16.gmra.mrb[52].mxu1 %vm1798_vm3, %v2286_v5  ;;  %v2839_v2 = vshrl.u32 %v14917_v59, 16  ;;  %v2852_v5 = vrot.slane %v2850_v61, 4 }
 0x10e   : > { %13539 = vmatprep.mubr.msk.bf16.mxu0 %vm15307_vm1, %v15306_v34  ;;  %13625 = vmatprep.mubr.msk.bf16.mxu1 %vm15307_vm1, %v15306_v34 }
 0x10f   : > { %v2841_v14 = vrot.slane %v2839_v2, 3  ;;  %v2853_v26 = vor.u32 %v2852_v5, %v2849_v4  ;;  %v3605_v2 = vrot.slane %v3603_v57, 4  ;;  %v14929_v4 = vld [vmem:[%s15476_s22 + $0x30] sm:$0xff]  }
 0x110   : > { %v3612_v10 = vshll.u32 %v14929_v4, 16 }
 0x111   : > { %v2863_v53 = vsel %vm2837_vm5, %v2853_v26, %v2862_v44 }
 0x115   : > { %13540 = vmatmul.mubr.msk.bf16.gmra.mrb[56].mxu0 %vm1798_vm3, %v1752_v12  ;;  %13626 = vmatmul.mubr.msk.bf16.gmra.mrb[56].mxu1 %vm1798_vm3, %v2288_v15  ;;  %v2298_v12 = vsel %vm18744_vm4, %v2295_v54, %v2297_v58  ;;  %v2844_v15 = vrot.slane %v2842_v3, 4 }
 0x116   : > { %13543 = vmatprep.mubr.msk.bf16.mxu0 %vm15307_vm1, %v15306_v34  ;;  %13629 = vmatprep.mubr.msk.bf16.mxu1 %vm15307_vm1, %v15306_v34 }
 0x117   : > { %v2845_v27 = vor.u32 %v2844_v15, %v2841_v14  ;;  %v2901_v14 = vshrl.u32 %v14930_v7, 16  ;;  %v14931_v15 = vld [vmem:[%s15476_s22 + $0x38] sm:$0xff]  }
 0x119   : > { %v2854_v38 = vsel %vm2837_vm5, %v2845_v27, %v2853_v26  ;;  %v3621_v26 = vshll.u32 %v14931_v15, 16  ;;  %v14933_v27 = vld [vmem:[%s15476_s22 + $0x40] sm:$0xff]  }
 0x11d   : > { %13544 = vmatmul.mubr.msk.bf16.gmra.mrb[60].mxu0 %vm1798_vm3, %v1761_v22  ;;  %13630 = vmatmul.mubr.msk.bf16.gmra.mrb[60].mxu1 %vm1798_vm3, %v2290_v25  ;;  %v3575_v22 = vrot.slane %v3573_v16, 3  ;;  %v3570_v25 = vrot.slane %v3568_v19, 4  ;;  %v3614_v19 = vrot.slane %v3612_v10, 4 }
 0x11e   : > { %13547 = vmatprep.mubr.msk.bf16.mxu0 %vm15307_vm1, %v15306_v34  ;;  %13633 = vmatprep.mubr.msk.bf16.mxu1 %vm15307_vm1, %v15306_v34 }
 0x11f   : > { %v3571_v31 = vor.u32 %v3570_v25, %v3567_v24  ;;  %v3579_v32 = vor.u32 %v3578_v23, %v3575_v22  ;;  %v2903_v22 = vrot.slane %v2901_v14, 3  ;;  %v3618_v23 = vshrl.u32 %v14931_v15, 16 }
 0x121   : > { %v3580_v41 = vsel %vm2837_vm5, %v3571_v31, %v3579_v32  ;;  %v3589_v56 = vsel %vm2837_vm5, %v3579_v32, %v3588_v49  ;;  %v3620_v30 = vrot.slane %v3618_v23, 3  ;;  %v3623_v32 = vrot.slane %v3621_v26, 4 }
 0x125   : > { %13548 = vmatmul.mubr.msk.bf16.gmra.mrb[64].mxu0 %vm1798_vm3, %v1770_v33  ;;  %13634 = vmatmul.mubr.msk.bf16.gmra.mrb[64].mxu1 %vm1798_vm3, %v2292_v37  ;;  %v2867_v33 = vrot.slane %v2865_v20, 3  ;;  %v14925_v37 = vld [vmem:[%s15476_s22 + $0x20] sm:$0xff]   ;;  %v2904_v20 = vshll.u32 %v14930_v7, 16  ;;  %v14936_v7 = vld [vmem:[%s15476_s22 + $0x50] sm:$0xff]  }
 0x126   : > { %13551 = vmatprep.mubr.msk.bf16.mxu0 %vm15307_vm1, %v15306_v34  ;;  %13637 = vmatprep.mubr.msk.bf16.mxu1 %vm15307_vm1, %v15306_v34  ;;  %v3591_v42 = vshrl.u32 %v14925_v37, 16  ;;  %v3594_v43 = vshll.u32 %v14925_v37, 16  ;;  %v2931_v23 = vshll.u32 %v14936_v7, 16 }
 0x127   : > { %v2871_v59 = vor.u32 %v2870_v45, %v2867_v33  ;;  %v2906_v29 = vrot.slane %v2904_v20, 4  ;;  %v3627_v33 = vshrl.u32 %v14933_v27, 16 }
 0x128   : > { %v3593_v51 = vrot.slane %v3591_v42, 3  ;;  %v3596_v52 = vrot.slane %v3594_v43, 4  ;;  %v14935_v42 = vld [vmem:[%s15476_s22 + $0x48] sm:$0xff]  }
 0x129   : > { %v2872_v5 = vsel %vm2837_vm5, %v2862_v44, %v2871_v59  ;;  %v3629_v44 = vrot.slane %v3627_v33, 3  ;;  %v14938_v33 = vld [vmem:[%s15476_s22 + $0x58] sm:$0xff]  }
 0x12a   : > { %v3597_v0 = vor.u32 %v3596_v52, %v3593_v51  ;;  %v3636_v51 = vshrl.u32 %v14935_v42, 16 }
 0x12c   : > { %v3598_v8 = vsel %vm2837_vm5, %v3588_v49, %v3597_v0  ;;  %v2907_v49 = vor.u32 %v2906_v29, %v2903_v22  ;;  %v2928_v22 = vshrl.u32 %v14936_v7, 16 }
 0x12d   : > { %13552 = vmatmul.mubr.msk.bf16.gmra.mrb[68].mxu0 %vm1798_vm3, %v1779_v47  ;;  %13638 = vmatmul.mubr.msk.bf16.gmra.mrb[68].mxu1 %vm1798_vm3, %v2294_v50  ;;  %v14926_v47 = vld [vmem:[%s15476_s22 + $0x28] sm:$0xff]   ;;  %v2877_v50 = vshll.u32 %v14924_v36, 16  ;;  %v12530_v36 = vld [vmem:[%s18727_s1 + $0x14] sm:$0xf] }
 0x12e   : > { %13555 = vmatprep.mubr.msk.bf16.mxu0 %vm15307_vm1, %v15306_v34  ;;  %13641 = vmatprep.mubr.msk.bf16.mxu1 %vm15307_vm1, %v15306_v34  ;;  %v2883_v54 = vshrl.u32 %v14926_v47, 16  ;;  %v5057_v39 = vsel %vm1862_vm0, %v12530_v36, 0 }
 0x12f   : > { %v2879_v61 = vrot.slane %v2877_v50, 4  ;;  %v14934_v50 = vld [vmem:[%s15476_s22 + $0x48] sm:$0xff]  }
 0x130   : > { %v2885_v62 = vrot.slane %v2883_v54, 3  ;;  %v3639_v54 = vshll.u32 %v14935_v42, 16 }
 0x135   : > { %13556 = vmatmul.mubr.msk.bf16.gmra.mrb[72].mxu0 %vm1798_vm3, %v1788_v60  ;;  %13642 = vmatmul.mubr.msk.bf16.gmra.mrb[72].mxu1 %vm1798_vm3, %v2296_v63  ;;  %v2876_v60 = vrot.slane %v2874_v46, 3  ;;  %v2886_v63 = vshll.u32 %v14926_v47, 16  ;;  %v2910_v47 = vshrl.u32 %v14932_v40, 16 }
 0x136   : > { %13559 = vmatprep.mubr.msk.bf16.mxu0 %vm15307_vm1, %v15306_v34  ;;  %13645 = vmatprep.mubr.msk.bf16.mxu1 %vm15307_vm1, %v15306_v34 }
 0x137   : > { %v2880_v11 = vor.u32 %v2879_v61, %v2876_v60  ;;  %v2912_v60 = vrot.slane %v2910_v47, 3  ;;  %v2915_v61 = vrot.slane %v2913_v48, 4  ;;  %v2930_v47 = vrot.slane %v2928_v22, 3 }
 0x138   : > { %v2933_v48 = vrot.slane %v2931_v23, 4 }
 0x139   : > { %v2881_v21 = vsel %vm2837_vm5, %v2871_v59, %v2880_v11  ;;  %v2916_v10 = vor.u32 %v2915_v61, %v2912_v60 }
 0x13a   : > { %v2934_v60 = vor.u32 %v2933_v48, %v2930_v47 }
 0x13d   : > { %13560 = vmatmul.mubr.msk.bf16.gmra.mrb[76].mxu0 %vm1798_vm3, %v1797_v9  ;;  %13646 = vmatmul.mubr.msk.bf16.gmra.mrb[76].mxu1 %vm1798_vm3, %v2298_v12  ;;  %v3609_v9 = vshrl.u32 %v14929_v4, 16  ;;  %v2888_v12 = vrot.slane %v2886_v63, 4 }
 0x13e   : > { %13563 = vmatprep.mubr.msk.bf16.mxu0 %vm15307_vm1, %v15306_v34  ;;  %13649 = vmatprep.mubr.msk.bf16.mxu1 %vm15307_vm1, %v15306_v34 }
 0x13f   : > { %v3611_v18 = vrot.slane %v3609_v9, 3  ;;  %v2889_v25 = vor.u32 %v2888_v12, %v2885_v62  ;;  %v2919_v62 = vshrl.u32 %v14934_v50, 16 }
 0x141   : > { %v3615_v28 = vor.u32 %v3614_v19, %v3611_v18  ;;  %v2890_v31 = vsel %vm2837_vm5, %v2880_v11, %v2889_v25  ;;  %v2917_v19 = vsel %vm2837_vm5, %v2907_v49, %v2916_v10 }
 0x145   : > { %13564 = vmatmul.mubr.msk.bf16.gmra.mrb[80].mxu0 %vm1798_vm3, %v1796_v1  ;;  %13650 = vmatmul.mubr.msk.bf16.gmra.mrb[80].mxu1 %vm1798_vm3, %v2297_v58  ;;  %v14928_v58 = vld [vmem:[%s15476_s22 + $0x30] sm:$0xff]   ;;  %v3602_v1 = vrot.slane %v3600_v55, 3 }
 0x146   : > { %13655 = vmatprep.mubr.msk.bf16.mxu0 %vm15307_vm1, %v15306_v34  ;;  %13741 = vmatprep.mubr.msk.bf16.mxu1 %vm15307_vm1, %v15306_v34  ;;  %v2892_v3 = vshrl.u32 %v14928_v58, 16 }
 0x147   : > { %v3606_v16 = vor.u32 %v3605_v2, %v3602_v1  ;;  %v2922_v1 = vshll.u32 %v14934_v50, 16  ;;  %v3638_v2 = vrot.slane %v3636_v51, 3 }
 0x148   : > { %v2894_v13 = vrot.slane %v2892_v3, 3 }
 0x149   : > { %v3607_v24 = vsel %vm2837_vm5, %v3597_v0, %v3606_v16  ;;  %v3616_v35 = vsel %vm2837_vm5, %v3606_v16, %v3615_v28  ;;  %v2921_v16 = vrot.slane %v2919_v62, 3 }
 0x14d   : > { %13656 = vmatmul.mubr.msk.bf16.vlgmr.msra.gmra.mrb[84].mxu0 %vm1798_vm3, %v2854_v38  ;;  %13742 = vmatmul.mubr.msk.bf16.vlgmr.msra.gmra.mrb[84].mxu1 %vm1798_vm3, %v3580_v41  ;;  %v3630_v38 = vshll.u32 %v14933_v27, 16  ;;  %v3624_v41 = vor.u32 %v3623_v32, %v3620_v30 }
 0x14e   : > { %13826 = vmatpush3.bf16.msra.mxu0 %v4351_v6  ;;  %13659 = vmatprep.mubr.msk.bf16.mxu0 %vm15307_vm1, %v15306_v34  ;;  %v2895_v6 = vshll.u32 %v14928_v58, 16 }
 0x14f   : > { %13997 = vmatprep.subr.bf16.mxu0 %v15306_v34  ;;  %13745 = vmatprep.mubr.msk.bf16.mxu1 %vm15307_vm1, %v15306_v34  ;;  %v3632_v45 = vrot.slane %v3630_v38, 4  ;;  %v3625_v46 = vsel %vm2837_vm5, %v3615_v28, %v3624_v41 }
 0x150   : > { %v2897_v17 = vrot.slane %v2895_v6, 4  ;;  %13912 = vmatpush3.bf16.msra.mxu1 %v5057_v39 }
 0x151   : > { %14083 = vmatprep.subr.bf16.mxu1 %v15306_v34 }
 0x152   : > { %v2898_v37 = vor.u32 %v2897_v17, %v2894_v13 }
 0x154   : > { %v2899_v43 = vsel %vm2837_vm5, %v2889_v25, %v2898_v37  ;;  %v2908_v58 = vsel %vm2837_vm5, %v2898_v37, %v2907_v49 }
 0x155   : > { %13660 = vmatmul.mubr.msk.bf16.gmra.mrb[88].mxu0 %vm1798_vm3, %v2863_v53  ;;  %13746 = vmatmul.mubr.msk.bf16.gmra.mrb[88].mxu1 %vm1798_vm3, %v3589_v56  ;;  %v3633_v53 = vor.u32 %v3632_v45, %v3629_v44  ;;  %v14937_v56 = vld [vmem:[%s15476_s22 + $0x50] sm:$0xff]  }
 0x156   : > { %13663 = vmatprep.mubr.msk.bf16.mxu0 %vm15307_vm1, %v15306_v34  ;;  %13749 = vmatprep.mubr.msk.bf16.mxu1 %vm15307_vm1, %v15306_v34  ;;  %v3648_v9 = vshll.u32 %v14937_v56, 16 }
 0x157   : > { %v3634_v4 = vsel %vm2837_vm5, %v3624_v41, %v3633_v53 }
 0x158   : > { %v3650_v28 = vrot.slane %v3648_v9, 4 }
 0x15d   : > { %13664 = vmatmul.mubr.msk.bf16.gmra.mrb[92].mxu0 %vm1798_vm3, %v2872_v5  ;;  %13750 = vmatmul.mubr.msk.bf16.gmra.mrb[92].mxu1 %vm1798_vm3, %v3598_v8  ;;  %v3641_v5 = vrot.slane %v3639_v54, 4  ;;  %v3645_v8 = vshrl.u32 %v14937_v56, 16 }
 0x15e   : > { %13667 = vmatprep.mubr.msk.bf16.mxu0 %vm15307_vm1, %v15306_v34  ;;  %13753 = vmatprep.mubr.msk.bf16.mxu1 %vm15307_vm1, %v15306_v34 }
 0x15f   : > { %v3642_v13 = vor.u32 %v3641_v5, %v3638_v2  ;;  %v3647_v27 = vrot.slane %v3645_v8, 3 }
 0x161   : > { %v3643_v30 = vsel %vm2837_vm5, %v3633_v53, %v3642_v13  ;;  %v3651_v38 = vor.u32 %v3650_v28, %v3647_v27 }
 0x163   : > { %v3652_v54 = vsel %vm2837_vm5, %v3642_v13, %v3651_v38 }
 0x165   : > { %13668 = vmatmul.mubr.msk.bf16.gmra.mrb[96].mxu0 %vm1798_vm3, %v2881_v21  ;;  %13754 = vmatmul.mubr.msk.bf16.gmra.mrb[96].mxu1 %vm1798_vm3, %v3607_v24  ;;  %v2924_v21 = vrot.slane %v2922_v1, 4 }
 0x166   : > { %13671 = vmatprep.mubr.msk.bf16.mxu0 %vm15307_vm1, %v15306_v34  ;;  %13757 = vmatprep.mubr.msk.bf16.mxu1 %vm15307_vm1, %v15306_v34 }
 0x16d   : > { %13672 = vmatmul.mubr.msk.bf16.gmra.mrb[100].mxu0 %vm1798_vm3, %v2890_v31  ;;  %13758 = vmatmul.mubr.msk.bf16.gmra.mrb[100].mxu1 %vm1798_vm3, %v3616_v35  ;;  %v14939_v31 = vld [vmem:[%s15476_s22 + $0x58] sm:$0xff]   ;;  %v2925_v35 = vor.u32 %v2924_v21, %v2921_v16 }
 0x16e   : > { %13675 = vmatprep.mubr.msk.bf16.mxu0 %vm15307_vm1, %v15306_v34  ;;  %13761 = vmatprep.mubr.msk.bf16.mxu1 %vm15307_vm1, %v15306_v34  ;;  %v3654_v39 = vshrl.u32 %v14939_v31, 16  ;;  %v3657_v40 = vshll.u32 %v14939_v31, 16 }
 0x16f   : > { %v2926_v45 = vsel %vm2837_vm5, %v2916_v10, %v2925_v35  ;;  %v14940_v10 = vld [vmem:[%s15476_s22 + $0x60] sm:$0xff]  }
 0x170   : > { %v3659_v56 = vrot.slane %v3657_v40, 4  ;;  %v2946_v21 = vshrl.u32 %v14940_v10, 16  ;;  %v2949_v22 = vshll.u32 %v14940_v10, 16 }
 0x175   : > { %13676 = vmatmul.mubr.msk.bf16.gmra.mrb[104].mxu0 %vm1798_vm3, %v2899_v43  ;;  %13762 = vmatmul.mubr.msk.bf16.gmra.mrb[104].mxu1 %vm1798_vm3, %v3625_v46 }
 0x176   : > { %13679 = vmatprep.mubr.msk.bf16.mxu0 %vm15307_vm1, %v15306_v34  ;;  %13765 = vmatprep.mubr.msk.bf16.mxu1 %vm15307_vm1, %v15306_v34 }
 0x178   : > { %v1900_v52 = vpop.f32.mrb[0].mxu0  ;;  %v2399_v59 = vpop.f32.mrb[0].mxu1 }
 0x179   : > { %2067 = vst.msk [vmem:[#allocation2] sm:$0xff] %vm2066_vm6, %v1900_v52  ;;  %v13485_v55 = vpop.f32.mrb[1].mxu0  ;;  %v13571_v0 = vpop.f32.mrb[1].mxu1  ;;  %v2937_v52 = vshrl.u32 %v14938_v33, 16 }
 0x17a   : > { %v1903_v57 = vpop.f32.mrb[2].mxu0  ;;  %v2402_v3 = vpop.f32.mrb[2].mxu1  ;;  %v3656_v55 = vrot.slane %v3654_v39, 3 }
 0x17b   : > { %2068 = vst.msk [vmem:[#allocation2 + $0x8] sm:$0xff] %vm2066_vm6, %v1903_v57  ;;  %v13486_v63 = vpop.f32.mrb[3].mxu0  ;;  %v13572_v6 = vpop.f32.mrb[3].mxu1  ;;  %v14941_v57 = vld [vmem:[%s15476_s22 + $0x60] sm:$0xff]   ;;  %v2939_v8 = vrot.slane %v2937_v52, 3 }
 0x17c   : > { %v3660_v63 = vor.u32 %v3659_v56, %v3656_v55  ;;  %v3663_v0 = vshrl.u32 %v14941_v57, 16  ;;  %v3666_v1 = vshll.u32 %v14941_v57, 16  ;;  %v2935_v6 = vsel %vm2837_vm5, %v2925_v35, %v2934_v60 }
 0x17d   : > { %13680 = vmatmul.mubr.msk.bf16.gmra.mrb[108].mxu0 %vm1798_vm3, %v2908_v58  ;;  %13766 = vmatmul.mubr.msk.bf16.gmra.mrb[108].mxu1 %vm1798_vm3, %v3634_v4  ;;  %v2948_v35 = vrot.slane %v2946_v21, 3 }
 0x17e   : > { %13683 = vmatprep.mubr.msk.bf16.mxu0 %vm15307_vm1, %v15306_v34  ;;  %13769 = vmatprep.mubr.msk.bf16.mxu1 %vm15307_vm1, %v15306_v34  ;;  %v3665_v16 = vrot.slane %v3663_v0, 3 }
 0x180   : > { %v1908_v11 = vpop.f32.mrb[4].mxu0  ;;  %v2565_v12 = vld [vmem:[#allocation2] sm:$0xff]  ;;  %v2407_v20 = vpop.f32.mrb[4].mxu1 }
 0x181   : > { %2069 = vst.msk [vmem:[#allocation2 + $0x10] sm:$0xff] %vm2066_vm6, %v1908_v11  ;;  %v2606_v14 = vadd.f32 %v2565_v12, %v2399_v59  ;;  %v13489_v15 = vpop.f32.mrb[5].mxu0  ;;  %v13575_v26 = vpop.f32.mrb[5].mxu1  ;;  %v2940_v59 = vshll.u32 %v14938_v33, 16 }
 0x182   : > { %v1911_v17 = vpop.f32.mrb[6].mxu0  ;;  %v2566_v18 = vld [vmem:[#allocation2 + $0x8] sm:$0xff]  ;;  %v2410_v29 = vpop.f32.mrb[6].mxu1  ;;  %v3661_v15 = vsel %vm2837_vm5, %v3651_v38, %v3660_v63 }
 0x183   : > { %2647 = vst.msk [vmem:[#allocation2] sm:$0xff] %vm2066_vm6, %v2606_v14  ;;  %2070 = vst.msk [vmem:[#allocation2 + $0x18] sm:$0xff] %vm2066_vm6, %v1911_v17  ;;  %v2607_v24 = vadd.f32 %v2566_v18, %v2402_v3  ;;  %v13490_v25 = vpop.f32.mrb[7].mxu0  ;;  %v13576_v32 = vpop.f32.mrb[7].mxu1  ;;  %v2942_v9 = vrot.slane %v2940_v59, 4  ;;  %v3668_v17 = vrot.slane %v3666_v1, 4 }
 0x184   : > { %v14943_v18 = vld [vmem:[%s15476_s22 + $0x68] sm:$0xff]  }
 0x185   : > { %2648 = vst.msk [vmem:[#allocation2 + $0x8] sm:$0xff] %vm2066_vm6, %v2607_v24  ;;  %13684 = vmatmul.mubr.msk.bf16.gmra.mrb[112].mxu0 %vm1798_vm3, %v2917_v19  ;;  %13770 = vmatmul.mubr.msk.bf16.gmra.mrb[112].mxu1 %vm1798_vm3, %v3643_v30  ;;  %v3669_v25 = vor.u32 %v3668_v17, %v3665_v16  ;;  %v3672_v26 = vshrl.u32 %v14943_v18, 16  ;;  %v3675_v27 = vshll.u32 %v14943_v18, 16 }
 0x186   : > { %13687 = vmatprep.mubr.msk.bf16.mxu0 %vm15307_vm1, %v15306_v34  ;;  %13773 = vmatprep.mubr.msk.bf16.mxu1 %vm15307_vm1, %v15306_v34 }
 0x188   : > { %v1916_v36 = vpop.f32.mrb[8].mxu0  ;;  %v2567_v37 = vld [vmem:[#allocation2 + $0x10] sm:$0xff]  ;;  %v2415_v46 = vpop.f32.mrb[8].mxu1 }
 0x189   : > { %2071 = vst.msk [vmem:[#allocation2 + $0x20] sm:$0xff] %vm2066_vm6, %v1916_v36  ;;  %v2608_v41 = vadd.f32 %v2567_v37, %v2407_v20  ;;  %v13493_v42 = vpop.f32.mrb[9].mxu0  ;;  %v13579_v51 = vpop.f32.mrb[9].mxu1  ;;  %v2943_v20 = vor.u32 %v2942_v9, %v2939_v8  ;;  %v2951_v36 = vrot.slane %v2949_v22, 4  ;;  %v14942_v37 = vld [vmem:[%s15476_s22 + $0x68] sm:$0xff]  }
 0x18a   : > { %v1919_v43 = vpop.f32.mrb[10].mxu0  ;;  %v2568_v44 = vld [vmem:[#allocation2 + $0x18] sm:$0xff]  ;;  %v2418_v53 = vpop.f32.mrb[10].mxu1  ;;  %v3670_v42 = vsel %vm2837_vm5, %v3660_v63, %v3669_v25  ;;  %v2955_v48 = vshrl.u32 %v14942_v37, 16  ;;  %v14944_v63 = vld [vmem:[%s15476_s22 + $0x70] sm:$0xff]  }
 0x18b   : > { %2649 = vst.msk [vmem:[#allocation2 + $0x10] sm:$0xff] %vm2066_vm6, %v2608_v41  ;;  %2072 = vst.msk [vmem:[#allocation2 + $0x28] sm:$0xff] %vm2066_vm6, %v1919_v43  ;;  %v2609_v49 = vadd.f32 %v2568_v44, %v2410_v29  ;;  %v13494_v50 = vpop.f32.mrb[11].mxu0  ;;  %v13580_v58 = vpop.f32.mrb[11].mxu1  ;;  %v2944_v32 = vsel %vm2837_vm5, %v2934_v60, %v2943_v20  ;;  %v3674_v43 = vrot.slane %v3672_v26, 3  ;;  %v3677_v44 = vrot.slane %v3675_v27, 4 }
 0x18c   : > { %v2952_v47 = vor.u32 %v2951_v36, %v2948_v35  ;;  %v2964_v10 = vshrl.u32 %v14944_v63, 16 }
 0x18d   : > { %2650 = vst.msk [vmem:[#allocation2 + $0x18] sm:$0xff] %vm2066_vm6, %v2609_v49  ;;  %13688 = vmatmul.mubr.msk.bf16.gmra.mrb[116].mxu0 %vm1798_vm3, %v2926_v45  ;;  %13774 = vmatmul.mubr.msk.bf16.gmra.mrb[116].mxu1 %vm1798_vm3, %v3652_v54  ;;  %v14945_v45 = vld [vmem:[%s15476_s22 + $0x70] sm:$0xff]   ;;  %v2958_v49 = vshll.u32 %v14942_v37, 16  ;;  %v3678_v52 = vor.u32 %v3677_v44, %v3674_v43 }
 0x18e   : > { %13691 = vmatprep.mubr.msk.bf16.mxu0 %vm15307_vm1, %v15306_v34  ;;  %13777 = vmatprep.mubr.msk.bf16.mxu1 %vm15307_vm1, %v15306_v34  ;;  %v3684_v54 = vshll.u32 %v14945_v45, 16  ;;  %v2953_v59 = vsel %vm2837_vm5, %v2943_v20, %v2952_v47 }
 0x190   : > { %v1924_v61 = vpop.f32.mrb[12].mxu0  ;;  %v2569_v62 = vld [vmem:[#allocation2 + $0x20] sm:$0xff]  ;;  %v2423_v7 = vpop.f32.mrb[12].mxu1 }
 0x191   : > { %2073 = vst.msk [vmem:[#allocation2 + $0x30] sm:$0xff] %vm2066_vm6, %v1924_v61  ;;  %v2610_v2 = vadd.f32 %v2569_v62, %v2415_v46  ;;  %v13497_v3 = vpop.f32.mrb[13].mxu0  ;;  %v13583_v13 = vpop.f32.mrb[13].mxu1  ;;  %v2957_v61 = vrot.slane %v2955_v48, 3  ;;  %v2960_v62 = vrot.slane %v2958_v49, 4 }
 0x192   : > { %v1927_v4 = vpop.f32.mrb[14].mxu0  ;;  %v2570_v5 = vld [vmem:[#allocation2 + $0x28] sm:$0xff]  ;;  %v2426_v14 = vpop.f32.mrb[14].mxu1 }
 0x193   : > { %2651 = vst.msk [vmem:[#allocation2 + $0x20] sm:$0xff] %vm2066_vm6, %v2610_v2  ;;  %2074 = vst.msk [vmem:[#allocation2 + $0x38] sm:$0xff] %vm2066_vm6, %v1927_v4  ;;  %v2611_v11 = vadd.f32 %v2570_v5, %v2418_v53  ;;  %v13498_v12 = vpop.f32.mrb[15].mxu0  ;;  %v13584_v19 = vpop.f32.mrb[15].mxu1  ;;  %v3681_v53 = vshrl.u32 %v14945_v45, 16  ;;  %v3679_v4 = vsel %vm2837_vm5, %v3669_v25, %v3678_v52  ;;  %v2961_v9 = vor.u32 %v2960_v62, %v2957_v61  ;;  %v14946_v25 = vld [vmem:[%s15476_s22 + $0x78] sm:$0xff]  }
 0x194   : > { %v2973_v37 = vshrl.u32 %v14946_v25, 16 }
 0x195   : > { %2652 = vst.msk [vmem:[#allocation2 + $0x28] sm:$0xff] %vm2066_vm6, %v2611_v11  ;;  %13692 = vmatmul.mubr.msk.bf16.gmra.mrb[120].mxu0 %vm1798_vm3, %v2935_v6  ;;  %13778 = vmatmul.mubr.msk.bf16.gmra.mrb[120].mxu1 %vm1798_vm3, %v3661_v15  ;;  %v3683_v5 = vrot.slane %v3681_v53, 3  ;;  %v3686_v6 = vrot.slane %v3684_v54, 4  ;;  %v2967_v11 = vshll.u32 %v14944_v63, 16  ;;  %v2962_v21 = vsel %vm2837_vm5, %v2952_v47, %v2961_v9 }
 0x196   : > { %13695 = vmatprep.mubr.msk.bf16.mxu0 %vm15307_vm1, %v15306_v34  ;;  %13781 = vmatprep.mubr.msk.bf16.mxu1 %vm15307_vm1, %v15306_v34 }
 0x198   : > { %v1932_v23 = vpop.f32.mrb[16].mxu0  ;;  %v2571_v24 = vld [vmem:[#allocation2 + $0x30] sm:$0xff]  ;;  %v2431_v33 = vpop.f32.mrb[16].mxu1 }
 0x199   : > { %2075 = vst.msk [vmem:[#allocation2 + $0x40] sm:$0xff] %vm2066_vm6, %v1932_v23  ;;  %v2612_v28 = vadd.f32 %v2571_v24, %v2423_v7  ;;  %v13501_v29 = vpop.f32.mrb[17].mxu0  ;;  %v13587_v40 = vpop.f32.mrb[17].mxu1  ;;  %v14947_v7 = vld [vmem:[%s15476_s22 + $0x78] sm:$0xff]   ;;  %v2966_v23 = vrot.slane %v2964_v10, 3  ;;  %v2969_v24 = vrot.slane %v2967_v11, 4 }
 0x19a   : > { %v1935_v30 = vpop.f32.mrb[18].mxu0  ;;  %v2572_v31 = vld [vmem:[#allocation2 + $0x38] sm:$0xff]  ;;  %v2434_v41 = vpop.f32.mrb[18].mxu1  ;;  %v3690_v15 = vshrl.u32 %v14947_v7, 16  ;;  %v3693_v16 = vshll.u32 %v14947_v7, 16 }
 0x19b   : > { %2653 = vst.msk [vmem:[#allocation2 + $0x30] sm:$0xff] %vm2066_vm6, %v2612_v28  ;;  %2076 = vst.msk [vmem:[#allocation2 + $0x48] sm:$0xff] %vm2066_vm6, %v1935_v30  ;;  %v2613_v38 = vadd.f32 %v2572_v31, %v2426_v14  ;;  %v13502_v39 = vpop.f32.mrb[19].mxu0  ;;  %v13588_v46 = vpop.f32.mrb[19].mxu1  ;;  %v3687_v14 = vor.u32 %v3686_v6, %v3683_v5  ;;  %v2970_v36 = vor.u32 %v2969_v24, %v2966_v23 }
 0x19c   : > { %v3692_v31 = vrot.slane %v3690_v15, 3 }
 0x19d   : > { %2654 = vst.msk [vmem:[#allocation2 + $0x38] sm:$0xff] %vm2066_vm6, %v2613_v38  ;;  %13696 = vmatmul.mubr.msk.bf16.gmra.mrb[124].mxu0 %vm1798_vm3, %v2944_v32  ;;  %13782 = vmatmul.mubr.msk.bf16.gmra.mrb[124].mxu1 %vm1798_vm3, %v3670_v42  ;;  %v3688_v30 = vsel %vm2837_vm5, %v3678_v52, %v3687_v14  ;;  %v3695_v32 = vrot.slane %v3693_v16, 4  ;;  %v2976_v38 = vshll.u32 %v14946_v25, 16  ;;  %v2971_v48 = vsel %vm2837_vm5, %v2961_v9, %v2970_v36  ;;  %v14948_v52 = vld [vmem:[%s15476_s22 + $0x80] sm:$0xff]  }
 0x19e   : > { %13699 = vmatprep.mubr.msk.bf16.mxu0 %vm15307_vm1, %v15306_v34  ;;  %13785 = vmatprep.mubr.msk.bf16.mxu1 %vm15307_vm1, %v15306_v34  ;;  %v2982_v63 = vshrl.u32 %v14948_v52, 16 }
 0x1a0   : > { %v1940_v50 = vpop.f32.mrb[20].mxu0  ;;  %v2573_v51 = vld [vmem:[#allocation2 + $0x40] sm:$0xff]  ;;  %v2439_v60 = vpop.f32.mrb[20].mxu1 }
 0x1a1   : > { %2077 = vst.msk [vmem:[#allocation2 + $0x50] sm:$0xff] %vm2066_vm6, %v1940_v50  ;;  %v2614_v55 = vadd.f32 %v2573_v51, %v2431_v33  ;;  %v13505_v56 = vpop.f32.mrb[21].mxu0  ;;  %v13591_v2 = vpop.f32.mrb[21].mxu1  ;;  %v14949_v33 = vld [vmem:[%s15476_s22 + $0x80] sm:$0xff]   ;;  %v2975_v50 = vrot.slane %v2973_v37, 3  ;;  %v2978_v51 = vrot.slane %v2976_v38, 4 }
 0x1a2   : > { %v1943_v57 = vpop.f32.mrb[22].mxu0  ;;  %v2574_v58 = vld [vmem:[#allocation2 + $0x48] sm:$0xff]  ;;  %v2442_v3 = vpop.f32.mrb[22].mxu1  ;;  %v3699_v42 = vshrl.u32 %v14949_v33, 16  ;;  %v3702_v43 = vshll.u32 %v14949_v33, 16 }
 0x1a3   : > { %2655 = vst.msk [vmem:[#allocation2 + $0x40] sm:$0xff] %vm2066_vm6, %v2614_v55  ;;  %2078 = vst.msk [vmem:[#allocation2 + $0x58] sm:$0xff] %vm2066_vm6, %v1943_v57  ;;  %v2615_v0 = vadd.f32 %v2574_v58, %v2434_v41  ;;  %v13506_v1 = vpop.f32.mrb[23].mxu0  ;;  %v13592_v8 = vpop.f32.mrb[23].mxu1  ;;  %v3696_v41 = vor.u32 %v3695_v32, %v3692_v31  ;;  %v2979_v62 = vor.u32 %v2978_v51, %v2975_v50 }
 0x1a4   : > { %v3701_v58 = vrot.slane %v3699_v42, 3 }
 0x1a5   : > { %2656 = vst.msk [vmem:[#allocation2 + $0x48] sm:$0xff] %vm2066_vm6, %v2615_v0  ;;  %13700 = vmatmul.mubr.msk.bf16.gmra.mrb[128].mxu0 %vm1798_vm3, %v2953_v59  ;;  %13786 = vmatmul.mubr.msk.bf16.gmra.mrb[128].mxu1 %vm1798_vm3, %v3679_v4  ;;  %v3697_v57 = vsel %vm2837_vm5, %v3687_v14, %v3696_v41  ;;  %v3704_v59 = vrot.slane %v3702_v43, 4  ;;  %v2985_v0 = vshll.u32 %v14948_v52, 16  ;;  %v2980_v10 = vsel %vm2837_vm5, %v2970_v36, %v2979_v62  ;;  %v14950_v14 = vld [vmem:[%s15476_s22 + $0x88] sm:$0xff]  }
 0x1a6   : > { %13703 = vmatprep.mubr.msk.bf16.mxu0 %vm15307_vm1, %v15306_v34  ;;  %13789 = vmatprep.mubr.msk.bf16.mxu1 %vm15307_vm1, %v15306_v34  ;;  %v2991_v25 = vshrl.u32 %v14950_v14, 16 }
 0x1a8   : > { %v1948_v12 = vpop.f32.mrb[24].mxu0  ;;  %v2575_v13 = vld [vmem:[#allocation2 + $0x50] sm:$0xff]  ;;  %v2447_v22 = vpop.f32.mrb[24].mxu1 }
 0x1a9   : > { %2079 = vst.msk [vmem:[#allocation2 + $0x60] sm:$0xff] %vm2066_vm6, %v1948_v12  ;;  %v2616_v17 = vadd.f32 %v2575_v13, %v2439_v60  ;;  %v13509_v18 = vpop.f32.mrb[25].mxu0  ;;  %v13595_v28 = vpop.f32.mrb[25].mxu1  ;;  %v14951_v60 = vld [vmem:[%s15476_s22 + $0x88] sm:$0xff]   ;;  %v2984_v12 = vrot.slane %v2982_v63, 3  ;;  %v2987_v13 = vrot.slane %v2985_v0, 4 }
 0x1aa   : > { %v1951_v19 = vpop.f32.mrb[26].mxu0  ;;  %v2576_v20 = vld [vmem:[#allocation2 + $0x58] sm:$0xff]  ;;  %v2450_v29 = vpop.f32.mrb[26].mxu1  ;;  %v3708_v4 = vshrl.u32 %v14951_v60, 16  ;;  %v3711_v5 = vshll.u32 %v14951_v60, 16 }
 0x1ab   : > { %2657 = vst.msk [vmem:[#allocation2 + $0x50] sm:$0xff] %vm2066_vm6, %v2616_v17  ;;  %2080 = vst.msk [vmem:[#allocation2 + $0x68] sm:$0xff] %vm2066_vm6, %v1951_v19  ;;  %v2617_v26 = vadd.f32 %v2576_v20, %v2442_v3  ;;  %v13510_v27 = vpop.f32.mrb[27].mxu0  ;;  %v13596_v35 = vpop.f32.mrb[27].mxu1  ;;  %v3705_v3 = vor.u32 %v3704_v59, %v3701_v58  ;;  %v2988_v24 = vor.u32 %v2987_v13, %v2984_v12 }
 0x1ac   : > { %v3710_v20 = vrot.slane %v3708_v4, 3 }
 0x1ad   : > { %2658 = vst.msk [vmem:[#allocation2 + $0x58] sm:$0xff] %vm2066_vm6, %v2617_v26  ;;  %13704 = vmatmul.mubr.msk.bf16.gmra.mrb[132].mxu0 %vm1798_vm3, %v2962_v21  ;;  %13790 = vmatmul.mubr.msk.bf16.gmra.mrb[132].mxu1 %vm1798_vm3, %v3688_v30  ;;  %v3706_v19 = vsel %vm2837_vm5, %v3696_v41, %v3705_v3  ;;  %v3713_v21 = vrot.slane %v3711_v5, 4  ;;  %v2994_v26 = vshll.u32 %v14950_v14, 16  ;;  %v2989_v37 = vsel %vm2837_vm5, %v2979_v62, %v2988_v24  ;;  %v14952_v41 = vld [vmem:[%s15476_s22 + $0x90] sm:$0xff]  }
 0x1ae   : > { %13707 = vmatprep.mubr.msk.bf16.mxu0 %vm15307_vm1, %v15306_v34  ;;  %13793 = vmatprep.mubr.msk.bf16.mxu1 %vm15307_vm1, %v15306_v34  ;;  %v3000_v52 = vshrl.u32 %v14952_v41, 16 }
 0x1b0   : > { %v1956_v39 = vpop.f32.mrb[28].mxu0  ;;  %v2577_v40 = vld [vmem:[#allocation2 + $0x60] sm:$0xff]  ;;  %v2455_v49 = vpop.f32.mrb[28].mxu1 }
 0x1b1   : > { %2081 = vst.msk [vmem:[#allocation2 + $0x70] sm:$0xff] %vm2066_vm6, %v1956_v39  ;;  %v2618_v44 = vadd.f32 %v2577_v40, %v2447_v22  ;;  %v13513_v45 = vpop.f32.mrb[29].mxu0  ;;  %v13599_v55 = vpop.f32.mrb[29].mxu1  ;;  %v14953_v22 = vld [vmem:[%s15476_s22 + $0x90] sm:$0xff]   ;;  %v2993_v39 = vrot.slane %v2991_v25, 3  ;;  %v2996_v40 = vrot.slane %v2994_v26, 4 }
 0x1b2   : > { %v1959_v46 = vpop.f32.mrb[30].mxu0  ;;  %v2578_v47 = vld [vmem:[#allocation2 + $0x68] sm:$0xff]  ;;  %v2458_v56 = vpop.f32.mrb[30].mxu1  ;;  %v3717_v30 = vshrl.u32 %v14953_v22, 16  ;;  %v3720_v31 = vshll.u32 %v14953_v22, 16 }
 0x1b3   : > { %2659 = vst.msk [vmem:[#allocation2 + $0x60] sm:$0xff] %vm2066_vm6, %v2618_v44  ;;  %2082 = vst.msk [vmem:[#allocation2 + $0x78] sm:$0xff] %vm2066_vm6, %v1959_v46  ;;  %v2619_v53 = vadd.f32 %v2578_v47, %v2450_v29  ;;  %v13514_v54 = vpop.f32.mrb[31].mxu0  ;;  %v13600_v61 = vpop.f32.mrb[31].mxu1  ;;  %v3714_v29 = vor.u32 %v3713_v21, %v3710_v20  ;;  %v2997_v51 = vor.u32 %v2996_v40, %v2993_v39 }
 0x1b4   : > { %v3719_v47 = vrot.slane %v3717_v30, 3 }
 0x1b5   : > { %2660 = vst.msk [vmem:[#allocation2 + $0x68] sm:$0xff] %vm2066_vm6, %v2619_v53  ;;  %13708 = vmatmul.mubr.msk.bf16.gmra.mrb[136].mxu0 %vm1798_vm3, %v2971_v48  ;;  %13794 = vmatmul.mubr.msk.bf16.gmra.mrb[136].mxu1 %vm1798_vm3, %v3697_v57  ;;  %v3715_v46 = vsel %vm2837_vm5, %v3705_v3, %v3714_v29  ;;  %v3722_v48 = vrot.slane %v3720_v31, 4  ;;  %v3003_v53 = vshll.u32 %v14952_v41, 16  ;;  %v2998_v63 = vsel %vm2837_vm5, %v2988_v24, %v2997_v51  ;;  %v14954_v3 = vld [vmem:[%s15476_s22 + $0x98] sm:$0xff]  }
 0x1b6   : > { %13711 = vmatprep.mubr.msk.bf16.mxu0 %vm15307_vm1, %v15306_v34  ;;  %13797 = vmatprep.mubr.msk.bf16.mxu1 %vm15307_vm1, %v15306_v34  ;;  %v3009_v14 = vshrl.u32 %v14954_v3, 16 }
 0x1b8   : > { %v1964_v1 = vpop.f32.mrb[32].mxu0  ;;  %v2579_v2 = vld [vmem:[#allocation2 + $0x70] sm:$0xff]  ;;  %v2463_v11 = vpop.f32.mrb[32].mxu1 }
 0x1b9   : > { %2083 = vst.msk [vmem:[#allocation2 + $0x80] sm:$0xff] %vm2066_vm6, %v1964_v1  ;;  %v2620_v6 = vadd.f32 %v2579_v2, %v2455_v49  ;;  %v13517_v7 = vpop.f32.mrb[33].mxu0  ;;  %v13603_v17 = vpop.f32.mrb[33].mxu1  ;;  %v14955_v49 = vld [vmem:[%s15476_s22 + $0x98] sm:$0xff]   ;;  %v3002_v1 = vrot.slane %v3000_v52, 3  ;;  %v3005_v2 = vrot.slane %v3003_v53, 4 }
 0x1ba   : > { %v1967_v8 = vpop.f32.mrb[34].mxu0  ;;  %v2580_v9 = vld [vmem:[#allocation2 + $0x78] sm:$0xff]  ;;  %v2466_v18 = vpop.f32.mrb[34].mxu1  ;;  %v3726_v57 = vshrl.u32 %v14955_v49, 16  ;;  %v3729_v58 = vshll.u32 %v14955_v49, 16 }
 0x1bb   : > { %2661 = vst.msk [vmem:[#allocation2 + $0x70] sm:$0xff] %vm2066_vm6, %v2620_v6  ;;  %2084 = vst.msk [vmem:[#allocation2 + $0x88] sm:$0xff] %vm2066_vm6, %v1967_v8  ;;  %v2621_v15 = vadd.f32 %v2580_v9, %v2458_v56  ;;  %v13518_v16 = vpop.f32.mrb[35].mxu0  ;;  %v13604_v23 = vpop.f32.mrb[35].mxu1  ;;  %v3723_v56 = vor.u32 %v3722_v48, %v3719_v47  ;;  %v3006_v13 = vor.u32 %v3005_v2, %v3002_v1 }
 0x1bc   : > { %v3728_v9 = vrot.slane %v3726_v57, 3 }
 0x1bd   : > { %2662 = vst.msk [vmem:[#allocation2 + $0x78] sm:$0xff] %vm2066_vm6, %v2621_v15  ;;  %13712 = vmatmul.mubr.msk.bf16.gmra.mrb[140].mxu0 %vm1798_vm3, %v2980_v10  ;;  %13798 = vmatmul.mubr.msk.bf16.gmra.mrb[140].mxu1 %vm1798_vm3, %v3706_v19  ;;  %v3724_v8 = vsel %vm2837_vm5, %v3714_v29, %v3723_v56  ;;  %v3731_v10 = vrot.slane %v3729_v58, 4  ;;  %v3012_v15 = vshll.u32 %v14954_v3, 16  ;;  %v3007_v25 = vsel %vm2837_vm5, %v2997_v51, %v3006_v13  ;;  %v14956_v29 = vld [vmem:[%s15476_s22 + $0xa0] sm:$0xff]  }
 0x1be   : > { %13715 = vmatprep.mubr.msk.bf16.mxu0 %vm15307_vm1, %v15306_v34  ;;  %13801 = vmatprep.mubr.msk.bf16.mxu1 %vm15307_vm1, %v15306_v34  ;;  %v3018_v41 = vshrl.u32 %v14956_v29, 16 }
 0x1c0   : > { %v1972_v27 = vpop.f32.mrb[36].mxu0  ;;  %v2581_v28 = vld [vmem:[#allocation2 + $0x80] sm:$0xff]  ;;  %v2471_v38 = vpop.f32.mrb[36].mxu1 }
 0x1c1   : > { %2085 = vst.msk [vmem:[#allocation2 + $0x90] sm:$0xff] %vm2066_vm6, %v1972_v27  ;;  %v2622_v32 = vadd.f32 %v2581_v28, %v2463_v11  ;;  %v13521_v33 = vpop.f32.mrb[37].mxu0  ;;  %v13607_v44 = vpop.f32.mrb[37].mxu1  ;;  %v14957_v11 = vld [vmem:[%s15476_s22 + $0xa0] sm:$0xff]   ;;  %v3011_v27 = vrot.slane %v3009_v14, 3  ;;  %v3014_v28 = vrot.slane %v3012_v15, 4 }
 0x1c2   : > { %v1975_v35 = vpop.f32.mrb[38].mxu0  ;;  %v2582_v36 = vld [vmem:[#allocation2 + $0x88] sm:$0xff]  ;;  %v2474_v45 = vpop.f32.mrb[38].mxu1  ;;  %v3735_v19 = vshrl.u32 %v14957_v11, 16  ;;  %v3738_v20 = vshll.u32 %v14957_v11, 16 }
 0x1c3   : > { %2663 = vst.msk [vmem:[#allocation2 + $0x80] sm:$0xff] %vm2066_vm6, %v2622_v32  ;;  %2086 = vst.msk [vmem:[#allocation2 + $0x98] sm:$0xff] %vm2066_vm6, %v1975_v35  ;;  %v2623_v42 = vadd.f32 %v2582_v36, %v2466_v18  ;;  %v13522_v43 = vpop.f32.mrb[39].mxu0  ;;  %v13608_v50 = vpop.f32.mrb[39].mxu1  ;;  %v3732_v18 = vor.u32 %v3731_v10, %v3728_v9  ;;  %v3015_v40 = vor.u32 %v3014_v28, %v3011_v27  ;;  %v14961_v15 = vld [vmem:[%s15476_s22 + $0xc] sm:$0xff]  }
 0x1c4   : > { %v3737_v36 = vrot.slane %v3735_v19, 3  ;;  %v14962_v19 = vld [vmem:[%s15476_s22 + $0x14] sm:$0xff]  }
 0x1c5   : > { %2664 = vst.msk [vmem:[#allocation2 + $0x88] sm:$0xff] %vm2066_vm6, %v2623_v42  ;;  %13716 = vmatmul.mubr.msk.bf16.gmra.mrb[144].mxu0 %vm1798_vm3, %v2989_v37  ;;  %13802 = vmatmul.mubr.msk.bf16.gmra.mrb[144].mxu1 %vm1798_vm3, %v3715_v46  ;;  %v3733_v35 = vsel %vm2837_vm5, %v3723_v56, %v3732_v18  ;;  %v3740_v37 = vrot.slane %v3738_v20, 4  ;;  %v3021_v42 = vshll.u32 %v14956_v29, 16  ;;  %v3016_v52 = vsel %vm2837_vm5, %v3006_v13, %v3015_v40 }
 0x1c6   : > { %13719 = vmatprep.mubr.msk.bf16.mxu0 %vm15307_vm1, %v15306_v34  ;;  %13805 = vmatprep.mubr.msk.bf16.mxu1 %vm15307_vm1, %v15306_v34  ;;  %v4829_v20 = vshll.u32 %v14961_v15, 16 }
 0x1c8   : > { %v1980_v54 = vpop.f32.mrb[40].mxu0  ;;  %v2583_v55 = vld [vmem:[#allocation2 + $0x90] sm:$0xff]  ;;  %v2479_v0 = vpop.f32.mrb[40].mxu1 }
 0x1c9   : > { %2087 = vst.msk [vmem:[#allocation2 + $0xa0] sm:$0xff] %vm2066_vm6, %v1980_v54  ;;  %v2624_v59 = vadd.f32 %v2583_v55, %v2471_v38  ;;  %v13525_v60 = vpop.f32.mrb[41].mxu0  ;;  %v13611_v6 = vpop.f32.mrb[41].mxu1  ;;  %v14958_v38 = vld [vmem:[%s15476_s22 + $0xa8] sm:$0xff]   ;;  %v3020_v54 = vrot.slane %v3018_v41, 3  ;;  %v3023_v55 = vrot.slane %v3021_v42, 4 }
 0x1ca   : > { %v1983_v61 = vpop.f32.mrb[42].mxu0  ;;  %v2584_v62 = vld [vmem:[#allocation2 + $0x98] sm:$0xff]  ;;  %v2482_v7 = vpop.f32.mrb[42].mxu1  ;;  %v3744_v46 = vshrl.u32 %v14958_v38, 16  ;;  %v3747_v47 = vshll.u32 %v14958_v38, 16 }
 0x1cb   : > { %2665 = vst.msk [vmem:[#allocation2 + $0x90] sm:$0xff] %vm2066_vm6, %v2624_v59  ;;  %2088 = vst.msk [vmem:[#allocation2 + $0xa8] sm:$0xff] %vm2066_vm6, %v1983_v61  ;;  %v2625_v4 = vadd.f32 %v2584_v62, %v2474_v45  ;;  %v13526_v5 = vpop.f32.mrb[43].mxu0  ;;  %v13612_v12 = vpop.f32.mrb[43].mxu1  ;;  %v3741_v45 = vor.u32 %v3740_v37, %v3737_v36  ;;  %v12573_v37 = vld [vmem:[%s18727_s1 + $0x18] sm:$0xf] }
 0x1cc   : > { %v3746_v61 = vrot.slane %v3744_v46, 3  ;;  %v3749_v62 = vrot.slane %v3747_v47, 4 }
 0x1cd   : > { %2666 = vst.msk [vmem:[#allocation2 + $0x98] sm:$0xff] %vm2066_vm6, %v2625_v4  ;;  %13720 = vmatmul.mubr.msk.bf16.gmra.mrb[148].mxu0 %vm1798_vm3, %v2998_v63  ;;  %13806 = vmatmul.mubr.msk.bf16.gmra.mrb[148].mxu1 %vm1798_vm3, %v3724_v8  ;;  %v3742_v60 = vsel %vm2837_vm5, %v3732_v18, %v3741_v45 }
 0x1ce   : > { %13723 = vmatprep.mubr.msk.bf16.mxu0 %vm15307_vm1, %v15306_v34  ;;  %13809 = vmatprep.mubr.msk.bf16.mxu1 %vm15307_vm1, %v15306_v34  ;;  %v3750_v3 = vor.u32 %v3749_v62, %v3746_v61 }
 0x1d0   : > { %v1988_v16 = vpop.f32.mrb[44].mxu0  ;;  %v2585_v17 = vld [vmem:[#allocation2 + $0xa0] sm:$0xff]  ;;  %v2487_v26 = vpop.f32.mrb[44].mxu1  ;;  %v3751_v14 = vsel %vm2837_vm5, %v3741_v45, %v3750_v3 }
 0x1d1   : > { %2089 = vst.msk [vmem:[#allocation2 + $0xb0] sm:$0xff] %vm2066_vm6, %v1988_v16  ;;  %v2626_v21 = vadd.f32 %v2585_v17, %v2479_v0  ;;  %v13529_v22 = vpop.f32.mrb[45].mxu0  ;;  %v13615_v32 = vpop.f32.mrb[45].mxu1  ;;  %v3024_v0 = vor.u32 %v3023_v55, %v3020_v54 }
 0x1d2   : > { %v1991_v23 = vpop.f32.mrb[46].mxu0  ;;  %v2586_v24 = vld [vmem:[#allocation2 + $0xa8] sm:$0xff]  ;;  %v2490_v33 = vpop.f32.mrb[46].mxu1  ;;  %v4834_v32 = vshll.u32 %v14962_v19, 16 }
 0x1d3   : > { %2667 = vst.msk [vmem:[#allocation2 + $0xa0] sm:$0xff] %vm2066_vm6, %v2626_v21  ;;  %2090 = vst.msk [vmem:[#allocation2 + $0xb8] sm:$0xff] %vm2066_vm6, %v1991_v23  ;;  %v2627_v30 = vadd.f32 %v2586_v24, %v2482_v7  ;;  %v13530_v31 = vpop.f32.mrb[47].mxu0  ;;  %v13616_v39 = vpop.f32.mrb[47].mxu1  ;;  %v3025_v8 = vsel %vm2837_vm5, %v3015_v40, %v3024_v0  ;;  %v14964_v40 = vld [vmem:[%s15476_s22 + $0x1c] sm:$0xff]  }
 0x1d4   : > { %v4831_v31 = vrot.slane %v4829_v20, 1  ;;  %v4836_v39 = vrot.slane %v4834_v32, 1  ;;  %v4842_v54 = vshll.u32 %v14964_v40, 16 }
 0x1d5   : > { %2668 = vst.msk [vmem:[#allocation2 + $0xa8] sm:$0xff] %vm2066_vm6, %v2627_v30  ;;  %13724 = vmatmul.mubr.msk.bf16.gmra.mrb[152].mxu0 %vm1798_vm3, %v3007_v25  ;;  %13810 = vmatmul.mubr.msk.bf16.gmra.mrb[152].mxu1 %vm1798_vm3, %v3733_v35  ;;  %v4827_v30 = vshrl.u32 %v14961_v15, 16  ;;  %v14968_v15 = vld [vmem:[%s15476_s22 + $0x2c] sm:$0xff]  }
 0x1d6   : > { %13727 = vmatprep.mubr.msk.bf16.mxu0 %vm15307_vm1, %v15306_v34  ;;  %13813 = vmatprep.mubr.msk.bf16.mxu1 %vm15307_vm1, %v15306_v34 }
 0x1d7   : > { %v4832_v38 = vor.u32 %v4831_v31, %v4827_v30 }
 0x1d8   : > { %v1996_v43 = vpop.f32.mrb[48].mxu0  ;;  %v2587_v44 = vld [vmem:[#allocation2 + $0xb0] sm:$0xff]  ;;  %v2495_v53 = vpop.f32.mrb[48].mxu1 }
 0x1d9   : > { %2091 = vst.msk [vmem:[#allocation2 + $0xc0] sm:$0xff] %vm2066_vm6, %v1996_v43  ;;  %v2628_v48 = vadd.f32 %v2587_v44, %v2487_v26  ;;  %v13533_v49 = vpop.f32.mrb[49].mxu0  ;;  %v13619_v58 = vpop.f32.mrb[49].mxu1  ;;  %v14959_v43 = vld [vmem:[%s15476_s22 + $0xc] sm:$0xff]  }
 0x1da   : > { %v1999_v50 = vpop.f32.mrb[50].mxu0  ;;  %v2588_v51 = vld [vmem:[#allocation2 + $0xb8] sm:$0xff]  ;;  %v2498_v59 = vpop.f32.mrb[50].mxu1  ;;  %v5762_v49 = vsel %vm1862_vm0, %v12573_v37, 0 }
 0x1db   : > { %2669 = vst.msk [vmem:[#allocation2 + $0xb0] sm:$0xff] %vm2066_vm6, %v2628_v48  ;;  %2092 = vst.msk [vmem:[#allocation2 + $0xc8] sm:$0xff] %vm2066_vm6, %v1999_v50  ;;  %v2629_v56 = vadd.f32 %v2588_v51, %v2490_v33  ;;  %v13534_v57 = vpop.f32.mrb[51].mxu0  ;;  %v13620_v63 = vpop.f32.mrb[51].mxu1 }
 0x1dc   : > { %v14960_v63 = vld [vmem:[%s15476_s22 + $0x14] sm:$0xff]  }
 0x1dd   : > { %2670 = vst.msk [vmem:[#allocation2 + $0xb8] sm:$0xff] %vm2066_vm6, %v2629_v56  ;;  %13728 = vmatmul.mubr.msk.bf16.gmra.mrb[156].mxu0 %vm1798_vm3, %v3016_v52  ;;  %13814 = vmatmul.mubr.msk.bf16.gmra.mrb[156].mxu1 %vm1798_vm3, %v3742_v60  ;;  %v4837_v52 = vsel %vm18743_vm7, %v4832_v38, %v4836_v39  ;;  %v14966_v60 = vld [vmem:[%s15476_s22 + $0x24] sm:$0xff]  }
 0x1de   : > { %13731 = vmatprep.mubr.msk.bf16.mxu0 %vm15307_vm1, %v15306_v34  ;;  %13817 = vmatprep.mubr.msk.bf16.mxu1 %vm15307_vm1, %v15306_v34  ;;  %v14965_v38 = vld [vmem:[%s15476_s22 + $0x24] sm:$0xff]  }
 0x1e0   : > { %v2004_v1 = vpop.f32.mrb[52].mxu0  ;;  %v2589_v2 = vld [vmem:[#allocation2 + $0xc0] sm:$0xff]  ;;  %v2503_v9 = vpop.f32.mrb[52].mxu1 }
 0x1e1   : > { %2093 = vst.msk [vmem:[#allocation2 + $0xd0] sm:$0xff] %vm2066_vm6, %v2004_v1  ;;  %v2630_v4 = vadd.f32 %v2589_v2, %v2495_v53  ;;  %v13537_v5 = vpop.f32.mrb[53].mxu0  ;;  %v13623_v12 = vpop.f32.mrb[53].mxu1  ;;  %v4838_v53 = vshrl.u32 %v14962_v19, 16 }
 0x1e2   : > { %v2007_v6 = vpop.f32.mrb[54].mxu0  ;;  %v2590_v7 = vld [vmem:[#allocation2 + $0xc8] sm:$0xff]  ;;  %v2506_v13 = vpop.f32.mrb[54].mxu1 }
 0x1e3   : > { %2671 = vst.msk [vmem:[#allocation2 + $0xc0] sm:$0xff] %vm2066_vm6, %v2630_v4  ;;  %2094 = vst.msk [vmem:[#allocation2 + $0xd8] sm:$0xff] %vm2066_vm6, %v2007_v6  ;;  %v2631_v10 = vadd.f32 %v2590_v7, %v2498_v59  ;;  %v13538_v11 = vpop.f32.mrb[55].mxu0  ;;  %v13624_v16 = vpop.f32.mrb[55].mxu1  ;;  %v4840_v58 = vor.u32 %v4838_v53, %v4836_v39  ;;  %v4844_v59 = vrot.slane %v4842_v54, 1  ;;  %v14972_v54 = vld [vmem:[%s15476_s22 + $0x3c] sm:$0xff]  }
 0x1e5   : > { %2672 = vst.msk [vmem:[#allocation2 + $0xc8] sm:$0xff] %vm2066_vm6, %v2631_v10  ;;  %13732 = vmatmul.mubr.msk.bf16.gmra.mrb[160].mxu0 %vm1798_vm3, %v3025_v8  ;;  %13818 = vmatmul.mubr.msk.bf16.gmra.mrb[160].mxu1 %vm1798_vm3, %v3751_v14  ;;  %v4845_v7 = vsel %vm18743_vm7, %v4840_v58, %v4844_v59  ;;  %v4846_v8 = vshrl.u32 %v14964_v40, 16 }
 0x1e6   : > { %13735 = vmatprep.mubr.msk.bf16.mxu0 %vm15307_vm1, %v15306_v34  ;;  %13821 = vmatprep.mubr.msk.bf16.mxu1 %vm15307_vm1, %v15306_v34 }
 0x1e8   : > { %v2012_v17 = vpop.f32.mrb[56].mxu0  ;;  %v2591_v18 = vld [vmem:[#allocation2 + $0xd0] sm:$0xff]  ;;  %v2511_v25 = vpop.f32.mrb[56].mxu1 }
 0x1e9   : > { %2095 = vst.msk [vmem:[#allocation2 + $0xe0] sm:$0xff] %vm2066_vm6, %v2012_v17  ;;  %v2632_v21 = vadd.f32 %v2591_v18, %v2503_v9  ;;  %v13541_v22 = vpop.f32.mrb[57].mxu0  ;;  %v13627_v28 = vpop.f32.mrb[57].mxu1  ;;  %v4850_v9 = vshll.u32 %v14966_v60, 16  ;;  %v14963_v18 = vld [vmem:[%s15476_s22 + $0x1c] sm:$0xff]  }
 0x1ea   : > { %v2015_v23 = vpop.f32.mrb[58].mxu0  ;;  %v2592_v24 = vld [vmem:[#allocation2 + $0xd8] sm:$0xff]  ;;  %v2514_v29 = vpop.f32.mrb[58].mxu1  ;;  %v4858_v28 = vshll.u32 %v14968_v15, 16 }
 0x1eb   : > { %2673 = vst.msk [vmem:[#allocation2 + $0xd0] sm:$0xff] %vm2066_vm6, %v2632_v21  ;;  %2096 = vst.msk [vmem:[#allocation2 + $0xe8] sm:$0xff] %vm2066_vm6, %v2015_v23  ;;  %v2633_v26 = vadd.f32 %v2592_v24, %v2506_v13  ;;  %v13542_v27 = vpop.f32.mrb[59].mxu0  ;;  %v13628_v33 = vpop.f32.mrb[59].mxu1  ;;  %v4848_v13 = vor.u32 %v4846_v8, %v4844_v59  ;;  %v4852_v14 = vrot.slane %v4850_v9, 1 }
 0x1ec   : > { %v4854_v27 = vshrl.u32 %v14966_v60, 16  ;;  %v4860_v33 = vrot.slane %v4858_v28, 1  ;;  %v3292_v28 = vld [vmem:[#allocation2] sm:$0xff] }
 0x1ed   : > { %2674 = vst.msk [vmem:[#allocation2 + $0xd8] sm:$0xff] %vm2066_vm6, %v2633_v26  ;;  %13736 = vmatmul.mubr.msk.bf16.gmra.mrb[164].mxu0 %vm1798_vm3, %v3024_v0  ;;  %13822 = vmatmul.mubr.msk.bf16.gmra.mrb[164].mxu1 %vm1798_vm3, %v3750_v3  ;;  %v4853_v26 = vsel %vm18743_vm7, %v4848_v13, %v4852_v14 }
 0x1ee   : > { %13827 = vmatprep.mubr.msk.bf16.mxu0 %vm15307_vm1, %v15306_v34  ;;  %13913 = vmatprep.mubr.msk.bf16.mxu1 %vm15307_vm1, %v15306_v34  ;;  %v4856_v32 = vor.u32 %v4854_v27, %v4852_v14  ;;  %v14969_v14 = vld [vmem:[%s15476_s22 + $0x34] sm:$0xff]  }
 0x1f0   : > { %v2020_v35 = vpop.f32.mrb[60].mxu0  ;;  %v2593_v36 = vld [vmem:[#allocation2 + $0xe0] sm:$0xff]  ;;  %v2519_v46 = vpop.f32.mrb[60].mxu1 }
 0x1f1   : > { %2097 = vst.msk [vmem:[#allocation2 + $0xf0] sm:$0xff] %vm2066_vm6, %v2020_v35  ;;  %v2634_v41 = vadd.f32 %v2593_v36, %v2511_v25  ;;  %v13545_v42 = vpop.f32.mrb[61].mxu0  ;;  %v13631_v50 = vpop.f32.mrb[61].mxu1  ;;  %v14970_v35 = vld [vmem:[%s15476_s22 + $0x34] sm:$0xff]  }
 0x1f2   : > { %v2023_v44 = vpop.f32.mrb[62].mxu0  ;;  %v2594_v45 = vld [vmem:[#allocation2 + $0xe8] sm:$0xff]  ;;  %v2522_v51 = vpop.f32.mrb[62].mxu1 }
 0x1f3   : > { %2675 = vst.msk [vmem:[#allocation2 + $0xe0] sm:$0xff] %vm2066_vm6, %v2634_v41  ;;  %2098 = vst.msk [vmem:[#allocation2 + $0xf8] sm:$0xff] %vm2066_vm6, %v2023_v44  ;;  %v2635_v47 = vadd.f32 %v2594_v45, %v2514_v29  ;;  %v13546_v48 = vpop.f32.mrb[63].mxu0  ;;  %v13632_v55 = vpop.f32.mrb[63].mxu1 }
 0x1f4   : > { %v4866_v48 = vshll.u32 %v14970_v35, 16 }
 0x1f5   : > { %2676 = vst.msk [vmem:[#allocation2 + $0xe8] sm:$0xff] %vm2066_vm6, %v2635_v47  ;;  %13828 = vmatmul.mubr.msk.bf16.vlgmr.msra.gmra.mrb[168].mxu0 %vm1798_vm3, %v14959_v43  ;;  %13914 = vmatmul.mubr.msk.bf16.vlgmr.msra.gmra.mrb[168].mxu1 %vm1798_vm3, %v4837_v52  ;;  %v4862_v47 = vshrl.u32 %v14968_v15, 16 }
 0x1f6   : > { %13998 = vmatpush3.bf16.msra.mxu0 %v5762_v49  ;;  %13831 = vmatprep.mubr.msk.bf16.mxu0 %vm15307_vm1, %v15306_v34  ;;  %v4868_v53 = vrot.slane %v4866_v48, 1 }
 0x1f7   : > { %14169 = vmatprep.subr.bf16.mxu0 %v15306_v34  ;;  %13917 = vmatprep.mubr.msk.bf16.mxu1 %vm15307_vm1, %v15306_v34  ;;  %v4864_v52 = vor.u32 %v4862_v47, %v4860_v33 }
 0x1f8   : > { %v2028_v56 = vpop.f32.mrb[64].mxu0  ;;  %v2595_v57 = vld [vmem:[#allocation2 + $0xf0] sm:$0xff]  ;;  %v2527_v2 = vpop.f32.mrb[64].mxu1 }
 0x1f9   : > { %2099 = vst.msk [vmem:[#allocation2 + $0x100] sm:$0xff] %vm2066_vm6, %v2028_v56  ;;  %v2636_v61 = vadd.f32 %v2595_v57, %v2519_v46  ;;  %v13549_v62 = vpop.f32.mrb[65].mxu0  ;;  %v13635_v5 = vpop.f32.mrb[65].mxu1  ;;  %v4861_v46 = vsel %vm18743_vm7, %v4856_v32, %v4860_v33  ;;  %v14967_v57 = vld [vmem:[%s15476_s22 + $0x2c] sm:$0xff]  }
 0x1fa   : > { %v2031_v0 = vpop.f32.mrb[66].mxu0  ;;  %v2596_v1 = vld [vmem:[#allocation2 + $0xf8] sm:$0xff]  ;;  %v2530_v6 = vpop.f32.mrb[66].mxu1 }
 0x1fb   : > { %2677 = vst.msk [vmem:[#allocation2 + $0xf0] sm:$0xff] %vm2066_vm6, %v2636_v61  ;;  %2100 = vst.msk [vmem:[#allocation2 + $0x108] sm:$0xff] %vm2066_vm6, %v2031_v0  ;;  %v2637_v3 = vadd.f32 %v2596_v1, %v2522_v51  ;;  %v13550_v4 = vpop.f32.mrb[67].mxu0  ;;  %v13636_v10 = vpop.f32.mrb[67].mxu1  ;;  %v4869_v1 = vsel %vm18743_vm7, %v4864_v52, %v4868_v53  ;;  %v12616_v5 = vld [vmem:[%s18727_s1 + $0x1c] sm:$0xf] }
 0x1fc   : > { %v14978_v52 = vld [vmem:[%s15476_s22 + $0x54] sm:$0xff]  }
 0x1fd   : > { %2678 = vst.msk [vmem:[#allocation2 + $0xf8] sm:$0xff] %vm2066_vm6, %v2637_v3  ;;  %13832 = vmatmul.mubr.msk.bf16.gmra.mrb[172].mxu0 %vm1798_vm3, %v14960_v63  ;;  %13918 = vmatmul.mubr.msk.bf16.gmra.mrb[172].mxu1 %vm1798_vm3, %v4845_v7  ;;  %v4874_v3 = vshll.u32 %v14972_v54, 16 }
 0x1fe   : > { %13835 = vmatprep.mubr.msk.bf16.mxu0 %vm15307_vm1, %v15306_v34  ;;  %13921 = vmatprep.mubr.msk.bf16.mxu1 %vm15307_vm1, %v15306_v34 }
 0x1ff   : > { %v4876_v10 = vrot.slane %v4874_v3, 1 }
 0x200   : > { %v2036_v11 = vpop.f32.mrb[68].mxu0  ;;  %v2597_v12 = vld [vmem:[#allocation2 + $0x100] sm:$0xff]  ;;  %v2535_v21 = vpop.f32.mrb[68].mxu1 }
 0x201   : > { %2101 = vst.msk [vmem:[#allocation2 + $0x110] sm:$0xff] %vm2066_vm6, %v2036_v11  ;;  %v2638_v16 = vadd.f32 %v2597_v12, %v2527_v2  ;;  %v13553_v17 = vpop.f32.mrb[69].mxu0  ;;  %v13639_v24 = vpop.f32.mrb[69].mxu1  ;;  %v4870_v2 = vshrl.u32 %v14970_v35, 16  ;;  %v14974_v11 = vld [vmem:[%s15476_s22 + $0x44] sm:$0xff]  }
 0x202   : > { %v2039_v19 = vpop.f32.mrb[70].mxu0  ;;  %v2598_v20 = vld [vmem:[#allocation2 + $0x108] sm:$0xff]  ;;  %v2538_v25 = vpop.f32.mrb[70].mxu1  ;;  %v4882_v24 = vshll.u32 %v14974_v11, 16 }
 0x203   : > { %2679 = vst.msk [vmem:[#allocation2 + $0x100] sm:$0xff] %vm2066_vm6, %v2638_v16  ;;  %2102 = vst.msk [vmem:[#allocation2 + $0x118] sm:$0xff] %vm2066_vm6, %v2039_v19  ;;  %v2639_v22 = vadd.f32 %v2598_v20, %v2530_v6  ;;  %v13554_v23 = vpop.f32.mrb[71].mxu0  ;;  %v13640_v29 = vpop.f32.mrb[71].mxu1  ;;  %v6342_v6 = vsel %vm1862_vm0, %v12616_v5, 0  ;;  %v4872_v9 = vor.u32 %v4870_v2, %v4868_v53 }
 0x204   : > { %14084 = vmatpush3.bf16.msra.mxu1 %v6342_v6  ;;  %v4878_v23 = vshrl.u32 %v14972_v54, 16 }
 0x205   : > { %2680 = vst.msk [vmem:[#allocation2 + $0x108] sm:$0xff] %vm2066_vm6, %v2639_v22  ;;  %13836 = vmatmul.mubr.msk.bf16.gmra.mrb[176].mxu0 %vm1798_vm3, %v14963_v18  ;;  %13922 = vmatmul.mubr.msk.bf16.gmra.mrb[176].mxu1 %vm1798_vm3, %v4853_v26 }
 0x206   : > { %13839 = vmatprep.mubr.msk.bf16.mxu0 %vm15307_vm1, %v15306_v34  ;;  %13925 = vmatprep.mubr.msk.bf16.mxu1 %vm15307_vm1, %v15306_v34  ;;  %v4880_v29 = vor.u32 %v4878_v23, %v4876_v10 }
 0x207   : > { %14255 = vmatprep.subr.bf16.mxu1 %v15306_v34 }
 0x208   : > { %v2044_v30 = vpop.f32.mrb[72].mxu0  ;;  %v2599_v31 = vld [vmem:[#allocation2 + $0x110] sm:$0xff]  ;;  %v2543_v41 = vpop.f32.mrb[72].mxu1 }
 0x209   : > { %2103 = vst.msk [vmem:[#allocation2 + $0x120] sm:$0xff] %vm2066_vm6, %v2044_v30  ;;  %v2640_v36 = vadd.f32 %v2599_v31, %v2535_v21  ;;  %v13557_v37 = vpop.f32.mrb[73].mxu0  ;;  %v13643_v44 = vpop.f32.mrb[73].mxu1  ;;  %v4877_v21 = vsel %vm18743_vm7, %v4872_v9, %v4876_v10  ;;  %v4884_v30 = vrot.slane %v4882_v24, 1  ;;  %v14976_v31 = vld [vmem:[%s15476_s22 + $0x4c] sm:$0xff]  }
 0x20a   : > { %v2047_v39 = vpop.f32.mrb[74].mxu0  ;;  %v2600_v40 = vld [vmem:[#allocation2 + $0x118] sm:$0xff]  ;;  %v2546_v45 = vpop.f32.mrb[74].mxu1  ;;  %v4894_v3 = vshrl.u32 %v14976_v31, 16 }
 0x20b   : > { %2681 = vst.msk [vmem:[#allocation2 + $0x110] sm:$0xff] %vm2066_vm6, %v2640_v36  ;;  %2104 = vst.msk [vmem:[#allocation2 + $0x128] sm:$0xff] %vm2066_vm6, %v2047_v39  ;;  %v2641_v42 = vadd.f32 %v2600_v40, %v2538_v25  ;;  %v13558_v43 = vpop.f32.mrb[75].mxu0  ;;  %v13644_v49 = vpop.f32.mrb[75].mxu1  ;;  %v14971_v36 = vld [vmem:[%s15476_s22 + $0x3c] sm:$0xff]   ;;  %v4885_v44 = vsel %vm18743_vm7, %v4880_v29, %v4884_v30 }
 0x20c   : > { %v3294_v49 = vld [vmem:[#allocation2 + $0x10] sm:$0xff] }
 0x20d   : > { %2682 = vst.msk [vmem:[#allocation2 + $0x118] sm:$0xff] %vm2066_vm6, %v2641_v42  ;;  %13840 = vmatmul.mubr.msk.bf16.gmra.mrb[180].mxu0 %vm1798_vm3, %v14965_v38  ;;  %13926 = vmatmul.mubr.msk.bf16.gmra.mrb[180].mxu1 %vm1798_vm3, %v4861_v46  ;;  %v3293_v38 = vld [vmem:[#allocation2 + $0x8] sm:$0xff]  ;;  %v4890_v46 = vshll.u32 %v14976_v31, 16  ;;  %v3298_v31 = vld [vmem:[#allocation2 + $0x30] sm:$0xff] }
 0x20e   : > { %13843 = vmatprep.mubr.msk.bf16.mxu0 %vm15307_vm1, %v15306_v34  ;;  %13929 = vmatprep.mubr.msk.bf16.mxu1 %vm15307_vm1, %v15306_v34 }
 0x210   : > { %v2052_v50 = vpop.f32.mrb[76].mxu0  ;;  %v2601_v51 = vld [vmem:[#allocation2 + $0x120] sm:$0xff]  ;;  %v2551_v60 = vpop.f32.mrb[76].mxu1 }
 0x211   : > { %2105 = vst.msk [vmem:[#allocation2 + $0x130] sm:$0xff] %vm2066_vm6, %v2052_v50  ;;  %v2642_v55 = vadd.f32 %v2601_v51, %v2543_v41  ;;  %v13561_v56 = vpop.f32.mrb[77].mxu0  ;;  %v13647_v63 = vpop.f32.mrb[77].mxu1  ;;  %v4892_v51 = vrot.slane %v4890_v46, 1 }
 0x212   : > { %v2055_v58 = vpop.f32.mrb[78].mxu0  ;;  %v2602_v59 = vld [vmem:[#allocation2 + $0x128] sm:$0xff]  ;;  %v2554_v0 = vpop.f32.mrb[78].mxu1 }
 0x213   : > { %2683 = vst.msk [vmem:[#allocation2 + $0x120] sm:$0xff] %vm2066_vm6, %v2642_v55  ;;  %2106 = vst.msk [vmem:[#allocation2 + $0x138] sm:$0xff] %vm2066_vm6, %v2055_v58  ;;  %v2643_v61 = vadd.f32 %v2602_v59, %v2546_v45  ;;  %v13562_v62 = vpop.f32.mrb[79].mxu0  ;;  %v13648_v4 = vpop.f32.mrb[79].mxu1  ;;  %v4886_v45 = vshrl.u32 %v14974_v11, 16  ;;  %v14973_v55 = vld [vmem:[%s15476_s22 + $0x44] sm:$0xff]   ;;  %v4896_v9 = vor.u32 %v4894_v3, %v4892_v51 }
 0x214   : > { %v4898_v4 = vshll.u32 %v14978_v52, 16  ;;  %v14980_v11 = vld [vmem:[%s15476_s22 + $0x5c] sm:$0xff]  }
 0x215   : > { %2684 = vst.msk [vmem:[#allocation2 + $0x128] sm:$0xff] %vm2066_vm6, %v2643_v61  ;;  %13844 = vmatmul.mubr.msk.bf16.gmra.mrb[184].mxu0 %vm1798_vm3, %v14967_v57  ;;  %13930 = vmatmul.mubr.msk.bf16.gmra.mrb[184].mxu1 %vm1798_vm3, %v4869_v1  ;;  %v4888_v50 = vor.u32 %v4886_v45, %v4884_v30  ;;  %v3295_v57 = vld [vmem:[#allocation2 + $0x18] sm:$0xff] }
 0x216   : > { %13847 = vmatprep.mubr.msk.bf16.mxu0 %vm15307_vm1, %v15306_v34  ;;  %13933 = vmatprep.mubr.msk.bf16.mxu1 %vm15307_vm1, %v15306_v34  ;;  %v4900_v10 = vrot.slane %v4898_v4, 1 }
 0x217   : > { %v4893_v2 = vsel %vm18743_vm7, %v4888_v50, %v4892_v51  ;;  %v4910_v50 = vshrl.u32 %v14980_v11, 16 }
 0x218   : > { %v2060_v7 = vpop.f32.mrb[80].mxu0  ;;  %v2603_v8 = vld [vmem:[#allocation2 + $0x130] sm:$0xff]  ;;  %v2559_v17 = vpop.f32.mrb[80].mxu1 }
 0x219   : > { %2107 = vst.msk [vmem:[#allocation2 + $0x140] sm:$0xff] %vm2066_vm6, %v2060_v7  ;;  %v2644_v12 = vadd.f32 %v2603_v8, %v2551_v60  ;;  %v13565_v13 = vpop.f32.mrb[81].mxu0  ;;  %v13651_v20 = vpop.f32.mrb[81].mxu1  ;;  %v3296_v8 = vld [vmem:[#allocation2 + $0x20] sm:$0xff] }
 0x21a   : > { %v2063_v15 = vpop.f32.mrb[82].mxu0  ;;  %v2604_v16 = vld [vmem:[#allocation2 + $0x138] sm:$0xff]  ;;  %v2562_v22 = vpop.f32.mrb[82].mxu1 }
 0x21b   : > { %2685 = vst.msk [vmem:[#allocation2 + $0x130] sm:$0xff] %vm2066_vm6, %v2644_v12  ;;  %v2645_v18 = vadd.f32 %v2604_v16, %v2554_v0  ;;  %v13566_v19 = vpop.f32.mrb[83].mxu0  ;;  %v13652_v25 = vpop.f32.mrb[83].mxu1  ;;  %v3297_v16 = vld [vmem:[#allocation2 + $0x28] sm:$0xff] }
 0x21c   : > { %v4901_v25 = vsel %vm18743_vm7, %v4896_v9, %v4900_v10 }
 0x21d   : > { %2686 = vst.msk [vmem:[#allocation2 + $0x138] sm:$0xff] %vm2066_vm6, %v2645_v18  ;;  %13848 = vmatmul.mubr.msk.bf16.gmra.mrb[188].mxu0 %vm1798_vm3, %v14969_v14  ;;  %13934 = vmatmul.mubr.msk.bf16.gmra.mrb[188].mxu1 %vm1798_vm3, %v4877_v21  ;;  %v14975_v14 = vld [vmem:[%s15476_s22 + $0x4c] sm:$0xff]  }
 0x21e   : > { %13851 = vmatprep.mubr.msk.bf16.mxu0 %vm15307_vm1, %v15306_v34  ;;  %13937 = vmatprep.mubr.msk.bf16.mxu1 %vm15307_vm1, %v15306_v34 }
 0x220   : > { %v2605_v26 = vld [vmem:[#allocation2 + $0x140] sm:$0xff]  ;;  %v3126_v27 = vpop.f32.mrb[84].mxu0  ;;  %v3852_v39 = vpop.f32.mrb[84].mxu1 }
 0x221   : > { %v2646_v32 = vadd.f32 %v2605_v26, %v2559_v17  ;;  %v3333_v33 = vadd.f32 %v3292_v28, %v3126_v27  ;;  %v13657_v35 = vpop.f32.mrb[85].mxu0  ;;  %v13743_v42 = vpop.f32.mrb[85].mxu1  ;;  %v4902_v26 = vshrl.u32 %v14978_v52, 16  ;;  %v4906_v27 = vshll.u32 %v14980_v11, 16 }
 0x222   : > { %v3129_v37 = vpop.f32.mrb[86].mxu0  ;;  %v3855_v43 = vpop.f32.mrb[86].mxu1  ;;  %v14982_v35 = vld [vmem:[%s15476_s22 + $0x64] sm:$0xff]  }
 0x223   : > { %2687 = vst.msk [vmem:[#allocation2 + $0x140] sm:$0xff] %vm2066_vm6, %v2646_v32  ;;  %3374 = vst.msk [vmem:[#allocation2] sm:$0xff] %vm2066_vm6, %v3333_v33  ;;  %v3334_v40 = vadd.f32 %v3293_v38, %v3129_v37  ;;  %v13658_v41 = vpop.f32.mrb[87].mxu0  ;;  %v13744_v47 = vpop.f32.mrb[87].mxu1  ;;  %v4904_v32 = vor.u32 %v4902_v26, %v4900_v10  ;;  %v4908_v33 = vrot.slane %v4906_v27, 1  ;;  %v14977_v38 = vld [vmem:[%s15476_s22 + $0x54] sm:$0xff]  }
 0x224   : > { %v4914_v51 = vshll.u32 %v14982_v35, 16  ;;  %v4918_v9 = vshrl.u32 %v14982_v35, 16 }
 0x225   : > { %3375 = vst.msk [vmem:[#allocation2 + $0x8] sm:$0xff] %vm2066_vm6, %v3334_v40  ;;  %13852 = vmatmul.mubr.msk.bf16.gmra.mrb[192].mxu0 %vm1798_vm3, %v14971_v36  ;;  %13938 = vmatmul.mubr.msk.bf16.gmra.mrb[192].mxu1 %vm1798_vm3, %v4885_v44  ;;  %v3299_v40 = vld [vmem:[#allocation2 + $0x38] sm:$0xff] }
 0x226   : > { %13855 = vmatprep.mubr.msk.bf16.mxu0 %vm15307_vm1, %v15306_v34  ;;  %13941 = vmatprep.mubr.msk.bf16.mxu1 %vm15307_vm1, %v15306_v34 }
 0x228   : > { %v3134_v48 = vpop.f32.mrb[88].mxu0  ;;  %v3860_v59 = vpop.f32.mrb[88].mxu1 }
 0x229   : > { %v3335_v53 = vadd.f32 %v3294_v49, %v3134_v48  ;;  %v13661_v54 = vpop.f32.mrb[89].mxu0  ;;  %v13747_v63 = vpop.f32.mrb[89].mxu1  ;;  %v4909_v49 = vsel %vm18743_vm7, %v4904_v32, %v4908_v33 }
 0x22a   : > { %v3137_v56 = vpop.f32.mrb[90].mxu0  ;;  %v4018_v58 = vld [vmem:[#allocation2] sm:$0xff]  ;;  %v3863_v1 = vpop.f32.mrb[90].mxu1  ;;  %v3301_v63 = vld [vmem:[#allocation2 + $0x48] sm:$0xff] }
 0x22b   : > { %3376 = vst.msk [vmem:[#allocation2 + $0x10] sm:$0xff] %vm2066_vm6, %v3335_v53  ;;  %v3336_v60 = vadd.f32 %v3295_v57, %v3137_v56  ;;  %v4059_v61 = vadd.f32 %v4018_v58, %v3852_v39  ;;  %v13662_v62 = vpop.f32.mrb[91].mxu0  ;;  %v13748_v6 = vpop.f32.mrb[91].mxu1  ;;  %v4912_v56 = vor.u32 %v4910_v50, %v4908_v33  ;;  %v4916_v57 = vrot.slane %v4914_v51, 1  ;;  %v14984_v58 = vld [vmem:[%s15476_s22 + $0x6c] sm:$0xff]  }
 0x22c   : > { %v4019_v0 = vld [vmem:[#allocation2 + $0x8] sm:$0xff]  ;;  %v4922_v10 = vshll.u32 %v14984_v58, 16  ;;  %v4926_v32 = vshrl.u32 %v14984_v58, 16 }
 0x22d   : > { %3377 = vst.msk [vmem:[#allocation2 + $0x18] sm:$0xff] %vm2066_vm6, %v3336_v60  ;;  %4100 = vst.msk [vmem:[#allocation2] sm:$0xff] %vm2066_vm6, %v4059_v61  ;;  %v4060_v5 = vadd.f32 %v4019_v0, %v3855_v43  ;;  %13856 = vmatmul.mubr.msk.bf16.gmra.mrb[196].mxu0 %vm1798_vm3, %v14973_v55  ;;  %13942 = vmatmul.mubr.msk.bf16.gmra.mrb[196].mxu1 %vm1798_vm3, %v4893_v2  ;;  %v3300_v55 = vld [vmem:[#allocation2 + $0x40] sm:$0xff] }
 0x22e   : > { %13859 = vmatprep.mubr.msk.bf16.mxu0 %vm15307_vm1, %v15306_v34  ;;  %13945 = vmatprep.mubr.msk.bf16.mxu1 %vm15307_vm1, %v15306_v34  ;;  %v14979_v61 = vld [vmem:[%s15476_s22 + $0x5c] sm:$0xff]  }
 0x22f   : > { %4101 = vst.msk [vmem:[#allocation2 + $0x8] sm:$0xff] %vm2066_vm6, %v4060_v5 }
 0x230   : > { %v3142_v7 = vpop.f32.mrb[92].mxu0  ;;  %v3868_v18 = vpop.f32.mrb[92].mxu1 }
 0x231   : > { %v3337_v12 = vadd.f32 %v3296_v8, %v3142_v7  ;;  %v13665_v13 = vpop.f32.mrb[93].mxu0  ;;  %v13751_v22 = vpop.f32.mrb[93].mxu1  ;;  %v4917_v8 = vsel %vm18743_vm7, %v4912_v56, %v4916_v57 }
 0x232   : > { %v3145_v15 = vpop.f32.mrb[94].mxu0  ;;  %v4020_v17 = vld [vmem:[#allocation2 + $0x10] sm:$0xff]  ;;  %v3871_v24 = vpop.f32.mrb[94].mxu1  ;;  %v3303_v22 = vld [vmem:[#allocation2 + $0x58] sm:$0xff] }
 0x233   : > { %3378 = vst.msk [vmem:[#allocation2 + $0x20] sm:$0xff] %vm2066_vm6, %v3337_v12  ;;  %v3338_v19 = vadd.f32 %v3297_v16, %v3145_v15  ;;  %v4061_v20 = vadd.f32 %v4020_v17, %v3860_v59  ;;  %v13666_v21 = vpop.f32.mrb[95].mxu0  ;;  %v13752_v29 = vpop.f32.mrb[95].mxu1  ;;  %v4920_v15 = vor.u32 %v4918_v9, %v4916_v57  ;;  %v4924_v16 = vrot.slane %v4922_v10, 1  ;;  %v14986_v17 = vld [vmem:[%s15476_s22 + $0x74] sm:$0xff]  }
 0x234   : > { %v4021_v23 = vld [vmem:[#allocation2 + $0x18] sm:$0xff]  ;;  %v4930_v33 = vshll.u32 %v14986_v17, 16  ;;  %v4934_v56 = vshrl.u32 %v14986_v17, 16 }
 0x235   : > { %3379 = vst.msk [vmem:[#allocation2 + $0x28] sm:$0xff] %vm2066_vm6, %v3338_v19  ;;  %4102 = vst.msk [vmem:[#allocation2 + $0x10] sm:$0xff] %vm2066_vm6, %v4061_v20  ;;  %v4062_v28 = vadd.f32 %v4021_v23, %v3863_v1  ;;  %13860 = vmatmul.mubr.msk.bf16.gmra.mrb[200].mxu0 %vm1798_vm3, %v14975_v14  ;;  %13946 = vmatmul.mubr.msk.bf16.gmra.mrb[200].mxu1 %vm1798_vm3, %v4901_v25  ;;  %v3302_v14 = vld [vmem:[#allocation2 + $0x50] sm:$0xff]  ;;  %v14981_v20 = vld [vmem:[%s15476_s22 + $0x64] sm:$0xff]  }
 0x236   : > { %13863 = vmatprep.mubr.msk.bf16.mxu0 %vm15307_vm1, %v15306_v34  ;;  %13949 = vmatprep.mubr.msk.bf16.mxu1 %vm15307_vm1, %v15306_v34 }
 0x237   : > { %4103 = vst.msk [vmem:[#allocation2 + $0x18] sm:$0xff] %vm2066_vm6, %v4062_v28 }
 0x238   : > { %v3150_v30 = vpop.f32.mrb[96].mxu0  ;;  %v3876_v42 = vpop.f32.mrb[96].mxu1 }
 0x239   : > { %v3339_v36 = vadd.f32 %v3298_v31, %v3150_v30  ;;  %v13669_v37 = vpop.f32.mrb[97].mxu0  ;;  %v13755_v46 = vpop.f32.mrb[97].mxu1  ;;  %v4925_v31 = vsel %vm18743_vm7, %v4920_v15, %v4924_v16 }
 0x23a   : > { %v3153_v39 = vpop.f32.mrb[98].mxu0  ;;  %v4022_v41 = vld [vmem:[#allocation2 + $0x20] sm:$0xff]  ;;  %v3879_v48 = vpop.f32.mrb[98].mxu1  ;;  %v3305_v46 = vld [vmem:[#allocation2 + $0x68] sm:$0xff] }
 0x23b   : > { %3380 = vst.msk [vmem:[#allocation2 + $0x30] sm:$0xff] %vm2066_vm6, %v3339_v36  ;;  %v3340_v43 = vadd.f32 %v3299_v40, %v3153_v39  ;;  %v4063_v44 = vadd.f32 %v4022_v41, %v3868_v18  ;;  %v13670_v45 = vpop.f32.mrb[99].mxu0  ;;  %v13756_v53 = vpop.f32.mrb[99].mxu1  ;;  %v4928_v39 = vor.u32 %v4926_v32, %v4924_v16  ;;  %v4932_v40 = vrot.slane %v4930_v33, 1  ;;  %v14988_v41 = vld [vmem:[%s15476_s22 + $0x7c] sm:$0xff]  }
 0x23c   : > { %v4023_v47 = vld [vmem:[#allocation2 + $0x28] sm:$0xff]  ;;  %v4938_v57 = vshll.u32 %v14988_v41, 16  ;;  %v4942_v15 = vshrl.u32 %v14988_v41, 16 }
 0x23d   : > { %3381 = vst.msk [vmem:[#allocation2 + $0x38] sm:$0xff] %vm2066_vm6, %v3340_v43  ;;  %4104 = vst.msk [vmem:[#allocation2 + $0x20] sm:$0xff] %vm2066_vm6, %v4063_v44  ;;  %v4064_v52 = vadd.f32 %v4023_v47, %v3871_v24  ;;  %13864 = vmatmul.mubr.msk.bf16.gmra.mrb[204].mxu0 %vm1798_vm3, %v14977_v38  ;;  %13950 = vmatmul.mubr.msk.bf16.gmra.mrb[204].mxu1 %vm1798_vm3, %v4909_v49  ;;  %v3304_v38 = vld [vmem:[#allocation2 + $0x60] sm:$0xff]  ;;  %v14983_v44 = vld [vmem:[%s15476_s22 + $0x6c] sm:$0xff]  }
 0x23e   : > { %13867 = vmatprep.mubr.msk.bf16.mxu0 %vm15307_vm1, %v15306_v34  ;;  %13953 = vmatprep.mubr.msk.bf16.mxu1 %vm15307_vm1, %v15306_v34 }
 0x23f   : > { %4105 = vst.msk [vmem:[#allocation2 + $0x28] sm:$0xff] %vm2066_vm6, %v4064_v52 }
 0x240   : > { %v3158_v54 = vpop.f32.mrb[100].mxu0  ;;  %v3884_v1 = vpop.f32.mrb[100].mxu1 }
 0x241   : > { %v3341_v59 = vadd.f32 %v3300_v55, %v3158_v54  ;;  %v13673_v60 = vpop.f32.mrb[101].mxu0  ;;  %v13759_v5 = vpop.f32.mrb[101].mxu1  ;;  %v4933_v55 = vsel %vm18743_vm7, %v4928_v39, %v4932_v40 }
 0x242   : > { %v3161_v62 = vpop.f32.mrb[102].mxu0  ;;  %v4024_v0 = vld [vmem:[#allocation2 + $0x30] sm:$0xff]  ;;  %v3887_v7 = vpop.f32.mrb[102].mxu1  ;;  %v3307_v5 = vld [vmem:[#allocation2 + $0x78] sm:$0xff] }
 0x243   : > { %3382 = vst.msk [vmem:[#allocation2 + $0x40] sm:$0xff] %vm2066_vm6, %v3341_v59  ;;  %v3342_v2 = vadd.f32 %v3301_v63, %v3161_v62  ;;  %v4065_v3 = vadd.f32 %v4024_v0, %v3876_v42  ;;  %v13674_v4 = vpop.f32.mrb[103].mxu0  ;;  %v13760_v12 = vpop.f32.mrb[103].mxu1  ;;  %v4936_v62 = vor.u32 %v4934_v56, %v4932_v40  ;;  %v4940_v63 = vrot.slane %v4938_v57, 1  ;;  %v14990_v0 = vld [vmem:[%s15476_s22 + $0x84] sm:$0xff]  }
 0x244   : > { %v4025_v6 = vld [vmem:[#allocation2 + $0x38] sm:$0xff]  ;;  %v4946_v16 = vshll.u32 %v14990_v0, 16  ;;  %v4950_v39 = vshrl.u32 %v14990_v0, 16 }
 0x245   : > { %3383 = vst.msk [vmem:[#allocation2 + $0x48] sm:$0xff] %vm2066_vm6, %v3342_v2  ;;  %4106 = vst.msk [vmem:[#allocation2 + $0x30] sm:$0xff] %vm2066_vm6, %v4065_v3  ;;  %v4066_v11 = vadd.f32 %v4025_v6, %v3879_v48  ;;  %13868 = vmatmul.mubr.msk.bf16.gmra.mrb[208].mxu0 %vm1798_vm3, %v14979_v61  ;;  %13954 = vmatmul.mubr.msk.bf16.gmra.mrb[208].mxu1 %vm1798_vm3, %v4917_v8  ;;  %v3306_v61 = vld [vmem:[#allocation2 + $0x70] sm:$0xff] }
 0x246   : > { %13871 = vmatprep.mubr.msk.bf16.mxu0 %vm15307_vm1, %v15306_v34  ;;  %13957 = vmatprep.mubr.msk.bf16.mxu1 %vm15307_vm1, %v15306_v34  ;;  %v14985_v3 = vld [vmem:[%s15476_s22 + $0x74] sm:$0xff]  }
 0x247   : > { %4107 = vst.msk [vmem:[#allocation2 + $0x38] sm:$0xff] %vm2066_vm6, %v4066_v11 }
 0x248   : > { %v3166_v13 = vpop.f32.mrb[104].mxu0  ;;  %v3892_v24 = vpop.f32.mrb[104].mxu1 }
 0x249   : > { %v3343_v18 = vadd.f32 %v3302_v14, %v3166_v13  ;;  %v13677_v19 = vpop.f32.mrb[105].mxu0  ;;  %v13763_v28 = vpop.f32.mrb[105].mxu1  ;;  %v4941_v14 = vsel %vm18743_vm7, %v4936_v62, %v4940_v63 }
 0x24a   : > { %v3169_v21 = vpop.f32.mrb[106].mxu0  ;;  %v4026_v23 = vld [vmem:[#allocation2 + $0x40] sm:$0xff]  ;;  %v3895_v30 = vpop.f32.mrb[106].mxu1  ;;  %v3309_v28 = vld [vmem:[#allocation2 + $0x88] sm:$0xff] }
 0x24b   : > { %3384 = vst.msk [vmem:[#allocation2 + $0x50] sm:$0xff] %vm2066_vm6, %v3343_v18  ;;  %v3344_v25 = vadd.f32 %v3303_v22, %v3169_v21  ;;  %v4067_v26 = vadd.f32 %v4026_v23, %v3884_v1  ;;  %v13678_v27 = vpop.f32.mrb[107].mxu0  ;;  %v13764_v36 = vpop.f32.mrb[107].mxu1  ;;  %v4944_v21 = vor.u32 %v4942_v15, %v4940_v63  ;;  %v4948_v22 = vrot.slane %v4946_v16, 1  ;;  %v14992_v23 = vld [vmem:[%s15476_s22 + $0x8c] sm:$0xff]  }
 0x24c   : > { %v4027_v29 = vld [vmem:[#allocation2 + $0x48] sm:$0xff]  ;;  %v4954_v40 = vshll.u32 %v14992_v23, 16  ;;  %v4958_v62 = vshrl.u32 %v14992_v23, 16 }
 0x24d   : > { %3385 = vst.msk [vmem:[#allocation2 + $0x58] sm:$0xff] %vm2066_vm6, %v3344_v25  ;;  %4108 = vst.msk [vmem:[#allocation2 + $0x40] sm:$0xff] %vm2066_vm6, %v4067_v26  ;;  %v4068_v35 = vadd.f32 %v4027_v29, %v3887_v7  ;;  %13872 = vmatmul.mubr.msk.bf16.gmra.mrb[212].mxu0 %vm1798_vm3, %v14981_v20  ;;  %13958 = vmatmul.mubr.msk.bf16.gmra.mrb[212].mxu1 %vm1798_vm3, %v4925_v31  ;;  %v3308_v20 = vld [vmem:[#allocation2 + $0x80] sm:$0xff] }
 0x24e   : > { %13875 = vmatprep.mubr.msk.bf16.mxu0 %vm15307_vm1, %v15306_v34  ;;  %13961 = vmatprep.mubr.msk.bf16.mxu1 %vm15307_vm1, %v15306_v34  ;;  %v14987_v26 = vld [vmem:[%s15476_s22 + $0x7c] sm:$0xff]  }
 0x24f   : > { %4109 = vst.msk [vmem:[#allocation2 + $0x48] sm:$0xff] %vm2066_vm6, %v4068_v35 }
 0x250   : > { %v3174_v37 = vpop.f32.mrb[108].mxu0  ;;  %v3900_v48 = vpop.f32.mrb[108].mxu1 }
 0x251   : > { %v3345_v42 = vadd.f32 %v3304_v38, %v3174_v37  ;;  %v13681_v43 = vpop.f32.mrb[109].mxu0  ;;  %v13767_v52 = vpop.f32.mrb[109].mxu1  ;;  %v4949_v38 = vsel %vm18743_vm7, %v4944_v21, %v4948_v22 }
 0x252   : > { %v3177_v45 = vpop.f32.mrb[110].mxu0  ;;  %v4028_v47 = vld [vmem:[#allocation2 + $0x50] sm:$0xff]  ;;  %v3903_v54 = vpop.f32.mrb[110].mxu1  ;;  %v3311_v52 = vld [vmem:[#allocation2 + $0x98] sm:$0xff] }
 0x253   : > { %3386 = vst.msk [vmem:[#allocation2 + $0x60] sm:$0xff] %vm2066_vm6, %v3345_v42  ;;  %v3346_v49 = vadd.f32 %v3305_v46, %v3177_v45  ;;  %v4069_v50 = vadd.f32 %v4028_v47, %v3892_v24  ;;  %v13682_v51 = vpop.f32.mrb[111].mxu0  ;;  %v13768_v59 = vpop.f32.mrb[111].mxu1  ;;  %v4952_v45 = vor.u32 %v4950_v39, %v4948_v22  ;;  %v4956_v46 = vrot.slane %v4954_v40, 1  ;;  %v14994_v47 = vld [vmem:[%s15476_s22 + $0x94] sm:$0xff]  }
 0x254   : > { %v4029_v53 = vld [vmem:[#allocation2 + $0x58] sm:$0xff]  ;;  %v4962_v63 = vshll.u32 %v14994_v47, 16  ;;  %v4966_v21 = vshrl.u32 %v14994_v47, 16 }
 0x255   : > { %3387 = vst.msk [vmem:[#allocation2 + $0x68] sm:$0xff] %vm2066_vm6, %v3346_v49  ;;  %4110 = vst.msk [vmem:[#allocation2 + $0x50] sm:$0xff] %vm2066_vm6, %v4069_v50  ;;  %v4070_v58 = vadd.f32 %v4029_v53, %v3895_v30  ;;  %13876 = vmatmul.mubr.msk.bf16.gmra.mrb[216].mxu0 %vm1798_vm3, %v14983_v44  ;;  %13962 = vmatmul.mubr.msk.bf16.gmra.mrb[216].mxu1 %vm1798_vm3, %v4933_v55  ;;  %v3310_v44 = vld [vmem:[#allocation2 + $0x90] sm:$0xff]  ;;  %v14989_v50 = vld [vmem:[%s15476_s22 + $0x84] sm:$0xff]  }
 0x256   : > { %13879 = vmatprep.mubr.msk.bf16.mxu0 %vm15307_vm1, %v15306_v34  ;;  %13965 = vmatprep.mubr.msk.bf16.mxu1 %vm15307_vm1, %v15306_v34 }
 0x257   : > { %4111 = vst.msk [vmem:[#allocation2 + $0x58] sm:$0xff] %vm2066_vm6, %v4070_v58 }
 0x258   : > { %v3182_v60 = vpop.f32.mrb[112].mxu0  ;;  %v3908_v7 = vpop.f32.mrb[112].mxu1 }
 0x259   : > { %v3347_v1 = vadd.f32 %v3306_v61, %v3182_v60  ;;  %v13685_v2 = vpop.f32.mrb[113].mxu0  ;;  %v13771_v11 = vpop.f32.mrb[113].mxu1  ;;  %v4957_v61 = vsel %vm18743_vm7, %v4952_v45, %v4956_v46 }
 0x25a   : > { %v3185_v4 = vpop.f32.mrb[114].mxu0  ;;  %v4030_v6 = vld [vmem:[#allocation2 + $0x60] sm:$0xff]  ;;  %v3911_v13 = vpop.f32.mrb[114].mxu1  ;;  %v3313_v11 = vld [vmem:[#allocation2 + $0xa8] sm:$0xff] }
 0x25b   : > { %3388 = vst.msk [vmem:[#allocation2 + $0x70] sm:$0xff] %vm2066_vm6, %v3347_v1  ;;  %v3348_v8 = vadd.f32 %v3307_v5, %v3185_v4  ;;  %v4071_v9 = vadd.f32 %v4030_v6, %v3900_v48  ;;  %v13686_v10 = vpop.f32.mrb[115].mxu0  ;;  %v13772_v18 = vpop.f32.mrb[115].mxu1  ;;  %v4960_v4 = vor.u32 %v4958_v62, %v4956_v46  ;;  %v4964_v5 = vrot.slane %v4962_v63, 1  ;;  %v14996_v6 = vld [vmem:[%s15476_s22 + $0x9c] sm:$0xff]  }
 0x25c   : > { %v4031_v12 = vld [vmem:[#allocation2 + $0x68] sm:$0xff]  ;;  %v4970_v22 = vshll.u32 %v14996_v6, 16  ;;  %v4974_v45 = vshrl.u32 %v14996_v6, 16 }
 0x25d   : > { %3389 = vst.msk [vmem:[#allocation2 + $0x78] sm:$0xff] %vm2066_vm6, %v3348_v8  ;;  %4112 = vst.msk [vmem:[#allocation2 + $0x60] sm:$0xff] %vm2066_vm6, %v4071_v9  ;;  %v4072_v17 = vadd.f32 %v4031_v12, %v3903_v54  ;;  %13880 = vmatmul.mubr.msk.bf16.gmra.mrb[220].mxu0 %vm1798_vm3, %v14985_v3  ;;  %13966 = vmatmul.mubr.msk.bf16.gmra.mrb[220].mxu1 %vm1798_vm3, %v4941_v14  ;;  %v3312_v3 = vld [vmem:[#allocation2 + $0xa0] sm:$0xff]  ;;  %v14991_v9 = vld [vmem:[%s15476_s22 + $0x8c] sm:$0xff]  }
 0x25e   : > { %13883 = vmatprep.mubr.msk.bf16.mxu0 %vm15307_vm1, %v15306_v34  ;;  %13969 = vmatprep.mubr.msk.bf16.mxu1 %vm15307_vm1, %v15306_v34 }
 0x25f   : > { %4113 = vst.msk [vmem:[#allocation2 + $0x68] sm:$0xff] %vm2066_vm6, %v4072_v17 }
 0x260   : > { %v3190_v19 = vpop.f32.mrb[116].mxu0  ;;  %v3916_v30 = vpop.f32.mrb[116].mxu1 }
 0x261   : > { %v3349_v24 = vadd.f32 %v3308_v20, %v3190_v19  ;;  %v13689_v25 = vpop.f32.mrb[117].mxu0  ;;  %v13775_v35 = vpop.f32.mrb[117].mxu1  ;;  %v4965_v20 = vsel %vm18743_vm7, %v4960_v4, %v4964_v5 }
 0x262   : > { %v3193_v27 = vpop.f32.mrb[118].mxu0  ;;  %v4032_v29 = vld [vmem:[#allocation2 + $0x70] sm:$0xff]  ;;  %v3919_v37 = vpop.f32.mrb[118].mxu1  ;;  %v3315_v35 = vld [vmem:[#allocation2 + $0xb8] sm:$0xff] }
 0x263   : > { %3390 = vst.msk [vmem:[#allocation2 + $0x80] sm:$0xff] %vm2066_vm6, %v3349_v24  ;;  %v3350_v31 = vadd.f32 %v3309_v28, %v3193_v27  ;;  %v4073_v32 = vadd.f32 %v4032_v29, %v3908_v7  ;;  %v13690_v33 = vpop.f32.mrb[119].mxu0  ;;  %v13776_v42 = vpop.f32.mrb[119].mxu1  ;;  %v4968_v27 = vor.u32 %v4966_v21, %v4964_v5  ;;  %v4972_v28 = vrot.slane %v4970_v22, 1  ;;  %v14998_v29 = vld [vmem:[%s15476_s22 + $0xa4] sm:$0xff]  }
 0x264   : > { %v4033_v36 = vld [vmem:[#allocation2 + $0x78] sm:$0xff]  ;;  %v4978_v46 = vshll.u32 %v14998_v29, 16  ;;  %v4982_v4 = vshrl.u32 %v14998_v29, 16 }
 0x265   : > { %3391 = vst.msk [vmem:[#allocation2 + $0x88] sm:$0xff] %vm2066_vm6, %v3350_v31  ;;  %4114 = vst.msk [vmem:[#allocation2 + $0x70] sm:$0xff] %vm2066_vm6, %v4073_v32  ;;  %v4074_v41 = vadd.f32 %v4033_v36, %v3911_v13  ;;  %13884 = vmatmul.mubr.msk.bf16.gmra.mrb[224].mxu0 %vm1798_vm3, %v14987_v26  ;;  %13970 = vmatmul.mubr.msk.bf16.gmra.mrb[224].mxu1 %vm1798_vm3, %v4949_v38  ;;  %v3314_v26 = vld [vmem:[#allocation2 + $0xb0] sm:$0xff]  ;;  %v16886_v29 = vld [vmem:[%s15476_s22 + $0x1c] sm:$0xff]  }
 0x266   : > { %13887 = vmatprep.mubr.msk.bf16.mxu0 %vm15307_vm1, %v15306_v34  ;;  %13973 = vmatprep.mubr.msk.bf16.mxu1 %vm15307_vm1, %v15306_v34  ;;  %v14993_v32 = vld [vmem:[%s15476_s22 + $0x94] sm:$0xff]  }
 0x267   : > { %4115 = vst.msk [vmem:[#allocation2 + $0x78] sm:$0xff] %vm2066_vm6, %v4074_v41 }
 0x268   : > { %v3198_v43 = vpop.f32.mrb[120].mxu0  ;;  %v3924_v54 = vpop.f32.mrb[120].mxu1 }
 0x269   : > { %v3351_v48 = vadd.f32 %v3310_v44, %v3198_v43  ;;  %v13693_v49 = vpop.f32.mrb[121].mxu0  ;;  %v13779_v58 = vpop.f32.mrb[121].mxu1  ;;  %v4973_v44 = vsel %vm18743_vm7, %v4968_v27, %v4972_v28 }
 0x26a   : > { %v3201_v51 = vpop.f32.mrb[122].mxu0  ;;  %v4034_v53 = vld [vmem:[#allocation2 + $0x80] sm:$0xff]  ;;  %v3927_v60 = vpop.f32.mrb[122].mxu1  ;;  %v3317_v58 = vld [vmem:[#allocation2 + $0xc8] sm:$0xff] }
 0x26b   : > { %3392 = vst.msk [vmem:[#allocation2 + $0x90] sm:$0xff] %vm2066_vm6, %v3351_v48  ;;  %v3352_v55 = vadd.f32 %v3311_v52, %v3201_v51  ;;  %v4075_v56 = vadd.f32 %v4034_v53, %v3916_v30  ;;  %v13694_v57 = vpop.f32.mrb[123].mxu0  ;;  %v13780_v1 = vpop.f32.mrb[123].mxu1  ;;  %v4976_v51 = vor.u32 %v4974_v45, %v4972_v28  ;;  %v4980_v52 = vrot.slane %v4978_v46, 1  ;;  %v16861_v53 = vld [vmem:[%s15476_s22 + $0xac] sm:$0x1f]  }
 0x26c   : > { %v4035_v59 = vld [vmem:[#allocation2 + $0x88] sm:$0xff]  ;;  %v4986_v5 = vshll.u32 %v16861_v53, 16 }
 0x26d   : > { %3393 = vst.msk [vmem:[#allocation2 + $0x98] sm:$0xff] %vm2066_vm6, %v3352_v55  ;;  %4116 = vst.msk [vmem:[#allocation2 + $0x80] sm:$0xff] %vm2066_vm6, %v4075_v56  ;;  %v4076_v0 = vadd.f32 %v4035_v59, %v3919_v37  ;;  %13888 = vmatmul.mubr.msk.bf16.gmra.mrb[228].mxu0 %vm1798_vm3, %v14989_v50  ;;  %13974 = vmatmul.mubr.msk.bf16.gmra.mrb[228].mxu1 %vm1798_vm3, %v4957_v61  ;;  %v3316_v50 = vld [vmem:[#allocation2 + $0xc0] sm:$0xff] }
 0x26e   : > { %13891 = vmatprep.mubr.msk.bf16.mxu0 %vm15307_vm1, %v15306_v34  ;;  %13977 = vmatprep.mubr.msk.bf16.mxu1 %vm15307_vm1, %v15306_v34  ;;  %v14995_v56 = vld [vmem:[%s15476_s22 + $0x9c] sm:$0xff]  }
 0x26f   : > { %4117 = vst.msk [vmem:[#allocation2 + $0x88] sm:$0xff] %vm2066_vm6, %v4076_v0 }
 0x270   : > { %v3206_v2 = vpop.f32.mrb[124].mxu0  ;;  %v3932_v13 = vpop.f32.mrb[124].mxu1 }
 0x271   : > { %v3353_v7 = vadd.f32 %v3312_v3, %v3206_v2  ;;  %v13697_v8 = vpop.f32.mrb[125].mxu0  ;;  %v13783_v17 = vpop.f32.mrb[125].mxu1  ;;  %v4981_v3 = vsel %vm18743_vm7, %v4976_v51, %v4980_v52 }
 0x272   : > { %v3209_v10 = vpop.f32.mrb[126].mxu0  ;;  %v4036_v12 = vld [vmem:[#allocation2 + $0x90] sm:$0xff]  ;;  %v3935_v19 = vpop.f32.mrb[126].mxu1 }
 0x273   : > { %3394 = vst.msk [vmem:[#allocation2 + $0xa0] sm:$0xff] %vm2066_vm6, %v3353_v7  ;;  %v3354_v14 = vadd.f32 %v3313_v11, %v3209_v10  ;;  %v4077_v15 = vadd.f32 %v4036_v12, %v3924_v54  ;;  %v13698_v16 = vpop.f32.mrb[127].mxu0  ;;  %v13784_v24 = vpop.f32.mrb[127].mxu1  ;;  %v4984_v10 = vor.u32 %v4982_v4, %v4980_v52  ;;  %v4988_v11 = vrot.slane %v4986_v5, 1  ;;  %v15004_v52 = vld [vmem:[%s15476_s22 + $0x14] sm:$0xfe]  }
 0x274   : > { %v4037_v18 = vld [vmem:[#allocation2 + $0x98] sm:$0xff] }
 0x275   : > { %3395 = vst.msk [vmem:[#allocation2 + $0xa8] sm:$0xff] %vm2066_vm6, %v3354_v14  ;;  %4118 = vst.msk [vmem:[#allocation2 + $0x90] sm:$0xff] %vm2066_vm6, %v4077_v15  ;;  %v4078_v23 = vadd.f32 %v4037_v18, %v3927_v60  ;;  %13892 = vmatmul.mubr.msk.bf16.gmra.mrb[232].mxu0 %vm1798_vm3, %v14991_v9  ;;  %13978 = vmatmul.mubr.msk.bf16.gmra.mrb[232].mxu1 %vm1798_vm3, %v4965_v20  ;;  %v3318_v9 = vld [vmem:[#allocation2 + $0xd0] sm:$0xff]  ;;  %v14997_v14 = vld [vmem:[%s15476_s22 + $0xa4] sm:$0xff]  }
 0x276   : > { %13895 = vmatprep.mubr.msk.bf16.mxu0 %vm15307_vm1, %v15306_v34  ;;  %13981 = vmatprep.mubr.msk.bf16.mxu1 %vm15307_vm1, %v15306_v34  ;;  %v3319_v16 = vld [vmem:[#allocation2 + $0xd8] sm:$0xff] }
 0x277   : > { %4119 = vst.msk [vmem:[#allocation2 + $0x98] sm:$0xff] %vm2066_vm6, %v4078_v23 }
 0x278   : > { %v3214_v25 = vpop.f32.mrb[128].mxu0  ;;  %v3940_v37 = vpop.f32.mrb[128].mxu1 }
 0x279   : > { %v3355_v30 = vadd.f32 %v3314_v26, %v3214_v25  ;;  %v13701_v31 = vpop.f32.mrb[129].mxu0  ;;  %v13787_v41 = vpop.f32.mrb[129].mxu1  ;;  %v4989_v26 = vsel %vm18743_vm7, %v4984_v10, %v4988_v11 }
 0x27a   : > { %v3217_v33 = vpop.f32.mrb[130].mxu0  ;;  %v4038_v36 = vld [vmem:[#allocation2 + $0xa0] sm:$0xff]  ;;  %v3943_v43 = vpop.f32.mrb[130].mxu1  ;;  %v4990_v31 = vshrl.u32 %v16861_v53, 16 }
 0x27b   : > { %3396 = vst.msk [vmem:[#allocation2 + $0xb0] sm:$0xff] %vm2066_vm6, %v3355_v30  ;;  %v3356_v38 = vadd.f32 %v3315_v35, %v3217_v33  ;;  %v4079_v39 = vadd.f32 %v4038_v36, %v3932_v13  ;;  %v13702_v40 = vpop.f32.mrb[131].mxu0  ;;  %v13788_v48 = vpop.f32.mrb[131].mxu1  ;;  %v3320_v33 = vld [vmem:[#allocation2 + $0xe0] sm:$0xff] }
 0x27c   : > { %v4039_v42 = vld [vmem:[#allocation2 + $0xa8] sm:$0xff]  ;;  %v16898_v53 = vld [vmem:[%s15476_s22 + $0x1c] sm:$0xff]  }
 0x27d   : > { %3397 = vst.msk [vmem:[#allocation2 + $0xb8] sm:$0xff] %vm2066_vm6, %v3356_v38  ;;  %4120 = vst.msk [vmem:[#allocation2 + $0xa0] sm:$0xff] %vm2066_vm6, %v4079_v39  ;;  %v4080_v47 = vadd.f32 %v4039_v42, %v3935_v19  ;;  %13896 = vmatmul.mubr.msk.bf16.gmra.mrb[236].mxu0 %vm1798_vm3, %v14993_v32  ;;  %13982 = vmatmul.mubr.msk.bf16.gmra.mrb[236].mxu1 %vm1798_vm3, %v4973_v44  ;;  %v15001_v19 = vld [vmem:[%s15476_s22 + $0x14] sm:$0xff]   ;;  %v14999_v38 = vld [vmem:[%s15476_s22 + $0xac] ss:$0 sps:$4 sm:$0xff]   ;;  %v5539_v44 = vshll.u32 %v16886_v29, 16 }
 0x27e   : > { %13899 = vmatprep.mubr.msk.bf16.mxu0 %vm15307_vm1, %v15306_v34  ;;  %13985 = vmatprep.mubr.msk.bf16.mxu1 %vm15307_vm1, %v15306_v34  ;;  %v5534_v30 = vshll.u32 %v15001_v19, 16  ;;  %v5532_v42 = vshrl.u32 %v15001_v19, 16 }
 0x27f   : > { %4121 = vst.msk [vmem:[#allocation2 + $0xa8] sm:$0xff] %vm2066_vm6, %v4080_v47 }
 0x280   : > { %v3222_v49 = vpop.f32.mrb[132].mxu0  ;;  %v3948_v60 = vpop.f32.mrb[132].mxu1 }
 0x281   : > { %v3357_v54 = vadd.f32 %v3316_v50, %v3222_v49  ;;  %v13705_v55 = vpop.f32.mrb[133].mxu0  ;;  %v13791_v0 = vpop.f32.mrb[133].mxu1  ;;  %v4992_v49 = vor.u32 %v4990_v31, %v4988_v11 }
 0x282   : > { %v3225_v57 = vpop.f32.mrb[134].mxu0  ;;  %v4040_v59 = vld [vmem:[#allocation2 + $0xb0] sm:$0xff]  ;;  %v3951_v2 = vpop.f32.mrb[134].mxu1 }
 0x283   : > { %3398 = vst.msk [vmem:[#allocation2 + $0xc0] sm:$0xff] %vm2066_vm6, %v3357_v54  ;;  %v3358_v61 = vadd.f32 %v3317_v58, %v3225_v57  ;;  %v4081_v62 = vadd.f32 %v4040_v59, %v3940_v37  ;;  %v13706_v63 = vpop.f32.mrb[135].mxu0  ;;  %v13792_v7 = vpop.f32.mrb[135].mxu1  ;;  %v3321_v37 = vld [vmem:[#allocation2 + $0xe8] sm:$0xff]  ;;  %v5541_v57 = vrot.slane %v5539_v44, 1 }
 0x284   : > { %v4041_v1 = vld [vmem:[#allocation2 + $0xb8] sm:$0xff]  ;;  %v16906_v58 = vld [vmem:[%s15476_s22 + $0x24] sm:$0xff]   ;;  %v6238_v63 = vrot.slane %v16898_v53, 1 }
 0x285   : > { %3399 = vst.msk [vmem:[#allocation2 + $0xc8] sm:$0xff] %vm2066_vm6, %v3358_v61  ;;  %4122 = vst.msk [vmem:[#allocation2 + $0xb0] sm:$0xff] %vm2066_vm6, %v4081_v62  ;;  %v4082_v6 = vadd.f32 %v4041_v1, %v3943_v43  ;;  %13900 = vmatmul.mubr.msk.bf16.gmra.mrb[240].mxu0 %vm1798_vm3, %v14995_v56  ;;  %13986 = vmatmul.mubr.msk.bf16.gmra.mrb[240].mxu1 %vm1798_vm3, %v4981_v3  ;;  %v5536_v43 = vrot.slane %v5534_v30, 1  ;;  %v12659_v61 = vld [vmem:[%s18727_s1 + $0x20] sm:$0xf]  ;;  %v6237_v62 = vrot.slane %v15004_v52, 1 }
 0x286   : > { %13903 = vmatprep.mubr.msk.bf16.mxu0 %vm15307_vm1, %v15306_v34  ;;  %13989 = vmatprep.mubr.msk.bf16.mxu1 %vm15307_vm1, %v15306_v34  ;;  %v3323_v3 = vld [vmem:[#allocation2 + $0xf8] sm:$0xff] }
 0x287   : > { %4123 = vst.msk [vmem:[#allocation2 + $0xb8] sm:$0xff] %vm2066_vm6, %v4082_v6  ;;  %v5537_v56 = vor.u32 %v5536_v43, %v5532_v42  ;;  %v5543_v6 = vshrl.u32 %v16886_v29, 16  ;;  %v3325_v29 = vld [vmem:[#allocation2 + $0x108] sm:$0xff] }
 0x288   : > { %v3230_v8 = vpop.f32.mrb[136].mxu0  ;;  %v3956_v18 = vpop.f32.mrb[136].mxu1  ;;  %v16945_v43 = vld [vmem:[%s15476_s22 + $0x2c] sm:$0xff]  }
 0x289   : > { %v3359_v12 = vadd.f32 %v3318_v9, %v3230_v8  ;;  %v13709_v13 = vpop.f32.mrb[137].mxu0  ;;  %v13795_v23 = vpop.f32.mrb[137].mxu1  ;;  %v5542_v5 = vsel %vm18743_vm7, %v5537_v56, %v5541_v57  ;;  %v5547_v8 = vshll.u32 %v16906_v58, 16 }
 0x28a   : > { %v3233_v15 = vpop.f32.mrb[138].mxu0  ;;  %v4042_v17 = vld [vmem:[#allocation2 + $0xc0] sm:$0xff]  ;;  %v3959_v25 = vpop.f32.mrb[138].mxu1 }
 0x28b   : > { %3400 = vst.msk [vmem:[#allocation2 + $0xd0] sm:$0xff] %vm2066_vm6, %v3359_v12  ;;  %v3360_v20 = vadd.f32 %v3319_v16, %v3233_v15  ;;  %v4083_v21 = vadd.f32 %v4042_v17, %v3948_v60  ;;  %v13710_v22 = vpop.f32.mrb[139].mxu0  ;;  %v13796_v28 = vpop.f32.mrb[139].mxu1  ;;  %v3322_v60 = vld [vmem:[#allocation2 + $0xf0] sm:$0xff]  ;;  %v7069_v12 = vsel %vm1862_vm0, %v12659_v61, 0  ;;  %v6239_v16 = vsel %vm18742_vm8, %v6237_v62, %v6238_v63  ;;  %v16923_v17 = vld [vmem:[%s15476_s22 + $0x24] sm:$0xff]   ;;  %vm17611_vm0 = vmand %vm1448_vm11, %vm18738_vm14 }
 0x28c   : > { %v4043_v24 = vld [vmem:[#allocation2 + $0xc8] sm:$0xff] }
 0x28d   : > { %3401 = vst.msk [vmem:[#allocation2 + $0xd8] sm:$0xff] %vm2066_vm6, %v3360_v20  ;;  %4124 = vst.msk [vmem:[#allocation2 + $0xc0] sm:$0xff] %vm2066_vm6, %v4083_v21  ;;  %v4084_v27 = vadd.f32 %v4043_v24, %v3951_v2  ;;  %13904 = vmatmul.mubr.msk.bf16.gmra.mrb[244].mxu0 %vm1798_vm3, %v14997_v14  ;;  %13990 = vmatmul.mubr.msk.bf16.gmra.mrb[244].mxu1 %vm1798_vm3, %v4989_v26  ;;  %v5545_v20 = vor.u32 %v5543_v6, %v5541_v57  ;;  %v5549_v21 = vrot.slane %v5547_v8, 1  ;;  %v16931_v22 = vld [vmem:[%s15476_s22 + $0x2c] sm:$0xff]   ;;  %v3324_v24 = vld [vmem:[#allocation2 + $0x100] sm:$0xff] }
 0x28e   : > { %13907 = vmatprep.mubr.msk.bf16.mxu0 %vm15307_vm1, %v15306_v34  ;;  %13993 = vmatprep.mubr.msk.bf16.mxu1 %vm15307_vm1, %v15306_v34 }
 0x28f   : > { %4125 = vst.msk [vmem:[#allocation2 + $0xc8] sm:$0xff] %vm2066_vm6, %v4084_v27  ;;  %v5550_v31 = vsel %vm18743_vm7, %v5545_v20, %v5549_v21 }
 0x290   : > { %v3238_v32 = vpop.f32.mrb[140].mxu0  ;;  %v3964_v41 = vpop.f32.mrb[140].mxu1 }
 0x291   : > { %v3361_v35 = vadd.f32 %v3320_v33, %v3238_v32  ;;  %v13713_v36 = vpop.f32.mrb[141].mxu0  ;;  %v13799_v48 = vpop.f32.mrb[141].mxu1  ;;  %v5551_v33 = vshrl.u32 %v16906_v58, 16 }
 0x292   : > { %v3241_v39 = vpop.f32.mrb[142].mxu0  ;;  %v4044_v40 = vld [vmem:[#allocation2 + $0xd0] sm:$0xff]  ;;  %v3967_v51 = vpop.f32.mrb[142].mxu1 }
 0x293   : > { %3402 = vst.msk [vmem:[#allocation2 + $0xe0] sm:$0xff] %vm2066_vm6, %v3361_v35  ;;  %v3362_v45 = vadd.f32 %v3321_v37, %v3241_v39  ;;  %v4085_v46 = vadd.f32 %v4044_v40, %v3956_v18  ;;  %v13714_v47 = vpop.f32.mrb[143].mxu0  ;;  %v13800_v55 = vpop.f32.mrb[143].mxu1  ;;  %v5555_v35 = vshll.u32 %v16931_v22, 16  ;;  %v16953_v48 = vld [vmem:[%s15476_s22 + $0x34] sm:$0xff]  }
 0x294   : > { %v4045_v50 = vld [vmem:[#allocation2 + $0xd8] sm:$0xff]  ;;  %v5567_v20 = vshrl.u32 %v16953_v48, 16 }
 0x295   : > { %3403 = vst.msk [vmem:[#allocation2 + $0xe8] sm:$0xff] %vm2066_vm6, %v3362_v45  ;;  %4126 = vst.msk [vmem:[#allocation2 + $0xd0] sm:$0xff] %vm2066_vm6, %v4085_v46  ;;  %v4086_v54 = vadd.f32 %v4045_v50, %v3959_v25  ;;  %13908 = vmatmul.mubr.msk.bf16.gmra.mrb[248].mxu0 %vm1798_vm3, %v14999_v38  ;;  %13994 = vmatmul.mubr.msk.bf16.gmra.mrb[248].mxu1 %vm1798_vm3, %v4992_v49  ;;  %v6240_v25 = vrot.slane %v16923_v17, 1  ;;  %v5553_v46 = vor.u32 %v5551_v33, %v5549_v21  ;;  %v3326_v50 = vld [vmem:[#allocation2 + $0x110] sm:$0xff]  ;;  %v3327_v55 = vld [vmem:[#allocation2 + $0x118] sm:$0xff] }
 0x296   : > { %13999 = vmatprep.mubr.msk.bf16.mxu0 %vm15307_vm1, %v15306_v34  ;;  %14085 = vmatprep.mubr.msk.bf16.mxu1 %vm15307_vm1, %v15306_v34  ;;  %v5557_v47 = vrot.slane %v5555_v35, 1  ;;  %v15012_v35 = vld [vmem:[%s15476_s22 + $0x44] sm:$0xff]  }
 0x297   : > { %4127 = vst.msk [vmem:[#allocation2 + $0xd8] sm:$0xff] %vm2066_vm6, %v4086_v54  ;;  %v6241_v42 = vsel %vm18742_vm8, %v6238_v63, %v6240_v25 }
 0x298   : > { %v3246_v59 = vpop.f32.mrb[144].mxu0  ;;  %v3972_v7 = vpop.f32.mrb[144].mxu1  ;;  %v5558_v57 = vsel %vm18743_vm7, %v5553_v46, %v5557_v47 }
 0x299   : > { %v3363_v0 = vadd.f32 %v3322_v60, %v3246_v59  ;;  %v13717_v1 = vpop.f32.mrb[145].mxu0  ;;  %v13803_v13 = vpop.f32.mrb[145].mxu1  ;;  %v5559_v59 = vshrl.u32 %v16931_v22, 16  ;;  %v5563_v60 = vshll.u32 %v16953_v48, 16 }
 0x29a   : > { %v3249_v2 = vpop.f32.mrb[146].mxu0  ;;  %v4046_v4 = vld [vmem:[#allocation2 + $0xe0] sm:$0xff]  ;;  %v3975_v15 = vpop.f32.mrb[146].mxu1 }
 0x29b   : > { %3404 = vst.msk [vmem:[#allocation2 + $0xf0] sm:$0xff] %vm2066_vm6, %v3363_v0  ;;  %v3364_v9 = vadd.f32 %v3323_v3, %v3249_v2  ;;  %v4087_v10 = vadd.f32 %v4046_v4, %v3964_v41  ;;  %v13718_v11 = vpop.f32.mrb[147].mxu0  ;;  %v13804_v19 = vpop.f32.mrb[147].mxu1  ;;  %v16966_v4 = vld [vmem:[%s15476_s22 + $0x34] sm:$0xff]   ;;  %v5565_v8 = vrot.slane %v5563_v60, 1  ;;  %v15014_v60 = vld [vmem:[%s15476_s22 + $0x4c] sm:$0xff]  }
 0x29c   : > { %v4047_v14 = vld [vmem:[#allocation2 + $0xe8] sm:$0xff]  ;;  %v3328_v11 = vld [vmem:[#allocation2 + $0x120] sm:$0xff] }
 0x29d   : > { %3405 = vst.msk [vmem:[#allocation2 + $0xf8] sm:$0xff] %vm2066_vm6, %v3364_v9  ;;  %4128 = vst.msk [vmem:[#allocation2 + $0xe0] sm:$0xff] %vm2066_vm6, %v4087_v10  ;;  %v4088_v18 = vadd.f32 %v4047_v14, %v3967_v51  ;;  %14000 = vmatmul.mubr.msk.bf16.vlgmr.msra.gmra.mrb[252].mxu0 %vm1798_vm3, %v5542_v5  ;;  %14086 = vmatmul.mubr.msk.bf16.vlgmr.msra.gmra.mrb[252].mxu1 %vm1798_vm3, %v6239_v16  ;;  %v6242_v51 = vrot.slane %v16945_v43, 1  ;;  %v16974_v9 = vld [vmem:[%s15476_s22 + $0x3c] sm:$0xff]   ;;  %v3329_v16 = vld [vmem:[#allocation2 + $0x128] sm:$0xff] }
 0x29e   : > { %14170 = vmatpush3.bf16.msra.mxu0 %v7069_v12  ;;  %14003 = vmatprep.mubr.msk.bf16.mxu0 %vm15307_vm1, %v15306_v34  ;;  %v6244_v12 = vrot.slane %v16966_v4, 1  ;;  %v5571_v21 = vshll.u32 %v16974_v9, 16  ;;  %v5575_v46 = vshrl.u32 %v16974_v9, 16 }
 0x29f   : > { %4129 = vst.msk [vmem:[#allocation2 + $0xe8] sm:$0xff] %vm2066_vm6, %v4088_v18  ;;  %14351 = vmatprep.subr.bf16.mxu0 %v15306_v34  ;;  %14089 = vmatprep.mubr.msk.bf16.mxu1 %vm15307_vm1, %v15306_v34  ;;  %v6243_v3 = vsel %vm18742_vm8, %v6240_v25, %v6242_v51 }
 0x2a0   : > { %v3254_v23 = vpop.f32.mrb[148].mxu0  ;;  %v3980_v32 = vpop.f32.mrb[148].mxu1  ;;  %v5573_v33 = vrot.slane %v5571_v21, 1  ;;  %v4553_v21 = vld [vmem:[#allocation2] sm:$0xff] }
 0x2a1   : > { %v3365_v26 = vadd.f32 %v3324_v24, %v3254_v23  ;;  %v13721_v27 = vpop.f32.mrb[149].mxu0  ;;  %v13807_v39 = vpop.f32.mrb[149].mxu1 }
 0x2a2   : > { %v3257_v28 = vpop.f32.mrb[150].mxu0  ;;  %v4048_v30 = vld [vmem:[#allocation2 + $0xf0] sm:$0xff]  ;;  %v3983_v41 = vpop.f32.mrb[150].mxu1 }
 0x2a3   : > { %3406 = vst.msk [vmem:[#allocation2 + $0x100] sm:$0xff] %vm2066_vm6, %v3365_v26  ;;  %v3366_v36 = vadd.f32 %v3325_v29, %v3257_v28  ;;  %v4089_v37 = vadd.f32 %v4048_v30, %v3972_v7  ;;  %v13722_v38 = vpop.f32.mrb[151].mxu0  ;;  %v13808_v45 = vpop.f32.mrb[151].mxu1  ;;  %v5561_v7 = vor.u32 %v5559_v59, %v5557_v47  ;;  %v6245_v28 = vsel %vm18742_vm8, %v6242_v51, %v6244_v12  ;;  %v16987_v29 = vld [vmem:[%s15476_s22 + $0x3c] sm:$0xff]  }
 0x2a4   : > { %v4049_v40 = vld [vmem:[#allocation2 + $0xf8] sm:$0xff]  ;;  %v6246_v38 = vrot.slane %v16987_v29, 1  ;;  %v5579_v47 = vshll.u32 %v15012_v35, 16 }
 0x2a5   : > { %3407 = vst.msk [vmem:[#allocation2 + $0x108] sm:$0xff] %vm2066_vm6, %v3366_v36  ;;  %4130 = vst.msk [vmem:[#allocation2 + $0xf0] sm:$0xff] %vm2066_vm6, %v4089_v37  ;;  %v4090_v44 = vadd.f32 %v4049_v40, %v3975_v15  ;;  %14004 = vmatmul.mubr.msk.bf16.gmra.mrb[0].mxu0 %vm1798_vm3, %v5550_v31  ;;  %14090 = vmatmul.mubr.msk.bf16.gmra.mrb[0].mxu1 %vm1798_vm3, %v6241_v42  ;;  %v5566_v18 = vsel %vm18743_vm7, %v5561_v7, %v5565_v8  ;;  %v3330_v37 = vld [vmem:[#allocation2 + $0x130] sm:$0xff]  ;;  %v3331_v42 = vld [vmem:[#allocation2 + $0x138] sm:$0xff]  ;;  %v5587_v7 = vshll.u32 %v15014_v60, 16 }
 0x2a6   : > { %14007 = vmatprep.mubr.msk.bf16.mxu0 %vm15307_vm1, %v15306_v34  ;;  %14093 = vmatprep.mubr.msk.bf16.mxu1 %vm15307_vm1, %v15306_v34  ;;  %v5581_v59 = vrot.slane %v5579_v47, 1 }
 0x2a7   : > { %4131 = vst.msk [vmem:[#allocation2 + $0xf8] sm:$0xff] %vm2066_vm6, %v4090_v44 }
 0x2a8   : > { %v3262_v49 = vpop.f32.mrb[152].mxu0  ;;  %v3988_v58 = vpop.f32.mrb[152].mxu1 }
 0x2a9   : > { %v3367_v52 = vadd.f32 %v3326_v50, %v3262_v49  ;;  %v13725_v53 = vpop.f32.mrb[153].mxu0  ;;  %v13811_v0 = vpop.f32.mrb[153].mxu1 }
 0x2aa   : > { %v3265_v54 = vpop.f32.mrb[154].mxu0  ;;  %v4050_v56 = vld [vmem:[#allocation2 + $0x100] sm:$0xff]  ;;  %v3991_v2 = vpop.f32.mrb[154].mxu1 }
 0x2ab   : > { %3408 = vst.msk [vmem:[#allocation2 + $0x110] sm:$0xff] %vm2066_vm6, %v3367_v52  ;;  %v3368_v61 = vadd.f32 %v3327_v55, %v3265_v54  ;;  %v4091_v62 = vadd.f32 %v4050_v56, %v3980_v32  ;;  %v13726_v63 = vpop.f32.mrb[155].mxu0  ;;  %v13812_v6 = vpop.f32.mrb[155].mxu1  ;;  %v5569_v32 = vor.u32 %v5567_v20, %v5565_v8  ;;  %v6247_v54 = vsel %vm18742_vm8, %v6244_v12, %v6246_v38  ;;  %v17005_v55 = vld [vmem:[%s15476_s22 + $0x44] sm:$0xff]  }
 0x2ac   : > { %v4051_v1 = vld [vmem:[#allocation2 + $0x108] sm:$0xff]  ;;  %v6248_v63 = vrot.slane %v17005_v55, 1  ;;  %v5583_v6 = vshrl.u32 %v15012_v35, 16 }
 0x2ad   : > { %3409 = vst.msk [vmem:[#allocation2 + $0x118] sm:$0xff] %vm2066_vm6, %v3368_v61  ;;  %4132 = vst.msk [vmem:[#allocation2 + $0x100] sm:$0xff] %vm2066_vm6, %v4091_v62  ;;  %v4092_v5 = vadd.f32 %v4051_v1, %v3983_v41  ;;  %14008 = vmatmul.mubr.msk.bf16.gmra.mrb[4].mxu0 %vm1798_vm3, %v5558_v57  ;;  %14094 = vmatmul.mubr.msk.bf16.gmra.mrb[4].mxu1 %vm1798_vm3, %v6243_v3  ;;  %v5574_v44 = vsel %vm18743_vm7, %v5569_v32, %v5573_v33  ;;  %v3332_v62 = vld [vmem:[#allocation2 + $0x140] sm:$0xff] }
 0x2ae   : > { %14011 = vmatprep.mubr.msk.bf16.mxu0 %vm15307_vm1, %v15306_v34  ;;  %14097 = vmatprep.mubr.msk.bf16.mxu1 %vm15307_vm1, %v15306_v34  ;;  %v6249_v12 = vsel %vm18742_vm8, %v6246_v38, %v6248_v63 }
 0x2af   : > { %4133 = vst.msk [vmem:[#allocation2 + $0x108] sm:$0xff] %vm2066_vm6, %v4092_v5 }
 0x2b0   : > { %v3270_v10 = vpop.f32.mrb[156].mxu0  ;;  %v3996_v19 = vpop.f32.mrb[156].mxu1 }
 0x2b1   : > { %v3369_v13 = vadd.f32 %v3328_v11, %v3270_v10  ;;  %v13729_v14 = vpop.f32.mrb[157].mxu0  ;;  %v13815_v25 = vpop.f32.mrb[157].mxu1 }
 0x2b2   : > { %v3273_v15 = vpop.f32.mrb[158].mxu0  ;;  %v4052_v17 = vld [vmem:[#allocation2 + $0x110] sm:$0xff]  ;;  %v3999_v27 = vpop.f32.mrb[158].mxu1 }
 0x2b3   : > { %3410 = vst.msk [vmem:[#allocation2 + $0x120] sm:$0xff] %vm2066_vm6, %v3369_v13  ;;  %v3370_v22 = vadd.f32 %v3329_v16, %v3273_v15  ;;  %v4093_v23 = vadd.f32 %v4052_v17, %v3988_v58  ;;  %v13730_v24 = vpop.f32.mrb[159].mxu0  ;;  %v13816_v31 = vpop.f32.mrb[159].mxu1  ;;  %v5577_v58 = vor.u32 %v5575_v46, %v5573_v33  ;;  %v17022_v14 = vld [vmem:[%s15476_s22 + $0x4c] sm:$0xff]   ;;  %v5585_v17 = vor.u32 %v5583_v6, %v5581_v59  ;;  %v4557_v6 = vld [vmem:[#allocation2 + $0x20] sm:$0xff] }
 0x2b4   : > { %v4053_v26 = vld [vmem:[#allocation2 + $0x118] sm:$0xff] }
 0x2b5   : > { %3411 = vst.msk [vmem:[#allocation2 + $0x128] sm:$0xff] %vm2066_vm6, %v3370_v22  ;;  %4134 = vst.msk [vmem:[#allocation2 + $0x110] sm:$0xff] %vm2066_vm6, %v4093_v23  ;;  %v4094_v30 = vadd.f32 %v4053_v26, %v3991_v2  ;;  %14012 = vmatmul.mubr.msk.bf16.gmra.mrb[8].mxu0 %vm1798_vm3, %v5566_v18  ;;  %14098 = vmatmul.mubr.msk.bf16.gmra.mrb[8].mxu1 %vm1798_vm3, %v6245_v28  ;;  %v5582_v4 = vsel %vm18743_vm7, %v5577_v58, %v5581_v59  ;;  %v5589_v18 = vrot.slane %v5587_v7, 1 }
 0x2b6   : > { %14015 = vmatprep.mubr.msk.bf16.mxu0 %vm15307_vm1, %v15306_v34  ;;  %14101 = vmatprep.mubr.msk.bf16.mxu1 %vm15307_vm1, %v15306_v34  ;;  %v6250_v22 = vrot.slane %v17022_v14, 1 }
 0x2b7   : > { %4135 = vst.msk [vmem:[#allocation2 + $0x118] sm:$0xff] %vm2066_vm6, %v4094_v30  ;;  %v5590_v28 = vsel %vm18743_vm7, %v5585_v17, %v5589_v18  ;;  %v5591_v30 = vshrl.u32 %v15014_v60, 16 }
 0x2b8   : > { %v3278_v36 = vpop.f32.mrb[160].mxu0  ;;  %v4004_v45 = vpop.f32.mrb[160].mxu1  ;;  %v6251_v38 = vsel %vm18742_vm8, %v6248_v63, %v6250_v22  ;;  %v17057_v63 = vld [vmem:[%s15476_s22 + $0x5c] sm:$0xff]  }
 0x2b9   : > { %v3371_v39 = vadd.f32 %v3330_v37, %v3278_v36  ;;  %v13733_v40 = vpop.f32.mrb[161].mxu0  ;;  %v13819_v51 = vpop.f32.mrb[161].mxu1  ;;  %v6254_v7 = vrot.slane %v17057_v63, 1 }
 0x2ba   : > { %v3281_v41 = vpop.f32.mrb[162].mxu0  ;;  %v4054_v43 = vld [vmem:[#allocation2 + $0x120] sm:$0xff]  ;;  %v4007_v53 = vpop.f32.mrb[162].mxu1 }
 0x2bb   : > { %3412 = vst.msk [vmem:[#allocation2 + $0x130] sm:$0xff] %vm2066_vm6, %v3371_v39  ;;  %v3372_v48 = vadd.f32 %v3331_v42, %v3281_v41  ;;  %v4095_v49 = vadd.f32 %v4054_v43, %v3996_v19  ;;  %v13734_v50 = vpop.f32.mrb[163].mxu0  ;;  %v13820_v57 = vpop.f32.mrb[163].mxu1  ;;  %v15016_v19 = vld [vmem:[%s15476_s22 + $0x54] sm:$0xff]   ;;  %v5593_v41 = vor.u32 %v5591_v30, %v5589_v18  ;;  %v17046_v43 = vld [vmem:[%s15476_s22 + $0x5c] sm:$0xff]  }
 0x2bc   : > { %v4055_v52 = vld [vmem:[#allocation2 + $0x128] sm:$0xff]  ;;  %v5595_v31 = vshll.u32 %v15016_v19, 16  ;;  %v17038_v39 = vld [vmem:[%s15476_s22 + $0x54] sm:$0xff]   ;;  %v5603_v55 = vshll.u32 %v17046_v43, 16 }
 0x2bd   : > { %3413 = vst.msk [vmem:[#allocation2 + $0x138] sm:$0xff] %vm2066_vm6, %v3372_v48  ;;  %4136 = vst.msk [vmem:[#allocation2 + $0x120] sm:$0xff] %vm2066_vm6, %v4095_v49  ;;  %v4096_v56 = vadd.f32 %v4055_v52, %v3999_v27  ;;  %14016 = vmatmul.mubr.msk.bf16.gmra.mrb[12].mxu0 %vm1798_vm3, %v5574_v44  ;;  %14102 = vmatmul.mubr.msk.bf16.gmra.mrb[12].mxu1 %vm1798_vm3, %v6247_v54  ;;  %v4554_v27 = vld [vmem:[#allocation2 + $0x8] sm:$0xff]  ;;  %v6252_v46 = vrot.slane %v17038_v39, 1  ;;  %v4556_v50 = vld [vmem:[#allocation2 + $0x18] sm:$0xff]  ;;  %v5599_v54 = vshrl.u32 %v15016_v19, 16 }
 0x2be   : > { %14019 = vmatprep.mubr.msk.bf16.mxu0 %vm15307_vm1, %v15306_v34  ;;  %14105 = vmatprep.mubr.msk.bf16.mxu1 %vm15307_vm1, %v15306_v34  ;;  %v5597_v42 = vrot.slane %v5595_v31, 1  ;;  %v4559_v31 = vld [vmem:[#allocation2 + $0x30] sm:$0xff] }
 0x2bf   : > { %4137 = vst.msk [vmem:[#allocation2 + $0x128] sm:$0xff] %vm2066_vm6, %v4096_v56 }
 0x2c0   : > { %v3286_v61 = vpop.f32.mrb[164].mxu0  ;;  %v4012_v5 = vpop.f32.mrb[164].mxu1  ;;  %v5598_v52 = vsel %vm18743_vm7, %v5593_v41, %v5597_v42 }
 0x2c1   : > { %v3373_v0 = vadd.f32 %v3332_v62, %v3286_v61  ;;  %v13737_v1 = vpop.f32.mrb[165].mxu0  ;;  %v13823_v10 = vpop.f32.mrb[165].mxu1  ;;  %v6253_v62 = vsel %vm18742_vm8, %v6250_v22, %v6252_v46 }
 0x2c2   : > { %v3289_v2 = vpop.f32.mrb[166].mxu0  ;;  %v4056_v3 = vld [vmem:[#allocation2 + $0x130] sm:$0xff]  ;;  %v4015_v13 = vpop.f32.mrb[166].mxu1 }
 0x2c3   : > { %3414 = vst.msk [vmem:[#allocation2 + $0x140] sm:$0xff] %vm2066_vm6, %v3373_v0  ;;  %v4097_v8 = vadd.f32 %v4056_v3, %v4004_v45  ;;  %v13738_v9 = vpop.f32.mrb[167].mxu0  ;;  %v13824_v16 = vpop.f32.mrb[167].mxu1  ;;  %v4555_v45 = vld [vmem:[#allocation2 + $0x10] sm:$0xff]  ;;  %v5601_v2 = vor.u32 %v5599_v54, %v5597_v42  ;;  %v5605_v3 = vrot.slane %v5603_v55, 1 }
 0x2c4   : > { %v4057_v11 = vld [vmem:[#allocation2 + $0x138] sm:$0xff] }
 0x2c5   : > { %4138 = vst.msk [vmem:[#allocation2 + $0x130] sm:$0xff] %vm2066_vm6, %v4097_v8  ;;  %v4098_v15 = vadd.f32 %v4057_v11, %v4007_v53  ;;  %14020 = vmatmul.mubr.msk.bf16.gmra.mrb[16].mxu0 %vm1798_vm3, %v5582_v4  ;;  %14106 = vmatmul.mubr.msk.bf16.gmra.mrb[16].mxu1 %vm1798_vm3, %v6249_v12  ;;  %v17065_v4 = vld [vmem:[%s15476_s22 + $0x64] sm:$0xff]   ;;  %v5606_v13 = vsel %vm18743_vm7, %v5601_v2, %v5605_v3  ;;  %v17107_v55 = vld [vmem:[%s15476_s22 + $0x74] sm:$0xff]  }
 0x2c6   : > { %14023 = vmatprep.mubr.msk.bf16.mxu0 %vm15307_vm1, %v15306_v34  ;;  %14109 = vmatprep.mubr.msk.bf16.mxu1 %vm15307_vm1, %v15306_v34  ;;  %v4558_v11 = vld [vmem:[#allocation2 + $0x28] sm:$0xff]  ;;  %v5611_v16 = vshll.u32 %v17065_v4, 16  ;;  %v5615_v41 = vshrl.u32 %v17065_v4, 16 }
 0x2c7   : > { %4139 = vst.msk [vmem:[#allocation2 + $0x138] sm:$0xff] %vm2066_vm6, %v4098_v15  ;;  %v5607_v15 = vshrl.u32 %v17046_v43, 16 }
 0x2c8   : > { %v4387_v20 = vpop.f32.mrb[168].mxu0  ;;  %v5093_v29 = vpop.f32.mrb[168].mxu1 }
 0x2c9   : > { %v4594_v23 = vadd.f32 %v4553_v21, %v4387_v20  ;;  %v13829_v24 = vpop.f32.mrb[169].mxu0  ;;  %v13915_v36 = vpop.f32.mrb[169].mxu1 }
 0x2ca   : > { %v4058_v25 = vld [vmem:[#allocation2 + $0x140] sm:$0xff]  ;;  %v4390_v26 = vpop.f32.mrb[170].mxu0  ;;  %v5096_v37 = vpop.f32.mrb[170].mxu1 }
 0x2cb   : > { %4635 = vst.msk [vmem:[#allocation2] sm:$0xff] %vm2066_vm6, %v4594_v23  ;;  %v4099_v32 = vadd.f32 %v4058_v25, %v4012_v5  ;;  %v4595_v33 = vadd.f32 %v4554_v27, %v4390_v26  ;;  %v13830_v35 = vpop.f32.mrb[171].mxu0  ;;  %v13916_v40 = vpop.f32.mrb[171].mxu1  ;;  %v6255_v23 = vsel %vm18742_vm8, %v6252_v46, %v6254_v7  ;;  %v17078_v24 = vld [vmem:[%s15476_s22 + $0x64] sm:$0xff]   ;;  %v5609_v27 = vor.u32 %v5607_v15, %v5605_v3 }
 0x2cc   : > { %v5627_v3 = vshll.u32 %v17107_v55, 16 }
 0x2cd   : > { %4140 = vst.msk [vmem:[#allocation2 + $0x140] sm:$0xff] %vm2066_vm6, %v4099_v32  ;;  %4636 = vst.msk [vmem:[#allocation2 + $0x8] sm:$0xff] %vm2066_vm6, %v4595_v33  ;;  %14024 = vmatmul.mubr.msk.bf16.gmra.mrb[20].mxu0 %vm1798_vm3, %v5590_v28  ;;  %14110 = vmatmul.mubr.msk.bf16.gmra.mrb[20].mxu1 %vm1798_vm3, %v6251_v38  ;;  %v5613_v28 = vrot.slane %v5611_v16, 1  ;;  %v6256_v32 = vrot.slane %v17078_v24, 1  ;;  %v17128_v16 = vld [vmem:[%s15476_s22 + $0x7c] sm:$0xff]  }
 0x2ce   : > { %14027 = vmatprep.mubr.msk.bf16.mxu0 %vm15307_vm1, %v15306_v34  ;;  %14113 = vmatprep.mubr.msk.bf16.mxu1 %vm15307_vm1, %v15306_v34  ;;  %v5629_v15 = vrot.slane %v5627_v3, 1  ;;  %v17170_v3 = vld [vmem:[%s15476_s22 + $0x8c] sm:$0xff]  }
 0x2cf   : > { %v5614_v39 = vsel %vm18743_vm7, %v5609_v27, %v5613_v28  ;;  %v5631_v27 = vshrl.u32 %v17107_v55, 16 }
 0x2d0   : > { %v4395_v44 = vpop.f32.mrb[172].mxu0  ;;  %v5101_v53 = vpop.f32.mrb[172].mxu1 }
 0x2d1   : > { %v4596_v47 = vadd.f32 %v4555_v45, %v4395_v44  ;;  %v13833_v48 = vpop.f32.mrb[173].mxu0  ;;  %v13919_v59 = vpop.f32.mrb[173].mxu1 }
 0x2d2   : > { %v4398_v49 = vpop.f32.mrb[174].mxu0  ;;  %v5259_v51 = vld [vmem:[#allocation2] sm:$0xff]  ;;  %v5104_v61 = vpop.f32.mrb[174].mxu1 }
 0x2d3   : > { %4637 = vst.msk [vmem:[#allocation2 + $0x10] sm:$0xff] %vm2066_vm6, %v4596_v47  ;;  %v4597_v56 = vadd.f32 %v4556_v50, %v4398_v49  ;;  %v5300_v57 = vadd.f32 %v5259_v51, %v5093_v29  ;;  %v13834_v58 = vpop.f32.mrb[175].mxu0  ;;  %v13920_v1 = vpop.f32.mrb[175].mxu1  ;;  %v17086_v29 = vld [vmem:[%s15476_s22 + $0x6c] sm:$0xff]   ;;  %v6257_v49 = vsel %vm18742_vm8, %v6254_v7, %v6256_v32 }
 0x2d4   : > { %v5260_v60 = vld [vmem:[#allocation2 + $0x8] sm:$0xff]  ;;  %v5619_v42 = vshll.u32 %v17086_v29, 16  ;;  %v5623_v2 = vshrl.u32 %v17086_v29, 16 }
 0x2d5   : > { %4638 = vst.msk [vmem:[#allocation2 + $0x18] sm:$0xff] %vm2066_vm6, %v4597_v56  ;;  %5341 = vst.msk [vmem:[#allocation2] sm:$0xff] %vm2066_vm6, %v5300_v57  ;;  %v5301_v0 = vadd.f32 %v5260_v60, %v5096_v37  ;;  %14028 = vmatmul.mubr.msk.bf16.gmra.mrb[24].mxu0 %vm1798_vm3, %v5598_v52  ;;  %14114 = vmatmul.mubr.msk.bf16.gmra.mrb[24].mxu1 %vm1798_vm3, %v6253_v62  ;;  %v4560_v37 = vld [vmem:[#allocation2 + $0x38] sm:$0xff]  ;;  %v17099_v50 = vld [vmem:[%s15476_s22 + $0x6c] sm:$0xff]  }
 0x2d6   : > { %14031 = vmatprep.mubr.msk.bf16.mxu0 %vm15307_vm1, %v15306_v34  ;;  %14117 = vmatprep.mubr.msk.bf16.mxu1 %vm15307_vm1, %v15306_v34  ;;  %v5621_v54 = vrot.slane %v5619_v42, 1  ;;  %v4561_v57 = vld [vmem:[#allocation2 + $0x40] sm:$0xff]  ;;  %v6258_v58 = vrot.slane %v17099_v50, 1  ;;  %v4562_v62 = vld [vmem:[#allocation2 + $0x48] sm:$0xff] }
 0x2d7   : > { %5342 = vst.msk [vmem:[#allocation2 + $0x8] sm:$0xff] %vm2066_vm6, %v5301_v0  ;;  %v17149_v42 = vld [vmem:[%s15476_s22 + $0x84] sm:$0xff]  }
 0x2d8   : > { %v4403_v5 = vpop.f32.mrb[176].mxu0  ;;  %v5109_v14 = vpop.f32.mrb[176].mxu1 }
 0x2d9   : > { %v4598_v8 = vadd.f32 %v4557_v6, %v4403_v5  ;;  %v13837_v9 = vpop.f32.mrb[177].mxu0  ;;  %v13923_v20 = vpop.f32.mrb[177].mxu1 }
 0x2da   : > { %v4406_v10 = vpop.f32.mrb[178].mxu0  ;;  %v5261_v12 = vld [vmem:[#allocation2 + $0x10] sm:$0xff]  ;;  %v5112_v22 = vpop.f32.mrb[178].mxu1 }
 0x2db   : > { %4639 = vst.msk [vmem:[#allocation2 + $0x20] sm:$0xff] %vm2066_vm6, %v4598_v8  ;;  %v4599_v17 = vadd.f32 %v4558_v11, %v4406_v10  ;;  %v5302_v18 = vadd.f32 %v5261_v12, %v5101_v53  ;;  %v13838_v19 = vpop.f32.mrb[179].mxu0  ;;  %v13924_v26 = vpop.f32.mrb[179].mxu1  ;;  %v5617_v53 = vor.u32 %v5615_v41, %v5613_v28  ;;  %v6259_v10 = vsel %vm18742_vm8, %v6256_v32, %v6258_v58  ;;  %v17120_v11 = vld [vmem:[%s15476_s22 + $0x74] sm:$0xff]  }
 0x2dc   : > { %v5262_v21 = vld [vmem:[#allocation2 + $0x18] sm:$0xff]  ;;  %v6260_v19 = vrot.slane %v17120_v11, 1  ;;  %v5635_v28 = vshll.u32 %v17128_v16, 16 }
 0x2dd   : > { %4640 = vst.msk [vmem:[#allocation2 + $0x28] sm:$0xff] %vm2066_vm6, %v4599_v17  ;;  %5343 = vst.msk [vmem:[#allocation2 + $0x10] sm:$0xff] %vm2066_vm6, %v5302_v18  ;;  %v5303_v25 = vadd.f32 %v5262_v21, %v5104_v61  ;;  %14032 = vmatmul.mubr.msk.bf16.gmra.mrb[28].mxu0 %vm1798_vm3, %v5606_v13  ;;  %14118 = vmatmul.mubr.msk.bf16.gmra.mrb[28].mxu1 %vm1798_vm3, %v6255_v23  ;;  %v5622_v0 = vsel %vm18743_vm7, %v5617_v53, %v5621_v54  ;;  %v4563_v18 = vld [vmem:[#allocation2 + $0x50] sm:$0xff]  ;;  %v4564_v23 = vld [vmem:[#allocation2 + $0x58] sm:$0xff]  ;;  %v5639_v53 = vshrl.u32 %v17128_v16, 16 }
 0x2de   : > { %14035 = vmatprep.mubr.msk.bf16.mxu0 %vm15307_vm1, %v15306_v34  ;;  %14121 = vmatprep.mubr.msk.bf16.mxu1 %vm15307_vm1, %v15306_v34  ;;  %v5637_v41 = vrot.slane %v5635_v28, 1  ;;  %v17191_v28 = vld [vmem:[%s15476_s22 + $0x94] sm:$0xff]  }
 0x2df   : > { %5344 = vst.msk [vmem:[#allocation2 + $0x18] sm:$0xff] %vm2066_vm6, %v5303_v25 }
 0x2e0   : > { %v4411_v30 = vpop.f32.mrb[180].mxu0  ;;  %v5117_v40 = vpop.f32.mrb[180].mxu1 }
 0x2e1   : > { %v4600_v33 = vadd.f32 %v4559_v31, %v4411_v30  ;;  %v13841_v35 = vpop.f32.mrb[181].mxu0  ;;  %v13927_v46 = vpop.f32.mrb[181].mxu1 }
 0x2e2   : > { %v4414_v36 = vpop.f32.mrb[182].mxu0  ;;  %v5263_v38 = vld [vmem:[#allocation2 + $0x20] sm:$0xff]  ;;  %v5120_v48 = vpop.f32.mrb[182].mxu1 }
 0x2e3   : > { %4641 = vst.msk [vmem:[#allocation2 + $0x30] sm:$0xff] %vm2066_vm6, %v4600_v33  ;;  %v4601_v43 = vadd.f32 %v4560_v37, %v4414_v36  ;;  %v5304_v44 = vadd.f32 %v5263_v38, %v5109_v14  ;;  %v13842_v45 = vpop.f32.mrb[183].mxu0  ;;  %v13928_v52 = vpop.f32.mrb[183].mxu1  ;;  %v5625_v14 = vor.u32 %v5623_v2, %v5621_v54  ;;  %v6261_v36 = vsel %vm18742_vm8, %v6258_v58, %v6260_v19  ;;  %v17141_v37 = vld [vmem:[%s15476_s22 + $0x7c] sm:$0xff]  }
 0x2e4   : > { %v5264_v47 = vld [vmem:[#allocation2 + $0x28] sm:$0xff]  ;;  %v6262_v45 = vrot.slane %v17141_v37, 1  ;;  %v5643_v54 = vshll.u32 %v17149_v42, 16 }
 0x2e5   : > { %4642 = vst.msk [vmem:[#allocation2 + $0x38] sm:$0xff] %vm2066_vm6, %v4601_v43  ;;  %5345 = vst.msk [vmem:[#allocation2 + $0x20] sm:$0xff] %vm2066_vm6, %v5304_v44  ;;  %v5305_v51 = vadd.f32 %v5264_v47, %v5112_v22  ;;  %14036 = vmatmul.mubr.msk.bf16.gmra.mrb[32].mxu0 %vm1798_vm3, %v5614_v39  ;;  %14122 = vmatmul.mubr.msk.bf16.gmra.mrb[32].mxu1 %vm1798_vm3, %v6257_v49  ;;  %v5630_v25 = vsel %vm18743_vm7, %v5625_v14, %v5629_v15  ;;  %v4565_v44 = vld [vmem:[#allocation2 + $0x60] sm:$0xff]  ;;  %v4566_v49 = vld [vmem:[#allocation2 + $0x68] sm:$0xff]  ;;  %v5647_v14 = vshrl.u32 %v17149_v42, 16 }
 0x2e6   : > { %14039 = vmatprep.mubr.msk.bf16.mxu0 %vm15307_vm1, %v15306_v34  ;;  %14125 = vmatprep.mubr.msk.bf16.mxu1 %vm15307_vm1, %v15306_v34  ;;  %v5645_v2 = vrot.slane %v5643_v54, 1  ;;  %v17212_v54 = vld [vmem:[%s15476_s22 + $0x9c] sm:$0xff]  }
 0x2e7   : > { %5346 = vst.msk [vmem:[#allocation2 + $0x28] sm:$0xff] %vm2066_vm6, %v5305_v51 }
 0x2e8   : > { %v4419_v56 = vpop.f32.mrb[184].mxu0  ;;  %v5125_v1 = vpop.f32.mrb[184].mxu1 }
 0x2e9   : > { %v4602_v59 = vadd.f32 %v4561_v57, %v4419_v56  ;;  %v13845_v60 = vpop.f32.mrb[185].mxu0  ;;  %v13931_v7 = vpop.f32.mrb[185].mxu1 }
 0x2ea   : > { %v4422_v61 = vpop.f32.mrb[186].mxu0  ;;  %v5265_v63 = vld [vmem:[#allocation2 + $0x30] sm:$0xff]  ;;  %v5128_v9 = vpop.f32.mrb[186].mxu1 }
 0x2eb   : > { %4643 = vst.msk [vmem:[#allocation2 + $0x40] sm:$0xff] %vm2066_vm6, %v4602_v59  ;;  %v4603_v4 = vadd.f32 %v4562_v62, %v4422_v61  ;;  %v5306_v5 = vadd.f32 %v5265_v63, %v5117_v40  ;;  %v13846_v6 = vpop.f32.mrb[187].mxu0  ;;  %v13932_v13 = vpop.f32.mrb[187].mxu1  ;;  %v5633_v40 = vor.u32 %v5631_v27, %v5629_v15  ;;  %v6263_v61 = vsel %vm18742_vm8, %v6260_v19, %v6262_v45  ;;  %v17162_v62 = vld [vmem:[%s15476_s22 + $0x84] sm:$0xff]  }
 0x2ec   : > { %v5266_v8 = vld [vmem:[#allocation2 + $0x38] sm:$0xff]  ;;  %v6264_v6 = vrot.slane %v17162_v62, 1  ;;  %v5651_v15 = vshll.u32 %v17170_v3, 16 }
 0x2ed   : > { %4644 = vst.msk [vmem:[#allocation2 + $0x48] sm:$0xff] %vm2066_vm6, %v4603_v4  ;;  %5347 = vst.msk [vmem:[#allocation2 + $0x30] sm:$0xff] %vm2066_vm6, %v5306_v5  ;;  %v5307_v12 = vadd.f32 %v5266_v8, %v5120_v48  ;;  %14040 = vmatmul.mubr.msk.bf16.gmra.mrb[36].mxu0 %vm1798_vm3, %v5622_v0  ;;  %14126 = vmatmul.mubr.msk.bf16.gmra.mrb[36].mxu1 %vm1798_vm3, %v6259_v10  ;;  %v5638_v51 = vsel %vm18743_vm7, %v5633_v40, %v5637_v41  ;;  %v4567_v5 = vld [vmem:[#allocation2 + $0x70] sm:$0xff]  ;;  %v4568_v10 = vld [vmem:[#allocation2 + $0x78] sm:$0xff]  ;;  %v5655_v40 = vshrl.u32 %v17170_v3, 16 }
 0x2ee   : > { %14043 = vmatprep.mubr.msk.bf16.mxu0 %vm15307_vm1, %v15306_v34  ;;  %14129 = vmatprep.mubr.msk.bf16.mxu1 %vm15307_vm1, %v15306_v34  ;;  %v5653_v27 = vrot.slane %v5651_v15, 1  ;;  %v17233_v15 = vld [vmem:[%s15476_s22 + $0xa4] sm:$0xff]  }
 0x2ef   : > { %5348 = vst.msk [vmem:[#allocation2 + $0x38] sm:$0xff] %vm2066_vm6, %v5307_v12 }
 0x2f0   : > { %v4427_v17 = vpop.f32.mrb[188].mxu0  ;;  %v5133_v26 = vpop.f32.mrb[188].mxu1 }
 0x2f1   : > { %v4604_v20 = vadd.f32 %v4563_v18, %v4427_v17  ;;  %v13849_v21 = vpop.f32.mrb[189].mxu0  ;;  %v13935_v32 = vpop.f32.mrb[189].mxu1 }
 0x2f2   : > { %v4430_v22 = vpop.f32.mrb[190].mxu0  ;;  %v5267_v24 = vld [vmem:[#allocation2 + $0x40] sm:$0xff]  ;;  %v5136_v35 = vpop.f32.mrb[190].mxu1 }
 0x2f3   : > { %4645 = vst.msk [vmem:[#allocation2 + $0x50] sm:$0xff] %vm2066_vm6, %v4604_v20  ;;  %v4605_v29 = vadd.f32 %v4564_v23, %v4430_v22  ;;  %v5308_v30 = vadd.f32 %v5267_v24, %v5125_v1  ;;  %v13850_v31 = vpop.f32.mrb[191].mxu0  ;;  %v13936_v39 = vpop.f32.mrb[191].mxu1  ;;  %v5641_v1 = vor.u32 %v5639_v53, %v5637_v41  ;;  %v6265_v22 = vsel %vm18742_vm8, %v6262_v45, %v6264_v6  ;;  %v17183_v23 = vld [vmem:[%s15476_s22 + $0x8c] sm:$0xff]  }
 0x2f4   : > { %v5268_v33 = vld [vmem:[#allocation2 + $0x48] sm:$0xff]  ;;  %v6266_v31 = vrot.slane %v17183_v23, 1  ;;  %v5659_v41 = vshll.u32 %v17191_v28, 16 }
 0x2f5   : > { %4646 = vst.msk [vmem:[#allocation2 + $0x58] sm:$0xff] %vm2066_vm6, %v4605_v29  ;;  %5349 = vst.msk [vmem:[#allocation2 + $0x40] sm:$0xff] %vm2066_vm6, %v5308_v30  ;;  %v5309_v38 = vadd.f32 %v5268_v33, %v5128_v9  ;;  %14044 = vmatmul.mubr.msk.bf16.gmra.mrb[40].mxu0 %vm1798_vm3, %v5630_v25  ;;  %14130 = vmatmul.mubr.msk.bf16.gmra.mrb[40].mxu1 %vm1798_vm3, %v6261_v36  ;;  %v5646_v12 = vsel %vm18743_vm7, %v5641_v1, %v5645_v2  ;;  %v4569_v30 = vld [vmem:[#allocation2 + $0x80] sm:$0xff]  ;;  %v4570_v36 = vld [vmem:[#allocation2 + $0x88] sm:$0xff]  ;;  %v5663_v1 = vshrl.u32 %v17191_v28, 16 }
 0x2f6   : > { %14047 = vmatprep.mubr.msk.bf16.mxu0 %vm15307_vm1, %v15306_v34  ;;  %14133 = vmatprep.mubr.msk.bf16.mxu1 %vm15307_vm1, %v15306_v34  ;;  %v5661_v53 = vrot.slane %v5659_v41, 1  ;;  %v17254_v41 = vld [vmem:[%s15476_s22 + $0xac] sm:$0xff]  }
 0x2f7   : > { %5350 = vst.msk [vmem:[#allocation2 + $0x48] sm:$0xff] %vm2066_vm6, %v5309_v38 }
 0x2f8   : > { %v4435_v43 = vpop.f32.mrb[192].mxu0  ;;  %v5141_v52 = vpop.f32.mrb[192].mxu1 }
 0x2f9   : > { %v4606_v46 = vadd.f32 %v4565_v44, %v4435_v43  ;;  %v13853_v47 = vpop.f32.mrb[193].mxu0  ;;  %v13939_v58 = vpop.f32.mrb[193].mxu1 }
 0x2fa   : > { %v4438_v48 = vpop.f32.mrb[194].mxu0  ;;  %v5269_v50 = vld [vmem:[#allocation2 + $0x50] sm:$0xff]  ;;  %v5144_v60 = vpop.f32.mrb[194].mxu1 }
 0x2fb   : > { %4647 = vst.msk [vmem:[#allocation2 + $0x60] sm:$0xff] %vm2066_vm6, %v4606_v46  ;;  %v4607_v55 = vadd.f32 %v4566_v49, %v4438_v48  ;;  %v5310_v56 = vadd.f32 %v5269_v50, %v5133_v26  ;;  %v13854_v57 = vpop.f32.mrb[195].mxu0  ;;  %v13940_v0 = vpop.f32.mrb[195].mxu1  ;;  %v5649_v26 = vor.u32 %v5647_v14, %v5645_v2  ;;  %v6267_v48 = vsel %vm18742_vm8, %v6264_v6, %v6266_v31  ;;  %v17204_v49 = vld [vmem:[%s15476_s22 + $0x94] sm:$0xff]  }
 0x2fc   : > { %v5270_v59 = vld [vmem:[#allocation2 + $0x58] sm:$0xff]  ;;  %v6268_v57 = vrot.slane %v17204_v49, 1  ;;  %v5667_v2 = vshll.u32 %v17212_v54, 16 }
 0x2fd   : > { %4648 = vst.msk [vmem:[#allocation2 + $0x68] sm:$0xff] %vm2066_vm6, %v4607_v55  ;;  %5351 = vst.msk [vmem:[#allocation2 + $0x50] sm:$0xff] %vm2066_vm6, %v5310_v56  ;;  %v5311_v63 = vadd.f32 %v5270_v59, %v5136_v35  ;;  %14048 = vmatmul.mubr.msk.bf16.gmra.mrb[44].mxu0 %vm1798_vm3, %v5638_v51  ;;  %14134 = vmatmul.mubr.msk.bf16.gmra.mrb[44].mxu1 %vm1798_vm3, %v6263_v61  ;;  %v5654_v38 = vsel %vm18743_vm7, %v5649_v26, %v5653_v27  ;;  %v4571_v56 = vld [vmem:[#allocation2 + $0x90] sm:$0xff]  ;;  %v4572_v61 = vld [vmem:[#allocation2 + $0x98] sm:$0xff]  ;;  %v5671_v26 = vshrl.u32 %v17212_v54, 16 }
 0x2fe   : > { %14051 = vmatprep.mubr.msk.bf16.mxu0 %vm15307_vm1, %v15306_v34  ;;  %14137 = vmatprep.mubr.msk.bf16.mxu1 %vm15307_vm1, %v15306_v34  ;;  %v5669_v14 = vrot.slane %v5667_v2, 1  ;;  %v17275_v2 = vld [vmem:[%s15476_s22 + $0xb4] sm:$0x1f]  }
 0x2ff   : > { %5352 = vst.msk [vmem:[#allocation2 + $0x58] sm:$0xff] %vm2066_vm6, %v5311_v63 }
 0x300   : > { %v4443_v4 = vpop.f32.mrb[196].mxu0  ;;  %v5149_v13 = vpop.f32.mrb[196].mxu1 }
 0x301   : > { %v4608_v7 = vadd.f32 %v4567_v5, %v4443_v4  ;;  %v13857_v8 = vpop.f32.mrb[197].mxu0  ;;  %v13943_v19 = vpop.f32.mrb[197].mxu1 }
 0x302   : > { %v4446_v9 = vpop.f32.mrb[198].mxu0  ;;  %v5271_v11 = vld [vmem:[#allocation2 + $0x60] sm:$0xff]  ;;  %v5152_v21 = vpop.f32.mrb[198].mxu1 }
 0x303   : > { %4649 = vst.msk [vmem:[#allocation2 + $0x70] sm:$0xff] %vm2066_vm6, %v4608_v7  ;;  %v4609_v16 = vadd.f32 %v4568_v10, %v4446_v9  ;;  %v5312_v17 = vadd.f32 %v5271_v11, %v5141_v52  ;;  %v13858_v18 = vpop.f32.mrb[199].mxu0  ;;  %v13944_v25 = vpop.f32.mrb[199].mxu1  ;;  %v5657_v52 = vor.u32 %v5655_v40, %v5653_v27  ;;  %v6269_v9 = vsel %vm18742_vm8, %v6266_v31, %v6268_v57  ;;  %v17225_v10 = vld [vmem:[%s15476_s22 + $0x9c] sm:$0xff]  }
 0x304   : > { %v5272_v20 = vld [vmem:[#allocation2 + $0x68] sm:$0xff]  ;;  %v6270_v18 = vrot.slane %v17225_v10, 1  ;;  %v5675_v27 = vshll.u32 %v17233_v15, 16 }
 0x305   : > { %4650 = vst.msk [vmem:[#allocation2 + $0x78] sm:$0xff] %vm2066_vm6, %v4609_v16  ;;  %5353 = vst.msk [vmem:[#allocation2 + $0x60] sm:$0xff] %vm2066_vm6, %v5312_v17  ;;  %v5313_v24 = vadd.f32 %v5272_v20, %v5144_v60  ;;  %14052 = vmatmul.mubr.msk.bf16.gmra.mrb[48].mxu0 %vm1798_vm3, %v5646_v12  ;;  %14138 = vmatmul.mubr.msk.bf16.gmra.mrb[48].mxu1 %vm1798_vm3, %v6265_v22  ;;  %v5662_v63 = vsel %vm18743_vm7, %v5657_v52, %v5661_v53  ;;  %v4573_v17 = vld [vmem:[#allocation2 + $0xa0] sm:$0xff]  ;;  %v4574_v22 = vld [vmem:[#allocation2 + $0xa8] sm:$0xff]  ;;  %v5679_v52 = vshrl.u32 %v17233_v15, 16 }
 0x306   : > { %14055 = vmatprep.mubr.msk.bf16.mxu0 %vm15307_vm1, %v15306_v34  ;;  %14141 = vmatprep.mubr.msk.bf16.mxu1 %vm15307_vm1, %v15306_v34  ;;  %v5677_v40 = vrot.slane %v5675_v27, 1 }
 0x307   : > { %5354 = vst.msk [vmem:[#allocation2 + $0x68] sm:$0xff] %vm2066_vm6, %v5313_v24 }
 0x308   : > { %v4451_v29 = vpop.f32.mrb[200].mxu0  ;;  %v5157_v39 = vpop.f32.mrb[200].mxu1 }
 0x309   : > { %v4610_v32 = vadd.f32 %v4569_v30, %v4451_v29  ;;  %v13861_v33 = vpop.f32.mrb[201].mxu0  ;;  %v13947_v45 = vpop.f32.mrb[201].mxu1 }
 0x30a   : > { %v4454_v35 = vpop.f32.mrb[202].mxu0  ;;  %v5273_v37 = vld [vmem:[#allocation2 + $0x70] sm:$0xff]  ;;  %v5160_v47 = vpop.f32.mrb[202].mxu1 }
 0x30b   : > { %4651 = vst.msk [vmem:[#allocation2 + $0x80] sm:$0xff] %vm2066_vm6, %v4610_v32  ;;  %v4611_v42 = vadd.f32 %v4570_v36, %v4454_v35  ;;  %v5314_v43 = vadd.f32 %v5273_v37, %v5149_v13  ;;  %v13862_v44 = vpop.f32.mrb[203].mxu0  ;;  %v13948_v51 = vpop.f32.mrb[203].mxu1  ;;  %v5665_v13 = vor.u32 %v5663_v1, %v5661_v53  ;;  %v6271_v35 = vsel %vm18742_vm8, %v6268_v57, %v6270_v18  ;;  %v17246_v36 = vld [vmem:[%s15476_s22 + $0xa4] sm:$0xff]  }
 0x30c   : > { %v5274_v46 = vld [vmem:[#allocation2 + $0x78] sm:$0xff]  ;;  %v6272_v44 = vrot.slane %v17246_v36, 1  ;;  %v5683_v53 = vshll.u32 %v17254_v41, 16 }
 0x30d   : > { %4652 = vst.msk [vmem:[#allocation2 + $0x88] sm:$0xff] %vm2066_vm6, %v4611_v42  ;;  %5355 = vst.msk [vmem:[#allocation2 + $0x70] sm:$0xff] %vm2066_vm6, %v5314_v43  ;;  %v5315_v50 = vadd.f32 %v5274_v46, %v5152_v21  ;;  %14056 = vmatmul.mubr.msk.bf16.gmra.mrb[52].mxu0 %vm1798_vm3, %v5654_v38  ;;  %14142 = vmatmul.mubr.msk.bf16.gmra.mrb[52].mxu1 %vm1798_vm3, %v6267_v48  ;;  %v5670_v24 = vsel %vm18743_vm7, %v5665_v13, %v5669_v14  ;;  %v4575_v43 = vld [vmem:[#allocation2 + $0xb0] sm:$0xff]  ;;  %v4576_v48 = vld [vmem:[#allocation2 + $0xb8] sm:$0xff]  ;;  %v5687_v13 = vshrl.u32 %v17254_v41, 16 }
 0x30e   : > { %14059 = vmatprep.mubr.msk.bf16.mxu0 %vm15307_vm1, %v15306_v34  ;;  %14145 = vmatprep.mubr.msk.bf16.mxu1 %vm15307_vm1, %v15306_v34  ;;  %v5685_v1 = vrot.slane %v5683_v53, 1 }
 0x30f   : > { %5356 = vst.msk [vmem:[#allocation2 + $0x78] sm:$0xff] %vm2066_vm6, %v5315_v50 }
 0x310   : > { %v4459_v55 = vpop.f32.mrb[204].mxu0  ;;  %v5165_v0 = vpop.f32.mrb[204].mxu1 }
 0x311   : > { %v4612_v58 = vadd.f32 %v4571_v56, %v4459_v55  ;;  %v13865_v59 = vpop.f32.mrb[205].mxu0  ;;  %v13951_v6 = vpop.f32.mrb[205].mxu1 }
 0x312   : > { %v4462_v60 = vpop.f32.mrb[206].mxu0  ;;  %v5275_v62 = vld [vmem:[#allocation2 + $0x80] sm:$0xff]  ;;  %v5168_v8 = vpop.f32.mrb[206].mxu1 }
 0x313   : > { %4653 = vst.msk [vmem:[#allocation2 + $0x90] sm:$0xff] %vm2066_vm6, %v4612_v58  ;;  %v4613_v3 = vadd.f32 %v4572_v61, %v4462_v60  ;;  %v5316_v4 = vadd.f32 %v5275_v62, %v5157_v39  ;;  %v13866_v5 = vpop.f32.mrb[207].mxu0  ;;  %v13952_v12 = vpop.f32.mrb[207].mxu1  ;;  %v5673_v39 = vor.u32 %v5671_v26, %v5669_v14  ;;  %v6273_v60 = vsel %vm18742_vm8, %v6270_v18, %v6272_v44  ;;  %v17267_v61 = vld [vmem:[%s15476_s22 + $0xac] sm:$0xff]  }
 0x314   : > { %v5276_v7 = vld [vmem:[#allocation2 + $0x88] sm:$0xff]  ;;  %v6274_v5 = vrot.slane %v17267_v61, 1  ;;  %v5691_v14 = vshll.u32 %v17275_v2, 16 }
 0x315   : > { %4654 = vst.msk [vmem:[#allocation2 + $0x98] sm:$0xff] %vm2066_vm6, %v4613_v3  ;;  %5357 = vst.msk [vmem:[#allocation2 + $0x80] sm:$0xff] %vm2066_vm6, %v5316_v4  ;;  %v5317_v11 = vadd.f32 %v5276_v7, %v5160_v47  ;;  %14060 = vmatmul.mubr.msk.bf16.gmra.mrb[56].mxu0 %vm1798_vm3, %v5662_v63  ;;  %14146 = vmatmul.mubr.msk.bf16.gmra.mrb[56].mxu1 %vm1798_vm3, %v6269_v9  ;;  %v5678_v50 = vsel %vm18743_vm7, %v5673_v39, %v5677_v40  ;;  %v4577_v4 = vld [vmem:[#allocation2 + $0xc0] sm:$0xff]  ;;  %v4578_v9 = vld [vmem:[#allocation2 + $0xc8] sm:$0xff] }
 0x316   : > { %14063 = vmatprep.mubr.msk.bf16.mxu0 %vm15307_vm1, %v15306_v34  ;;  %14149 = vmatprep.mubr.msk.bf16.mxu1 %vm15307_vm1, %v15306_v34  ;;  %v5693_v26 = vrot.slane %v5691_v14, 1  ;;  %v15044_v39 = vld [vmem:[%s15476_s22 + $0x1c] sm:$0xff]  }
 0x317   : > { %5358 = vst.msk [vmem:[#allocation2 + $0x88] sm:$0xff] %vm2066_vm6, %v5317_v11  ;;  %v6829_v53 = vshll.u32 %v15044_v39, 16 }
 0x318   : > { %v4467_v16 = vpop.f32.mrb[208].mxu0  ;;  %v5173_v25 = vpop.f32.mrb[208].mxu1 }
 0x319   : > { %v4614_v19 = vadd.f32 %v4573_v17, %v4467_v16  ;;  %v13869_v20 = vpop.f32.mrb[209].mxu0  ;;  %v13955_v31 = vpop.f32.mrb[209].mxu1 }
 0x31a   : > { %v4470_v21 = vpop.f32.mrb[210].mxu0  ;;  %v5277_v23 = vld [vmem:[#allocation2 + $0x90] sm:$0xff]  ;;  %v5176_v33 = vpop.f32.mrb[210].mxu1 }
 0x31b   : > { %4655 = vst.msk [vmem:[#allocation2 + $0xa0] sm:$0xff] %vm2066_vm6, %v4614_v19  ;;  %v4615_v28 = vadd.f32 %v4574_v22, %v4470_v21  ;;  %v5318_v29 = vadd.f32 %v5277_v23, %v5165_v0  ;;  %v13870_v30 = vpop.f32.mrb[211].mxu0  ;;  %v13956_v38 = vpop.f32.mrb[211].mxu1  ;;  %v5681_v0 = vor.u32 %v5679_v52, %v5677_v40  ;;  %v6275_v21 = vsel %vm18742_vm8, %v6272_v44, %v6274_v5  ;;  %v17288_v22 = vld [vmem:[%s15476_s22 + $0xb4] sm:$0x1f]  }
 0x31c   : > { %v5278_v32 = vld [vmem:[#allocation2 + $0x98] sm:$0xff]  ;;  %v6826_v52 = vshrl.u32 %v15044_v39, 16 }
 0x31d   : > { %4656 = vst.msk [vmem:[#allocation2 + $0xa8] sm:$0xff] %vm2066_vm6, %v4615_v28  ;;  %5359 = vst.msk [vmem:[#allocation2 + $0x90] sm:$0xff] %vm2066_vm6, %v5318_v29  ;;  %v5319_v37 = vadd.f32 %v5278_v32, %v5168_v8  ;;  %14064 = vmatmul.mubr.msk.bf16.gmra.mrb[60].mxu0 %vm1798_vm3, %v5670_v24  ;;  %14150 = vmatmul.mubr.msk.bf16.gmra.mrb[60].mxu1 %vm1798_vm3, %v6271_v35  ;;  %v5686_v11 = vsel %vm18743_vm7, %v5681_v0, %v5685_v1  ;;  %v4579_v28 = vld [vmem:[#allocation2 + $0xd0] sm:$0xff]  ;;  %v6276_v29 = vrot.slane %v17288_v22, 1  ;;  %v4580_v35 = vld [vmem:[#allocation2 + $0xd8] sm:$0xff] }
 0x31e   : > { %14067 = vmatprep.mubr.msk.bf16.mxu0 %vm15307_vm1, %v15306_v34  ;;  %14153 = vmatprep.mubr.msk.bf16.mxu1 %vm15307_vm1, %v15306_v34  ;;  %v15043_v32 = vld [vmem:[%s15476_s22 + $0x14] sm:$0xfe]  }
 0x31f   : > { %5360 = vst.msk [vmem:[#allocation2 + $0x98] sm:$0xff] %vm2066_vm6, %v5319_v37 }
 0x320   : > { %v4475_v42 = vpop.f32.mrb[212].mxu0  ;;  %v5181_v51 = vpop.f32.mrb[212].mxu1 }
 0x321   : > { %v4616_v45 = vadd.f32 %v4575_v43, %v4475_v42  ;;  %v13873_v46 = vpop.f32.mrb[213].mxu0  ;;  %v13959_v57 = vpop.f32.mrb[213].mxu1 }
 0x322   : > { %v4478_v47 = vpop.f32.mrb[214].mxu0  ;;  %v5279_v49 = vld [vmem:[#allocation2 + $0xa0] sm:$0xff]  ;;  %v5184_v59 = vpop.f32.mrb[214].mxu1  ;;  %v6277_v46 = vsel %vm18742_vm8, %v6274_v5, %v6276_v29  ;;  %vm7554_vm8 = vsmask.f32 256 }
 0x323   : > { %4657 = vst.msk [vmem:[#allocation2 + $0xb0] sm:$0xff] %vm2066_vm6, %v4616_v45  ;;  %v4617_v54 = vadd.f32 %v4576_v48, %v4478_v47  ;;  %v5320_v55 = vadd.f32 %v5279_v49, %v5173_v25  ;;  %v13874_v56 = vpop.f32.mrb[215].mxu0  ;;  %v13960_v63 = vpop.f32.mrb[215].mxu1  ;;  %v5689_v25 = vor.u32 %v5687_v13, %v5685_v1  ;;  %v5695_v48 = vshrl.u32 %v17275_v2, 16 }
 0x324   : > { %v5280_v58 = vld [vmem:[#allocation2 + $0xa8] sm:$0xff]  ;;  %v6828_v1 = vrot.slane %v6826_v52, 1  ;;  %v6831_v2 = vrot.slane %v6829_v53, 2 }
 0x325   : > { %4658 = vst.msk [vmem:[#allocation2 + $0xb8] sm:$0xff] %vm2066_vm6, %v4617_v54  ;;  %5361 = vst.msk [vmem:[#allocation2 + $0xa0] sm:$0xff] %vm2066_vm6, %v5320_v55  ;;  %v5321_v62 = vadd.f32 %v5280_v58, %v5176_v33  ;;  %14068 = vmatmul.mubr.msk.bf16.gmra.mrb[64].mxu0 %vm1798_vm3, %v5678_v50  ;;  %14154 = vmatmul.mubr.msk.bf16.gmra.mrb[64].mxu1 %vm1798_vm3, %v6273_v60  ;;  %v5694_v37 = vsel %vm18743_vm7, %v5689_v25, %v5693_v26  ;;  %v6818_v50 = vshrl.u32 %v15043_v32, 16  ;;  %v4581_v55 = vld [vmem:[#allocation2 + $0xe0] sm:$0xff] }
 0x326   : > { %14071 = vmatprep.mubr.msk.bf16.mxu0 %vm15307_vm1, %v15306_v34  ;;  %14157 = vmatprep.mubr.msk.bf16.mxu1 %vm15307_vm1, %v15306_v34  ;;  %v5697_v56 = vor.u32 %v5695_v48, %v5693_v26  ;;  %v6832_v13 = vor.u32 %v6831_v2, %v6828_v1 }
 0x327   : > { %5362 = vst.msk [vmem:[#allocation2 + $0xa8] sm:$0xff] %vm2066_vm6, %v5321_v62  ;;  %v6820_v60 = vrot.slane %v6818_v50, 1 }
 0x328   : > { %v4483_v3 = vpop.f32.mrb[216].mxu0  ;;  %v5189_v12 = vpop.f32.mrb[216].mxu1 }
 0x329   : > { %v4618_v6 = vadd.f32 %v4577_v4, %v4483_v3  ;;  %v13877_v7 = vpop.f32.mrb[217].mxu0  ;;  %v13963_v18 = vpop.f32.mrb[217].mxu1  ;;  %v15045_v3 = vld [vmem:[%s15476_s22 + $0x24] sm:$0xff]  }
 0x32a   : > { %v4486_v8 = vpop.f32.mrb[218].mxu0  ;;  %v5281_v10 = vld [vmem:[#allocation2 + $0xb0] sm:$0xff]  ;;  %v5192_v20 = vpop.f32.mrb[218].mxu1  ;;  %v6835_v14 = vshrl.u32 %v15045_v3, 16 }
 0x32b   : > { %4659 = vst.msk [vmem:[#allocation2 + $0xc0] sm:$0xff] %vm2066_vm6, %v4618_v6  ;;  %v4619_v15 = vadd.f32 %v4578_v9, %v4486_v8  ;;  %v5322_v16 = vadd.f32 %v5281_v10, %v5181_v51  ;;  %v13878_v17 = vpop.f32.mrb[219].mxu0  ;;  %v13964_v24 = vpop.f32.mrb[219].mxu1  ;;  %v6821_v51 = vshll.u32 %v15043_v32, 16 }
 0x32c   : > { %v5282_v19 = vld [vmem:[#allocation2 + $0xb8] sm:$0xff]  ;;  %v4583_v17 = vld [vmem:[#allocation2 + $0xf0] sm:$0xff]  ;;  %v6837_v26 = vrot.slane %v6835_v14, 1 }
 0x32d   : > { %4660 = vst.msk [vmem:[#allocation2 + $0xc8] sm:$0xff] %vm2066_vm6, %v4619_v15  ;;  %5363 = vst.msk [vmem:[#allocation2 + $0xb0] sm:$0xff] %vm2066_vm6, %v5322_v16  ;;  %v5323_v23 = vadd.f32 %v5282_v19, %v5184_v59  ;;  %14072 = vmatmul.mubr.msk.bf16.gmra.mrb[68].mxu0 %vm1798_vm3, %v5686_v11  ;;  %14158 = vmatmul.mubr.msk.bf16.gmra.mrb[68].mxu1 %vm1798_vm3, %v6275_v21  ;;  %v4582_v59 = vld [vmem:[#allocation2 + $0xe8] sm:$0xff]  ;;  %v6823_v61 = vrot.slane %v6821_v51, 2  ;;  %v6838_v15 = vshll.u32 %v15045_v3, 16  ;;  %v15047_v51 = vld [vmem:[%s15476_s22 + $0x34] sm:$0xff]  }
 0x32e   : > { %14075 = vmatprep.mubr.msk.bf16.mxu0 %vm15307_vm1, %v15306_v34  ;;  %14161 = vmatprep.mubr.msk.bf16.mxu1 %vm15307_vm1, %v15306_v34  ;;  %v4588_v3 = vld [vmem:[#allocation2 + $0x118] sm:$0xff] }
 0x32f   : > { %5364 = vst.msk [vmem:[#allocation2 + $0xb8] sm:$0xff] %vm2066_vm6, %v5323_v23 }
 0x330   : > { %v4491_v27 = vpop.f32.mrb[220].mxu0  ;;  %v5197_v38 = vpop.f32.mrb[220].mxu1 }
 0x331   : > { %v4620_v30 = vadd.f32 %v4579_v28, %v4491_v27  ;;  %v13881_v31 = vpop.f32.mrb[221].mxu0  ;;  %v13967_v43 = vpop.f32.mrb[221].mxu1  ;;  %v6840_v27 = vrot.slane %v6838_v15, 2  ;;  %v15046_v28 = vld [vmem:[%s15476_s22 + $0x2c] sm:$0xff]  }
 0x332   : > { %v4494_v33 = vpop.f32.mrb[222].mxu0  ;;  %v5283_v36 = vld [vmem:[#allocation2 + $0xc0] sm:$0xff]  ;;  %v5200_v45 = vpop.f32.mrb[222].mxu1  ;;  %v6847_v39 = vshll.u32 %v15046_v28, 16 }
 0x333   : > { %4661 = vst.msk [vmem:[#allocation2 + $0xd0] sm:$0xff] %vm2066_vm6, %v4620_v30  ;;  %v4621_v40 = vadd.f32 %v4580_v35, %v4494_v33  ;;  %v5324_v41 = vadd.f32 %v5283_v36, %v5189_v12  ;;  %v13882_v42 = vpop.f32.mrb[223].mxu0  ;;  %v13968_v49 = vpop.f32.mrb[223].mxu1  ;;  %v6824_v12 = vor.u32 %v6823_v61, %v6820_v60  ;;  %v6853_v61 = vshrl.u32 %v15047_v51, 16 }
 0x334   : > { %v5284_v44 = vld [vmem:[#allocation2 + $0xc8] sm:$0xff]  ;;  %v6849_v50 = vrot.slane %v6847_v39, 2 }
 0x335   : > { %4662 = vst.msk [vmem:[#allocation2 + $0xd8] sm:$0xff] %vm2066_vm6, %v4621_v40  ;;  %5365 = vst.msk [vmem:[#allocation2 + $0xc0] sm:$0xff] %vm2066_vm6, %v5324_v41  ;;  %v5325_v47 = vadd.f32 %v5284_v44, %v5192_v20  ;;  %14076 = vmatmul.mubr.msk.bf16.gmra.mrb[72].mxu0 %vm1798_vm3, %v5694_v37  ;;  %14162 = vmatmul.mubr.msk.bf16.gmra.mrb[72].mxu1 %vm1798_vm3, %v6277_v46  ;;  %v4584_v20 = vld [vmem:[#allocation2 + $0xf8] sm:$0xff]  ;;  %v6833_v24 = vsel %vm18739_vm9, %v6824_v12, %v6832_v13  ;;  %v4585_v41 = vld [vmem:[#allocation2 + $0x100] sm:$0xff] }
 0x336   : > { %14079 = vmatprep.mubr.msk.bf16.mxu0 %vm15307_vm1, %v15306_v34  ;;  %14165 = vmatprep.mubr.msk.bf16.mxu1 %vm15307_vm1, %v15306_v34  ;;  %v6841_v37 = vor.u32 %v6840_v27, %v6837_v26  ;;  %v4586_v44 = vld [vmem:[#allocation2 + $0x108] sm:$0xff] }
 0x337   : > { %5366 = vst.msk [vmem:[#allocation2 + $0xc8] sm:$0xff] %vm2066_vm6, %v5325_v47  ;;  %v4590_v27 = vld [vmem:[#allocation2 + $0x128] sm:$0xff] }
 0x338   : > { %v4499_v54 = vpop.f32.mrb[224].mxu0  ;;  %v5205_v0 = vpop.f32.mrb[224].mxu1  ;;  %v6842_v47 = vsel %vm18739_vm9, %v6832_v13, %v6841_v37 }
 0x339   : > { %v4622_v57 = vadd.f32 %v4581_v55, %v4499_v54  ;;  %v13885_v58 = vpop.f32.mrb[225].mxu0  ;;  %v13971_v7 = vpop.f32.mrb[225].mxu1 }
 0x33a   : > { %v4502_v62 = vpop.f32.mrb[226].mxu0  ;;  %v5285_v63 = vld [vmem:[#allocation2 + $0xd0] sm:$0xff]  ;;  %v5208_v9 = vpop.f32.mrb[226].mxu1 }
 0x33b   : > { %4663 = vst.msk [vmem:[#allocation2 + $0xe0] sm:$0xff] %vm2066_vm6, %v4622_v57  ;;  %v4623_v4 = vadd.f32 %v4582_v59, %v4502_v62  ;;  %v5326_v5 = vadd.f32 %v5285_v63, %v5197_v38  ;;  %v13886_v6 = vpop.f32.mrb[227].mxu0  ;;  %v13972_v11 = vpop.f32.mrb[227].mxu1  ;;  %v6844_v38 = vshrl.u32 %v15046_v28, 16  ;;  %v6856_v62 = vshll.u32 %v15047_v51, 16 }
 0x33c   : > { %v5286_v8 = vld [vmem:[#allocation2 + $0xd8] sm:$0xff] }
 0x33d   : > { %4664 = vst.msk [vmem:[#allocation2 + $0xe8] sm:$0xff] %vm2066_vm6, %v4623_v4  ;;  %5367 = vst.msk [vmem:[#allocation2 + $0xd0] sm:$0xff] %vm2066_vm6, %v5326_v5  ;;  %v5327_v10 = vadd.f32 %v5286_v8, %v5200_v45  ;;  %14080 = vmatmul.mubr.msk.bf16.gmra.mrb[76].mxu0 %vm1798_vm3, %v5697_v56  ;;  %14166 = vmatmul.mubr.msk.bf16.gmra.mrb[76].mxu1 %vm1798_vm3, %v6276_v29  ;;  %v6846_v49 = vrot.slane %v6844_v38, 1  ;;  %v6855_v8 = vrot.slane %v6853_v61, 1 }
 0x33e   : > { %14171 = vmatprep.mubr.msk.bf16.mxu0 %vm15307_vm1, %v15306_v34  ;;  %14259 = vmatprep.mubr.msk.bf16.mxu1 %vm15307_vm1, %v15306_v34 }
 0x33f   : > { %5368 = vst.msk [vmem:[#allocation2 + $0xd8] sm:$0xff] %vm2066_vm6, %v5327_v10  ;;  %v6850_v60 = vor.u32 %v6849_v50, %v6846_v49  ;;  %v15048_v10 = vld [vmem:[%s15476_s22 + $0x3c] sm:$0xff]  }
 0x340   : > { %v4507_v16 = vpop.f32.mrb[228].mxu0  ;;  %v5213_v25 = vpop.f32.mrb[228].mxu1  ;;  %v4592_v50 = vld [vmem:[#allocation2 + $0x138] sm:$0xff] }
 0x341   : > { %v4624_v18 = vadd.f32 %v4583_v17, %v4507_v16  ;;  %v13889_v19 = vpop.f32.mrb[229].mxu0  ;;  %v13975_v31 = vpop.f32.mrb[229].mxu1  ;;  %v6851_v6 = vsel %vm18739_vm9, %v6841_v37, %v6850_v60 }
 0x342   : > { %v4510_v21 = vpop.f32.mrb[230].mxu0  ;;  %v5287_v23 = vld [vmem:[#allocation2 + $0xe0] sm:$0xff]  ;;  %v5216_v33 = vpop.f32.mrb[230].mxu1 }
 0x343   : > { %4665 = vst.msk [vmem:[#allocation2 + $0xf0] sm:$0xff] %vm2066_vm6, %v4624_v18  ;;  %v4625_v22 = vadd.f32 %v4584_v20, %v4510_v21  ;;  %v5328_v29 = vadd.f32 %v5287_v23, %v5205_v0  ;;  %v13890_v30 = vpop.f32.mrb[231].mxu0  ;;  %v13976_v36 = vpop.f32.mrb[231].mxu1  ;;  %v4587_v0 = vld [vmem:[#allocation2 + $0x110] sm:$0xff]  ;;  %v6862_v20 = vshrl.u32 %v15048_v10, 16  ;;  %v6865_v21 = vshll.u32 %v15048_v10, 16 }
 0x344   : > { %v5288_v32 = vld [vmem:[#allocation2 + $0xe8] sm:$0xff] }
 0x345   : > { %4666 = vst.msk [vmem:[#allocation2 + $0xf8] sm:$0xff] %vm2066_vm6, %v4625_v22  ;;  %5369 = vst.msk [vmem:[#allocation2 + $0xe0] sm:$0xff] %vm2066_vm6, %v5328_v29  ;;  %v5329_v35 = vadd.f32 %v5288_v32, %v5208_v9  ;;  %14172 = vmatmul.mubr.msk.bf16.vlgmr.msra.gmra.mrb[80].mxu0 %vm1798_vm3, %v6833_v24  ;;  %v6858_v9 = vrot.slane %v6856_v62, 2  ;;  %v4589_v24 = vld [vmem:[#allocation2 + $0x120] sm:$0xff]  ;;  %v6864_v31 = vrot.slane %v6862_v20, 1  ;;  %v6867_v32 = vrot.slane %v6865_v21, 2 }
 0x346   : > { %14175 = vmatprep.mubr.msk.bf16.mxu0 %vm15307_vm1, %v15306_v34 }
 0x347   : > { %5370 = vst.msk [vmem:[#allocation2 + $0xe8] sm:$0xff] %vm2066_vm6, %v5329_v35  ;;  %v6859_v19 = vor.u32 %v6858_v9, %v6855_v8 }
 0x348   : > { %v4515_v40 = vpop.f32.mrb[232].mxu0  ;;  %v5221_v48 = vpop.f32.mrb[232].mxu1 }
 0x349   : > { %v4626_v42 = vadd.f32 %v4585_v41, %v4515_v40  ;;  %v13893_v43 = vpop.f32.mrb[233].mxu0  ;;  %v13979_v55 = vpop.f32.mrb[233].mxu1  ;;  %v6860_v29 = vsel %vm18739_vm9, %v6850_v60, %v6859_v19 }
 0x34a   : > { %v4518_v45 = vpop.f32.mrb[234].mxu0  ;;  %v5289_v46 = vld [vmem:[#allocation2 + $0xf0] sm:$0xff]  ;;  %v5224_v57 = vpop.f32.mrb[234].mxu1  ;;  %v6868_v43 = vor.u32 %v6867_v32, %v6864_v31 }
 0x34b   : > { %4667 = vst.msk [vmem:[#allocation2 + $0x100] sm:$0xff] %vm2066_vm6, %v4626_v42  ;;  %v4627_v52 = vadd.f32 %v4586_v44, %v4518_v45  ;;  %v5330_v53 = vadd.f32 %v5289_v46, %v5213_v25  ;;  %v13894_v54 = vpop.f32.mrb[235].mxu0  ;;  %v13980_v59 = vpop.f32.mrb[235].mxu1 }
 0x34c   : > { %v5290_v56 = vld [vmem:[#allocation2 + $0xf8] sm:$0xff] }
 0x34d   : > { %4668 = vst.msk [vmem:[#allocation2 + $0x108] sm:$0xff] %vm2066_vm6, %v4627_v52  ;;  %5371 = vst.msk [vmem:[#allocation2 + $0xf0] sm:$0xff] %vm2066_vm6, %v5330_v53  ;;  %v5331_v58 = vadd.f32 %v5290_v56, %v5216_v33  ;;  %14176 = vmatmul.mubr.msk.bf16.gmra.mrb[84].mxu0 %vm1798_vm3, %v6842_v47  ;;  %v15049_v33 = vld [vmem:[%s15476_s22 + $0x44] sm:$0xff]   ;;  %v4591_v47 = vld [vmem:[#allocation2 + $0x130] sm:$0xff]  ;;  %v6869_v53 = vsel %vm18739_vm9, %v6859_v19, %v6868_v43 }
 0x34e   : > { %14179 = vmatprep.mubr.msk.bf16.mxu0 %vm15307_vm1, %v15306_v34  ;;  %v6871_v44 = vshrl.u32 %v15049_v33, 16  ;;  %v6874_v45 = vshll.u32 %v15049_v33, 16 }
 0x34f   : > { %5372 = vst.msk [vmem:[#allocation2 + $0xf8] sm:$0xff] %vm2066_vm6, %v5331_v58 }
 0x350   : > { %v4523_v63 = vpop.f32.mrb[236].mxu0  ;;  %v5229_v7 = vpop.f32.mrb[236].mxu1  ;;  %v6873_v55 = vrot.slane %v6871_v44, 1  ;;  %v6876_v56 = vrot.slane %v6874_v45, 2 }
 0x351   : > { %v4628_v1 = vadd.f32 %v4587_v0, %v4523_v63  ;;  %v13897_v2 = vpop.f32.mrb[237].mxu0  ;;  %v13983_v14 = vpop.f32.mrb[237].mxu1 }
 0x352   : > { %v4526_v4 = vpop.f32.mrb[238].mxu0  ;;  %v5291_v5 = vld [vmem:[#allocation2 + $0x100] sm:$0xff]  ;;  %v5232_v16 = vpop.f32.mrb[238].mxu1  ;;  %v6877_v2 = vor.u32 %v6876_v56, %v6873_v55 }
 0x353   : > { %4669 = vst.msk [vmem:[#allocation2 + $0x110] sm:$0xff] %vm2066_vm6, %v4628_v1  ;;  %v4629_v11 = vadd.f32 %v4588_v3, %v4526_v4  ;;  %v5332_v12 = vadd.f32 %v5291_v5, %v5221_v48  ;;  %v13898_v13 = vpop.f32.mrb[239].mxu0  ;;  %v13984_v18 = vpop.f32.mrb[239].mxu1 }
 0x354   : > { %v5292_v15 = vld [vmem:[#allocation2 + $0x108] sm:$0xff] }
 0x355   : > { %4670 = vst.msk [vmem:[#allocation2 + $0x118] sm:$0xff] %vm2066_vm6, %v4629_v11  ;;  %5373 = vst.msk [vmem:[#allocation2 + $0x100] sm:$0xff] %vm2066_vm6, %v5332_v12  ;;  %v5333_v17 = vadd.f32 %v5292_v15, %v5224_v57  ;;  %14180 = vmatmul.mubr.msk.bf16.gmra.mrb[88].mxu0 %vm1798_vm3, %v6851_v6  ;;  %v15050_v57 = vld [vmem:[%s15476_s22 + $0x4c] sm:$0xff]   ;;  %v4593_v6 = vld [vmem:[#allocation2 + $0x140] sm:$0xff]  ;;  %v6878_v11 = vsel %vm18739_vm9, %v6868_v43, %v6877_v2 }
 0x356   : > { %14183 = vmatprep.mubr.msk.bf16.mxu0 %vm15307_vm1, %v15306_v34  ;;  %v6880_v3 = vshrl.u32 %v15050_v57, 16  ;;  %v6883_v4 = vshll.u32 %v15050_v57, 16  ;;  %v15051_v15 = vld [vmem:[%s15476_s22 + $0x54] sm:$0xff]  }
 0x357   : > { %5374 = vst.msk [vmem:[#allocation2 + $0x108] sm:$0xff] %vm2066_vm6, %v5333_v17 }
 0x358   : > { %v4531_v23 = vpop.f32.mrb[240].mxu0  ;;  %v5237_v30 = vpop.f32.mrb[240].mxu1  ;;  %v6882_v13 = vrot.slane %v6880_v3, 1  ;;  %v6885_v14 = vrot.slane %v6883_v4, 2 }
 0x359   : > { %v4630_v25 = vadd.f32 %v4589_v24, %v4531_v23  ;;  %v13901_v26 = vpop.f32.mrb[241].mxu0  ;;  %v13987_v38 = vpop.f32.mrb[241].mxu1 }
 0x35a   : > { %v4534_v28 = vpop.f32.mrb[242].mxu0  ;;  %v5293_v22 = vld [vmem:[#allocation2 + $0x110] sm:$0xff]  ;;  %v5240_v40 = vpop.f32.mrb[242].mxu1  ;;  %v6886_v24 = vor.u32 %v6885_v14, %v6882_v13  ;;  %v6892_v26 = vshll.u32 %v15051_v15, 16  ;;  %v15052_v38 = vld [vmem:[%s15476_s22 + $0x5c] sm:$0xff]  }
 0x35b   : > { %4671 = vst.msk [vmem:[#allocation2 + $0x120] sm:$0xff] %vm2066_vm6, %v4630_v25  ;;  %v4631_v35 = vadd.f32 %v4590_v27, %v4534_v28  ;;  %v5334_v36 = vadd.f32 %v5293_v22, %v5229_v7  ;;  %v13902_v37 = vpop.f32.mrb[243].mxu0  ;;  %v13988_v42 = vpop.f32.mrb[243].mxu1  ;;  %v6889_v25 = vshrl.u32 %v15051_v15, 16  ;;  %v5964_v28 = vld [vmem:[#allocation2] sm:$0xff] }
 0x35c   : > { %v5294_v39 = vld [vmem:[#allocation2 + $0x118] sm:$0xff]  ;;  %v6887_v33 = vsel %vm18739_vm9, %v6877_v2, %v6886_v24  ;;  %v6894_v37 = vrot.slane %v6892_v26, 2 }
 0x35d   : > { %4672 = vst.msk [vmem:[#allocation2 + $0x128] sm:$0xff] %vm2066_vm6, %v4631_v35  ;;  %5375 = vst.msk [vmem:[#allocation2 + $0x110] sm:$0xff] %vm2066_vm6, %v5334_v36  ;;  %v5335_v41 = vadd.f32 %v5294_v39, %v5232_v16  ;;  %14184 = vmatmul.mubr.msk.bf16.gmra.mrb[92].mxu0 %vm1798_vm3, %v6860_v29  ;;  %v6891_v36 = vrot.slane %v6889_v25, 1 }
 0x35e   : > { %14187 = vmatprep.mubr.msk.bf16.mxu0 %vm15307_vm1, %v15306_v34 }
 0x35f   : > { %5376 = vst.msk [vmem:[#allocation2 + $0x118] sm:$0xff] %vm2066_vm6, %v5335_v41  ;;  %v6895_v45 = vor.u32 %v6894_v37, %v6891_v36 }
 0x360   : > { %v4539_v46 = vpop.f32.mrb[244].mxu0  ;;  %v5245_v54 = vpop.f32.mrb[244].mxu1 }
 0x361   : > { %v4632_v48 = vadd.f32 %v4591_v47, %v4539_v46  ;;  %v13905_v49 = vpop.f32.mrb[245].mxu0  ;;  %v13991_v61 = vpop.f32.mrb[245].mxu1  ;;  %v6898_v46 = vshrl.u32 %v15052_v38, 16  ;;  %v6901_v47 = vshll.u32 %v15052_v38, 16  ;;  %v6896_v55 = vsel %vm18739_vm9, %v6886_v24, %v6895_v45 }
 0x362   : > { %v4542_v51 = vpop.f32.mrb[246].mxu0  ;;  %v5295_v52 = vld [vmem:[#allocation2 + $0x120] sm:$0xff]  ;;  %v5248_v63 = vpop.f32.mrb[246].mxu1  ;;  %v5966_v49 = vld [vmem:[#allocation2 + $0x10] sm:$0xff] }
 0x363   : > { %4673 = vst.msk [vmem:[#allocation2 + $0x130] sm:$0xff] %vm2066_vm6, %v4632_v48  ;;  %v4633_v58 = vadd.f32 %v4592_v50, %v4542_v51  ;;  %v5336_v59 = vadd.f32 %v5295_v52, %v5237_v30  ;;  %v13906_v60 = vpop.f32.mrb[247].mxu0  ;;  %v13992_v1 = vpop.f32.mrb[247].mxu1  ;;  %v5965_v30 = vld [vmem:[#allocation2 + $0x8] sm:$0xff]  ;;  %v5967_v52 = vld [vmem:[#allocation2 + $0x18] sm:$0xff]  ;;  %v6900_v57 = vrot.slane %v6898_v46, 1 }
 0x364   : > { %v5296_v62 = vld [vmem:[#allocation2 + $0x128] sm:$0xff] }
 0x365   : > { %4674 = vst.msk [vmem:[#allocation2 + $0x138] sm:$0xff] %vm2066_vm6, %v4633_v58  ;;  %5377 = vst.msk [vmem:[#allocation2 + $0x120] sm:$0xff] %vm2066_vm6, %v5336_v59  ;;  %v5337_v0 = vadd.f32 %v5296_v62, %v5240_v40  ;;  %14188 = vmatmul.mubr.msk.bf16.gmra.mrb[96].mxu0 %vm1798_vm3, %v6869_v53  ;;  %v6903_v58 = vrot.slane %v6901_v47, 2  ;;  %v15053_v59 = vld [vmem:[%s15476_s22 + $0x64] sm:$0xff]  }
 0x366   : > { %14191 = vmatprep.mubr.msk.bf16.mxu0 %vm15307_vm1, %v15306_v34 }
 0x367   : > { %5378 = vst.msk [vmem:[#allocation2 + $0x128] sm:$0xff] %vm2066_vm6, %v5337_v0  ;;  %v6904_v4 = vor.u32 %v6903_v58, %v6900_v57 }
 0x368   : > { %v4547_v5 = vpop.f32.mrb[248].mxu0  ;;  %v5253_v12 = vpop.f32.mrb[248].mxu1 }
 0x369   : > { %v13909_v7 = vpop.f32.mrb[249].mxu0  ;;  %v4634_v8 = vadd.f32 %v4593_v6, %v4547_v5  ;;  %v13995_v18 = vpop.f32.mrb[249].mxu1  ;;  %v6907_v5 = vshrl.u32 %v15053_v59, 16  ;;  %v6910_v6 = vshll.u32 %v15053_v59, 16  ;;  %v6905_v14 = vsel %vm18739_vm9, %v6895_v45, %v6904_v4  ;;  %v5973_v59 = vld [vmem:[#allocation2 + $0x48] sm:$0xff] }
 0x36a   : > { %v4550_v9 = vpop.f32.mrb[250].mxu0  ;;  %v5297_v10 = vld [vmem:[#allocation2 + $0x130] sm:$0xff]  ;;  %v5256_v20 = vpop.f32.mrb[250].mxu1 }
 0x36b   : > { %v5338_v16 = vadd.f32 %v5297_v10, %v5245_v54  ;;  %v13910_v17 = vpop.f32.mrb[251].mxu0  ;;  %4675 = vst.msk [vmem:[#allocation2 + $0x140] sm:$0xff] %vm2066_vm6, %v4634_v8  ;;  %v13996_v23 = vpop.f32.mrb[251].mxu1  ;;  %v5968_v8 = vld [vmem:[#allocation2 + $0x20] sm:$0xff]  ;;  %v15054_v18 = vld [vmem:[%s15476_s22 + $0x6c] sm:$0xff]  }
 0x36c   : > { %v5298_v19 = vld [vmem:[#allocation2 + $0x138] sm:$0xff]  ;;  %v6912_v17 = vrot.slane %v6910_v6, 2 }
 0x36d   : > { %5379 = vst.msk [vmem:[#allocation2 + $0x130] sm:$0xff] %vm2066_vm6, %v5338_v16  ;;  %v5339_v21 = vadd.f32 %v5298_v19, %v5248_v63  ;;  %14192 = vmatmul.mubr.msk.bf16.gmra.mrb[100].mxu0 %vm1798_vm3, %v6878_v11  ;;  %v5969_v11 = vld [vmem:[#allocation2 + $0x28] sm:$0xff]  ;;  %v6909_v16 = vrot.slane %v6907_v5, 1 }
 0x36e   : > { %14195 = vmatprep.mubr.msk.bf16.mxu0 %vm15307_vm1, %v15306_v34 }
 0x36f   : > { %5380 = vst.msk [vmem:[#allocation2 + $0x138] sm:$0xff] %vm2066_vm6, %v5339_v21 }
 0x370   : > { %v5798_v27 = vpop.f32.mrb[252].mxu0  ;;  %v6378_v35 = vpop.f32.mrb[252].mxu1 }
 0x371   : > { %v14001_v22 = vpop.f32.mrb[253].mxu0  ;;  %v6005_v29 = vadd.f32 %v5964_v28, %v5798_v27  ;;  %v14087_v41 = vpop.f32.mrb[253].mxu1  ;;  %v6913_v28 = vor.u32 %v6912_v17, %v6909_v16 }
 0x372   : > { %v5299_v31 = vld [vmem:[#allocation2 + $0x140] sm:$0xff]  ;;  %v5801_v32 = vpop.f32.mrb[254].mxu0  ;;  %v6381_v43 = vpop.f32.mrb[254].mxu1  ;;  %v6916_v22 = vshrl.u32 %v15054_v18, 16 }
 0x373   : > { %v5340_v39 = vadd.f32 %v5299_v31, %v5253_v12  ;;  %v14002_v40 = vpop.f32.mrb[255].mxu0  ;;  %6046 = vst.msk [vmem:[#allocation2] sm:$0xff] %vm2066_vm6, %v6005_v29  ;;  %v6006_v42 = vadd.f32 %v5965_v30, %v5801_v32  ;;  %v14088_v44 = vpop.f32.mrb[255].mxu1  ;;  %v6919_v29 = vshll.u32 %v15054_v18, 16  ;;  %v5970_v31 = vld [vmem:[#allocation2 + $0x30] sm:$0xff]  ;;  %v6914_v38 = vsel %vm18739_vm9, %v6904_v4, %v6913_v28  ;;  %v5975_v18 = vld [vmem:[#allocation2 + $0x58] sm:$0xff] }
 0x374   : > { %v6918_v40 = vrot.slane %v6916_v22, 1 }
 0x375   : > { %5381 = vst.msk [vmem:[#allocation2 + $0x140] sm:$0xff] %vm2066_vm6, %v5340_v39  ;;  %14196 = vmatmul.mubr.msk.bf16.gmra.mrb[104].mxu0 %vm1798_vm3, %v6887_v33  ;;  %6047 = vst.msk [vmem:[#allocation2 + $0x8] sm:$0xff] %vm2066_vm6, %v6006_v42  ;;  %v6921_v41 = vrot.slane %v6919_v29, 2  ;;  %v15055_v42 = vld [vmem:[%s15476_s22 + $0x74] sm:$0xff]  }
 0x376   : > { %14199 = vmatprep.mubr.msk.bf16.mxu0 %vm15307_vm1, %v15306_v34 }
 0x378   : > { %v5806_v48 = vpop.f32.mrb[0].mxu0  ;;  %v6386_v56 = vpop.f32.mrb[0].mxu1 }
 0x379   : > { %v14005_v50 = vpop.f32.mrb[1].mxu0  ;;  %v6007_v51 = vadd.f32 %v5966_v49, %v5806_v48  ;;  %v14091_v62 = vpop.f32.mrb[1].mxu1 }
 0x37a   : > { %v5809_v53 = vpop.f32.mrb[2].mxu0  ;;  %v6544_v54 = vld [vmem:[#allocation2] sm:$0xff]  ;;  %v6389_v1 = vpop.f32.mrb[2].mxu1 }
 0x37b   : > { %v6585_v60 = vadd.f32 %v6544_v54, %v6378_v35  ;;  %v14006_v61 = vpop.f32.mrb[3].mxu0  ;;  %6048 = vst.msk [vmem:[#allocation2 + $0x10] sm:$0xff] %vm2066_vm6, %v6007_v51  ;;  %v6008_v63 = vadd.f32 %v5967_v52, %v5809_v53  ;;  %v14092_v3 = vpop.f32.mrb[3].mxu1  ;;  %v5971_v35 = vld [vmem:[#allocation2 + $0x38] sm:$0xff]  ;;  %v15064_v51 = vld [vmem:[%s18729_s3] sm:$0xff]   ;;  %v6922_v52 = vor.u32 %v6921_v41, %v6918_v40  ;;  %v6925_v53 = vshrl.u32 %v15055_v42, 16 }
 0x37c   : > { %v6545_v0 = vld [vmem:[#allocation2 + $0x8] sm:$0xff]  ;;  %v6928_v54 = vshll.u32 %v15055_v42, 16  ;;  %14256 = vmatpush3.bf16.msra.mxu1 %v15064_v51 }
 0x37d   : > { %6626 = vst.msk [vmem:[#allocation2] sm:$0xff] %vm2066_vm6, %v6585_v60  ;;  %v6586_v2 = vadd.f32 %v6545_v0, %v6381_v43  ;;  %14200 = vmatmul.mubr.msk.bf16.gmra.mrb[108].mxu0 %vm1798_vm3, %v6896_v55  ;;  %6049 = vst.msk [vmem:[#allocation2 + $0x18] sm:$0xff] %vm2066_vm6, %v6008_v63  ;;  %14257 = vmatprep.subr.bf16.mxu1 %v15306_v34  ;;  %v6923_v62 = vsel %vm18739_vm9, %v6913_v28, %v6922_v52  ;;  %v6927_v0 = vrot.slane %v6925_v53, 1  ;;  %v5977_v42 = vld [vmem:[#allocation2 + $0x68] sm:$0xff] }
 0x37e   : > { %14203 = vmatprep.mubr.msk.bf16.mxu0 %vm15307_vm1, %v15306_v34 }
 0x37f   : > { %6627 = vst.msk [vmem:[#allocation2 + $0x8] sm:$0xff] %vm2066_vm6, %v6586_v2  ;;  %v15056_v2 = vld [vmem:[%s15476_s22 + $0x7c] sm:$0xff]  }
 0x380   : > { %v5814_v7 = vpop.f32.mrb[4].mxu0  ;;  %v6394_v15 = vpop.f32.mrb[4].mxu1 }
 0x381   : > { %v6009_v9 = vadd.f32 %v5968_v8, %v5814_v7  ;;  %v14009_v10 = vpop.f32.mrb[5].mxu0  ;;  %v14095_v23 = vpop.f32.mrb[5].mxu1 }
 0x382   : > { %v5817_v12 = vpop.f32.mrb[6].mxu0  ;;  %v6546_v13 = vld [vmem:[#allocation2 + $0x10] sm:$0xff]  ;;  %v6397_v25 = vpop.f32.mrb[6].mxu1 }
 0x383   : > { %6050 = vst.msk [vmem:[#allocation2 + $0x20] sm:$0xff] %vm2066_vm6, %v6009_v9  ;;  %v6010_v19 = vadd.f32 %v5969_v11, %v5817_v12  ;;  %v6587_v20 = vadd.f32 %v6546_v13, %v6386_v56  ;;  %v14010_v21 = vpop.f32.mrb[7].mxu0  ;;  %v14096_v27 = vpop.f32.mrb[7].mxu1  ;;  %v5972_v56 = vld [vmem:[#allocation2 + $0x40] sm:$0xff]  ;;  %v6934_v12 = vshrl.u32 %v15056_v2, 16  ;;  %v6937_v13 = vshll.u32 %v15056_v2, 16 }
 0x384   : > { %v6547_v24 = vld [vmem:[#allocation2 + $0x18] sm:$0xff] }
 0x385   : > { %6051 = vst.msk [vmem:[#allocation2 + $0x28] sm:$0xff] %vm2066_vm6, %v6010_v19  ;;  %6628 = vst.msk [vmem:[#allocation2 + $0x10] sm:$0xff] %vm2066_vm6, %v6587_v20  ;;  %v6588_v26 = vadd.f32 %v6547_v24, %v6389_v1  ;;  %14204 = vmatmul.mubr.msk.bf16.gmra.mrb[112].mxu0 %vm1798_vm3, %v6905_v14  ;;  %v6930_v1 = vrot.slane %v6928_v54, 2  ;;  %v6936_v24 = vrot.slane %v6934_v12, 1 }
 0x386   : > { %14207 = vmatprep.mubr.msk.bf16.mxu0 %vm15307_vm1, %v15306_v34 }
 0x387   : > { %6629 = vst.msk [vmem:[#allocation2 + $0x18] sm:$0xff] %vm2066_vm6, %v6588_v26  ;;  %v6931_v11 = vor.u32 %v6930_v1, %v6927_v0  ;;  %v15057_v26 = vld [vmem:[%s15476_s22 + $0x84] sm:$0xff]   ;;  %v5979_v1 = vld [vmem:[#allocation2 + $0x78] sm:$0xff] }
 0x388   : > { %v5822_v30 = vpop.f32.mrb[8].mxu0  ;;  %v6402_v39 = vpop.f32.mrb[8].mxu1 }
 0x389   : > { %v6011_v32 = vadd.f32 %v5970_v31, %v5822_v30  ;;  %v14013_v33 = vpop.f32.mrb[9].mxu0  ;;  %v14099_v46 = vpop.f32.mrb[9].mxu1  ;;  %v6932_v21 = vsel %vm18739_vm9, %v6922_v52, %v6931_v11 }
 0x38a   : > { %v5825_v36 = vpop.f32.mrb[10].mxu0  ;;  %v6548_v37 = vld [vmem:[#allocation2 + $0x20] sm:$0xff]  ;;  %v6405_v48 = vpop.f32.mrb[10].mxu1 }
 0x38b   : > { %6052 = vst.msk [vmem:[#allocation2 + $0x30] sm:$0xff] %vm2066_vm6, %v6011_v32  ;;  %v6012_v43 = vadd.f32 %v5971_v35, %v5825_v36  ;;  %v6589_v44 = vadd.f32 %v6548_v37, %v6394_v15  ;;  %v14014_v45 = vpop.f32.mrb[11].mxu0  ;;  %v14100_v50 = vpop.f32.mrb[11].mxu1  ;;  %v5974_v15 = vld [vmem:[#allocation2 + $0x50] sm:$0xff]  ;;  %v6943_v36 = vshrl.u32 %v15057_v26, 16  ;;  %v6946_v37 = vshll.u32 %v15057_v26, 16 }
 0x38c   : > { %v6549_v47 = vld [vmem:[#allocation2 + $0x28] sm:$0xff] }
 0x38d   : > { %6053 = vst.msk [vmem:[#allocation2 + $0x38] sm:$0xff] %vm2066_vm6, %v6012_v43  ;;  %6630 = vst.msk [vmem:[#allocation2 + $0x20] sm:$0xff] %vm2066_vm6, %v6589_v44  ;;  %v6590_v49 = vadd.f32 %v6549_v47, %v6397_v25  ;;  %14208 = vmatmul.mubr.msk.bf16.gmra.mrb[116].mxu0 %vm1798_vm3, %v6914_v38  ;;  %v6939_v25 = vrot.slane %v6937_v13, 2  ;;  %v6945_v47 = vrot.slane %v6943_v36, 1 }
 0x38e   : > { %14211 = vmatprep.mubr.msk.bf16.mxu0 %vm15307_vm1, %v15306_v34 }
 0x38f   : > { %6631 = vst.msk [vmem:[#allocation2 + $0x28] sm:$0xff] %vm2066_vm6, %v6590_v49  ;;  %v6940_v35 = vor.u32 %v6939_v25, %v6936_v24  ;;  %v15058_v49 = vld [vmem:[%s15476_s22 + $0x8c] sm:$0xff]  }
 0x390   : > { %v5830_v55 = vpop.f32.mrb[12].mxu0  ;;  %v6410_v63 = vpop.f32.mrb[12].mxu1  ;;  %v5981_v25 = vld [vmem:[#allocation2 + $0x88] sm:$0xff] }
 0x391   : > { %v6013_v57 = vadd.f32 %v5972_v56, %v5830_v55  ;;  %v14017_v58 = vpop.f32.mrb[13].mxu0  ;;  %v14103_v6 = vpop.f32.mrb[13].mxu1  ;;  %v6941_v45 = vsel %vm18739_vm9, %v6931_v11, %v6940_v35 }
 0x392   : > { %v5833_v60 = vpop.f32.mrb[14].mxu0  ;;  %v6550_v61 = vld [vmem:[#allocation2 + $0x30] sm:$0xff]  ;;  %v6413_v8 = vpop.f32.mrb[14].mxu1 }
 0x393   : > { %6054 = vst.msk [vmem:[#allocation2 + $0x40] sm:$0xff] %vm2066_vm6, %v6013_v57  ;;  %v6014_v3 = vadd.f32 %v5973_v59, %v5833_v60  ;;  %v6591_v4 = vadd.f32 %v6550_v61, %v6402_v39  ;;  %v14018_v5 = vpop.f32.mrb[15].mxu0  ;;  %v14104_v10 = vpop.f32.mrb[15].mxu1  ;;  %v5976_v39 = vld [vmem:[#allocation2 + $0x60] sm:$0xff]  ;;  %v6952_v59 = vshrl.u32 %v15058_v49, 16  ;;  %v6955_v60 = vshll.u32 %v15058_v49, 16 }
 0x394   : > { %v6551_v7 = vld [vmem:[#allocation2 + $0x38] sm:$0xff] }
 0x395   : > { %6055 = vst.msk [vmem:[#allocation2 + $0x48] sm:$0xff] %vm2066_vm6, %v6014_v3  ;;  %6632 = vst.msk [vmem:[#allocation2 + $0x30] sm:$0xff] %vm2066_vm6, %v6591_v4  ;;  %v6592_v9 = vadd.f32 %v6551_v7, %v6405_v48  ;;  %14212 = vmatmul.mubr.msk.bf16.gmra.mrb[120].mxu0 %vm1798_vm3, %v6923_v62  ;;  %v6948_v48 = vrot.slane %v6946_v37, 2  ;;  %v5978_v62 = vld [vmem:[#allocation2 + $0x70] sm:$0xff]  ;;  %v6954_v6 = vrot.slane %v6952_v59, 1  ;;  %v6957_v7 = vrot.slane %v6955_v60, 2 }
 0x396   : > { %14215 = vmatprep.mubr.msk.bf16.mxu0 %vm15307_vm1, %v15306_v34 }
 0x397   : > { %6633 = vst.msk [vmem:[#allocation2 + $0x38] sm:$0xff] %vm2066_vm6, %v6592_v9  ;;  %v6949_v58 = vor.u32 %v6948_v48, %v6945_v47  ;;  %v15061_v47 = vld [vmem:[%s15476_s22 + $0xa4] sm:$0xff]  }
 0x398   : > { %v5838_v14 = vpop.f32.mrb[16].mxu0  ;;  %v6418_v23 = vpop.f32.mrb[16].mxu1 }
 0x399   : > { %v6015_v16 = vadd.f32 %v5974_v15, %v5838_v14  ;;  %v14021_v17 = vpop.f32.mrb[17].mxu0  ;;  %v14107_v29 = vpop.f32.mrb[17].mxu1  ;;  %v6950_v4 = vsel %vm18739_vm9, %v6940_v35, %v6949_v58 }
 0x39a   : > { %v5841_v19 = vpop.f32.mrb[18].mxu0  ;;  %v6552_v20 = vld [vmem:[#allocation2 + $0x40] sm:$0xff]  ;;  %v6421_v31 = vpop.f32.mrb[18].mxu1  ;;  %v6958_v17 = vor.u32 %v6957_v7, %v6954_v6  ;;  %v5985_v6 = vld [vmem:[#allocation2 + $0xa8] sm:$0xff] }
 0x39b   : > { %6056 = vst.msk [vmem:[#allocation2 + $0x50] sm:$0xff] %vm2066_vm6, %v6015_v16  ;;  %v6016_v27 = vadd.f32 %v5975_v18, %v5841_v19  ;;  %v6593_v28 = vadd.f32 %v6552_v20, %v6410_v63  ;;  %v14022_v22 = vpop.f32.mrb[19].mxu0  ;;  %v14108_v33 = vpop.f32.mrb[19].mxu1 }
 0x39c   : > { %v6553_v30 = vld [vmem:[#allocation2 + $0x48] sm:$0xff] }
 0x39d   : > { %6057 = vst.msk [vmem:[#allocation2 + $0x58] sm:$0xff] %vm2066_vm6, %v6016_v27  ;;  %6634 = vst.msk [vmem:[#allocation2 + $0x40] sm:$0xff] %vm2066_vm6, %v6593_v28  ;;  %v6594_v32 = vadd.f32 %v6553_v30, %v6413_v8  ;;  %14216 = vmatmul.mubr.msk.bf16.gmra.mrb[124].mxu0 %vm1798_vm3, %v6932_v21  ;;  %v15059_v8 = vld [vmem:[%s15476_s22 + $0x94] sm:$0xff]   ;;  %v5980_v21 = vld [vmem:[#allocation2 + $0x80] sm:$0xff]  ;;  %v6959_v28 = vsel %vm18739_vm9, %v6949_v58, %v6958_v17 }
 0x39e   : > { %14219 = vmatprep.mubr.msk.bf16.mxu0 %vm15307_vm1, %v15306_v34  ;;  %v6961_v18 = vshrl.u32 %v15059_v8, 16  ;;  %v6964_v19 = vshll.u32 %v15059_v8, 16 }
 0x39f   : > { %6635 = vst.msk [vmem:[#allocation2 + $0x48] sm:$0xff] %vm2066_vm6, %v6594_v32 }
 0x3a0   : > { %v5846_v38 = vpop.f32.mrb[20].mxu0  ;;  %v6426_v46 = vpop.f32.mrb[20].mxu1  ;;  %v6963_v29 = vrot.slane %v6961_v18, 1  ;;  %v6966_v30 = vrot.slane %v6964_v19, 2 }
 0x3a1   : > { %v6017_v40 = vadd.f32 %v5976_v39, %v5846_v38  ;;  %v14025_v41 = vpop.f32.mrb[21].mxu0  ;;  %v14111_v53 = vpop.f32.mrb[21].mxu1  ;;  %v15308_v39 = vmov 0  }
 0x3a2   : > { %v5849_v43 = vpop.f32.mrb[22].mxu0  ;;  %v6554_v44 = vld [vmem:[#allocation2 + $0x50] sm:$0xff]  ;;  %v6429_v55 = vpop.f32.mrb[22].mxu1  ;;  %1435 = vst.msk [vmem:[#allocation3 + $0xc] sm:$0xf] %vm1431_vm10, %v15308_v39 }
 0x3a3   : > { %6058 = vst.msk [vmem:[#allocation2 + $0x60] sm:$0xff] %vm2066_vm6, %v6017_v40  ;;  %v6018_v50 = vadd.f32 %v5977_v42, %v5849_v43  ;;  %v6595_v51 = vadd.f32 %v6554_v44, %v6418_v23  ;;  %v14026_v52 = vpop.f32.mrb[23].mxu0  ;;  %v14112_v57 = vpop.f32.mrb[23].mxu1  ;;  %v6967_v42 = vor.u32 %v6966_v30, %v6963_v29 }
 0x3a4   : > { %v6555_v54 = vld [vmem:[#allocation2 + $0x58] sm:$0xff]  ;;  %1436 = vst.msk [vmem:[#allocation3 + $0x10] sm:$0xf] %vm1431_vm10, %v15308_v39  ;;  %1432 = vst.msk [vmem:[#allocation3] sm:$0xf] %vm1431_vm10, %v15308_v39 }
 0x3a5   : > { %6059 = vst.msk [vmem:[#allocation2 + $0x68] sm:$0xff] %vm2066_vm6, %v6018_v50  ;;  %6636 = vst.msk [vmem:[#allocation2 + $0x50] sm:$0xff] %vm2066_vm6, %v6595_v51  ;;  %v6596_v56 = vadd.f32 %v6555_v54, %v6421_v31  ;;  %14220 = vmatmul.mubr.msk.bf16.gmra.mrb[128].mxu0 %vm1798_vm3, %v6941_v45  ;;  %v15060_v31 = vld [vmem:[%s15476_s22 + $0x9c] sm:$0xff]   ;;  %v6968_v53 = vsel %vm18739_vm9, %v6958_v17, %v6967_v42 }
 0x3a6   : > { %14223 = vmatprep.mubr.msk.bf16.mxu0 %vm15307_vm1, %v15306_v34  ;;  %1433 = vst.msk [vmem:[#allocation3 + $0x4] sm:$0xf] %vm1431_vm10, %v15308_v39  ;;  %1434 = vst.msk [vmem:[#allocation3 + $0x8] sm:$0xf] %vm1431_vm10, %v15308_v39  ;;  %v6970_v43 = vshrl.u32 %v15060_v31, 16  ;;  %v6973_v44 = vshll.u32 %v15060_v31, 16 }
 0x3a7   : > { %6637 = vst.msk [vmem:[#allocation2 + $0x58] sm:$0xff] %vm2066_vm6, %v6596_v56  ;;  %v5983_v51 = vld [vmem:[#allocation2 + $0x98] sm:$0xff] }
 0x3a8   : > { %v5854_v61 = vpop.f32.mrb[24].mxu0  ;;  %v6434_v5 = vpop.f32.mrb[24].mxu1  ;;  %1437 = vst.msk [vmem:[#allocation3 + $0x14] sm:$0xf] %vm1431_vm10, %v15308_v39  ;;  %1438 = vst.msk [vmem:[#allocation3 + $0x18] sm:$0xf] %vm1431_vm10, %v15308_v39 }
 0x3a9   : > { %v6019_v63 = vadd.f32 %v5978_v62, %v5854_v61  ;;  %v14029_v0 = vpop.f32.mrb[25].mxu0  ;;  %v14115_v12 = vpop.f32.mrb[25].mxu1  ;;  %1439 = vst.msk [vmem:[#allocation3 + $0x1c] sm:$0xf] %vm1431_vm10, %v15308_v39  ;;  %1440 = vst.msk [vmem:[#allocation3 + $0x20] sm:$0xf] %vm1431_vm10, %v15308_v39 }
 0x3aa   : > { %v5857_v2 = vpop.f32.mrb[26].mxu0  ;;  %v6556_v3 = vld [vmem:[#allocation2 + $0x60] sm:$0xff]  ;;  %v6437_v14 = vpop.f32.mrb[26].mxu1  ;;  %1441 = vst.msk [vmem:[#allocation3 + $0x24] sm:$0xf] %vm1431_vm10, %v15308_v39  ;;  %v6975_v56 = vrot.slane %v6973_v44, 2 }
 0x3ab   : > { %6060 = vst.msk [vmem:[#allocation2 + $0x70] sm:$0xff] %vm2066_vm6, %v6019_v63  ;;  %v6020_v9 = vadd.f32 %v5979_v1, %v5857_v2  ;;  %v6597_v10 = vadd.f32 %v6556_v3, %v6426_v46  ;;  %v14030_v11 = vpop.f32.mrb[27].mxu0  ;;  %v14116_v16 = vpop.f32.mrb[27].mxu1  ;;  %v5982_v46 = vld [vmem:[#allocation2 + $0x90] sm:$0xff]  ;;  %v6979_v63 = vshrl.u32 %v15061_v47, 16  ;;  %v5984_v2 = vld [vmem:[#allocation2 + $0xa0] sm:$0xff] }
 0x3ac   : > { %v6557_v13 = vld [vmem:[#allocation2 + $0x68] sm:$0xff]  ;;  %1442 = vst.msk [vmem:[#allocation3 + $0x28] sm:$0xf] %vm1431_vm10, %v15308_v39  ;;  %1443 = vst.msk [vmem:[#allocation3 + $0x2c] sm:$0xf] %vm1431_vm10, %v15308_v39  ;;  %v5987_v31 = vld [vmem:[#allocation2 + $0xb8] sm:$0xff] }
 0x3ad   : > { %6061 = vst.msk [vmem:[#allocation2 + $0x78] sm:$0xff] %vm2066_vm6, %v6020_v9  ;;  %6638 = vst.msk [vmem:[#allocation2 + $0x60] sm:$0xff] %vm2066_vm6, %v6597_v10  ;;  %v6598_v15 = vadd.f32 %v6557_v13, %v6429_v55  ;;  %14224 = vmatmul.mubr.msk.bf16.gmra.mrb[132].mxu0 %vm1798_vm3, %v6950_v4  ;;  %v6972_v55 = vrot.slane %v6970_v43, 1  ;;  %v6982_v4 = vshll.u32 %v15061_v47, 16  ;;  %v6981_v7 = vrot.slane %v6979_v63, 1  ;;  %v15062_v10 = vld [vmem:[%s15476_s22 + $0xac] sm:$0xff]  }
 0x3ae   : > { %14227 = vmatprep.mubr.msk.bf16.mxu0 %vm15307_vm1, %v15306_v34  ;;  %1444 = vst.msk [vmem:[#allocation3 + $0x30] sm:$0xf] %vm1431_vm10, %v15308_v39  ;;  %1445 = vst.msk [vmem:[#allocation3 + $0x34] sm:$0xf] %vm1431_vm10, %v15308_v39 }
 0x3af   : > { %6639 = vst.msk [vmem:[#allocation2 + $0x68] sm:$0xff] %vm2066_vm6, %v6598_v15  ;;  %v6976_v3 = vor.u32 %v6975_v56, %v6972_v55  ;;  %v6984_v15 = vrot.slane %v6982_v4, 2 }
 0x3b0   : > { %v5862_v20 = vpop.f32.mrb[28].mxu0  ;;  %v6442_v22 = vpop.f32.mrb[28].mxu1  ;;  %1446 = vst.msk [vmem:[#allocation3 + $0x38] sm:$0xf] %vm1431_vm10, %v15308_v39  ;;  %1447 = vst.msk [vmem:[#allocation3 + $0x3c] sm:$0xf] %vm1431_vm10, %v15308_v39 }
 0x3b1   : > { %v6021_v23 = vadd.f32 %v5980_v21, %v5862_v20  ;;  %v14033_v24 = vpop.f32.mrb[29].mxu0  ;;  %v14119_v36 = vpop.f32.mrb[29].mxu1  ;;  %1449 = vst.msk [vmem:[#allocation3 + $0x40] sm:$0x3] %vm1448_vm11, %v15308_v39  ;;  %v6977_v13 = vsel %vm18739_vm9, %v6967_v42, %v6976_v3  ;;  %vm7469_vm11 = vcmask 257026  }
 0x3b2   : > { %v5865_v26 = vpop.f32.mrb[30].mxu0  ;;  %v6558_v27 = vld [vmem:[#allocation2 + $0x70] sm:$0xff]  ;;  %v6445_v38 = vpop.f32.mrb[30].mxu1 }
 0x3b3   : > { %6062 = vst.msk [vmem:[#allocation2 + $0x80] sm:$0xff] %vm2066_vm6, %v6021_v23  ;;  %v6022_v32 = vadd.f32 %v5981_v25, %v5865_v26  ;;  %v6599_v33 = vadd.f32 %v6558_v27, %v6434_v5  ;;  %v14034_v35 = vpop.f32.mrb[31].mxu0  ;;  %v14120_v41 = vpop.f32.mrb[31].mxu1  ;;  %v6988_v25 = vshrl.u32 %v15062_v10, 16  ;;  %v6985_v26 = vor.u32 %v6984_v15, %v6981_v7 }
 0x3b4   : > { %v6559_v37 = vld [vmem:[#allocation2 + $0x78] sm:$0xff]  ;;  %v6991_v27 = vshll.u32 %v15062_v10, 16  ;;  %v15065_v10 = vld [vmem:[%s18729_s3 + $0x8] sm:$0xff]  }
 0x3b5   : > { %6063 = vst.msk [vmem:[#allocation2 + $0x88] sm:$0xff] %vm2066_vm6, %v6022_v32  ;;  %6640 = vst.msk [vmem:[#allocation2 + $0x70] sm:$0xff] %vm2066_vm6, %v6599_v33  ;;  %v6600_v40 = vadd.f32 %v6559_v37, %v6437_v14  ;;  %14228 = vmatmul.mubr.msk.bf16.gmra.mrb[136].mxu0 %vm1798_vm3, %v6959_v28  ;;  %v6990_v32 = vrot.slane %v6988_v25, 1  ;;  %v6986_v36 = vsel %vm18739_vm9, %v6976_v3, %v6985_v26  ;;  %14258 = vmatpush3.bf16.msra.mxu1 %v15065_v10 }
 0x3b6   : > { %14231 = vmatprep.mubr.msk.bf16.mxu0 %vm15307_vm1, %v15306_v34  ;;  %14287 = vmatprep.subr.bf16.mxu1 %v15306_v34 }
 0x3b7   : > { %6641 = vst.msk [vmem:[#allocation2 + $0x78] sm:$0xff] %vm2066_vm6, %v6600_v40  ;;  %v15063_v40 = vld [vmem:[%s15476_s22 + $0xb4] sm:$0x3f]  }
 0x3b8   : > { %v5870_v45 = vpop.f32.mrb[32].mxu0  ;;  %v6450_v54 = vpop.f32.mrb[32].mxu1 }
 0x3b9   : > { %v6023_v48 = vadd.f32 %v5982_v46, %v5870_v45  ;;  %v14037_v49 = vpop.f32.mrb[33].mxu0  ;;  %v14123_v60 = vpop.f32.mrb[33].mxu1 }
 0x3ba   : > { %v5873_v50 = vpop.f32.mrb[34].mxu0  ;;  %v6560_v52 = vld [vmem:[#allocation2 + $0x80] sm:$0xff]  ;;  %v6453_v62 = vpop.f32.mrb[34].mxu1 }
 0x3bb   : > { %6064 = vst.msk [vmem:[#allocation2 + $0x90] sm:$0xff] %vm2066_vm6, %v6023_v48  ;;  %v6024_v57 = vadd.f32 %v5983_v51, %v5873_v50  ;;  %v6601_v58 = vadd.f32 %v6560_v52, %v6442_v22  ;;  %v14038_v59 = vpop.f32.mrb[35].mxu0  ;;  %v14124_v1 = vpop.f32.mrb[35].mxu1  ;;  %v5986_v22 = vld [vmem:[#allocation2 + $0xb0] sm:$0xff]  ;;  %v6997_v50 = vshrl.u32 %v15063_v40, 16  ;;  %v7000_v51 = vshll.u32 %v15063_v40, 16 }
 0x3bc   : > { %v6561_v61 = vld [vmem:[#allocation2 + $0x88] sm:$0xff] }
 0x3bd   : > { %6065 = vst.msk [vmem:[#allocation2 + $0x98] sm:$0xff] %vm2066_vm6, %v6024_v57  ;;  %6642 = vst.msk [vmem:[#allocation2 + $0x80] sm:$0xff] %vm2066_vm6, %v6601_v58  ;;  %v6602_v0 = vadd.f32 %v6561_v61, %v6445_v38  ;;  %14232 = vmatmul.mubr.msk.bf16.gmra.mrb[140].mxu0 %vm1798_vm3, %v6968_v53  ;;  %v6993_v38 = vrot.slane %v6991_v27, 2  ;;  %v5988_v53 = vld [vmem:[#allocation2 + $0xc0] sm:$0xff]  ;;  %v5989_v57 = vld [vmem:[#allocation2 + $0xc8] sm:$0xff]  ;;  %v6999_v61 = vrot.slane %v6997_v50, 1 }
 0x3be   : > { %14235 = vmatprep.mubr.msk.bf16.mxu0 %vm15307_vm1, %v15306_v34 }
 0x3bf   : > { %6643 = vst.msk [vmem:[#allocation2 + $0x88] sm:$0xff] %vm2066_vm6, %v6602_v0  ;;  %v6994_v49 = vor.u32 %v6993_v38, %v6990_v32 }
 0x3c0   : > { %v5878_v5 = vpop.f32.mrb[36].mxu0  ;;  %v6458_v14 = vpop.f32.mrb[36].mxu1 }
 0x3c1   : > { %v6025_v8 = vadd.f32 %v5984_v2, %v5878_v5  ;;  %v14041_v9 = vpop.f32.mrb[37].mxu0  ;;  %v14127_v19 = vpop.f32.mrb[37].mxu1  ;;  %v6995_v59 = vsel %vm18739_vm9, %v6985_v26, %v6994_v49 }
 0x3c2   : > { %v5881_v11 = vpop.f32.mrb[38].mxu0  ;;  %v6562_v12 = vld [vmem:[#allocation2 + $0x90] sm:$0xff]  ;;  %v6461_v21 = vpop.f32.mrb[38].mxu1 }
 0x3c3   : > { %6066 = vst.msk [vmem:[#allocation2 + $0xa0] sm:$0xff] %vm2066_vm6, %v6025_v8  ;;  %v6026_v16 = vadd.f32 %v5985_v6, %v5881_v11  ;;  %v6603_v17 = vadd.f32 %v6562_v12, %v6450_v54  ;;  %v14042_v18 = vpop.f32.mrb[39].mxu0  ;;  %v14128_v24 = vpop.f32.mrb[39].mxu1  ;;  %v5990_v9 = vld [vmem:[#allocation2 + $0xd0] sm:$0xff] }
 0x3c4   : > { %v6563_v20 = vld [vmem:[#allocation2 + $0x98] sm:$0xff] }
 0x3c5   : > { %6067 = vst.msk [vmem:[#allocation2 + $0xa8] sm:$0xff] %vm2066_vm6, %v6026_v16  ;;  %6644 = vst.msk [vmem:[#allocation2 + $0x90] sm:$0xff] %vm2066_vm6, %v6603_v17  ;;  %v6604_v23 = vadd.f32 %v6563_v20, %v6453_v62  ;;  %14236 = vmatmul.mubr.msk.bf16.gmra.mrb[144].mxu0 %vm1798_vm3, %v6977_v13  ;;  %v7002_v62 = vrot.slane %v7000_v51, 2  ;;  %v5995_v51 = vld [vmem:[#allocation2 + $0xf8] sm:$0xff] }
 0x3c6   : > { %14239 = vmatprep.mubr.msk.bf16.mxu0 %vm15307_vm1, %v15306_v34 }
 0x3c7   : > { %6645 = vst.msk [vmem:[#allocation2 + $0x98] sm:$0xff] %vm2066_vm6, %v6604_v23  ;;  %v7003_v7 = vor.u32 %v7002_v62, %v6999_v61 }
 0x3c8   : > { %v5886_v28 = vpop.f32.mrb[40].mxu0  ;;  %v6466_v37 = vpop.f32.mrb[40].mxu1 }
 0x3c9   : > { %v6027_v29 = vadd.f32 %v5986_v22, %v5886_v28  ;;  %v14045_v30 = vpop.f32.mrb[41].mxu0  ;;  %v14131_v44 = vpop.f32.mrb[41].mxu1  ;;  %v7004_v16 = vsel %vm18739_vm9, %v6994_v49, %v7003_v7  ;;  %v5992_v28 = vld [vmem:[#allocation2 + $0xe0] sm:$0xff]  ;;  %vm17630_vm9 = vmand %vm7475_vm12, %vm7476_vm13  ;;  %vm18741_vm12 = vsmask.f32 7950 }
 0x3ca   : > { %v5889_v33 = vpop.f32.mrb[42].mxu0  ;;  %v6564_v35 = vld [vmem:[#allocation2 + $0xa0] sm:$0xff]  ;;  %v6469_v46 = vpop.f32.mrb[42].mxu1 }
 0x3cb   : > { %6068 = vst.msk [vmem:[#allocation2 + $0xb0] sm:$0xff] %vm2066_vm6, %v6027_v29  ;;  %v6028_v41 = vadd.f32 %v5987_v31, %v5889_v33  ;;  %v6605_v42 = vadd.f32 %v6564_v35, %v6458_v14  ;;  %v14046_v43 = vpop.f32.mrb[43].mxu0  ;;  %v14132_v48 = vpop.f32.mrb[43].mxu1  ;;  %v5991_v14 = vld [vmem:[#allocation2 + $0xd8] sm:$0xff]  ;;  %v5993_v31 = vld [vmem:[#allocation2 + $0xe8] sm:$0xff] }
 0x3cc   : > { %v6565_v45 = vld [vmem:[#allocation2 + $0xa8] sm:$0xff] }
 0x3cd   : > { %6069 = vst.msk [vmem:[#allocation2 + $0xb8] sm:$0xff] %vm2066_vm6, %v6028_v41  ;;  %6646 = vst.msk [vmem:[#allocation2 + $0xa0] sm:$0xff] %vm2066_vm6, %v6605_v42  ;;  %v6606_v47 = vadd.f32 %v6565_v45, %v6461_v21  ;;  %14240 = vmatmul.mubr.msk.bf16.gmra.mrb[148].mxu0 %vm1798_vm3, %v6986_v36  ;;  %v15068_v42 = vld [vmem:[%s18729_s3 + $0x30] sm:$0xff]  }
 0x3ce   : > { %14243 = vmatprep.mubr.msk.bf16.mxu0 %vm15307_vm1, %v15306_v34  ;;  %14352 = vmatpush3.bf16.msra.mxu0 %v15068_v42 }
 0x3cf   : > { %6647 = vst.msk [vmem:[#allocation2 + $0xa8] sm:$0xff] %vm2066_vm6, %v6606_v47  ;;  %14353 = vmatprep.subr.bf16.mxu0 %v15306_v34  ;;  %v15069_v47 = vld [vmem:[%s18729_s3 + $0x38] sm:$0xff]  }
 0x3d0   : > { %v5894_v52 = vpop.f32.mrb[44].mxu0  ;;  %v6474_v60 = vpop.f32.mrb[44].mxu1 }
 0x3d1   : > { %v6029_v54 = vadd.f32 %v5988_v53, %v5894_v52  ;;  %v14049_v55 = vpop.f32.mrb[45].mxu0  ;;  %v14135_v2 = vpop.f32.mrb[45].mxu1 }
 0x3d2   : > { %v5897_v56 = vpop.f32.mrb[46].mxu0  ;;  %v6566_v58 = vld [vmem:[#allocation2 + $0xb0] sm:$0xff]  ;;  %v6477_v4 = vpop.f32.mrb[46].mxu1  ;;  %14354 = vmatpush3.bf16.msra.mxu0 %v15069_v47 }
 0x3d3   : > { %6070 = vst.msk [vmem:[#allocation2 + $0xc0] sm:$0xff] %vm2066_vm6, %v6029_v54  ;;  %v6030_v63 = vadd.f32 %v5989_v57, %v5897_v56  ;;  %v6607_v0 = vadd.f32 %v6566_v58, %v6466_v37  ;;  %v14050_v1 = vpop.f32.mrb[47].mxu0  ;;  %v14136_v6 = vpop.f32.mrb[47].mxu1  ;;  %14415 = vmatprep.subr.bf16.mxu0 %v15306_v34 }
 0x3d4   : > { %v6567_v3 = vld [vmem:[#allocation2 + $0xb8] sm:$0xff] }
 0x3d5   : > { %6071 = vst.msk [vmem:[#allocation2 + $0xc8] sm:$0xff] %vm2066_vm6, %v6030_v63  ;;  %6648 = vst.msk [vmem:[#allocation2 + $0xb0] sm:$0xff] %vm2066_vm6, %v6607_v0  ;;  %v6608_v5 = vadd.f32 %v6567_v3, %v6469_v46  ;;  %14244 = vmatmul.mubr.msk.bf16.gmra.mrb[152].mxu0 %vm1798_vm3, %v6995_v59  ;;  %v5994_v46 = vld [vmem:[#allocation2 + $0xf0] sm:$0xff]  ;;  %v5996_v63 = vld [vmem:[#allocation2 + $0x100] sm:$0xff] }
 0x3d6   : > { %14247 = vmatprep.mubr.msk.bf16.mxu0 %vm15307_vm1, %v15306_v34  ;;  %v5997_v3 = vld [vmem:[#allocation2 + $0x108] sm:$0xff] }
 0x3d7   : > { %6649 = vst.msk [vmem:[#allocation2 + $0xb8] sm:$0xff] %vm2066_vm6, %v6608_v5 }
 0x3d8   : > { %v5902_v8 = vpop.f32.mrb[48].mxu0  ;;  %v6482_v17 = vpop.f32.mrb[48].mxu1 }
 0x3d9   : > { %v6031_v11 = vadd.f32 %v5990_v9, %v5902_v8  ;;  %v14053_v12 = vpop.f32.mrb[49].mxu0  ;;  %v14139_v21 = vpop.f32.mrb[49].mxu1 }
 0x3da   : > { %v5905_v13 = vpop.f32.mrb[50].mxu0  ;;  %v6568_v15 = vld [vmem:[#allocation2 + $0xc0] sm:$0xff]  ;;  %v6485_v24 = vpop.f32.mrb[50].mxu1 }
 0x3db   : > { %6072 = vst.msk [vmem:[#allocation2 + $0xd0] sm:$0xff] %vm2066_vm6, %v6031_v11  ;;  %v6032_v18 = vadd.f32 %v5991_v14, %v5905_v13  ;;  %v6609_v19 = vadd.f32 %v6568_v15, %v6474_v60  ;;  %v14054_v20 = vpop.f32.mrb[51].mxu0  ;;  %v14140_v26 = vpop.f32.mrb[51].mxu1  ;;  %v5998_v15 = vld [vmem:[#allocation2 + $0x110] sm:$0xff] }
 0x3dc   : > { %v6569_v23 = vld [vmem:[#allocation2 + $0xc8] sm:$0xff] }
 0x3dd   : > { %6073 = vst.msk [vmem:[#allocation2 + $0xd8] sm:$0xff] %vm2066_vm6, %v6032_v18  ;;  %6650 = vst.msk [vmem:[#allocation2 + $0xc0] sm:$0xff] %vm2066_vm6, %v6609_v19  ;;  %v6610_v25 = vadd.f32 %v6569_v23, %v6477_v4  ;;  %14248 = vmatmul.mubr.msk.bf16.gmra.mrb[156].mxu0 %vm1798_vm3, %v7004_v16  ;;  %v5999_v19 = vld [vmem:[#allocation2 + $0x118] sm:$0xff] }
 0x3de   : > { %14251 = vmatprep.mubr.msk.bf16.mxu0 %vm15307_vm1, %v15306_v34 }
 0x3df   : > { %6651 = vst.msk [vmem:[#allocation2 + $0xc8] sm:$0xff] %vm2066_vm6, %v6610_v25 }
 0x3e0   : > { %v5910_v27 = vpop.f32.mrb[52].mxu0  ;;  %v6490_v33 = vpop.f32.mrb[52].mxu1 }
 0x3e1   : > { %v6033_v22 = vadd.f32 %v5992_v28, %v5910_v27  ;;  %v14057_v29 = vpop.f32.mrb[53].mxu0  ;;  %v14143_v38 = vpop.f32.mrb[53].mxu1 }
 0x3e2   : > { %v5913_v30 = vpop.f32.mrb[54].mxu0  ;;  %v6570_v32 = vld [vmem:[#allocation2 + $0xd0] sm:$0xff]  ;;  %v6493_v41 = vpop.f32.mrb[54].mxu1 }
 0x3e3   : > { %6074 = vst.msk [vmem:[#allocation2 + $0xe0] sm:$0xff] %vm2066_vm6, %v6033_v22  ;;  %v6034_v35 = vadd.f32 %v5993_v31, %v5913_v30  ;;  %v6611_v36 = vadd.f32 %v6570_v32, %v6482_v17  ;;  %v14058_v37 = vpop.f32.mrb[55].mxu0  ;;  %v14144_v44 = vpop.f32.mrb[55].mxu1  ;;  %v6000_v31 = vld [vmem:[#allocation2 + $0x120] sm:$0xff] }
 0x3e4   : > { %v6571_v40 = vld [vmem:[#allocation2 + $0xd8] sm:$0xff] }
 0x3e5   : > { %6075 = vst.msk [vmem:[#allocation2 + $0xe8] sm:$0xff] %vm2066_vm6, %v6034_v35  ;;  %6652 = vst.msk [vmem:[#allocation2 + $0xd0] sm:$0xff] %vm2066_vm6, %v6611_v36  ;;  %v6612_v43 = vadd.f32 %v6571_v40, %v6485_v24  ;;  %14252 = vmatmul.mubr.msk.bf16.gmra.mrb[160].mxu0 %vm1798_vm3, %v7003_v7  ;;  %v6001_v36 = vld [vmem:[#allocation2 + $0x128] sm:$0xff]  ;;  %vm18740_vm3 = vsmask.f32 7946 }
 0x3e6   : > { %14355 = vmatprep.mubr.msk.bf16.mxu0 %vm15307_vm1, %v15306_v34  ;;  %vm17625_vm14 = vmand %vm7469_vm11, %vm18740_vm3  ;;  %vm7509_vm11 = vcmask 257027   ;;  %vm7516_vm3 = vsmask.f32 3328 }
 0x3e7   : > { %6653 = vst.msk [vmem:[#allocation2 + $0xd8] sm:$0xff] %vm2066_vm6, %v6612_v43  ;;  %vm17659_vm13 = vmand %vm7509_vm11, %vm18741_vm12  ;;  %vm7553_vm12 = vcmask 253952  }
 0x3e8   : > { %v5918_v45 = vpop.f32.mrb[56].mxu0  ;;  %v6498_v53 = vpop.f32.mrb[56].mxu1  ;;  %vm17675_vm11 = vmand %vm1431_vm10, %vm7516_vm3  ;;  %vm7548_vm3 = vsmask.f32 7938 }
 0x3e9   : > { %v6035_v48 = vadd.f32 %v5994_v46, %v5918_v45  ;;  %v14061_v49 = vpop.f32.mrb[57].mxu0  ;;  %v14147_v57 = vpop.f32.mrb[57].mxu1  ;;  %vm17698_vm7 = vmand %vm1431_vm10, %vm7548_vm3 }
 0x3ea   : > { %v5921_v50 = vpop.f32.mrb[58].mxu0  ;;  %v6572_v52 = vld [vmem:[#allocation2 + $0xe0] sm:$0xff]  ;;  %v6501_v59 = vpop.f32.mrb[58].mxu1  ;;  %v6002_v49 = vld [vmem:[#allocation2 + $0x130] sm:$0xff]  ;;  %vm17707_vm4 = vmand %vm7553_vm12, %vm7554_vm8 }
 0x3eb   : > { %6076 = vst.msk [vmem:[#allocation2 + $0xf0] sm:$0xff] %vm2066_vm6, %v6035_v48  ;;  %v6036_v54 = vadd.f32 %v5995_v51, %v5921_v50  ;;  %v6613_v55 = vadd.f32 %v6572_v52, %v6490_v33  ;;  %v14062_v56 = vpop.f32.mrb[59].mxu0  ;;  %v14148_v61 = vpop.f32.mrb[59].mxu1 }
 0x3ec   : > { %v6573_v58 = vld [vmem:[#allocation2 + $0xe8] sm:$0xff] }
 0x3ed   : > { %6077 = vst.msk [vmem:[#allocation2 + $0xf8] sm:$0xff] %vm2066_vm6, %v6036_v54  ;;  %6654 = vst.msk [vmem:[#allocation2 + $0xe0] sm:$0xff] %vm2066_vm6, %v6613_v55  ;;  %v6614_v60 = vadd.f32 %v6573_v58, %v6493_v41 }
 0x3ef   : > { %6655 = vst.msk [vmem:[#allocation2 + $0xe8] sm:$0xff] %vm2066_vm6, %v6614_v60 }
 0x3f0   : > { %v5926_v62 = vpop.f32.mrb[60].mxu0  ;;  %v6506_v5 = vpop.f32.mrb[60].mxu1 }
 0x3f1   : > { %v6037_v0 = vadd.f32 %v5996_v63, %v5926_v62  ;;  %v14065_v1 = vpop.f32.mrb[61].mxu0  ;;  %v14151_v9 = vpop.f32.mrb[61].mxu1 }
 0x3f2   : > { %v5929_v2 = vpop.f32.mrb[62].mxu0  ;;  %v6574_v4 = vld [vmem:[#allocation2 + $0xf0] sm:$0xff]  ;;  %v6509_v11 = vpop.f32.mrb[62].mxu1  ;;  %v6004_v1 = vld [vmem:[#allocation2 + $0x140] sm:$0xff] }
 0x3f3   : > { %6078 = vst.msk [vmem:[#allocation2 + $0x100] sm:$0xff] %vm2066_vm6, %v6037_v0  ;;  %v6038_v6 = vadd.f32 %v5997_v3, %v5929_v2  ;;  %v6615_v7 = vadd.f32 %v6574_v4, %v6498_v53  ;;  %v14066_v8 = vpop.f32.mrb[63].mxu0  ;;  %v14152_v13 = vpop.f32.mrb[63].mxu1  ;;  %v6003_v53 = vld [vmem:[#allocation2 + $0x138] sm:$0xff] }
 0x3f4   : > { %v6575_v10 = vld [vmem:[#allocation2 + $0xf8] sm:$0xff] }
 0x3f5   : > { %6079 = vst.msk [vmem:[#allocation2 + $0x108] sm:$0xff] %vm2066_vm6, %v6038_v6  ;;  %6656 = vst.msk [vmem:[#allocation2 + $0xf0] sm:$0xff] %vm2066_vm6, %v6615_v7  ;;  %v6616_v12 = vadd.f32 %v6575_v10, %v6501_v59 }
 0x3f7   : > { %6657 = vst.msk [vmem:[#allocation2 + $0xf8] sm:$0xff] %vm2066_vm6, %v6616_v12 }
 0x3f8   : > { %v5934_v14 = vpop.f32.mrb[64].mxu0  ;;  %v6514_v21 = vpop.f32.mrb[64].mxu1 }
 0x3f9   : > { %v6039_v16 = vadd.f32 %v5998_v15, %v5934_v14  ;;  %v14069_v17 = vpop.f32.mrb[65].mxu0  ;;  %v14155_v26 = vpop.f32.mrb[65].mxu1  ;;  %v7271_v15 = vld [vmem:[#allocation2] sm:$0xff] }
 0x3fa   : > { %v5937_v18 = vpop.f32.mrb[66].mxu0  ;;  %v6576_v20 = vld [vmem:[#allocation2 + $0x100] sm:$0xff]  ;;  %v6517_v28 = vpop.f32.mrb[66].mxu1  ;;  %v7273_v26 = vld [vmem:[#allocation2 + $0x10] sm:$0xff] }
 0x3fb   : > { %6080 = vst.msk [vmem:[#allocation2 + $0x110] sm:$0xff] %vm2066_vm6, %v6039_v16  ;;  %v6040_v23 = vadd.f32 %v5999_v19, %v5937_v18  ;;  %v6617_v24 = vadd.f32 %v6576_v20, %v6506_v5  ;;  %v14070_v25 = vpop.f32.mrb[67].mxu0  ;;  %v14156_v29 = vpop.f32.mrb[67].mxu1  ;;  %v7272_v20 = vld [vmem:[#allocation2 + $0x8] sm:$0xff] }
 0x3fc   : > { %v6577_v27 = vld [vmem:[#allocation2 + $0x108] sm:$0xff]  ;;  %v7274_v29 = vld [vmem:[#allocation2 + $0x18] sm:$0xff] }
 0x3fd   : > { %6081 = vst.msk [vmem:[#allocation2 + $0x118] sm:$0xff] %vm2066_vm6, %v6040_v23  ;;  %6658 = vst.msk [vmem:[#allocation2 + $0x100] sm:$0xff] %vm2066_vm6, %v6617_v24  ;;  %v6618_v22 = vadd.f32 %v6577_v27, %v6509_v11 }
 0x3ff   : > { %6659 = vst.msk [vmem:[#allocation2 + $0x108] sm:$0xff] %vm2066_vm6, %v6618_v22 }
 0x400   : > { %v5942_v30 = vpop.f32.mrb[68].mxu0  ;;  %v6522_v38 = vpop.f32.mrb[68].mxu1 }
 0x401   : > { %v6041_v32 = vadd.f32 %v6000_v31, %v5942_v30  ;;  %v14073_v33 = vpop.f32.mrb[69].mxu0  ;;  %v14159_v43 = vpop.f32.mrb[69].mxu1 }
 0x402   : > { %v5945_v35 = vpop.f32.mrb[70].mxu0  ;;  %v6578_v37 = vld [vmem:[#allocation2 + $0x110] sm:$0xff]  ;;  %v6525_v45 = vpop.f32.mrb[70].mxu1  ;;  %v7275_v33 = vld [vmem:[#allocation2 + $0x20] sm:$0xff] }
 0x403   : > { %6082 = vst.msk [vmem:[#allocation2 + $0x120] sm:$0xff] %vm2066_vm6, %v6041_v32  ;;  %v6042_v40 = vadd.f32 %v6001_v36, %v5945_v35  ;;  %v6619_v41 = vadd.f32 %v6578_v37, %v6514_v21  ;;  %v14074_v42 = vpop.f32.mrb[71].mxu0  ;;  %v14160_v47 = vpop.f32.mrb[71].mxu1  ;;  %v7277_v43 = vld [vmem:[#allocation2 + $0x30] sm:$0xff] }
 0x404   : > { %v6579_v44 = vld [vmem:[#allocation2 + $0x118] sm:$0xff] }
 0x405   : > { %6083 = vst.msk [vmem:[#allocation2 + $0x128] sm:$0xff] %vm2066_vm6, %v6042_v40  ;;  %6660 = vst.msk [vmem:[#allocation2 + $0x110] sm:$0xff] %vm2066_vm6, %v6619_v41  ;;  %v6620_v46 = vadd.f32 %v6579_v44, %v6517_v28  ;;  %v7278_v47 = vld [vmem:[#allocation2 + $0x38] sm:$0xff] }
 0x407   : > { %6661 = vst.msk [vmem:[#allocation2 + $0x118] sm:$0xff] %vm2066_vm6, %v6620_v46 }
 0x408   : > { %v5950_v48 = vpop.f32.mrb[72].mxu0  ;;  %v6530_v55 = vpop.f32.mrb[72].mxu1 }
 0x409   : > { %v6043_v50 = vadd.f32 %v6002_v49, %v5950_v48  ;;  %v14077_v51 = vpop.f32.mrb[73].mxu0  ;;  %v14163_v59 = vpop.f32.mrb[73].mxu1 }
 0x40a   : > { %v5953_v52 = vpop.f32.mrb[74].mxu0  ;;  %v6580_v54 = vld [vmem:[#allocation2 + $0x120] sm:$0xff]  ;;  %v6533_v61 = vpop.f32.mrb[74].mxu1  ;;  %v7280_v59 = vld [vmem:[#allocation2 + $0x48] sm:$0xff] }
 0x40b   : > { %6084 = vst.msk [vmem:[#allocation2 + $0x130] sm:$0xff] %vm2066_vm6, %v6043_v50  ;;  %v6044_v56 = vadd.f32 %v6003_v53, %v5953_v52  ;;  %v6621_v57 = vadd.f32 %v6580_v54, %v6522_v38  ;;  %v14078_v58 = vpop.f32.mrb[75].mxu0  ;;  %v14164_v63 = vpop.f32.mrb[75].mxu1  ;;  %v7276_v38 = vld [vmem:[#allocation2 + $0x28] sm:$0xff]  ;;  %v7279_v53 = vld [vmem:[#allocation2 + $0x40] sm:$0xff] }
 0x40c   : > { %v6581_v60 = vld [vmem:[#allocation2 + $0x128] sm:$0xff]  ;;  %v17599_v63 = vld [vmem:[%s18728_s2] ss:$0 sm:$0xff] }
 0x40d   : > { %6085 = vst.msk [vmem:[#allocation2 + $0x138] sm:$0xff] %vm2066_vm6, %v6044_v56  ;;  %6662 = vst.msk [vmem:[#allocation2 + $0x120] sm:$0xff] %vm2066_vm6, %v6621_v57  ;;  %v6622_v62 = vadd.f32 %v6581_v60, %v6525_v45 }
 0x40f   : > { %6663 = vst.msk [vmem:[#allocation2 + $0x128] sm:$0xff] %vm2066_vm6, %v6622_v62 }
 0x410   : > { %v5958_v0 = vpop.f32.mrb[76].mxu0  ;;  %v6538_v6 = vpop.f32.mrb[76].mxu1 }
 0x411   : > { %v6045_v2 = vadd.f32 %v6004_v1, %v5958_v0  ;;  %v14081_v3 = vpop.f32.mrb[77].mxu0  ;;  %v14167_v9 = vpop.f32.mrb[77].mxu1 }
 0x412   : > { %v5961_v4 = vpop.f32.mrb[78].mxu0  ;;  %v6582_v5 = vld [vmem:[#allocation2 + $0x130] sm:$0xff]  ;;  %v6541_v11 = vpop.f32.mrb[78].mxu1  ;;  %v7282_v9 = vld [vmem:[#allocation2 + $0x58] sm:$0xff] }
 0x413   : > { %6086 = vst.msk [vmem:[#allocation2 + $0x140] sm:$0xff] %vm2066_vm6, %v6045_v2  ;;  %v6623_v7 = vadd.f32 %v6582_v5, %v6530_v55  ;;  %v14082_v8 = vpop.f32.mrb[79].mxu0  ;;  %v14168_v13 = vpop.f32.mrb[79].mxu1  ;;  %v7281_v4 = vld [vmem:[#allocation2 + $0x50] sm:$0xff] }
 0x414   : > { %v6583_v10 = vld [vmem:[#allocation2 + $0x138] sm:$0xff] }
 0x415   : > { %6664 = vst.msk [vmem:[#allocation2 + $0x130] sm:$0xff] %vm2066_vm6, %v6623_v7  ;;  %v6624_v12 = vadd.f32 %v6583_v10, %v6533_v61 }
 0x417   : > { %6665 = vst.msk [vmem:[#allocation2 + $0x138] sm:$0xff] %vm2066_vm6, %v6624_v12 }
 0x418   : > { %v7105_v14 = vpop.f32.mrb[80].mxu0 }
 0x419   : > { %v7312_v16 = vadd.f32 %v7271_v15, %v7105_v14  ;;  %v14173_v17 = vpop.f32.mrb[81].mxu0 }
 0x41a   : > { %v6584_v18 = vld [vmem:[#allocation2 + $0x140] sm:$0xff]  ;;  %v7108_v19 = vpop.f32.mrb[82].mxu0 }
 0x41b   : > { %7353 = vst.msk [vmem:[#allocation2] sm:$0xff] %vm2066_vm6, %v7312_v16  ;;  %v6625_v21 = vadd.f32 %v6584_v18, %v6538_v6  ;;  %v7313_v23 = vadd.f32 %v7272_v20, %v7108_v19  ;;  %v14174_v24 = vpop.f32.mrb[83].mxu0  ;;  %v7432_v20 = vld [vmem:[#allocation3 + $0xc] sm:$0xe] }
 0x41d   : > { %6666 = vst.msk [vmem:[#allocation2 + $0x140] sm:$0xff] %vm2066_vm6, %v6625_v21  ;;  %7354 = vst.msk [vmem:[#allocation2 + $0x8] sm:$0xff] %vm2066_vm6, %v7313_v23  ;;  %v7283_v23 = vld [vmem:[#allocation2 + $0x60] sm:$0xff] }
 0x420   : > { %v7113_v25 = vpop.f32.mrb[84].mxu0 }
 0x421   : > { %v7314_v27 = vadd.f32 %v7273_v26, %v7113_v25  ;;  %v14177_v28 = vpop.f32.mrb[85].mxu0 }
 0x422   : > { %v7116_v22 = vpop.f32.mrb[86].mxu0  ;;  %v7284_v28 = vld [vmem:[#allocation2 + $0x68] sm:$0xff] }
 0x423   : > { %7355 = vst.msk [vmem:[#allocation2 + $0x10] sm:$0xff] %vm2066_vm6, %v7314_v27  ;;  %v7315_v30 = vadd.f32 %v7274_v29, %v7116_v22  ;;  %v14178_v31 = vpop.f32.mrb[87].mxu0  ;;  %v7438_v29 = vld [vmem:[#allocation3 + $0x10] sm:$0x3] }
 0x425   : > { %7356 = vst.msk [vmem:[#allocation2 + $0x18] sm:$0xff] %vm2066_vm6, %v7315_v30 }
 0x428   : > { %v7121_v32 = vpop.f32.mrb[88].mxu0 }
 0x429   : > { %v7316_v35 = vadd.f32 %v7275_v33, %v7121_v32  ;;  %v14181_v36 = vpop.f32.mrb[89].mxu0 }
 0x42a   : > { %v7124_v37 = vpop.f32.mrb[90].mxu0 }
 0x42b   : > { %7357 = vst.msk [vmem:[#allocation2 + $0x20] sm:$0xff] %vm2066_vm6, %v7316_v35  ;;  %v7317_v40 = vadd.f32 %v7276_v38, %v7124_v37  ;;  %v14182_v41 = vpop.f32.mrb[91].mxu0 }
 0x42d   : > { %7358 = vst.msk [vmem:[#allocation2 + $0x28] sm:$0xff] %vm2066_vm6, %v7317_v40  ;;  %v15066_v40 = vld [vmem:[#allocation3] sm:$0xfc]  }
 0x430   : > { %v7129_v42 = vpop.f32.mrb[92].mxu0 }
 0x431   : > { %v7318_v44 = vadd.f32 %v7277_v43, %v7129_v42  ;;  %v14185_v45 = vpop.f32.mrb[93].mxu0 }
 0x432   : > { %v7132_v46 = vpop.f32.mrb[94].mxu0  ;;  %v7396_v50 = vld [vmem:[#allocation2 + $0x13] ss:$2 sm:$0xff]  ;;  %v7398_v51 = vld [vmem:[#allocation2 + $0x14] ss:$2 sm:$0xff] }
 0x433   : > { %7359 = vst.msk [vmem:[#allocation2 + $0x30] sm:$0xff] %vm2066_vm6, %v7318_v44  ;;  %v7319_v48 = vadd.f32 %v7278_v47, %v7132_v46  ;;  %v14186_v49 = vpop.f32.mrb[95].mxu0  ;;  %v7399_v54 = vmax.f32 %v7396_v50, %v7398_v51  ;;  %v7285_v45 = vld [vmem:[#allocation2 + $0x70] sm:$0xff]  ;;  %v7748_v46 = vshrl.u32 %v15066_v40, 16  ;;  %v7751_v47 = vshll.u32 %v15066_v40, 16 }
 0x434   : > { %v7289_v40 = vld [vmem:[#allocation2 + $0x90] sm:$0xff] }
 0x435   : > { %7360 = vst.msk [vmem:[#allocation2 + $0x38] sm:$0xff] %vm2066_vm6, %v7319_v48 }
 0x438   : > { %v7137_v52 = vpop.f32.mrb[96].mxu0 }
 0x439   : > { %v7320_v55 = vadd.f32 %v7279_v53, %v7137_v52  ;;  %v14189_v56 = vpop.f32.mrb[97].mxu0  ;;  %v7286_v52 = vld [vmem:[#allocation2 + $0x78] sm:$0xff] }
 0x43a   : > { %v7401_v57 = vld [vmem:[#allocation2 + $0x25] ss:$2 sm:$0xff]  ;;  %v7140_v58 = vpop.f32.mrb[98].mxu0  ;;  %v7404_v0 = vld [vmem:[#allocation2 + $0x26] ss:$2 sm:$0xff] }
 0x43b   : > { %v7402_v60 = vmax.f32 %v7399_v54, %v7401_v57  ;;  %7361 = vst.msk [vmem:[#allocation2 + $0x40] sm:$0xff] %vm2066_vm6, %v7320_v55  ;;  %v7321_v61 = vadd.f32 %v7280_v59, %v7140_v58  ;;  %v14190_v62 = vpop.f32.mrb[99].mxu0  ;;  %v7750_v57 = vrot.slane %v7748_v46, 2  ;;  %v7753_v58 = vrot.slane %v7751_v47, 3 }
 0x43c   : > { %v7472_v62 = vld [vmem:[#allocation3 + $0x10] sm:$0xc] }
 0x43d   : > { %v7405_v1 = vmax.f32 %v7402_v60, %v7404_v0  ;;  %7362 = vst.msk [vmem:[#allocation2 + $0x48] sm:$0xff] %vm2066_vm6, %v7321_v61 }
 0x43f   : > { %v7412_v2 = vadd.f32 %v17599_v63, %v7405_v1 }
 0x440   : > { %v7145_v3 = vpop.f32.mrb[100].mxu0 }
 0x441   : > { %v7413_v5 = vmax.f32 %v7412_v2, 0.0  ;;  %v7322_v6 = vadd.f32 %v7281_v4, %v7145_v3  ;;  %v14193_v7 = vpop.f32.mrb[101].mxu0  ;;  %v7287_v3 = vld [vmem:[#allocation2 + $0x80] sm:$0xff] }
 0x442   : > { %v7148_v8 = vpop.f32.mrb[102].mxu0  ;;  %v7442_v15 = vld [vmem:[#allocation2 + $0x37] ss:$2 sm:$0xff]  ;;  %v7444_v16 = vld [vmem:[#allocation2 + $0x38] ss:$2 sm:$0xff] }
 0x443   : > { %v13083_v10 = vpack.c.bf16 %v7413_v5, %v7413_v5  ;;  %7363 = vst.msk [vmem:[#allocation2 + $0x50] sm:$0xff] %vm2066_vm6, %v7322_v6  ;;  %v7323_v11 = vadd.f32 %v7282_v9, %v7148_v8  ;;  %v14194_v12 = vpop.f32.mrb[103].mxu0  ;;  %v7445_v25 = vmax.f32 %v7442_v15, %v7444_v16  ;;  %v7288_v9 = vld [vmem:[#allocation2 + $0x88] sm:$0xff]  ;;  %v7478_v16 = vld [vmem:[#allocation3 + $0x14] sm:$0x7] }
 0x445   : > { %v7419_v13 = vshrl.u32 %v13083_v10, 16  ;;  %v7422_v14 = vshll.u32 %v13083_v10, 16  ;;  %7364 = vst.msk [vmem:[#allocation2 + $0x58] sm:$0xff] %vm2066_vm6, %v7323_v11  ;;  %v7754_v10 = vor.u32 %v7753_v58, %v7750_v57 }
 0x447   : > { %v7421_v17 = vrot.slane %v7419_v13, 6  ;;  %v7424_v18 = vrot.slane %v7422_v14, 7  ;;  %v7308_v13 = vld [vmem:[#allocation2 + $0x128] sm:$0xff] }
 0x448   : > { %v7153_v21 = vpop.f32.mrb[104].mxu0 }
 0x449   : > { %v7425_v24 = vor.u32 %v7424_v18, %v7421_v17  ;;  %v7324_v26 = vadd.f32 %v7283_v23, %v7153_v21  ;;  %v14197_v27 = vpop.f32.mrb[105].mxu0  ;;  %v15076_v21 = vld [vmem:[%s18729_s3 + $0x10] sm:$0xff]  }
 0x44a   : > { %v7447_v30 = vld [vmem:[#allocation2 + $0x49] ss:$2 sm:$0xff]  ;;  %v7156_v31 = vpop.f32.mrb[106].mxu0 }
 0x44b   : > { %v7426_v32 = vrot.slane %v7425_v24, 4  ;;  %v7433_v33 = vsel %vm17605_vm15, %v7425_v24, %v7432_v20  ;;  %v7448_v35 = vmax.f32 %v7445_v25, %v7447_v30  ;;  %7365 = vst.msk [vmem:[#allocation2 + $0x60] sm:$0xff] %vm2066_vm6, %v7324_v26  ;;  %v7325_v36 = vadd.f32 %v7284_v28, %v7156_v31  ;;  %v14198_v37 = vpop.f32.mrb[107].mxu0  ;;  %v15070_v20 = vld [vmem:[#allocation3 + $0x4] sm:$0xf8]  }
 0x44c   : > { %7434 = vst [vmem:[#allocation3 + $0xc] sm:$0xe] %v7433_v33  ;;  %v7450_v38 = vld [vmem:[#allocation2 + $0x4a] ss:$2 sm:$0xff]  ;;  %v8502_v33 = vshrl.u32 %v15070_v20, 16 }
 0x44d   : > { %v7439_v41 = vsel %vm17611_vm0, %v7426_v32, %v7438_v29  ;;  %v7451_v42 = vmax.f32 %v7448_v35, %v7450_v38  ;;  %7366 = vst.msk [vmem:[#allocation2 + $0x68] sm:$0xff] %vm2066_vm6, %v7325_v36  ;;  %v8505_v35 = vshll.u32 %v15070_v20, 16  ;;  %v15080_v36 = vld [vmem:[%s18729_s3 + $0x18] sm:$0xff]  }
 0x44e   : > { %7440 = vst [vmem:[#allocation3 + $0x10] sm:$0x3] %v7439_v41  ;;  %v8504_v46 = vrot.slane %v8502_v33, 3 }
 0x44f   : > { %v7452_v43 = vadd.f32 %v17599_v63, %v7451_v42  ;;  %v8507_v47 = vrot.slane %v8505_v35, 4 }
 0x450   : > { %v7161_v44 = vpop.f32.mrb[108].mxu0 }
 0x451   : > { %v7453_v48 = vmax.f32 %v7452_v43, 0.0  ;;  %v7326_v49 = vadd.f32 %v7285_v45, %v7161_v44  ;;  %v14201_v50 = vpop.f32.mrb[109].mxu0  ;;  %v7290_v45 = vld [vmem:[#allocation2 + $0x98] sm:$0xff] }
 0x452   : > { %v7164_v51 = vpop.f32.mrb[110].mxu0 }
 0x453   : > { %v13084_v53 = vpack.c.bf16 %v7453_v48, %v7453_v48  ;;  %7367 = vst.msk [vmem:[#allocation2 + $0x70] sm:$0xff] %vm2066_vm6, %v7326_v49  ;;  %v7327_v54 = vadd.f32 %v7286_v52, %v7164_v51  ;;  %v14202_v55 = vpop.f32.mrb[111].mxu0  ;;  %v15067_v56 = vld [vmem:[#allocation3 + $0x8] sm:$0xff]  }
 0x454   : > { %v7756_v61 = vshrl.u32 %v15067_v56, 16  ;;  %v7759_v0 = vshll.u32 %v15067_v56, 16  ;;  %v7482_v6 = vld [vmem:[#allocation2 + $0x5b] ss:$2 sm:$0xff]  ;;  %v7484_v7 = vld [vmem:[#allocation2 + $0x5c] ss:$2 sm:$0xff]  ;;  %v8508_v56 = vor.u32 %v8507_v47, %v8504_v46 }
 0x455   : > { %v7459_v59 = vshrl.u32 %v13084_v53, 16  ;;  %v7462_v60 = vshll.u32 %v13084_v53, 16  ;;  %7368 = vst.msk [vmem:[#allocation2 + $0x78] sm:$0xff] %vm2066_vm6, %v7327_v54  ;;  %v7485_v25 = vmax.f32 %v7482_v6, %v7484_v7  ;;  %v7512_v55 = vld [vmem:[#allocation3 + $0x14] sm:$0x8] }
 0x456   : > { %v7758_v4 = vrot.slane %v7756_v61, 2  ;;  %v7761_v11 = vrot.slane %v7759_v0, 3  ;;  %v7291_v0 = vld [vmem:[#allocation2 + $0xa0] sm:$0xff] }
 0x457   : > { %v7461_v1 = vrot.slane %v7459_v59, 5  ;;  %v7464_v2 = vrot.slane %v7462_v60, 6 }
 0x458   : > { %v7169_v8 = vpop.f32.mrb[112].mxu0  ;;  %v17634_v18 = vor.u32 %v7761_v11, %v7758_v4  ;;  %v7518_v11 = vld [vmem:[#allocation3 + $0x18] sm:$0xf] }
 0x459   : > { %v7465_v12 = vor.u32 %v7464_v2, %v7461_v1  ;;  %v7328_v14 = vadd.f32 %v7287_v3, %v7169_v8  ;;  %v14205_v15 = vpop.f32.mrb[113].mxu0  ;;  %v7292_v8 = vld [vmem:[#allocation2 + $0xa8] sm:$0xff] }
 0x45a   : > { %v7172_v17 = vpop.f32.mrb[114].mxu0  ;;  %v7763_v29 = vsel %vm1609_vm2, %v7754_v10, %v17634_v18 }
 0x45b   : > { %v7466_v23 = vrot.slane %v7465_v12, 4  ;;  %v7473_v24 = vsel %vm17625_vm14, %v7465_v12, %v7472_v62  ;;  %7369 = vst.msk [vmem:[#allocation2 + $0x80] sm:$0xff] %vm2066_vm6, %v7328_v14  ;;  %v7329_v26 = vadd.f32 %v7288_v9, %v7172_v17  ;;  %v14206_v27 = vpop.f32.mrb[115].mxu0  ;;  %14260 = vmatmul.mubr.msk.bf16.vlgmr.msra.gmra.mrb[80].mxu1 %vm2066_vm6, %v7763_v29  ;;  %v7293_v29 = vld [vmem:[#allocation2 + $0xb0] sm:$0xff] }
 0x45c   : > { %7474 = vst [vmem:[#allocation3 + $0x10] sm:$0xc] %v7473_v24  ;;  %v7487_v28 = vld [vmem:[#allocation2 + $0x6d] ss:$2 sm:$0xff]  ;;  %v7490_v32 = vld [vmem:[#allocation2 + $0x6e] ss:$2 sm:$0xff]  ;;  %14263 = vmatprep.mubr.msk.bf16.mxu1 %vm15307_vm1, %v15306_v34  ;;  %14288 = vmatpush3.bf16.msra.mxu1 %v15076_v21 }
 0x45d   : > { %v7479_v30 = vsel %vm17630_vm9, %v7466_v23, %v7478_v16  ;;  %v7488_v31 = vmax.f32 %v7485_v25, %v7487_v28  ;;  %7370 = vst.msk [vmem:[#allocation2 + $0x88] sm:$0xff] %vm2066_vm6, %v7329_v26  ;;  %14289 = vmatprep.subr.bf16.mxu1 %v15306_v34  ;;  %v15087_v16 = vld [vmem:[%s18729_s3 + $0x50] sm:$0xff]   ;;  %v15088_v24 = vld [vmem:[%s18729_s3 + $0x58] sm:$0xff]  }
 0x45e   : > { %7480 = vst [vmem:[#allocation3 + $0x14] sm:$0x7] %v7479_v30 }
 0x45f   : > { %v7491_v37 = vmax.f32 %v7488_v31, %v7490_v32 }
 0x460   : > { %v7177_v38 = vpop.f32.mrb[116].mxu0  ;;  %14290 = vmatpush3.bf16.msra.mxu1 %v15080_v36  ;;  %v7294_v36 = vld [vmem:[#allocation2 + $0xb8] sm:$0xff] }
 0x461   : > { %v7492_v41 = vadd.f32 %v17599_v63, %v7491_v37  ;;  %v7330_v42 = vadd.f32 %v7289_v40, %v7177_v38  ;;  %v14209_v43 = vpop.f32.mrb[117].mxu0  ;;  %14319 = vmatprep.subr.bf16.mxu1 %v15306_v34 }
 0x462   : > { %v7180_v44 = vpop.f32.mrb[118].mxu0 }
 0x463   : > { %v7493_v48 = vmax.f32 %v7492_v41, 0.0  ;;  %7371 = vst.msk [vmem:[#allocation2 + $0x90] sm:$0xff] %vm2066_vm6, %v7330_v42  ;;  %v7331_v49 = vadd.f32 %v7290_v45, %v7180_v44  ;;  %v14210_v50 = vpop.f32.mrb[119].mxu0  ;;  %v15071_v51 = vld [vmem:[#allocation3 + $0xc] sm:$0xff]  }
 0x464   : > { %v8510_v53 = vshrl.u32 %v15071_v51, 16  ;;  %v8513_v54 = vshll.u32 %v15071_v51, 16  ;;  %v7522_v20 = vld [vmem:[#allocation2 + $0x7f] ss:$2 sm:$0xff]  ;;  %v7524_v21 = vld [vmem:[#allocation2 + $0x80] ss:$2 sm:$0xff] }
 0x465   : > { %v13085_v52 = vpack.c.bf16 %v7493_v48, %v7493_v48  ;;  %7372 = vst.msk [vmem:[#allocation2 + $0x98] sm:$0xff] %vm2066_vm6, %v7331_v49  ;;  %v7525_v27 = vmax.f32 %v7522_v20, %v7524_v21  ;;  %v7295_v50 = vld [vmem:[#allocation2 + $0xc0] sm:$0xff]  ;;  %v7297_v20 = vld [vmem:[#allocation2 + $0xd0] sm:$0xff] }
 0x466   : > { %v8512_v59 = vrot.slane %v8510_v53, 3  ;;  %v8515_v60 = vrot.slane %v8513_v54, 4 }
 0x467   : > { %v7499_v57 = vshll.u32 %v13085_v52, 16  ;;  %v7502_v58 = vshrl.u32 %v13085_v52, 16 }
 0x468   : > { %v7185_v62 = vpop.f32.mrb[120].mxu0  ;;  %v17663_v6 = vor.u32 %v8515_v60, %v8512_v59 }
 0x469   : > { %v7501_v1 = vrot.slane %v7499_v57, 5  ;;  %v7504_v2 = vrot.slane %v7502_v58, 4  ;;  %v7332_v3 = vadd.f32 %v7291_v0, %v7185_v62  ;;  %v14213_v4 = vpop.f32.mrb[121].mxu0  ;;  %v7296_v57 = vld [vmem:[#allocation2 + $0xc8] sm:$0xff] }
 0x46a   : > { %v7188_v7 = vpop.f32.mrb[122].mxu0  ;;  %v8517_v15 = vsel %vm2837_vm5, %v8508_v56, %v17663_v6 }
 0x46b   : > { %v7505_v9 = vor.u32 %v7504_v2, %v7501_v1  ;;  %v7513_v10 = vsel %vm17659_vm13, %v7501_v1, %v7512_v55  ;;  %7373 = vst.msk [vmem:[#allocation2 + $0xa0] sm:$0xff] %vm2066_vm6, %v7332_v3  ;;  %v7333_v12 = vadd.f32 %v7292_v8, %v7188_v7  ;;  %v14214_v14 = vpop.f32.mrb[123].mxu0  ;;  %14356 = vmatmul.mubr.msk.bf16.vlgmr.msra.gmra.mrb[164].mxu0 %vm2066_vm6, %v8517_v15  ;;  %v7550_v1 = vld [vmem:[#allocation3 + $0x1c] sm:$0xf]  ;;  %v7556_v2 = vld [vmem:[#allocation3 + $0x20] sm:$0x1] }
 0x46c   : > { %7514 = vst [vmem:[#allocation3 + $0x14] sm:$0x8] %v7513_v10  ;;  %14359 = vmatprep.mubr.msk.bf16.mxu0 %vm15307_vm1, %v15306_v34  ;;  %14416 = vmatpush3.bf16.msra.mxu0 %v15087_v16  ;;  %v7527_v25 = vld [vmem:[#allocation2 + $0x91] ss:$2 sm:$0xff] }
 0x46d   : > { %v7506_v23 = vrot.slane %v7505_v9, 4  ;;  %7374 = vst.msk [vmem:[#allocation2 + $0xa8] sm:$0xff] %vm2066_vm6, %v7333_v12  ;;  %14417 = vmatprep.subr.bf16.mxu0 %v15306_v34  ;;  %v7528_v30 = vmax.f32 %v7525_v27, %v7527_v25 }
 0x46f   : > { %v7519_v26 = vsel %vm17675_vm11, %v7506_v23, %v7518_v11 }
 0x470   : > { %7520 = vst [vmem:[#allocation3 + $0x18] sm:$0xf] %v7519_v26  ;;  %v7193_v28 = vpop.f32.mrb[124].mxu0  ;;  %14418 = vmatpush3.bf16.msra.mxu0 %v15088_v24 }
 0x471   : > { %v7334_v31 = vadd.f32 %v7293_v29, %v7193_v28  ;;  %v14217_v32 = vpop.f32.mrb[125].mxu0  ;;  %14479 = vmatprep.subr.bf16.mxu0 %v15306_v34 }
 0x472   : > { %v7530_v33 = vld [vmem:[#allocation2 + $0x92] ss:$2 sm:$0xff]  ;;  %v7196_v35 = vpop.f32.mrb[126].mxu0 }
 0x473   : > { %v7531_v37 = vmax.f32 %v7528_v30, %v7530_v33  ;;  %7375 = vst.msk [vmem:[#allocation2 + $0xb0] sm:$0xff] %vm2066_vm6, %v7334_v31  ;;  %v7335_v38 = vadd.f32 %v7294_v36, %v7196_v35  ;;  %v14218_v40 = vpop.f32.mrb[127].mxu0  ;;  %v15072_v41 = vld [vmem:[#allocation3 + $0x10] sm:$0xff]  }
 0x474   : > { %v7765_v43 = vshrl.u32 %v15072_v41, 16  ;;  %v7768_v44 = vshll.u32 %v15072_v41, 16  ;;  %v7298_v30 = vld [vmem:[#allocation2 + $0xd8] sm:$0xff] }
 0x475   : > { %v7532_v42 = vadd.f32 %v17599_v63, %v7531_v37  ;;  %7376 = vst.msk [vmem:[#allocation2 + $0xb8] sm:$0xff] %vm2066_vm6, %v7335_v38  ;;  %v7299_v38 = vld [vmem:[#allocation2 + $0xe0] sm:$0xff] }
 0x476   : > { %v7767_v46 = vrot.slane %v7765_v43, 2  ;;  %v7770_v47 = vrot.slane %v7768_v44, 3 }
 0x477   : > { %v7533_v45 = vmax.f32 %v7532_v42, 0.0  ;;  %v15073_v48 = vld [vmem:[#allocation3 + $0x14] sm:$0xff]  }
 0x478   : > { %v7201_v49 = vpop.f32.mrb[128].mxu0  ;;  %v17693_v54 = vor.u32 %v7770_v47, %v7767_v46  ;;  %v8519_v55 = vshrl.u32 %v15073_v48, 16  ;;  %v8522_v58 = vshll.u32 %v15073_v48, 16 }
 0x479   : > { %v13086_v51 = vpack.c.bf16 %v7533_v45, %v7533_v45  ;;  %v7336_v52 = vadd.f32 %v7295_v50, %v7201_v49  ;;  %v14221_v53 = vpop.f32.mrb[129].mxu0  ;;  %v7300_v45 = vld [vmem:[#allocation2 + $0xe8] sm:$0xff] }
 0x47a   : > { %v7204_v56 = vpop.f32.mrb[130].mxu0  ;;  %v7772_v3 = vsel %vm1609_vm2, %v17634_v18, %v17693_v54  ;;  %v8521_v4 = vrot.slane %v8519_v55, 3  ;;  %v8524_v7 = vrot.slane %v8522_v58, 4  ;;  %v7560_v11 = vld [vmem:[#allocation2 + $0xa3] ss:$2 sm:$0xff] }
 0x47b   : > { %v7539_v59 = vshrl.u32 %v13086_v51, 16  ;;  %7377 = vst.msk [vmem:[#allocation2 + $0xc0] sm:$0xff] %vm2066_vm6, %v7336_v52  ;;  %v7337_v60 = vadd.f32 %v7296_v57, %v7204_v56  ;;  %v14222_v62 = vpop.f32.mrb[131].mxu0  ;;  %v7542_v9 = vshll.u32 %v13086_v51, 16  ;;  %14264 = vmatmul.mubr.msk.bf16.gmra.mrb[84].mxu1 %vm2066_vm6, %v7772_v3  ;;  %v7562_v12 = vld [vmem:[#allocation2 + $0xa4] ss:$2 sm:$0xff] }
 0x47c   : > { %v17713_v14 = vor.u32 %v8524_v7, %v8521_v4  ;;  %14267 = vmatprep.mubr.msk.bf16.mxu1 %vm15307_vm1, %v15306_v34  ;;  %v7563_v25 = vmax.f32 %v7560_v11, %v7562_v12 }
 0x47d   : > { %v7541_v8 = vrot.slane %v7539_v59, 7  ;;  %7378 = vst.msk [vmem:[#allocation2 + $0xc8] sm:$0xff] %vm2066_vm6, %v7337_v60  ;;  %v7587_v60 = vld [vmem:[#allocation3 + $0x20] sm:$0xe] }
 0x47e   : > { %v8526_v21 = vsel %vm2837_vm5, %v17663_v6, %v17713_v14 }
 0x47f   : > { %v7544_v18 = vor.u32 %v7542_v9, %v7541_v8  ;;  %v7545_v15 = vrot.slane %v7541_v8, 4  ;;  %14360 = vmatmul.mubr.msk.bf16.gmra.mrb[168].mxu0 %vm2066_vm6, %v8526_v21  ;;  %v7590_v9 = vld [vmem:[#allocation3 + $0x24] sm:$0x3] }
 0x480   : > { %v7209_v16 = vpop.f32.mrb[132].mxu0  ;;  %14363 = vmatprep.mubr.msk.bf16.mxu0 %vm15307_vm1, %v15306_v34 }
 0x481   : > { %v7551_v23 = vsel %vm17698_vm7, %v7544_v18, %v7550_v1  ;;  %v7557_v24 = vsel %vm17707_vm4, %v7545_v15, %v7556_v2  ;;  %v7338_v26 = vadd.f32 %v7297_v20, %v7209_v16  ;;  %v14225_v27 = vpop.f32.mrb[133].mxu0  ;;  %v7301_v1 = vld [vmem:[#allocation2 + $0xf0] sm:$0xff]  ;;  %v7302_v18 = vld [vmem:[#allocation2 + $0xf8] sm:$0xff] }
 0x482   : > { %7552 = vst [vmem:[#allocation3 + $0x1c] sm:$0xf] %v7551_v23  ;;  %7558 = vst [vmem:[#allocation3 + $0x20] sm:$0x1] %v7557_v24  ;;  %v7565_v28 = vld [vmem:[#allocation2 + $0xb5] ss:$2 sm:$0xff] }
 0x483   : > { %v7212_v29 = vpop.f32.mrb[134].mxu0  ;;  %v7566_v6 = vmax.f32 %v7563_v25, %v7565_v28  ;;  %7379 = vst.msk [vmem:[#allocation2 + $0xd0] sm:$0xff] %vm2066_vm6, %v7338_v26  ;;  %v7568_v33 = vld [vmem:[#allocation2 + $0xb6] ss:$2 sm:$0xff] }
 0x484   : > { %v7339_v31 = vadd.f32 %v7298_v30, %v7212_v29  ;;  %v14226_v32 = vpop.f32.mrb[135].mxu0  ;;  %v7303_v28 = vld [vmem:[#allocation2 + $0x100] sm:$0xff] }
 0x485   : > { %v7569_v35 = vmax.f32 %v7566_v6, %v7568_v33  ;;  %v7304_v32 = vld [vmem:[#allocation2 + $0x108] sm:$0xff] }
 0x486   : > { %7380 = vst.msk [vmem:[#allocation2 + $0xd8] sm:$0xff] %vm2066_vm6, %v7339_v31 }
 0x487   : > { %v7570_v36 = vadd.f32 %v17599_v63, %v7569_v35 }
 0x488   : > { %v7217_v37 = vpop.f32.mrb[136].mxu0 }
 0x489   : > { %v7571_v40 = vmax.f32 %v7570_v36, 0.0  ;;  %v7340_v41 = vadd.f32 %v7299_v38, %v7217_v37  ;;  %v14229_v42 = vpop.f32.mrb[137].mxu0  ;;  %v15074_v43 = vld [vmem:[#allocation3 + $0x18] sm:$0xff]  }
 0x48a   : > { %v7220_v44 = vpop.f32.mrb[138].mxu0  ;;  %v7774_v49 = vshrl.u32 %v15074_v43, 16  ;;  %v7594_v50 = vld [vmem:[#allocation2 + $0xc7] ss:$2 sm:$0xff]  ;;  %v7596_v51 = vld [vmem:[#allocation2 + $0xc8] ss:$2 sm:$0xff] }
 0x48b   : > { %v13087_v46 = vpack.c.bf16 %v7571_v40, %v7571_v40  ;;  %7381 = vst.msk [vmem:[#allocation2 + $0xe0] sm:$0xff] %vm2066_vm6, %v7340_v41  ;;  %v7341_v47 = vadd.f32 %v7300_v45, %v7220_v44  ;;  %v14230_v48 = vpop.f32.mrb[139].mxu0  ;;  %v7777_v52 = vshll.u32 %v15074_v43, 16  ;;  %v7597_v4 = vmax.f32 %v7594_v50, %v7596_v51  ;;  %v7621_v41 = vld [vmem:[#allocation3 + $0x24] sm:$0xc] }
 0x48c   : > { %v7776_v56 = vrot.slane %v7774_v49, 2 }
 0x48d   : > { %v7577_v53 = vshrl.u32 %v13087_v46, 16  ;;  %v7580_v55 = vshll.u32 %v13087_v46, 16  ;;  %7382 = vst.msk [vmem:[#allocation2 + $0xe8] sm:$0xff] %vm2066_vm6, %v7341_v47  ;;  %v7779_v57 = vrot.slane %v7777_v52, 3  ;;  %v7305_v46 = vld [vmem:[#allocation2 + $0x110] sm:$0xff] }
 0x48f   : > { %v7579_v58 = vrot.slane %v7577_v53, 6  ;;  %v7582_v59 = vrot.slane %v7580_v55, 7  ;;  %v17732_v2 = vor.u32 %v7779_v57, %v7776_v56  ;;  %v7624_v55 = vld [vmem:[#allocation3 + $0x28] sm:$0x7]  ;;  %v7306_v57 = vld [vmem:[#allocation2 + $0x118] sm:$0xff] }
 0x490   : > { %v7225_v62 = vpop.f32.mrb[140].mxu0 }
 0x491   : > { %v7583_v3 = vor.u32 %v7582_v59, %v7579_v58  ;;  %v7342_v7 = vadd.f32 %v7301_v1, %v7225_v62  ;;  %v14233_v8 = vpop.f32.mrb[141].mxu0  ;;  %v7781_v15 = vsel %vm1609_vm2, %v17693_v54, %v17732_v2 }
 0x492   : > { %v7599_v11 = vld [vmem:[#allocation2 + $0xd9] ss:$2 sm:$0xff]  ;;  %v7228_v12 = vpop.f32.mrb[142].mxu0  ;;  %14268 = vmatmul.mubr.msk.bf16.gmra.mrb[88].mxu1 %vm2066_vm6, %v7781_v15 }
 0x493   : > { %v7584_v16 = vrot.slane %v7583_v3, 4  ;;  %v7588_v20 = vsel %vm17605_vm15, %v7583_v3, %v7587_v60  ;;  %v7600_v21 = vmax.f32 %v7597_v4, %v7599_v11  ;;  %7383 = vst.msk [vmem:[#allocation2 + $0xf0] sm:$0xff] %vm2066_vm6, %v7342_v7  ;;  %v7343_v23 = vadd.f32 %v7302_v18, %v7228_v12  ;;  %v14234_v24 = vpop.f32.mrb[143].mxu0  ;;  %14271 = vmatprep.mubr.msk.bf16.mxu1 %vm15307_vm1, %v15306_v34  ;;  %v7307_v18 = vld [vmem:[#allocation2 + $0x120] sm:$0xff] }
 0x494   : > { %7589 = vst [vmem:[#allocation3 + $0x20] sm:$0xe] %v7588_v20  ;;  %v7602_v25 = vld [vmem:[#allocation2 + $0xda] ss:$2 sm:$0xff] }
 0x495   : > { %v7591_v26 = vsel %vm17611_vm0, %v7584_v16, %v7590_v9  ;;  %v7603_v54 = vmax.f32 %v7600_v21, %v7602_v25  ;;  %7384 = vst.msk [vmem:[#allocation2 + $0xf8] sm:$0xff] %vm2066_vm6, %v7343_v23 }
 0x496   : > { %7592 = vst [vmem:[#allocation3 + $0x24] sm:$0x3] %v7591_v26 }
 0x497   : > { %v7604_v19 = vadd.f32 %v17599_v63, %v7603_v54 }
 0x498   : > { %v7233_v27 = vpop.f32.mrb[144].mxu0 }
 0x499   : > { %v7605_v29 = vmax.f32 %v7604_v19, 0.0  ;;  %v7344_v30 = vadd.f32 %v7303_v28, %v7233_v27  ;;  %v14237_v6 = vpop.f32.mrb[145].mxu0 }
 0x49a   : > { %v7236_v31 = vpop.f32.mrb[146].mxu0  ;;  %v7655_v6 = vld [vmem:[#allocation3 + $0x28] sm:$0x8] }
 0x49b   : > { %v13088_v33 = vpack.c.bf16 %v7605_v29, %v7605_v29  ;;  %7385 = vst.msk [vmem:[#allocation2 + $0x100] sm:$0xff] %vm2066_vm6, %v7344_v30  ;;  %v7345_v35 = vadd.f32 %v7304_v32, %v7236_v31  ;;  %v14238_v36 = vpop.f32.mrb[147].mxu0  ;;  %v15075_v22 = vld [vmem:[#allocation3 + $0x1c] sm:$0xff]   ;;  %v7309_v32 = vld [vmem:[#allocation2 + $0x130] sm:$0xff] }
 0x49c   : > { %v8528_v40 = vshrl.u32 %v15075_v22, 16  ;;  %v7628_v42 = vld [vmem:[#allocation2 + $0xeb] ss:$2 sm:$0xff]  ;;  %v8531_v43 = vshll.u32 %v15075_v22, 16  ;;  %v7630_v48 = vld [vmem:[#allocation2 + $0xec] ss:$2 sm:$0xff] }
 0x49d   : > { %v7611_v37 = vshrl.u32 %v13088_v33, 16  ;;  %v7614_v38 = vshll.u32 %v13088_v33, 16  ;;  %7386 = vst.msk [vmem:[#allocation2 + $0x108] sm:$0xff] %vm2066_vm6, %v7345_v35  ;;  %v7631_v62 = vmax.f32 %v7628_v42, %v7630_v48 }
 0x49e   : > { %v8530_v47 = vrot.slane %v8528_v40, 3  ;;  %v8533_v50 = vrot.slane %v8531_v43, 4  ;;  %v7310_v40 = vld [vmem:[#allocation2 + $0x138] sm:$0xff] }
 0x49f   : > { %v7613_v44 = vrot.slane %v7611_v37, 5  ;;  %v7616_v45 = vrot.slane %v7614_v38, 6 }
 0x4a0   : > { %v7241_v49 = vpop.f32.mrb[148].mxu0  ;;  %v17749_v58 = vor.u32 %v8533_v50, %v8530_v47 }
 0x4a1   : > { %v7617_v51 = vor.u32 %v7616_v45, %v7613_v44  ;;  %v7346_v52 = vadd.f32 %v7305_v46, %v7241_v49  ;;  %v14241_v53 = vpop.f32.mrb[149].mxu0  ;;  %v7658_v46 = vld [vmem:[#allocation3 + $0x2c] sm:$0xf] }
 0x4a2   : > { %v7244_v56 = vpop.f32.mrb[150].mxu0  ;;  %v8535_v7 = vsel %vm2837_vm5, %v17713_v14, %v17749_v58 }
 0x4a3   : > { %v7618_v59 = vrot.slane %v7617_v51, 4  ;;  %v7622_v60 = vsel %vm17625_vm14, %v7617_v51, %v7621_v41  ;;  %7387 = vst.msk [vmem:[#allocation2 + $0x110] sm:$0xff] %vm2066_vm6, %v7346_v52  ;;  %v7347_v1 = vadd.f32 %v7306_v57, %v7244_v56  ;;  %v14242_v3 = vpop.f32.mrb[151].mxu0  ;;  %14364 = vmatmul.mubr.msk.bf16.gmra.mrb[172].mxu0 %vm2066_vm6, %v8535_v7 }
 0x4a4   : > { %7623 = vst [vmem:[#allocation3 + $0x24] sm:$0xc] %v7622_v60  ;;  %v7633_v4 = vld [vmem:[#allocation2 + $0xfd] ss:$2 sm:$0xff]  ;;  %v7636_v5 = vld [vmem:[#allocation2 + $0xfe] ss:$2 sm:$0xff]  ;;  %14367 = vmatprep.mubr.msk.bf16.mxu0 %vm15307_vm1, %v15306_v34 }
 0x4a5   : > { %v7625_v8 = vsel %vm17630_vm9, %v7618_v59, %v7624_v55  ;;  %v7634_v9 = vmax.f32 %v7631_v62, %v7633_v4  ;;  %7388 = vst.msk [vmem:[#allocation2 + $0x118] sm:$0xff] %vm2066_vm6, %v7347_v1  ;;  %vm18767_vm9 = vsmask.f32 7424 }
 0x4a6   : > { %7626 = vst [vmem:[#allocation3 + $0x28] sm:$0x7] %v7625_v8  ;;  %vm18769_vm14 = vmmov %vm18767_vm9 }
 0x4a7   : > { %v7637_v11 = vmax.f32 %v7634_v9, %v7636_v5  ;;  %vm18771_vm0 = vmmov %vm18767_vm9 }
 0x4a8   : > { %v7249_v12 = vpop.f32.mrb[152].mxu0  ;;  %vm18775_vm3 = vmmov %vm18771_vm0 }
 0x4a9   : > { %v7638_v15 = vadd.f32 %v17599_v63, %v7637_v11  ;;  %v7348_v16 = vadd.f32 %v7307_v18, %v7249_v12  ;;  %v14245_v14 = vpop.f32.mrb[153].mxu0 }
 0x4aa   : > { %v7252_v20 = vpop.f32.mrb[154].mxu0 }
 0x4ab   : > { %v7639_v21 = vmax.f32 %v7638_v15, 0.0  ;;  %7389 = vst.msk [vmem:[#allocation2 + $0x120] sm:$0xff] %vm2066_vm6, %v7348_v16  ;;  %v7349_v23 = vadd.f32 %v7308_v13, %v7252_v20  ;;  %v14246_v24 = vpop.f32.mrb[155].mxu0  ;;  %v15077_v25 = vld [vmem:[#allocation3 + $0x20] sm:$0xff]  }
 0x4ac   : > { %v7783_v54 = vshrl.u32 %v15077_v25, 16  ;;  %v7786_v19 = vshll.u32 %v15077_v25, 16  ;;  %v7662_v47 = vld [vmem:[#allocation2 + $0x10f] ss:$2 sm:$0xff]  ;;  %v7664_v48 = vld [vmem:[#allocation2 + $0x110] ss:$2 sm:$0xff] }
 0x4ad   : > { %v13089_v26 = vpack.c.bf16 %v7639_v21, %v7639_v21  ;;  %7390 = vst.msk [vmem:[#allocation2 + $0x128] sm:$0xff] %vm2066_vm6, %v7349_v23  ;;  %v7665_v51 = vmax.f32 %v7662_v47, %v7664_v48  ;;  %v7688_v23 = vld [vmem:[#allocation3 + $0x30] sm:$0xf]  ;;  %v7691_v24 = vld [vmem:[#allocation3 + $0x34] sm:$0x1]  ;;  %v15085_v47 = vld [vmem:[#allocation3 + $0x8] sm:$0xff]  }
 0x4ae   : > { %v7785_v29 = vrot.slane %v7783_v54, 2  ;;  %v7788_v30 = vrot.slane %v7786_v19, 3 }
 0x4af   : > { %v7645_v27 = vshll.u32 %v13089_v26, 16  ;;  %v7648_v28 = vshrl.u32 %v13089_v26, 16 }
 0x4b0   : > { %v7257_v31 = vpop.f32.mrb[156].mxu0  ;;  %v7789_v37 = vor.u32 %v7788_v30, %v7785_v29 }
 0x4b1   : > { %v7647_v33 = vrot.slane %v7645_v27, 5  ;;  %v7650_v35 = vrot.slane %v7648_v28, 4  ;;  %v7350_v36 = vadd.f32 %v7309_v32, %v7257_v31  ;;  %v14249_v22 = vpop.f32.mrb[157].mxu0 }
 0x4b2   : > { %v7260_v38 = vpop.f32.mrb[158].mxu0  ;;  %v7790_v45 = vsel %vm1609_vm2, %v17732_v2, %v7789_v37  ;;  %v7311_v2 = vld [vmem:[#allocation2 + $0x140] sm:$0xff] }
 0x4b3   : > { %v7651_v41 = vor.u32 %v7650_v35, %v7647_v33  ;;  %v7656_v42 = vsel %vm17659_vm13, %v7647_v33, %v7655_v6  ;;  %7391 = vst.msk [vmem:[#allocation2 + $0x130] sm:$0xff] %vm2066_vm6, %v7350_v36  ;;  %v7351_v43 = vadd.f32 %v7310_v40, %v7260_v38  ;;  %v14250_v44 = vpop.f32.mrb[159].mxu0  ;;  %14272 = vmatmul.mubr.msk.bf16.gmra.mrb[92].mxu1 %vm2066_vm6, %v7790_v45  ;;  %vm18773_vm13 = vmmov %vm18771_vm0 }
 0x4b4   : > { %7657 = vst [vmem:[#allocation3 + $0x28] sm:$0x8] %v7656_v42  ;;  %14275 = vmatprep.mubr.msk.bf16.mxu1 %vm15307_vm1, %v15306_v34  ;;  %v7667_v61 = vld [vmem:[#allocation2 + $0x121] ss:$2 sm:$0xff] }
 0x4b5   : > { %v7652_v49 = vrot.slane %v7651_v41, 4  ;;  %7392 = vst.msk [vmem:[#allocation2 + $0x138] sm:$0xff] %vm2066_vm6, %v7351_v43  ;;  %v7668_v53 = vmax.f32 %v7665_v51, %v7667_v61  ;;  %v15091_v51 = vld [vmem:[#allocation3 + $0x10] sm:$0xff]  }
 0x4b7   : > { %v7659_v50 = vsel %vm17675_vm11, %v7652_v49, %v7658_v46  ;;  %v15084_v46 = vld [vmem:[#allocation3] sm:$0xf8]   ;;  %v15090_v49 = vld [vmem:[#allocation3 + $0x8] sm:$0xff]  }
 0x4b8   : > { %7660 = vst [vmem:[#allocation3 + $0x2c] sm:$0xf] %v7659_v50  ;;  %v7265_v52 = vpop.f32.mrb[160].mxu0  ;;  %v7998_v61 = vrot.slane %v15084_v46, 3  ;;  %v7999_v50 = vrot.slane %v15085_v47, 3 }
 0x4b9   : > { %v7352_v55 = vadd.f32 %v7311_v2, %v7265_v52  ;;  %v14253_v56 = vpop.f32.mrb[161].mxu0  ;;  %v15086_v52 = vld [vmem:[%s18729_s3 + $0x20] sm:$0xff]   ;;  %v8991_v2 = vshll.u32 %v15090_v49, 16 }
 0x4ba   : > { %v7670_v57 = vld [vmem:[#allocation2 + $0x122] ss:$2 sm:$0xff]  ;;  %v7268_v59 = vpop.f32.mrb[162].mxu0  ;;  %v8996_v56 = vshll.u32 %v15091_v51, 16 }
 0x4bb   : > { %v7671_v60 = vmax.f32 %v7668_v53, %v7670_v57  ;;  %7393 = vst.msk [vmem:[#allocation2 + $0x140] sm:$0xff] %vm2066_vm6, %v7352_v55  ;;  %v15078_v62 = vld [vmem:[#allocation3 + $0x24] sm:$0xff]   ;;  %v14254_v1 = vpop.f32.mrb[163].mxu0  ;;  %v15089_v55 = vld [vmem:[#allocation3 + $0x10] sm:$0xff]   ;;  %v8993_v59 = vrot.slane %v8991_v2, 1 }
 0x4bc   : > { %v8537_v4 = vshrl.u32 %v15078_v62, 16  ;;  %v8540_v7 = vshll.u32 %v15078_v62, 16  ;;  %v15096_v57 = vld [vmem:[%s18729_s3 + $0x28] sm:$0xff]   ;;  %v8989_v62 = vshrl.u32 %v15090_v49, 16  ;;  %v8998_v1 = vrot.slane %v8996_v56, 1  ;;  %v15107_v56 = vld [vmem:[#allocation3 + $0x10] sm:$0xff]  }
 0x4bd   : > { %v7672_v3 = vadd.f32 %v17599_v63, %v7671_v60  ;;  %v8001_v60 = vrot.slane %v15089_v55, 3 }
 0x4be   : > { %v8539_v8 = vrot.slane %v8537_v4, 3  ;;  %v8542_v9 = vrot.slane %v8540_v7, 4  ;;  %v8994_v4 = vor.u32 %v8993_v59, %v8989_v62  ;;  %v15105_v7 = vld [vmem:[%s18729_s3 + $0x70] sm:$0xff]  }
 0x4bf   : > { %v7673_v17 = vmax.f32 %v7672_v3, 0.0  ;;  %v15079_v5 = vld [vmem:[#allocation3 + $0x28] sm:$0xff]   ;;  %v15093_v3 = vld [vmem:[#allocation3 + $0x18] sm:$0xff]  }
 0x4c0   : > { %v8543_v12 = vor.u32 %v8542_v9, %v8539_v8  ;;  %v7792_v18 = vshrl.u32 %v15079_v5, 16  ;;  %v7795_v15 = vshll.u32 %v15079_v5, 16  ;;  %v15092_v8 = vld [vmem:[#allocation3 + $0x18] sm:$0xff]   ;;  %v8999_v9 = vsel %vm18767_vm9, %v8994_v4, %v8998_v1 }
 0x4c1   : > { %v13090_v11 = vpack.c.bf16 %v7673_v17, %v7673_v17  ;;  %v9004_v5 = vshll.u32 %v15093_v3, 16  ;;  %vm7930_vm9 = vcmask 523264  }
 0x4c2   : > { %v8544_v14 = vsel %vm2837_vm5, %v17749_v58, %v8543_v12  ;;  %v7794_v20 = vrot.slane %v7792_v18, 2  ;;  %v7797_v13 = vrot.slane %v7795_v15, 3  ;;  %v9000_v18 = vshrl.u32 %v15091_v51, 16 }
 0x4c3   : > { %v7679_v16 = vshrl.u32 %v13090_v11, 16  ;;  %14368 = vmatmul.mubr.msk.bf16.gmra.mrb[176].mxu0 %vm2066_vm6, %v8544_v14  ;;  %v7682_v63 = vshll.u32 %v13090_v11, 16  ;;  %v15106_v11 = vld [vmem:[%s18729_s3 + $0x78] sm:$0xff]   ;;  %v9006_v15 = vrot.slane %v9004_v5, 1  ;;  %v15110_v5 = vld [vmem:[#allocation3 + $0x18] sm:$0xff]  }
 0x4c4   : > { %14371 = vmatprep.mubr.msk.bf16.mxu0 %vm15307_vm1, %v15306_v34  ;;  %v7798_v25 = vor.u32 %v7797_v13, %v7794_v20  ;;  %v9002_v14 = vor.u32 %v9000_v18, %v8998_v1  ;;  %v15094_v13 = vld [vmem:[#allocation3 + $0x20] sm:$0xff]   ;;  %v8243_v1 = vshrl.u32 %v15107_v56, 16  ;;  %v15108_v18 = vld [vmem:[#allocation3 + $0xc] sm:$0xfe]  }
 0x4c5   : > { %v7681_v21 = vrot.slane %v7679_v16, 7  ;;  %v15095_v16 = vld [vmem:[#allocation3 + $0x20] sm:$0xff]  }
 0x4c6   : > { %v7799_v19 = vsel %vm1609_vm2, %v7789_v37, %v7798_v25 }
 0x4c7   : > { %v7684_v26 = vor.u32 %v7682_v63, %v7681_v21  ;;  %v7685_v54 = vrot.slane %v7681_v21, 4  ;;  %14276 = vmatmul.mubr.msk.bf16.gmra.mrb[96].mxu1 %vm2066_vm6, %v7799_v19  ;;  %v9007_v21 = vsel %vm18769_vm14, %v9002_v14, %v9006_v15  ;;  %v9012_v63 = vshll.u32 %v15095_v16, 16 }
 0x4c8   : > { %14279 = vmatprep.mubr.msk.bf16.mxu1 %vm15307_vm1, %v15306_v34  ;;  %v8255_v14 = vshll.u32 %v15110_v5, 16 }
 0x4c9   : > { %v7689_v27 = vsel %vm17698_vm7, %v7684_v26, %v7688_v23  ;;  %v7692_v58 = vsel %vm17707_vm4, %v7685_v54, %v7691_v24  ;;  %vm18765_vm4 = vcmask 1044480   ;;  %v8005_v23 = vrot.slane %v15094_v13, 3  ;;  %v15098_v26 = vld [vmem:[#allocation3 + $0x28] sm:$0xff]  }
 0x4ca   : > { %7690 = vst [vmem:[#allocation3 + $0x30] sm:$0xf] %v7689_v27  ;;  %7693 = vst [vmem:[#allocation3 + $0x34] sm:$0x1] %v7692_v58  ;;  %v8000_v53 = vsel %vm18765_vm4, %v7998_v61, %v7999_v50  ;;  %v9008_v24 = vshrl.u32 %v15093_v3, 16  ;;  %v15097_v27 = vld [vmem:[#allocation3 + $0x28] sm:$0xff]  }
 0x4cb   : > { %vm18766_vm7 = vmmov %vm18765_vm4  ;;  %v8246_v3 = vshll.u32 %v15107_v56, 16  ;;  %v9526_v13 = vrot.slane %v15108_v18, 1 }
 0x4cc   : > { %v8002_v17 = vsel %vm18766_vm7, %v7999_v50, %v8001_v60  ;;  %vm18768_vm10 = vmmov %vm18765_vm4  ;;  %v9010_v54 = vor.u32 %v9008_v24, %v9006_v15  ;;  %v15112_v24 = vld [vmem:[#allocation3 + $0x20] sm:$0xff]   ;;  %vm18777_vm7 = vcmask 1046528  }
 0x4cd   : > { %vm18770_vm15 = vmmov %vm18765_vm4 }
 0x4ce   : > { %vm18772_vm12 = vmmov %vm18765_vm4 }
 0x4cf   : > { %vm18774_vm11 = vmmov %vm18765_vm4 }
 0x4d0   : > { %vm18776_vm4 = vmmov %vm18771_vm0 }
 0x4d1   : > { %v15081_v28 = vld [vmem:[#allocation3 + $0x30] sm:$0x7f]   ;;  %vm18779_vm14 = vmmov %vm18777_vm7 }
 0x4d2   : > { %v15082_v29 = vld [vmem:[#allocation3 + $0x2c] sm:$0xff]   ;;  %v7801_v30 = vshrl.u32 %v15081_v28, 16  ;;  %v7804_v6 = vshll.u32 %v15081_v28, 16  ;;  %v15083_v31 = vld [vmem:[#allocation3 + $0x34] sm:$0xff]   ;;  %v9020_v28 = vshll.u32 %v15098_v26, 16 }
 0x4d3   : > { %v8546_v32 = vshrl.u32 %v15082_v29, 16  ;;  %v8549_v33 = vshll.u32 %v15082_v29, 16  ;;  %v8555_v10 = vshrl.u32 %v15083_v31, 16  ;;  %v8558_v37 = vshll.u32 %v15083_v31, 16  ;;  %v15100_v31 = vld [vmem:[#allocation3 + $0x30] sm:$0xff]  }
 0x4d4   : > { %v7803_v35 = vrot.slane %v7801_v30, 2  ;;  %v7806_v0 = vrot.slane %v7804_v6, 3  ;;  %v8007_v29 = vrot.slane %v15097_v27, 3  ;;  %v9016_v30 = vshrl.u32 %v15095_v16, 16 }
 0x4d5   : > { %v8548_v36 = vrot.slane %v8546_v32, 3  ;;  %v8551_v22 = vrot.slane %v8549_v33, 4  ;;  %v8557_v43 = vrot.slane %v8555_v10, 3  ;;  %v8560_v44 = vrot.slane %v8558_v37, 4 }
 0x4d6   : > { %v7807_v38 = vor.u32 %v7806_v0, %v7803_v35  ;;  %v9022_v6 = vrot.slane %v9020_v28, 1  ;;  %v8008_v33 = vsel %vm18772_vm12, %v8005_v23, %v8007_v29  ;;  %v15099_v35 = vld [vmem:[#allocation3 + $0x30] sm:$0x7f]   ;;  %v9024_v10 = vshrl.u32 %v15098_v26, 16  ;;  %v15111_v26 = vld [vmem:[#allocation3 + $0x1c] sm:$0xff]  }
 0x4d7   : > { %v8552_v40 = vor.u32 %v8551_v22, %v8548_v36  ;;  %v8561_v45 = vor.u32 %v8560_v44, %v8557_v43  ;;  %v9028_v36 = vshll.u32 %v15100_v31, 16  ;;  %v8009_v22 = vrot.slane %v15099_v35, 3  ;;  %v15103_v43 = vld [vmem:[#allocation3 + $0x8] sm:$0xff]  }
 0x4d8   : > { %v7808_v41 = vsel %vm1609_vm2, %v7798_v25, %v7807_v38  ;;  %v9014_v25 = vrot.slane %v9012_v63, 1  ;;  %v9032_v46 = vshrl.u32 %v15100_v31, 16  ;;  %v8234_v49 = vshrl.u32 %v15103_v43, 16 }
 0x4d9   : > { %14280 = vmatmul.mubr.msk.bf16.gmra.mrb[100].mxu1 %vm2066_vm6, %v7808_v41  ;;  %v8553_v42 = vsel %vm2837_vm5, %v8543_v12, %v8552_v40  ;;  %v8562_v48 = vsel %vm2837_vm5, %v8552_v40, %v8561_v45  ;;  %v8003_v12 = vrot.slane %v15092_v8, 3  ;;  %v9030_v37 = vrot.slane %v9028_v36, 1 }
 0x4da   : > { %14372 = vmatmul.mubr.msk.bf16.gmra.mrb[180].mxu0 %vm2066_vm6, %v8553_v42  ;;  %14283 = vmatprep.mubr.msk.bf16.mxu1 %vm15307_vm1, %v15306_v34  ;;  %v9015_v58 = vsel %vm18771_vm0, %v9010_v54, %v9014_v25  ;;  %v9018_v32 = vor.u32 %v9016_v30, %v9014_v25  ;;  %v9026_v40 = vor.u32 %v9024_v10, %v9022_v6  ;;  %v15102_v42 = vld [vmem:[#allocation3] sm:$0xf8]   ;;  %v8237_v61 = vshll.u32 %v15103_v43, 16  ;;  %v15117_v43 = vld [vmem:[#allocation3 + $0x30] sm:$0xff]   ;;  %vm18781_vm0 = vmmov %vm18777_vm7 }
 0x4db   : > { %14375 = vmatprep.mubr.msk.bf16.mxu0 %vm15307_vm1, %v15306_v34  ;;  %v8004_v20 = vsel %vm18768_vm10, %v8001_v60, %v8003_v12  ;;  %v8006_v19 = vsel %vm18770_vm15, %v8003_v12, %v8005_v23  ;;  %v8010_v41 = vsel %vm18774_vm11, %v8007_v29, %v8009_v22  ;;  %v8226_v47 = vshrl.u32 %v15102_v42, 16  ;;  %v15114_v12 = vld [vmem:[%s18729_s3 + $0x48] sm:$0xff]   ;;  %vm18778_vm10 = vmmov %vm18777_vm7 }
 0x4dc   : > { %v9023_v0 = vsel %vm18773_vm13, %v9018_v32, %v9022_v6  ;;  %v9031_v44 = vsel %vm18775_vm3, %v9026_v40, %v9030_v37  ;;  %v9034_v50 = vor.u32 %v9032_v46, %v9030_v37  ;;  %v8239_v55 = vrot.slane %v8237_v61, 4  ;;  %v15115_v32 = vld [vmem:[#allocation3 + $0x28] sm:$0xff]   ;;  %vm18780_vm15 = vmmov %vm18777_vm7 }
 0x4dd   : > { %v8245_v8 = vrot.slane %v8243_v1, 3  ;;  %v8252_v16 = vshrl.u32 %v15110_v5, 16  ;;  %v8257_v23 = vrot.slane %v8255_v14, 4  ;;  %v8264_v27 = vshll.u32 %v15112_v24, 16  ;;  %vm18782_vm12 = vmmov %vm18781_vm0  ;;  %v15120_v14 = vld [vmem:[#allocation3 + $0x8] sm:$0xff]  }
 0x4de   : > { %v8270_v10 = vshrl.u32 %v15115_v32, 16  ;;  %v8273_v37 = vshll.u32 %v15115_v32, 16  ;;  %vm18783_vm13 = vmmov %vm18775_vm3 }
 0x4df   : > { %v8254_v63 = vrot.slane %v8252_v16, 3  ;;  %v8266_v31 = vrot.slane %v8264_v27, 4  ;;  %v15121_v16 = vld [vmem:[%s18729_s3 + $0x60] sm:$0xff]   ;;  %vm18784_vm11 = vmmov %vm18775_vm3 }
 0x4e1   : > { %14284 = vmatmul.mubr.msk.bf16.gmra.mrb[104].mxu1 %vm2066_vm6, %v7807_v38  ;;  %v15101_v38 = vld [vmem:[#allocation3 + $0x38] sm:$0x1f]   ;;  %v8258_v54 = vor.u32 %v8257_v23, %v8254_v63 }
 0x4e2   : > { %14376 = vmatmul.mubr.msk.bf16.gmra.mrb[184].mxu0 %vm2066_vm6, %v8562_v48  ;;  %14291 = vmatprep.mubr.msk.bf16.mxu1 %vm15307_vm1, %v15306_v34  ;;  %v8229_v48 = vshll.u32 %v15102_v42, 16  ;;  %v9040_v59 = vshrl.u32 %v15101_v38, 16  ;;  %v8275_v42 = vrot.slane %v8273_v37, 4 }
 0x4e3   : > { %14379 = vmatprep.mubr.msk.bf16.mxu0 %vm15307_vm1, %v15306_v34 }
 0x4e4   : > { %v8231_v2 = vrot.slane %v8229_v48, 4  ;;  %v8282_v48 = vshll.u32 %v15117_v43, 16 }
 0x4e9   : > { %14292 = vmatmul.mubr.msk.bf16.vlgmr.msra.gmra.mrb[108].mxu1 %vm2066_vm6, %v8000_v53  ;;  %v8236_v53 = vrot.slane %v8234_v49, 3 }
 0x4ea   : > { %14320 = vmatpush3.bf16.msra.mxu1 %v15086_v52  ;;  %14380 = vmatmul.mubr.msk.bf16.gmra.mrb[188].mxu0 %vm2066_vm6, %v8561_v45  ;;  %v9036_v45 = vshll.u32 %v15101_v38, 16  ;;  %v8228_v52 = vrot.slane %v8226_v47, 3  ;;  %v8279_v47 = vshrl.u32 %v15117_v43, 16 }
 0x4eb   : > { %14295 = vmatprep.mubr.msk.bf16.mxu1 %vm15307_vm1, %v15306_v34  ;;  %14419 = vmatprep.mubr.msk.bf16.mxu0 %vm15307_vm1, %v15306_v34  ;;  %v8240_v62 = vor.u32 %v8239_v55, %v8236_v53  ;;  %v8284_v53 = vrot.slane %v8282_v48, 4  ;;  %v15133_v48 = vld [vmem:[#allocation3 + $0x24] sm:$0xff]  }
 0x4ec   : > { %14321 = vmatprep.subr.bf16.mxu1 %v15306_v34  ;;  %v9038_v51 = vrot.slane %v9036_v45, 1  ;;  %v8232_v60 = vor.u32 %v8231_v2, %v8228_v52  ;;  %v15116_v45 = vld [vmem:[#allocation3 + $0x2c] sm:$0xff]   ;;  %v8281_v2 = vrot.slane %v8279_v47, 3 }
 0x4ed   : > { %v9533_v49 = vrot.slane %v15116_v45, 1  ;;  %v15135_v45 = vld [vmem:[%s18729_s3 + $0x88] sm:$0xff]  }
 0x4ee   : > { %14322 = vmatpush3.bf16.msra.mxu1 %v15096_v57  ;;  %v9039_v57 = vsel %vm18776_vm4, %v9034_v50, %v9038_v51  ;;  %v9042_v4 = vor.u32 %v9040_v59, %v9038_v51  ;;  %v8285_v59 = vor.u32 %v8284_v53, %v8281_v2  ;;  %vm18785_vm4 = vmmov %vm18775_vm3 }
 0x4ef   : > { %14383 = vmatprep.subr.bf16.mxu1 %v15306_v34 }
 0x4f1   : > { %14296 = vmatmul.mubr.msk.bf16.gmra.mrb[112].mxu1 %vm2066_vm6, %v8002_v17  ;;  %v8241_v17 = vsel %vm2837_vm5, %v8232_v60, %v8240_v62 }
 0x4f2   : > { %14420 = vmatmul.mubr.msk.bf16.vlgmr.msra.gmra.mrb[192].mxu0 %vm2066_vm6, %v8999_v9  ;;  %14299 = vmatprep.mubr.msk.bf16.mxu1 %vm15307_vm1, %v15306_v34  ;;  %v8248_v9 = vrot.slane %v8246_v3, 4  ;;  %v15119_v3 = vld [vmem:[#allocation3 + $0x3c] sm:$0x1f]  }
 0x4f3   : > { %14423 = vmatprep.mubr.msk.bf16.mxu0 %vm15307_vm1, %v15306_v34  ;;  %14480 = vmatpush3.bf16.msra.mxu0 %v15105_v7  ;;  %v15104_v7 = vld [vmem:[%s18729_s3 + $0x40] sm:$0xff]  }
 0x4f4   : > { %14481 = vmatprep.subr.bf16.mxu0 %v15306_v34  ;;  %v8249_v15 = vor.u32 %v8248_v9, %v8245_v8 }
 0x4f6   : > { %v8259_v30 = vsel %vm2837_vm5, %v8249_v15, %v8258_v54 }
 0x4f7   : > { %14482 = vmatpush3.bf16.msra.mxu0 %v15106_v11  ;;  %v15109_v11 = vld [vmem:[#allocation3 + $0x14] sm:$0xff]  }
 0x4f8   : > { %14543 = vmatprep.subr.bf16.mxu0 %v15306_v34 }
 0x4f9   : > { %14300 = vmatmul.mubr.msk.bf16.gmra.mrb[116].mxu1 %vm2066_vm6, %v8004_v20  ;;  %v9527_v20 = vrot.slane %v15109_v11, 1 }
 0x4fa   : > { %14424 = vmatmul.mubr.msk.bf16.gmra.mrb[196].mxu0 %vm2066_vm6, %v9007_v21  ;;  %14303 = vmatprep.mubr.msk.bf16.mxu1 %vm15307_vm1, %v15306_v34  ;;  %v8250_v21 = vsel %vm2837_vm5, %v8240_v62, %v8249_v15 }
 0x4fb   : > { %14427 = vmatprep.mubr.msk.bf16.mxu0 %vm15307_vm1, %v15306_v34  ;;  %v9528_v25 = vsel %vm18777_vm7, %v9526_v13, %v9527_v20  ;;  %v15122_v13 = vld [vmem:[#allocation3 + $0x10] sm:$0xff]   ;;  %vm18786_vm7 = vmmov %vm18775_vm3 }
 0x501   : > { %14304 = vmatmul.mubr.msk.bf16.gmra.mrb[120].mxu1 %vm2066_vm6, %v8006_v19  ;;  %v8261_v19 = vshrl.u32 %v15112_v24, 16  ;;  %v15123_v24 = vld [vmem:[#allocation3 + $0x18] sm:$0xff]  }
 0x502   : > { %14428 = vmatmul.mubr.msk.bf16.gmra.mrb[200].mxu0 %vm2066_vm6, %v9015_v58  ;;  %14307 = vmatprep.mubr.msk.bf16.mxu1 %vm15307_vm1, %v15306_v34  ;;  %v9529_v58 = vrot.slane %v15111_v26, 1  ;;  %v15124_v26 = vld [vmem:[#allocation3 + $0x20] sm:$0xff]  }
 0x503   : > { %14431 = vmatprep.mubr.msk.bf16.mxu0 %vm15307_vm1, %v15306_v34  ;;  %v8263_v6 = vrot.slane %v8261_v19, 3  ;;  %v15126_v19 = vld [vmem:[#allocation3 + $0x28] sm:$0xff]  }
 0x504   : > { %v9530_v35 = vsel %vm18778_vm10, %v9527_v20, %v9529_v58  ;;  %v15125_v20 = vld [vmem:[%s18729_s3 + $0x68] sm:$0xff]   ;;  %vm18787_vm10 = vmmov %vm18775_vm3 }
 0x509   : > { %14308 = vmatmul.mubr.msk.bf16.gmra.mrb[124].mxu1 %vm2066_vm6, %v8008_v33 }
 0x50a   : > { %14432 = vmatmul.mubr.msk.bf16.gmra.mrb[204].mxu0 %vm2066_vm6, %v9023_v0  ;;  %14311 = vmatprep.mubr.msk.bf16.mxu1 %vm15307_vm1, %v15306_v34  ;;  %v15113_v0 = vld [vmem:[#allocation3 + $0x24] sm:$0xff]  }
 0x50b   : > { %14435 = vmatprep.mubr.msk.bf16.mxu0 %vm15307_vm1, %v15306_v34  ;;  %v9531_v38 = vrot.slane %v15113_v0, 1 }
 0x50d   : > { %v9534_v56 = vsel %vm18780_vm15, %v9531_v38, %v9533_v49 }
 0x511   : > { %14312 = vmatmul.mubr.msk.bf16.gmra.mrb[128].mxu1 %vm2066_vm6, %v8010_v41  ;;  %v8272_v41 = vrot.slane %v8270_v10, 3 }
 0x512   : > { %14436 = vmatmul.mubr.msk.bf16.gmra.mrb[208].mxu0 %vm2066_vm6, %v9031_v44  ;;  %14315 = vmatprep.mubr.msk.bf16.mxu1 %vm15307_vm1, %v15306_v34  ;;  %v9532_v44 = vsel %vm18779_vm14, %v9529_v58, %v9531_v38  ;;  %vm18788_vm14 = vsmask.f32 6400 }
 0x513   : > { %14439 = vmatprep.mubr.msk.bf16.mxu0 %vm15307_vm1, %v15306_v34  ;;  %v8276_v46 = vor.u32 %v8275_v42, %v8272_v41  ;;  %v15131_v42 = vld [vmem:[%s18729_s3 + $0x80] sm:$0xff]   ;;  %vm18789_vm15 = vmmov %vm18788_vm14 }
 0x515   : > { %v8286_v62 = vsel %vm2837_vm5, %v8276_v46, %v8285_v59 }
 0x519   : > { %14316 = vmatmul.mubr.msk.bf16.gmra.mrb[132].mxu1 %vm2066_vm6, %v8009_v22  ;;  %v8267_v22 = vor.u32 %v8266_v31, %v8263_v6  ;;  %v15130_v6 = vld [vmem:[#allocation3 + $0x14] sm:$0xff]  }
 0x51a   : > { %14440 = vmatmul.mubr.msk.bf16.gmra.mrb[212].mxu0 %vm2066_vm6, %v9039_v57  ;;  %14323 = vmatprep.mubr.msk.bf16.mxu1 %vm15307_vm1, %v15306_v34  ;;  %v15118_v57 = vld [vmem:[#allocation3 + $0x34] sm:$0xff]  }
 0x51b   : > { %14443 = vmatprep.mubr.msk.bf16.mxu0 %vm15307_vm1, %v15306_v34  ;;  %v8268_v40 = vsel %vm2837_vm5, %v8258_v54, %v8267_v22  ;;  %v8277_v52 = vsel %vm2837_vm5, %v8267_v22, %v8276_v46  ;;  %v9535_v60 = vrot.slane %v15118_v57, 1  ;;  %v15128_v31 = vld [vmem:[#allocation3 + $0x38] ss:$0 sps:$4 sm:$0xff]   ;;  %v9269_v46 = vshrl.u32 %v15130_v6, 16 }
 0x51d   : > { %v9536_v1 = vsel %vm18781_vm0, %v9533_v49, %v9535_v60  ;;  %vm18790_vm0 = vmmov %vm18788_vm14 }
 0x521   : > { %14324 = vmatmul.mubr.msk.bf16.vlgmr.msra.gmra.mrb[136].mxu1 %vm2066_vm6, %v8241_v17 }
 0x522   : > { %14384 = vmatpush3.bf16.msra.mxu1 %v15104_v7  ;;  %14444 = vmatmul.mubr.msk.bf16.gmra.mrb[216].mxu0 %vm2066_vm6, %v9042_v4  ;;  %v9537_v4 = vrot.slane %v15119_v3, 1 }
 0x523   : > { %14327 = vmatprep.mubr.msk.bf16.mxu1 %vm15307_vm1, %v15306_v34  ;;  %14483 = vmatprep.mubr.msk.bf16.mxu0 %vm15307_vm1, %v15306_v34 }
 0x524   : > { %14385 = vmatprep.subr.bf16.mxu1 %v15306_v34  ;;  %v9538_v9 = vsel %vm18782_vm12, %v9535_v60, %v9537_v4  ;;  %vm18791_vm12 = vmmov %vm18790_vm0 }
 0x526   : > { %14386 = vmatpush3.bf16.msra.mxu1 %v15114_v12 }
 0x527   : > { %14447 = vmatprep.subr.bf16.mxu1 %v15306_v34 }
 0x529   : > { %14328 = vmatmul.mubr.msk.bf16.gmra.mrb[140].mxu1 %vm2066_vm6, %v8250_v21 }
 0x52a   : > { %14484 = vmatmul.mubr.msk.bf16.vlgmr.msra.gmra.mrb[220].mxu0 %vm2066_vm6, %v9528_v25  ;;  %14331 = vmatprep.mubr.msk.bf16.mxu1 %vm15307_vm1, %v15306_v34 }
 0x52b   : > { %14487 = vmatprep.mubr.msk.bf16.mxu0 %vm15307_vm1, %v15306_v34 }
 0x52e   : > { %v7876_v28 = vpop.f32.mrb[80].mxu1 }
 0x52f   : > { %7931 = vst.msk [vmem:[#allocation4] sm:$0xff] %vm7930_vm9, %v7876_v28  ;;  %v14261_v29 = vpop.f32.mrb[81].mxu1 }
 0x530   : > { %v7879_v33 = vpop.f32.mrb[82].mxu1  ;;  %v15127_v29 = vld [vmem:[#allocation3 + $0x30] sm:$0xff]  }
 0x531   : > { %14332 = vmatmul.mubr.msk.bf16.gmra.mrb[144].mxu1 %vm2066_vm6, %v8259_v30  ;;  %7932 = vst.msk [vmem:[#allocation4 + $0x8] sm:$0xff] %vm7930_vm9, %v7879_v33  ;;  %v14262_v36 = vpop.f32.mrb[83].mxu1  ;;  %v15129_v30 = vld [vmem:[#allocation3 + $0xc] sm:$0xff]  }
 0x532   : > { %14488 = vmatmul.mubr.msk.bf16.gmra.mrb[224].mxu0 %vm2066_vm6, %v9530_v35  ;;  %14335 = vmatprep.mubr.msk.bf16.mxu1 %vm15307_vm1, %v15306_v34  ;;  %v9260_v33 = vshll.u32 %v15129_v30, 16  ;;  %v9265_v36 = vshll.u32 %v15130_v6, 16  ;;  %v9258_v37 = vshrl.u32 %v15129_v30, 16 }
 0x533   : > { %14491 = vmatprep.mubr.msk.bf16.mxu0 %vm15307_vm1, %v15306_v34 }
 0x534   : > { %v9262_v10 = vrot.slane %v9260_v33, 1  ;;  %v9267_v38 = vrot.slane %v9265_v36, 1 }
 0x536   : > { %v9263_v41 = vor.u32 %v9262_v10, %v9258_v37 }
 0x538   : > { %v9268_v43 = vsel %vm18783_vm13, %v9263_v41, %v9267_v38  ;;  %vm18792_vm13 = vmmov %vm18790_vm0 }
 0x539   : > { %14336 = vmatmul.mubr.msk.bf16.gmra.mrb[148].mxu1 %vm2066_vm6, %v8268_v40  ;;  %v15132_v40 = vld [vmem:[#allocation3 + $0x1c] sm:$0xff]  }
 0x53a   : > { %14492 = vmatmul.mubr.msk.bf16.gmra.mrb[228].mxu0 %vm2066_vm6, %v9532_v44  ;;  %14339 = vmatprep.mubr.msk.bf16.mxu1 %vm15307_vm1, %v15306_v34  ;;  %v9273_v44 = vshll.u32 %v15132_v40, 16  ;;  %v9277_v60 = vshrl.u32 %v15132_v40, 16 }
 0x53b   : > { %14495 = vmatprep.mubr.msk.bf16.mxu0 %vm15307_vm1, %v15306_v34 }
 0x53c   : > { %v9275_v47 = vrot.slane %v9273_v44, 1  ;;  %v15138_v44 = vld [vmem:[#allocation3 + $0xc] sm:$0xfe]  }
 0x53e   : > { %v17918_v61 = vpop.f32.mrb[164].mxu0 }
 0x53f   : > { %v14357_v50 = vpop.f32.mrb[165].mxu0 }
 0x540   : > { %v17920_v51 = vpop.f32.mrb[166].mxu0  ;;  %v9271_v50 = vor.u32 %v9269_v46, %v9267_v38  ;;  %v8132_v46 = vld [vmem:[#allocation4] sm:$0xff] }
 0x541   : > { %14340 = vmatmul.mubr.msk.bf16.gmra.mrb[152].mxu1 %vm2066_vm6, %v8277_v52  ;;  %v14358_v55 = vpop.f32.mrb[167].mxu0 }
 0x542   : > { %14496 = vmatmul.mubr.msk.bf16.gmra.mrb[232].mxu0 %vm2066_vm6, %v9534_v56  ;;  %14343 = vmatprep.mubr.msk.bf16.mxu1 %vm15307_vm1, %v15306_v34  ;;  %v9276_v53 = vsel %vm18784_vm11, %v9271_v50, %v9275_v47  ;;  %v9281_v55 = vshll.u32 %v15133_v48, 16  ;;  %vm18793_vm11 = vmmov %vm18790_vm0 }
 0x543   : > { %14499 = vmatprep.mubr.msk.bf16.mxu0 %vm15307_vm1, %v15306_v34 }
 0x549   : > { %14344 = vmatmul.mubr.msk.bf16.gmra.mrb[156].mxu1 %vm2066_vm6, %v8286_v62  ;;  %v9283_v62 = vrot.slane %v9281_v55, 1 }
 0x54a   : > { %14500 = vmatmul.mubr.msk.bf16.gmra.mrb[236].mxu0 %vm2066_vm6, %v9536_v1  ;;  %14347 = vmatprep.mubr.msk.bf16.mxu1 %vm15307_vm1, %v15306_v34  ;;  %v15134_v1 = vld [vmem:[#allocation3 + $0x2c] sm:$0xff]  }
 0x54b   : > { %14503 = vmatprep.mubr.msk.bf16.mxu0 %vm15307_vm1, %v15306_v34 }
 0x54e   : > { %v7884_v7 = vpop.f32.mrb[84].mxu1 }
 0x54f   : > { %7933 = vst.msk [vmem:[#allocation4 + $0x10] sm:$0xff] %vm7930_vm9, %v7884_v7  ;;  %v14265_v17 = vpop.f32.mrb[85].mxu1  ;;  %v9279_v7 = vor.u32 %v9277_v60, %v9275_v47  ;;  %v9754_v60 = vshrl.u32 %v15138_v44, 16 }
 0x550   : > { %v7887_v8 = vpop.f32.mrb[86].mxu1 }
 0x551   : > { %14348 = vmatmul.mubr.msk.bf16.gmra.mrb[160].mxu1 %vm2066_vm6, %v8285_v59  ;;  %7934 = vst.msk [vmem:[#allocation4 + $0x18] sm:$0xff] %vm7930_vm9, %v7887_v8  ;;  %v14266_v5 = vpop.f32.mrb[87].mxu1  ;;  %v9284_v17 = vsel %vm18775_vm3, %v9279_v7, %v9283_v62  ;;  %v9289_v8 = vshll.u32 %v15134_v1, 16  ;;  %vm1459_vm3 = vcmask 517120  }
 0x552   : > { %14504 = vmatmul.mubr.msk.bf16.gmra.mrb[240].mxu0 %vm2066_vm6, %v9538_v9  ;;  %14387 = vmatprep.mubr.msk.bf16.mxu1 %vm15307_vm1, %v15306_v34  ;;  %v17945_v11 = vpop.f32.mrb[168].mxu0  ;;  %v9285_v9 = vshrl.u32 %v15133_v48, 16 }
 0x553   : > { %14507 = vmatprep.mubr.msk.bf16.mxu0 %vm15307_vm1, %v15306_v34  ;;  %v14361_v12 = vpop.f32.mrb[169].mxu0  ;;  %v9291_v5 = vrot.slane %v9289_v8, 1 }
 0x554   : > { %v17949_v18 = vpop.f32.mrb[170].mxu0  ;;  %v9287_v12 = vor.u32 %v9285_v9, %v9283_v62  ;;  %v9757_v62 = vshll.u32 %v15138_v44, 16  ;;  %v15140_v9 = vld [vmem:[#allocation3 + $0x1c] sm:$0xff]  }
 0x555   : > { %v14362_v15 = vpop.f32.mrb[171].mxu0 }
 0x556   : > { %v15136_v15 = vld [vmem:[#allocation3 + $0x34] sm:$0xff]  }
 0x559   : > { %14388 = vmatmul.mubr.msk.bf16.vlgmr.msra.gmra.mrb[164].mxu1 %vm2066_vm6, %v15120_v14  ;;  %v9293_v14 = vshrl.u32 %v15134_v1, 16 }
 0x55a   : > { %14448 = vmatpush3.bf16.msra.mxu1 %v15121_v16  ;;  %14391 = vmatprep.mubr.msk.bf16.mxu1 %vm15307_vm1, %v15306_v34  ;;  %v9292_v16 = vsel %vm18785_vm4, %v9287_v12, %v9291_v5  ;;  %v9759_v12 = vrot.slane %v9757_v62, 2  ;;  %vm10010_vm4 = vcmask 519171  }
 0x55b   : > { %14449 = vmatprep.subr.bf16.mxu1 %v15306_v34  ;;  %14508 = vmatmul.mubr.msk.bf16.gmra.mrb[244].mxu0 %vm2066_vm6, %v9537_v4 }
 0x55c   : > { %14551 = vmatprep.mubr.msk.bf16.mxu0 %vm15307_vm1, %v15306_v34 }
 0x55e   : > { %14450 = vmatpush3.bf16.msra.mxu1 %v15125_v20  ;;  %v9297_v20 = vshll.u32 %v15136_v15, 16 }
 0x55f   : > { %14511 = vmatprep.subr.bf16.mxu1 %v15306_v34 }
 0x561   : > { %14392 = vmatmul.mubr.msk.bf16.gmra.mrb[168].mxu1 %vm2066_vm6, %v15122_v13 }
 0x562   : > { %14395 = vmatprep.mubr.msk.bf16.mxu1 %vm15307_vm1, %v15306_v34 }
 0x565   : > { %v7892_v21 = vpop.f32.mrb[88].mxu1 }
 0x566   : > { %7935 = vst.msk [vmem:[#allocation4 + $0x20] sm:$0xff] %vm7930_vm9, %v7892_v21  ;;  %v14269_v63 = vpop.f32.mrb[89].mxu1  ;;  %v9295_v21 = vor.u32 %v9293_v14, %v9291_v5  ;;  %v9756_v5 = vrot.slane %v9754_v60, 1  ;;  %v15142_v60 = vld [vmem:[#allocation3 + $0x2c] sm:$0xff]  }
 0x567   : > { %v7895_v23 = vpop.f32.mrb[90].mxu1  ;;  %v15137_v63 = vld [vmem:[#allocation3 + $0x3c] sm:$0x1f]  }
 0x568   : > { %7936 = vst.msk [vmem:[#allocation4 + $0x28] sm:$0xff] %vm7930_vm9, %v7895_v23  ;;  %v14270_v25 = vpop.f32.mrb[91].mxu1  ;;  %v9305_v6 = vshll.u32 %v15137_v63, 16 }
 0x569   : > { %14396 = vmatmul.mubr.msk.bf16.gmra.mrb[172].mxu1 %vm2066_vm6, %v15123_v24 }
 0x56a   : > { %14399 = vmatprep.mubr.msk.bf16.mxu1 %vm15307_vm1, %v15306_v34 }
 0x571   : > { %14400 = vmatmul.mubr.msk.bf16.gmra.mrb[176].mxu1 %vm2066_vm6, %v15124_v26 }
 0x572   : > { %14403 = vmatprep.mubr.msk.bf16.mxu1 %vm15307_vm1, %v15306_v34 }
 0x576   : > { %v17976_v54 = vpop.f32.mrb[172].mxu0 }
 0x577   : > { %v14365_v27 = vpop.f32.mrb[173].mxu0 }
 0x578   : > { %v17978_v58 = vpop.f32.mrb[174].mxu0 }
 0x579   : > { %14404 = vmatmul.mubr.msk.bf16.gmra.mrb[180].mxu1 %vm2066_vm6, %v15126_v19  ;;  %v14366_v28 = vpop.f32.mrb[175].mxu0  ;;  %v9299_v19 = vrot.slane %v9297_v20, 1  ;;  %v9771_v20 = vshrl.u32 %v15140_v9, 16 }
 0x57a   : > { %14407 = vmatprep.mubr.msk.bf16.mxu1 %vm15307_vm1, %v15306_v34 }
 0x57b   : > { %v9300_v30 = vsel %vm18786_vm7, %v9295_v21, %v9299_v19  ;;  %vm18794_vm7 = vsmask.f32 7950 }
 0x581   : > { %14408 = vmatmul.mubr.msk.bf16.gmra.mrb[184].mxu1 %vm2066_vm6, %v15127_v29 }
 0x582   : > { %14411 = vmatprep.mubr.msk.bf16.mxu1 %vm15307_vm1, %v15306_v34 }
 0x586   : > { %v7900_v32 = vpop.f32.mrb[92].mxu1 }
 0x587   : > { %7937 = vst.msk [vmem:[#allocation4 + $0x30] sm:$0xff] %vm7930_vm9, %v7900_v32  ;;  %v14273_v35 = vpop.f32.mrb[93].mxu1 }
 0x588   : > { %v7903_v0 = vpop.f32.mrb[94].mxu1  ;;  %v9307_v35 = vrot.slane %v9305_v6, 1 }
 0x589   : > { %7938 = vst.msk [vmem:[#allocation4 + $0x38] sm:$0xff] %vm7930_vm9, %v7903_v0  ;;  %v14274_v22 = vpop.f32.mrb[95].mxu1  ;;  %14412 = vmatmul.mubr.msk.bf16.gmra.mrb[188].mxu1 %vm2066_vm6, %v15128_v31  ;;  %v9301_v31 = vshrl.u32 %v15136_v15, 16 }
 0x58a   : > { %14451 = vmatprep.mubr.msk.bf16.mxu1 %vm15307_vm1, %v15306_v34 }
 0x58b   : > { %v9303_v33 = vor.u32 %v9301_v31, %v9299_v19  ;;  %v8135_v19 = vld [vmem:[#allocation4 + $0x18] sm:$0xff] }
 0x58d   : > { %v9308_v41 = vsel %vm18787_vm10, %v9303_v33, %v9307_v35  ;;  %v9773_v33 = vrot.slane %v9771_v20, 1  ;;  %vm18289_vm10 = vmand %vm10010_vm4, %vm18794_vm7  ;;  %vm10084_vm4 = vcmask 519169  }
 0x591   : > { %14452 = vmatmul.mubr.msk.bf16.vlgmr.msra.gmra.mrb[192].mxu1 %vm2066_vm6, %v9268_v43  ;;  %v9309_v43 = vshrl.u32 %v15137_v63, 16 }
 0x592   : > { %14512 = vmatpush3.bf16.msra.mxu1 %v15131_v42  ;;  %14455 = vmatprep.mubr.msk.bf16.mxu1 %vm15307_vm1, %v15306_v34  ;;  %v15139_v42 = vld [vmem:[#allocation3 + $0x14] sm:$0xff]  }
 0x593   : > { %14513 = vmatprep.subr.bf16.mxu1 %v15306_v34  ;;  %v9762_v47 = vshrl.u32 %v15139_v42, 16  ;;  %v9765_v48 = vshll.u32 %v15139_v42, 16  ;;  %v9311_v50 = vor.u32 %v9309_v43, %v9307_v35 }
 0x595   : > { %v9767_v8 = vrot.slane %v9765_v48, 2 }
 0x596   : > { %v18002_v49 = vpop.f32.mrb[176].mxu0  ;;  %14514 = vmatpush3.bf16.msra.mxu1 %v15135_v45 }
 0x597   : > { %v14369_v52 = vpop.f32.mrb[177].mxu0 }
 0x598   : > { %v18004_v2 = vpop.f32.mrb[178].mxu0 }
 0x599   : > { %v14370_v56 = vpop.f32.mrb[179].mxu0  ;;  %14456 = vmatmul.mubr.msk.bf16.gmra.mrb[196].mxu1 %vm2066_vm6, %v9276_v53 }
 0x59a   : > { %14459 = vmatprep.mubr.msk.bf16.mxu1 %vm15307_vm1, %v15306_v34  ;;  %v7908_v57 = vpop.f32.mrb[96].mxu1 }
 0x59b   : > { %7939 = vst.msk [vmem:[#allocation4 + $0x40] sm:$0xff] %vm7930_vm9, %v7908_v57  ;;  %v14277_v59 = vpop.f32.mrb[97].mxu1 }
 0x59c   : > { %v7911_v3 = vpop.f32.mrb[98].mxu1  ;;  %v8133_v59 = vld [vmem:[#allocation4 + $0x8] sm:$0xff] }
 0x59d   : > { %7940 = vst.msk [vmem:[#allocation4 + $0x48] sm:$0xff] %vm7930_vm9, %v7911_v3  ;;  %v14278_v4 = vpop.f32.mrb[99].mxu1 }
 0x5a1   : > { %14460 = vmatmul.mubr.msk.bf16.gmra.mrb[200].mxu1 %vm2066_vm6, %v9284_v17  ;;  %v9764_v17 = vrot.slane %v9762_v47, 1  ;;  %v8137_v47 = vld [vmem:[#allocation4 + $0x28] sm:$0xff] }
 0x5a2   : > { %14463 = vmatprep.mubr.msk.bf16.mxu1 %vm15307_vm1, %v15306_v34 }
 0x5a3   : > { %v9768_v14 = vor.u32 %v9767_v8, %v9764_v17 }
 0x5a9   : > { %14464 = vmatmul.mubr.msk.bf16.gmra.mrb[204].mxu1 %vm2066_vm6, %v9292_v16  ;;  %v8134_v16 = vld [vmem:[#allocation4 + $0x10] sm:$0xff] }
 0x5aa   : > { %14467 = vmatprep.mubr.msk.bf16.mxu1 %vm15307_vm1, %v15306_v34 }
 0x5ac   : > { %v7916_v13 = vpop.f32.mrb[100].mxu1 }
 0x5ad   : > { %7941 = vst.msk [vmem:[#allocation4 + $0x50] sm:$0xff] %vm7930_vm9, %v7916_v13  ;;  %v18021_v23 = vpop.f32.mrb[180].mxu0  ;;  %v14281_v24 = vpop.f32.mrb[101].mxu1  ;;  %v9774_v13 = vshll.u32 %v15140_v9, 16 }
 0x5ae   : > { %v14373_v25 = vpop.f32.mrb[181].mxu0  ;;  %v7919_v26 = vpop.f32.mrb[102].mxu1 }
 0x5af   : > { %7942 = vst.msk [vmem:[#allocation4 + $0x58] sm:$0xff] %vm7930_vm9, %v7919_v26  ;;  %v18024_v27 = vpop.f32.mrb[182].mxu0  ;;  %v14282_v28 = vpop.f32.mrb[103].mxu1  ;;  %v9776_v35 = vrot.slane %v9774_v13, 2 }
 0x5b0   : > { %v14374_v29 = vpop.f32.mrb[183].mxu0  ;;  %v9760_v28 = vor.u32 %v9759_v12, %v9756_v5 }
 0x5b1   : > { %14468 = vmatmul.mubr.msk.bf16.gmra.mrb[208].mxu1 %vm2066_vm6, %v9300_v30 }
 0x5b2   : > { %14471 = vmatprep.mubr.msk.bf16.mxu1 %vm15307_vm1, %v15306_v34 }
 0x5b4   : > { %v7924_v32 = vpop.f32.mrb[104].mxu1 }
 0x5b5   : > { %7943 = vst.msk [vmem:[#allocation4 + $0x60] sm:$0xff] %vm7930_vm9, %v7924_v32  ;;  %v18031_v0 = vpop.f32.mrb[184].mxu0  ;;  %v14285_v36 = vpop.f32.mrb[105].mxu1  ;;  %v9769_v32 = vsel %vm18788_vm14, %v9760_v28, %v9768_v14  ;;  %v8140_v28 = vld [vmem:[#allocation4 + $0x40] sm:$0xff]  ;;  %vm18797_vm14 = vsmask.f32 1280 }
 0x5b6   : > { %v14377_v22 = vpop.f32.mrb[185].mxu0  ;;  %v7927_v10 = vpop.f32.mrb[106].mxu1  ;;  %v15141_v36 = vld [vmem:[#allocation3 + $0x24] sm:$0xff]  }
 0x5b7   : > { %v18033_v37 = vpop.f32.mrb[186].mxu0  ;;  %v14286_v38 = vpop.f32.mrb[107].mxu1  ;;  %v8136_v10 = vld [vmem:[#allocation4 + $0x20] sm:$0xff] }
 0x5b8   : > { %v14378_v40 = vpop.f32.mrb[187].mxu0  ;;  %v9777_v38 = vor.u32 %v9776_v35, %v9773_v33 }
 0x5b9   : > { %14472 = vmatmul.mubr.msk.bf16.gmra.mrb[212].mxu1 %vm2066_vm6, %v9308_v41  ;;  %v9780_v40 = vshrl.u32 %v15141_v36, 16  ;;  %v9783_v41 = vshll.u32 %v15141_v36, 16 }
 0x5ba   : > { %14475 = vmatprep.mubr.msk.bf16.mxu1 %vm15307_vm1, %v15306_v34 }
 0x5bc   : > { %v8078_v45 = vpop.f32.mrb[108].mxu1 }
 0x5bd   : > { %v8145_v52 = vadd.f32 %v8132_v46, %v8078_v45  ;;  %v18039_v53 = vpop.f32.mrb[188].mxu0  ;;  %v14293_v55 = vpop.f32.mrb[109].mxu1 }
 0x5be   : > { %v14381_v56 = vpop.f32.mrb[189].mxu0  ;;  %v8081_v57 = vpop.f32.mrb[110].mxu1 }
 0x5bf   : > { %8158 = vst.msk [vmem:[#allocation4] sm:$0xff] %vm7930_vm9, %v8145_v52  ;;  %v8146_v1 = vadd.f32 %v8133_v59, %v8081_v57  ;;  %v8681_v3 = vpop.f32.mrb[190].mxu0  ;;  %v14294_v4 = vpop.f32.mrb[111].mxu1  ;;  %v9778_v56 = vsel %vm18789_vm15, %v9768_v14, %v9777_v38  ;;  %v9782_v57 = vrot.slane %v9780_v40, 1  ;;  %v9785_v59 = vrot.slane %v9783_v41, 2  ;;  %vm10016_vm15 = vmand %vm1459_vm3, %vm18797_vm14 }
 0x5c0   : > { %v14382_v7 = vpop.f32.mrb[191].mxu0  ;;  %v9789_v4 = vshrl.u32 %v15142_v60, 16  ;;  %vm10085_vm3 = vsmask.f32 3334  ;;  %vm10116_vm14 = vsmask.f32 2306 }
 0x5c1   : > { %8159 = vst.msk [vmem:[#allocation4 + $0x8] sm:$0xff] %vm7930_vm9, %v8146_v1  ;;  %14476 = vmatmul.mubr.msk.bf16.gmra.mrb[216].mxu1 %vm2066_vm6, %v9311_v50  ;;  %v8138_v1 = vld [vmem:[#allocation4 + $0x30] sm:$0xff]  ;;  %v9786_v3 = vor.u32 %v9785_v59, %v9782_v57  ;;  %v9792_v7 = vshll.u32 %v15142_v60, 16  ;;  %vm10086_vm7 = vmand %vm10084_vm4, %vm10085_vm3 }
 0x5c2   : > { %14515 = vmatprep.mubr.msk.bf16.mxu1 %vm15307_vm1, %v15306_v34 }
 0x5c4   : > { %v8086_v15 = vpop.f32.mrb[112].mxu1 }
 0x5c5   : > { %v8147_v21 = vadd.f32 %v8134_v16, %v8086_v15  ;;  %v18046_v63 = vpop.f32.mrb[192].mxu0  ;;  %v14297_v24 = vpop.f32.mrb[113].mxu1  ;;  %v8139_v15 = vld [vmem:[#allocation4 + $0x38] sm:$0xff] }
 0x5c6   : > { %v14421_v25 = vpop.f32.mrb[193].mxu0  ;;  %v8089_v26 = vpop.f32.mrb[114].mxu1  ;;  %v9791_v24 = vrot.slane %v9789_v4, 1  ;;  %v8143_v4 = vld [vmem:[#allocation4 + $0x58] sm:$0xff] }
 0x5c7   : > { %8160 = vst.msk [vmem:[#allocation4 + $0x10] sm:$0xff] %vm7930_vm9, %v8147_v21  ;;  %v8148_v29 = vadd.f32 %v8135_v19, %v8089_v26  ;;  %v18049_v30 = vpop.f32.mrb[194].mxu0  ;;  %v14298_v6 = vpop.f32.mrb[115].mxu1  ;;  %v9787_v21 = vsel %vm18790_vm0, %v9777_v38, %v9786_v3  ;;  %v9794_v25 = vrot.slane %v9792_v7, 2  ;;  %v15143_v26 = vld [vmem:[#allocation3 + $0x34] sm:$0xff]   ;;  %vm10048_vm0 = vcmask 519170  }
 0x5c8   : > { %v14422_v31 = vpop.f32.mrb[195].mxu0  ;;  %v9798_v6 = vshrl.u32 %v15143_v26, 16 }
 0x5c9   : > { %8161 = vst.msk [vmem:[#allocation4 + $0x18] sm:$0xff] %vm7930_vm9, %v8148_v29  ;;  %14516 = vmatmul.mubr.msk.bf16.vlgmr.msra.gmra.mrb[220].mxu1 %vm2066_vm6, %v9769_v32  ;;  %v9795_v29 = vor.u32 %v9794_v25, %v9791_v24  ;;  %v9801_v31 = vshll.u32 %v15143_v26, 16 }
 0x5ca   : > { %14519 = vmatprep.mubr.msk.bf16.mxu1 %vm15307_vm1, %v15306_v34 }
 0x5cc   : > { %v8094_v22 = vpop.f32.mrb[116].mxu1 }
 0x5cd   : > { %v8149_v42 = vadd.f32 %v8136_v10, %v8094_v22  ;;  %v18056_v43 = vpop.f32.mrb[196].mxu0  ;;  %v14301_v44 = vpop.f32.mrb[117].mxu1  ;;  %v8141_v10 = vld [vmem:[#allocation4 + $0x48] sm:$0xff] }
 0x5ce   : > { %v14425_v45 = vpop.f32.mrb[197].mxu0  ;;  %v8097_v46 = vpop.f32.mrb[118].mxu1  ;;  %v9796_v44 = vsel %vm18791_vm12, %v9786_v3, %v9795_v29  ;;  %vm10053_vm12 = vcmask 516096  }
 0x5cf   : > { %8162 = vst.msk [vmem:[#allocation4 + $0x20] sm:$0xff] %vm7930_vm9, %v8149_v42  ;;  %v8150_v48 = vadd.f32 %v8137_v47, %v8097_v46  ;;  %v18059_v50 = vpop.f32.mrb[198].mxu0  ;;  %v14302_v52 = vpop.f32.mrb[119].mxu1  ;;  %v9800_v45 = vrot.slane %v9798_v6, 1  ;;  %v9803_v46 = vrot.slane %v9801_v31, 2 }
 0x5d0   : > { %v14426_v55 = vpop.f32.mrb[199].mxu0  ;;  %v15144_v47 = vld [vmem:[#allocation3 + $0x3c] sm:$0x3f]   ;;  %v8142_v52 = vld [vmem:[#allocation4 + $0x50] sm:$0xff] }
 0x5d1   : > { %8163 = vst.msk [vmem:[#allocation4 + $0x28] sm:$0xff] %vm7930_vm9, %v8150_v48  ;;  %14520 = vmatmul.mubr.msk.bf16.gmra.mrb[224].mxu1 %vm2066_vm6, %v9778_v56  ;;  %v9804_v55 = vor.u32 %v9803_v46, %v9800_v45  ;;  %v9807_v56 = vshrl.u32 %v15144_v47, 16  ;;  %v9810_v57 = vshll.u32 %v15144_v47, 16 }
 0x5d2   : > { %14523 = vmatprep.mubr.msk.bf16.mxu1 %vm15307_vm1, %v15306_v34 }
 0x5d4   : > { %v8102_v62 = vpop.f32.mrb[120].mxu1 }
 0x5d5   : > { %v8151_v17 = vadd.f32 %v8138_v1, %v8102_v62  ;;  %v18066_v8 = vpop.f32.mrb[200].mxu0  ;;  %v14305_v9 = vpop.f32.mrb[121].mxu1 }
 0x5d6   : > { %v14429_v5 = vpop.f32.mrb[201].mxu0  ;;  %v8105_v12 = vpop.f32.mrb[122].mxu1 }
 0x5d7   : > { %8164 = vst.msk [vmem:[#allocation4 + $0x30] sm:$0xff] %vm7930_vm9, %v8151_v17  ;;  %v8152_v16 = vadd.f32 %v8139_v15, %v8105_v12  ;;  %v18069_v14 = vpop.f32.mrb[202].mxu0  ;;  %v14306_v20 = vpop.f32.mrb[123].mxu1  ;;  %v9805_v12 = vsel %vm18792_vm13, %v9795_v29, %v9804_v55  ;;  %v9809_v15 = vrot.slane %v9807_v56, 1  ;;  %vm18798_vm13 = vsmask.f32 7946 }
 0x5d8   : > { %v14430_v13 = vpop.f32.mrb[203].mxu0 }
 0x5d9   : > { %8165 = vst.msk [vmem:[#allocation4 + $0x38] sm:$0xff] %vm7930_vm9, %v8152_v16  ;;  %14524 = vmatmul.mubr.msk.bf16.gmra.mrb[228].mxu1 %vm2066_vm6, %v9787_v21  ;;  %v9812_v16 = vrot.slane %v9810_v57, 2  ;;  %v8144_v13 = vld [vmem:[#allocation4 + $0x60] sm:$0xff] }
 0x5da   : > { %14527 = vmatprep.mubr.msk.bf16.mxu1 %vm15307_vm1, %v15306_v34 }
 0x5db   : > { %v9813_v21 = vor.u32 %v9812_v16, %v9809_v15 }
 0x5dc   : > { %v8110_v19 = vpop.f32.mrb[124].mxu1 }
 0x5dd   : > { %v8153_v32 = vadd.f32 %v8140_v28, %v8110_v19  ;;  %v18076_v33 = vpop.f32.mrb[204].mxu0  ;;  %v14309_v35 = vpop.f32.mrb[125].mxu1 }
 0x5de   : > { %v14433_v36 = vpop.f32.mrb[205].mxu0  ;;  %v8113_v22 = vpop.f32.mrb[126].mxu1 }
 0x5df   : > { %8166 = vst.msk [vmem:[#allocation4 + $0x40] sm:$0xff] %vm7930_vm9, %v8153_v32  ;;  %v8154_v38 = vadd.f32 %v8141_v10, %v8113_v22  ;;  %v18079_v40 = vpop.f32.mrb[206].mxu0  ;;  %v14310_v41 = vpop.f32.mrb[127].mxu1  ;;  %v9814_v32 = vsel %vm18793_vm11, %v9804_v55, %v9813_v21  ;;  %v8408_v36 = vld [vmem:[#allocation4] sm:$0xff]  ;;  %v8410_v55 = vld [vmem:[#allocation4 + $0x10] sm:$0xff]  ;;  %vm10049_vm11 = vmand %vm10048_vm0, %vm18798_vm13  ;;  %vm18801_vm13 = vcmask 1046528  }
 0x5e0   : > { %v14434_v42 = vpop.f32.mrb[207].mxu0  ;;  %vm18799_vm0 = vsmask.f32 7424 }
 0x5e1   : > { %8167 = vst.msk [vmem:[#allocation4 + $0x48] sm:$0xff] %vm7930_vm9, %v8154_v38  ;;  %14528 = vmatmul.mubr.msk.bf16.gmra.mrb[232].mxu1 %vm2066_vm6, %v9796_v44  ;;  %v8409_v42 = vld [vmem:[#allocation4 + $0x8] sm:$0xff]  ;;  %vm18805_vm4 = vmmov %vm18799_vm0 }
 0x5e2   : > { %14531 = vmatprep.mubr.msk.bf16.mxu1 %vm15307_vm1, %v15306_v34 }
 0x5e4   : > { %v8118_v48 = vpop.f32.mrb[128].mxu1 }
 0x5e5   : > { %v8155_v59 = vadd.f32 %v8142_v52, %v8118_v48  ;;  %v18086_v60 = vpop.f32.mrb[208].mxu0  ;;  %v14313_v62 = vpop.f32.mrb[129].mxu1 }
 0x5e6   : > { %v14437_v1 = vpop.f32.mrb[209].mxu0  ;;  %v8121_v3 = vpop.f32.mrb[130].mxu1 }
 0x5e7   : > { %8168 = vst.msk [vmem:[#allocation4 + $0x50] sm:$0xff] %vm7930_vm9, %v8155_v59  ;;  %v8156_v7 = vadd.f32 %v8143_v4, %v8121_v3  ;;  %v18089_v17 = vpop.f32.mrb[210].mxu0  ;;  %v14314_v9 = vpop.f32.mrb[131].mxu1  ;;  %v8411_v3 = vld [vmem:[#allocation4 + $0x18] sm:$0xff] }
 0x5e8   : > { %v14438_v5 = vpop.f32.mrb[211].mxu0 }
 0x5e9   : > { %8169 = vst.msk [vmem:[#allocation4 + $0x58] sm:$0xff] %vm7930_vm9, %v8156_v7  ;;  %14532 = vmatmul.mubr.msk.bf16.gmra.mrb[236].mxu1 %vm2066_vm6, %v9805_v12 }
 0x5ea   : > { %14535 = vmatprep.mubr.msk.bf16.mxu1 %vm15307_vm1, %v15306_v34 }
 0x5ec   : > { %v8126_v20 = vpop.f32.mrb[132].mxu1 }
 0x5ed   : > { %v8157_v24 = vadd.f32 %v8144_v13, %v8126_v20  ;;  %v18096_v25 = vpop.f32.mrb[212].mxu0  ;;  %v14317_v26 = vpop.f32.mrb[133].mxu1 }
 0x5ee   : > { %v14441_v19 = vpop.f32.mrb[213].mxu0  ;;  %v8129_v28 = vpop.f32.mrb[134].mxu1 }
 0x5ef   : > { %8170 = vst.msk [vmem:[#allocation4 + $0x60] sm:$0xff] %vm7930_vm9, %v8157_v24  ;;  %v18099_v29 = vpop.f32.mrb[214].mxu0  ;;  %v14318_v6 = vpop.f32.mrb[135].mxu1 }
 0x5f0   : > { %v14442_v31 = vpop.f32.mrb[215].mxu0 }
 0x5f1   : > { %14536 = vmatmul.mubr.msk.bf16.gmra.mrb[240].mxu1 %vm2066_vm6, %v9814_v32  ;;  %v8413_v31 = vld [vmem:[#allocation4 + $0x28] sm:$0xff] }
 0x5f2   : > { %14539 = vmatprep.mubr.msk.bf16.mxu1 %vm15307_vm1, %v15306_v34 }
 0x5f4   : > { %v8354_v35 = vpop.f32.mrb[136].mxu1 }
 0x5f5   : > { %v8421_v22 = vadd.f32 %v8408_v36, %v8354_v35  ;;  %v14325_v10 = vpop.f32.mrb[137].mxu1  ;;  %v18105_v38 = vpop.f32.mrb[216].mxu0 }
 0x5f6   : > { %v8357_v41 = vpop.f32.mrb[138].mxu1  ;;  %v14445_v44 = vpop.f32.mrb[217].mxu0 }
 0x5f7   : > { %8434 = vst.msk [vmem:[#allocation4] sm:$0xff] %vm7930_vm9, %v8421_v22  ;;  %v8422_v45 = vadd.f32 %v8409_v42, %v8357_v41  ;;  %v14326_v46 = vpop.f32.mrb[139].mxu1  ;;  %v9161_v47 = vpop.f32.mrb[218].mxu0  ;;  %v8414_v44 = vld [vmem:[#allocation4 + $0x30] sm:$0xff] }
 0x5f8   : > { %v14446_v48 = vpop.f32.mrb[219].mxu0 }
 0x5f9   : > { %8435 = vst.msk [vmem:[#allocation4 + $0x8] sm:$0xff] %vm7930_vm9, %v8422_v45  ;;  %14540 = vmatmul.mubr.msk.bf16.gmra.mrb[244].mxu1 %vm2066_vm6, %v9813_v21  ;;  %v8412_v21 = vld [vmem:[#allocation4 + $0x20] sm:$0xff]  ;;  %vm1450_vm6 = vcmask 519168  }
 0x5fa   : > { %1453 = vst.msk [vmem:[#allocation5 + $0x8] sm:$0xf] %vm1450_vm6, %v15308_v39  ;;  %1454 = vst.msk [vmem:[#allocation5 + $0xc] sm:$0xf] %vm1450_vm6, %v15308_v39 }
 0x5fb   : > { %1452 = vst.msk [vmem:[#allocation5 + $0x4] sm:$0xf] %vm1450_vm6, %v15308_v39  ;;  %1455 = vst.msk [vmem:[#allocation5 + $0x10] sm:$0xf] %vm1450_vm6, %v15308_v39 }
 0x5fc   : > { %v8362_v52 = vpop.f32.mrb[140].mxu1  ;;  %1456 = vst.msk [vmem:[#allocation5 + $0x14] sm:$0xf] %vm1450_vm6, %v15308_v39  ;;  %1457 = vst.msk [vmem:[#allocation5 + $0x18] sm:$0xf] %vm1450_vm6, %v15308_v39 }
 0x5fd   : > { %v8423_v56 = vadd.f32 %v8410_v55, %v8362_v52  ;;  %v18110_v57 = vpop.f32.mrb[220].mxu0  ;;  %v14329_v59 = vpop.f32.mrb[141].mxu1  ;;  %v8415_v55 = vld [vmem:[#allocation4 + $0x38] sm:$0xff]  ;;  %1458 = vst.msk [vmem:[#allocation5 + $0x1c] sm:$0xf] %vm1450_vm6, %v15308_v39  ;;  %vm10054_vm6 = vmand %vm10053_vm12, %vm7554_vm8 }
 0x5fe   : > { %v14485_v62 = vpop.f32.mrb[221].mxu0  ;;  %v8365_v1 = vpop.f32.mrb[142].mxu1  ;;  %v8684_v4 = vld [vmem:[#allocation4] sm:$0xff]  ;;  %vm18800_vm12 = vmmov %vm18799_vm0 }
 0x5ff   : > { %8436 = vst.msk [vmem:[#allocation4 + $0x10] sm:$0xff] %vm7930_vm9, %v8423_v56  ;;  %v8424_v7 = vadd.f32 %v8411_v3, %v8365_v1  ;;  %v18113_v9 = vpop.f32.mrb[222].mxu0  ;;  %v14330_v5 = vpop.f32.mrb[143].mxu1  ;;  %v8697_v12 = vadd.f32 %v8684_v4, %v17918_v61 }
 0x600   : > { %v14486_v15 = vpop.f32.mrb[223].mxu0  ;;  %v8685_v16 = vld [vmem:[#allocation4 + $0x8] sm:$0xff]  ;;  %v8416_v5 = vld [vmem:[#allocation4 + $0x40] sm:$0xff] }
 0x601   : > { %8437 = vst.msk [vmem:[#allocation4 + $0x18] sm:$0xff] %vm7930_vm9, %v8424_v7  ;;  %8710 = vst.msk [vmem:[#allocation4] sm:$0xff] %vm7930_vm9, %v8697_v12  ;;  %v8698_v20 = vadd.f32 %v8685_v16, %v17920_v51 }
 0x603   : > { %8711 = vst.msk [vmem:[#allocation4 + $0x8] sm:$0xff] %vm7930_vm9, %v8698_v20 }
 0x604   : > { %v8370_v13 = vpop.f32.mrb[144].mxu1 }
 0x605   : > { %v8425_v24 = vadd.f32 %v8412_v21, %v8370_v13  ;;  %v18120_v26 = vpop.f32.mrb[224].mxu0  ;;  %v14333_v19 = vpop.f32.mrb[145].mxu1  ;;  %v8417_v21 = vld [vmem:[#allocation4 + $0x48] sm:$0xff] }
 0x606   : > { %v14489_v28 = vpop.f32.mrb[225].mxu0  ;;  %v8373_v6 = vpop.f32.mrb[146].mxu1  ;;  %v8686_v61 = vld [vmem:[#allocation4 + $0x10] sm:$0xff] }
 0x607   : > { %8438 = vst.msk [vmem:[#allocation4 + $0x20] sm:$0xff] %vm7930_vm9, %v8425_v24  ;;  %v8426_v32 = vadd.f32 %v8413_v31, %v8373_v6  ;;  %v18123_v35 = vpop.f32.mrb[226].mxu0  ;;  %v14334_v36 = vpop.f32.mrb[147].mxu1  ;;  %v8699_v51 = vadd.f32 %v8686_v61, %v17945_v11 }
 0x608   : > { %v14490_v22 = vpop.f32.mrb[227].mxu0  ;;  %v8687_v10 = vld [vmem:[#allocation4 + $0x18] sm:$0xff]  ;;  %v8418_v36 = vld [vmem:[#allocation4 + $0x50] sm:$0xff] }
 0x609   : > { %8439 = vst.msk [vmem:[#allocation4 + $0x28] sm:$0xff] %vm7930_vm9, %v8426_v32  ;;  %8712 = vst.msk [vmem:[#allocation4 + $0x10] sm:$0xff] %vm7930_vm9, %v8699_v51  ;;  %v8700_v41 = vadd.f32 %v8687_v10, %v17949_v18 }
 0x60b   : > { %8713 = vst.msk [vmem:[#allocation4 + $0x18] sm:$0xff] %vm7930_vm9, %v8700_v41 }
 0x60c   : > { %v8378_v42 = vpop.f32.mrb[148].mxu1 }
 0x60d   : > { %v8427_v45 = vadd.f32 %v8414_v44, %v8378_v42  ;;  %v18130_v46 = vpop.f32.mrb[228].mxu0  ;;  %v14337_v47 = vpop.f32.mrb[149].mxu1  ;;  %v8419_v44 = vld [vmem:[#allocation4 + $0x58] sm:$0xff] }
 0x60e   : > { %v14493_v48 = vpop.f32.mrb[229].mxu0  ;;  %v8381_v52 = vpop.f32.mrb[150].mxu1  ;;  %v8688_v11 = vld [vmem:[#allocation4 + $0x20] sm:$0xff] }
 0x60f   : > { %8440 = vst.msk [vmem:[#allocation4 + $0x30] sm:$0xff] %vm7930_vm9, %v8427_v45  ;;  %v8428_v56 = vadd.f32 %v8415_v55, %v8381_v52  ;;  %v18133_v59 = vpop.f32.mrb[230].mxu0  ;;  %v14338_v62 = vpop.f32.mrb[151].mxu1  ;;  %v8701_v18 = vadd.f32 %v8688_v11, %v17976_v54 }
 0x610   : > { %v14494_v1 = vpop.f32.mrb[231].mxu0  ;;  %v8689_v3 = vld [vmem:[#allocation4 + $0x28] sm:$0xff]  ;;  %v8420_v62 = vld [vmem:[#allocation4 + $0x60] sm:$0xff] }
 0x611   : > { %8441 = vst.msk [vmem:[#allocation4 + $0x38] sm:$0xff] %vm7930_vm9, %v8428_v56  ;;  %8714 = vst.msk [vmem:[#allocation4 + $0x20] sm:$0xff] %vm7930_vm9, %v8701_v18  ;;  %v8702_v4 = vadd.f32 %v8689_v3, %v17978_v58 }
 0x613   : > { %8715 = vst.msk [vmem:[#allocation4 + $0x28] sm:$0xff] %vm7930_vm9, %v8702_v4 }
 0x614   : > { %v8386_v7 = vpop.f32.mrb[152].mxu1 }
 0x615   : > { %v8429_v12 = vadd.f32 %v8416_v5, %v8386_v7  ;;  %v18140_v15 = vpop.f32.mrb[232].mxu0  ;;  %v14341_v16 = vpop.f32.mrb[153].mxu1 }
 0x616   : > { %v14497_v20 = vpop.f32.mrb[233].mxu0  ;;  %v8389_v13 = vpop.f32.mrb[154].mxu1  ;;  %v8690_v54 = vld [vmem:[#allocation4 + $0x30] sm:$0xff] }
 0x617   : > { %8442 = vst.msk [vmem:[#allocation4 + $0x40] sm:$0xff] %vm7930_vm9, %v8429_v12  ;;  %v8430_v24 = vadd.f32 %v8417_v21, %v8389_v13  ;;  %v18143_v19 = vpop.f32.mrb[234].mxu0  ;;  %v14342_v28 = vpop.f32.mrb[155].mxu1  ;;  %v8703_v58 = vadd.f32 %v8690_v54, %v18002_v49  ;;  %v8895_v54 = vld [vmem:[#allocation4] sm:$0xff] }
 0x618   : > { %v14498_v6 = vpop.f32.mrb[235].mxu0  ;;  %v8691_v31 = vld [vmem:[#allocation4 + $0x38] sm:$0xff] }
 0x619   : > { %8443 = vst.msk [vmem:[#allocation4 + $0x48] sm:$0xff] %vm7930_vm9, %v8430_v24  ;;  %8716 = vst.msk [vmem:[#allocation4 + $0x30] sm:$0xff] %vm7930_vm9, %v8703_v58  ;;  %v8704_v61 = vadd.f32 %v8691_v31, %v18004_v2  ;;  %v8896_v6 = vld [vmem:[#allocation4 + $0x8] sm:$0xff] }
 0x61b   : > { %8717 = vst.msk [vmem:[#allocation4 + $0x38] sm:$0xff] %vm7930_vm9, %v8704_v61 }
 0x61c   : > { %v8394_v32 = vpop.f32.mrb[156].mxu1 }
 0x61d   : > { %v8431_v51 = vadd.f32 %v8418_v36, %v8394_v32  ;;  %v18150_v22 = vpop.f32.mrb[236].mxu0  ;;  %v14345_v10 = vpop.f32.mrb[157].mxu1 }
 0x61e   : > { %v14501_v41 = vpop.f32.mrb[237].mxu0  ;;  %v8397_v42 = vpop.f32.mrb[158].mxu1  ;;  %v8692_v49 = vld [vmem:[#allocation4 + $0x40] sm:$0xff] }
 0x61f   : > { %8444 = vst.msk [vmem:[#allocation4 + $0x50] sm:$0xff] %vm7930_vm9, %v8431_v51  ;;  %v8432_v45 = vadd.f32 %v8419_v44, %v8397_v42  ;;  %v18153_v47 = vpop.f32.mrb[238].mxu0  ;;  %v14346_v48 = vpop.f32.mrb[159].mxu1  ;;  %v8705_v2 = vadd.f32 %v8692_v49, %v18021_v23  ;;  %v8897_v41 = vld [vmem:[#allocation4 + $0x10] sm:$0xff] }
 0x620   : > { %v14502_v52 = vpop.f32.mrb[239].mxu0  ;;  %v8693_v55 = vld [vmem:[#allocation4 + $0x48] sm:$0xff] }
 0x621   : > { %8445 = vst.msk [vmem:[#allocation4 + $0x58] sm:$0xff] %vm7930_vm9, %v8432_v45  ;;  %8718 = vst.msk [vmem:[#allocation4 + $0x40] sm:$0xff] %vm7930_vm9, %v8705_v2  ;;  %v8706_v11 = vadd.f32 %v8693_v55, %v18024_v27  ;;  %v8898_v45 = vld [vmem:[#allocation4 + $0x18] sm:$0xff] }
 0x623   : > { %8719 = vst.msk [vmem:[#allocation4 + $0x48] sm:$0xff] %vm7930_vm9, %v8706_v11 }
 0x624   : > { %v8402_v56 = vpop.f32.mrb[160].mxu1 }
 0x625   : > { %v8433_v18 = vadd.f32 %v8420_v62, %v8402_v56  ;;  %v18160_v1 = vpop.f32.mrb[240].mxu0  ;;  %v14349_v3 = vpop.f32.mrb[161].mxu1  ;;  %v8899_v62 = vld [vmem:[#allocation4 + $0x20] sm:$0xff] }
 0x626   : > { %v14505_v4 = vpop.f32.mrb[241].mxu0  ;;  %v8405_v7 = vpop.f32.mrb[162].mxu1  ;;  %v8694_v5 = vld [vmem:[#allocation4 + $0x50] sm:$0xff] }
 0x627   : > { %8446 = vst.msk [vmem:[#allocation4 + $0x60] sm:$0xff] %vm7930_vm9, %v8433_v18  ;;  %v18163_v23 = vpop.f32.mrb[242].mxu0  ;;  %v14350_v12 = vpop.f32.mrb[163].mxu1  ;;  %v8707_v16 = vadd.f32 %v8694_v5, %v18031_v0  ;;  %v8900_v7 = vld [vmem:[#allocation4 + $0x28] sm:$0xff] }
 0x628   : > { %v14506_v20 = vpop.f32.mrb[243].mxu0  ;;  %v8695_v27 = vld [vmem:[#allocation4 + $0x58] sm:$0xff] }
 0x629   : > { %8720 = vst.msk [vmem:[#allocation4 + $0x50] sm:$0xff] %vm7930_vm9, %v8707_v16  ;;  %v8708_v13 = vadd.f32 %v8695_v27, %v18033_v37 }
 0x62b   : > { %8721 = vst.msk [vmem:[#allocation4 + $0x58] sm:$0xff] %vm7930_vm9, %v8708_v13  ;;  %v8901_v13 = vld [vmem:[#allocation4 + $0x30] sm:$0xff] }
 0x62c   : > { %v8841_v21 = vpop.f32.mrb[164].mxu1 }
 0x62d   : > { %v8908_v24 = vadd.f32 %v8895_v54, %v8841_v21  ;;  %v14389_v28 = vpop.f32.mrb[165].mxu1  ;;  %v15145_v21 = vld [vmem:[%s18731_s5] sm:$0xff]  }
 0x62e   : > { %v8844_v58 = vpop.f32.mrb[166].mxu1  ;;  %v8696_v31 = vld [vmem:[#allocation4 + $0x60] sm:$0xff]  ;;  %v18169_v61 = vpop.f32.mrb[244].mxu0  ;;  %14544 = vmatpush3.bf16.msra.mxu0 %v15145_v21  ;;  %v15148_v21 = vld [vmem:[%s18731_s5 + $0x18] sm:$0xff]  }
 0x62f   : > { %8921 = vst.msk [vmem:[#allocation4] sm:$0xff] %vm7930_vm9, %v8908_v24  ;;  %v8909_v0 = vadd.f32 %v8896_v6, %v8844_v58  ;;  %v14390_v32 = vpop.f32.mrb[167].mxu1  ;;  %v8709_v36 = vadd.f32 %v8696_v31, %v18039_v53  ;;  %v14509_v37 = vpop.f32.mrb[245].mxu0  ;;  %v8902_v58 = vld [vmem:[#allocation4 + $0x38] sm:$0xff]  ;;  %14545 = vmatprep.subr.bf16.mxu0 %v15306_v34 }
 0x630   : > { %v9657_v51 = vpop.f32.mrb[246].mxu0  ;;  %v8903_v37 = vld [vmem:[#allocation4 + $0x40] sm:$0xff] }
 0x631   : > { %8922 = vst.msk [vmem:[#allocation4 + $0x8] sm:$0xff] %vm7930_vm9, %v8909_v0  ;;  %8722 = vst.msk [vmem:[#allocation4 + $0x60] sm:$0xff] %vm7930_vm9, %v8709_v36  ;;  %v14510_v53 = vpop.f32.mrb[247].mxu0 }
 0x634   : > { %v8849_v10 = vpop.f32.mrb[168].mxu1 }
 0x635   : > { %v8910_v42 = vadd.f32 %v8897_v41, %v8849_v10  ;;  %v14393_v44 = vpop.f32.mrb[169].mxu1  ;;  %v8904_v41 = vld [vmem:[#allocation4 + $0x48] sm:$0xff] }
 0x636   : > { %v8852_v49 = vpop.f32.mrb[170].mxu1  ;;  %v9164_v48 = vld [vmem:[#allocation4] sm:$0xff] }
 0x637   : > { %8923 = vst.msk [vmem:[#allocation4 + $0x10] sm:$0xff] %vm7930_vm9, %v8910_v42  ;;  %v8911_v2 = vadd.f32 %v8898_v45, %v8852_v49  ;;  %v14394_v52 = vpop.f32.mrb[171].mxu1  ;;  %v9177_v55 = vadd.f32 %v9164_v48, %v18046_v63 }
 0x638   : > { %v9165_v39 = vld [vmem:[#allocation4 + $0x8] sm:$0xff] }
 0x639   : > { %8924 = vst.msk [vmem:[#allocation4 + $0x18] sm:$0xff] %vm7930_vm9, %v8911_v2  ;;  %9190 = vst.msk [vmem:[#allocation4] sm:$0xff] %vm7930_vm9, %v9177_v55  ;;  %v9178_v11 = vadd.f32 %v9165_v39, %v18049_v30  ;;  %v8905_v2 = vld [vmem:[#allocation4 + $0x50] sm:$0xff] }
 0x63b   : > { %9191 = vst.msk [vmem:[#allocation4 + $0x8] sm:$0xff] %vm7930_vm9, %v9178_v11  ;;  %v8906_v11 = vld [vmem:[#allocation4 + $0x58] sm:$0xff] }
 0x63c   : > { %v8857_v56 = vpop.f32.mrb[172].mxu1 }
 0x63d   : > { %v8912_v18 = vadd.f32 %v8899_v62, %v8857_v56  ;;  %v14397_v3 = vpop.f32.mrb[173].mxu1 }
 0x63e   : > { %v8860_v4 = vpop.f32.mrb[174].mxu1  ;;  %v9166_v5 = vld [vmem:[#allocation4 + $0x10] sm:$0xff] }
 0x63f   : > { %8925 = vst.msk [vmem:[#allocation4 + $0x20] sm:$0xff] %vm7930_vm9, %v8912_v18  ;;  %v8913_v12 = vadd.f32 %v8900_v7, %v8860_v4  ;;  %v14398_v63 = vpop.f32.mrb[175].mxu1  ;;  %v9179_v16 = vadd.f32 %v9166_v5, %v18056_v43  ;;  %v8907_v5 = vld [vmem:[#allocation4 + $0x60] sm:$0xff] }
 0x640   : > { %v9167_v20 = vld [vmem:[#allocation4 + $0x18] sm:$0xff] }
 0x641   : > { %8926 = vst.msk [vmem:[#allocation4 + $0x28] sm:$0xff] %vm7930_vm9, %v8913_v12  ;;  %9192 = vst.msk [vmem:[#allocation4 + $0x10] sm:$0xff] %vm7930_vm9, %v9179_v16  ;;  %v9180_v30 = vadd.f32 %v9167_v20, %v18059_v50 }
 0x643   : > { %9193 = vst.msk [vmem:[#allocation4 + $0x18] sm:$0xff] %vm7930_vm9, %v9180_v30 }
 0x644   : > { %v8865_v27 = vpop.f32.mrb[176].mxu1 }
 0x645   : > { %v8914_v54 = vadd.f32 %v8901_v13, %v8865_v27  ;;  %v14401_v24 = vpop.f32.mrb[177].mxu1  ;;  %v15147_v13 = vld [vmem:[%s18731_s5 + $0x10] sm:$0xff]  }
 0x646   : > { %v8868_v28 = vpop.f32.mrb[178].mxu1  ;;  %v9168_v43 = vld [vmem:[#allocation4 + $0x20] sm:$0xff] }
 0x647   : > { %8927 = vst.msk [vmem:[#allocation4 + $0x30] sm:$0xff] %vm7930_vm9, %v8914_v54  ;;  %v8915_v6 = vadd.f32 %v8902_v58, %v8868_v28  ;;  %v14402_v31 = vpop.f32.mrb[179].mxu1  ;;  %v9181_v50 = vadd.f32 %v9168_v43, %v18066_v8  ;;  %v9433_v24 = vld [vmem:[#allocation4] sm:$0xff]  ;;  %v9434_v43 = vld [vmem:[#allocation4 + $0x8] sm:$0xff] }
 0x648   : > { %v9169_v0 = vld [vmem:[#allocation4 + $0x28] sm:$0xff] }
 0x649   : > { %8928 = vst.msk [vmem:[#allocation4 + $0x38] sm:$0xff] %vm7930_vm9, %v8915_v6  ;;  %9194 = vst.msk [vmem:[#allocation4 + $0x20] sm:$0xff] %vm7930_vm9, %v9181_v50  ;;  %v9182_v32 = vadd.f32 %v9169_v0, %v18069_v14 }
 0x64b   : > { %9195 = vst.msk [vmem:[#allocation4 + $0x28] sm:$0xff] %vm7930_vm9, %v9182_v32  ;;  %v9435_v32 = vld [vmem:[#allocation4 + $0x10] sm:$0xff] }
 0x64c   : > { %v8873_v36 = vpop.f32.mrb[180].mxu1 }
 0x64d   : > { %v8916_v51 = vadd.f32 %v8903_v37, %v8873_v36  ;;  %v14405_v53 = vpop.f32.mrb[181].mxu1 }
 0x64e   : > { %v8876_v10 = vpop.f32.mrb[182].mxu1  ;;  %v9170_v42 = vld [vmem:[#allocation4 + $0x30] sm:$0xff]  ;;  %v9436_v53 = vld [vmem:[#allocation4 + $0x18] sm:$0xff] }
 0x64f   : > { %8929 = vst.msk [vmem:[#allocation4 + $0x40] sm:$0xff] %vm7930_vm9, %v8916_v51  ;;  %v8917_v8 = vadd.f32 %v8904_v41, %v8876_v10  ;;  %v14406_v44 = vpop.f32.mrb[183].mxu1  ;;  %v9183_v49 = vadd.f32 %v9170_v42, %v18076_v33 }
 0x650   : > { %v9171_v45 = vld [vmem:[#allocation4 + $0x38] sm:$0xff] }
 0x651   : > { %8930 = vst.msk [vmem:[#allocation4 + $0x48] sm:$0xff] %vm7930_vm9, %v8917_v8  ;;  %9196 = vst.msk [vmem:[#allocation4 + $0x30] sm:$0xff] %vm7930_vm9, %v9183_v49  ;;  %v9184_v14 = vadd.f32 %v9171_v45, %v18079_v40  ;;  %v15146_v40 = vld [vmem:[%s18731_s5 + $0x8] sm:$0xff]  }
 0x652   : > { %14546 = vmatpush3.bf16.msra.mxu0 %v15146_v40  ;;  %v9437_v45 = vld [vmem:[#allocation4 + $0x20] sm:$0xff] }
 0x653   : > { %9197 = vst.msk [vmem:[#allocation4 + $0x38] sm:$0xff] %vm7930_vm9, %v9184_v14  ;;  %14547 = vmatprep.subr.bf16.mxu0 %v15306_v34 }
 0x654   : > { %v8881_v48 = vpop.f32.mrb[184].mxu1 }
 0x655   : > { %v8918_v52 = vadd.f32 %v8905_v2, %v8881_v48  ;;  %v14409_v55 = vpop.f32.mrb[185].mxu1 }
 0x656   : > { %v8884_v39 = vpop.f32.mrb[186].mxu1  ;;  %v9172_v56 = vld [vmem:[#allocation4 + $0x40] sm:$0xff]  ;;  %14548 = vmatpush3.bf16.msra.mxu0 %v15147_v13 }
 0x657   : > { %8931 = vst.msk [vmem:[#allocation4 + $0x50] sm:$0xff] %vm7930_vm9, %v8918_v52  ;;  %v8919_v62 = vadd.f32 %v8906_v11, %v8884_v39  ;;  %v14410_v33 = vpop.f32.mrb[187].mxu1  ;;  %v9185_v18 = vadd.f32 %v9172_v56, %v18086_v60  ;;  %14549 = vmatprep.subr.bf16.mxu0 %v15306_v34  ;;  %v9438_v52 = vld [vmem:[#allocation4 + $0x28] sm:$0xff] }
 0x658   : > { %v9173_v3 = vld [vmem:[#allocation4 + $0x48] sm:$0xff]  ;;  %v9439_v33 = vld [vmem:[#allocation4 + $0x30] sm:$0xff] }
 0x659   : > { %8932 = vst.msk [vmem:[#allocation4 + $0x58] sm:$0xff] %vm7930_vm9, %v8919_v62  ;;  %9198 = vst.msk [vmem:[#allocation4 + $0x40] sm:$0xff] %vm7930_vm9, %v9185_v18  ;;  %v9186_v4 = vadd.f32 %v9173_v3, %v18089_v17 }
 0x65a   : > { %14550 = vmatpush3.bf16.msra.mxu0 %v15148_v21 }
 0x65b   : > { %9199 = vst.msk [vmem:[#allocation4 + $0x48] sm:$0xff] %vm7930_vm9, %v9186_v4  ;;  %14563 = vmatprep.subr.bf16.mxu0 %v15306_v34  ;;  %v9440_v4 = vld [vmem:[#allocation4 + $0x38] sm:$0xff] }
 0x65c   : > { %v8889_v7 = vpop.f32.mrb[188].mxu1 }
 0x65d   : > { %v8920_v12 = vadd.f32 %v8907_v5, %v8889_v7  ;;  %v14413_v60 = vpop.f32.mrb[189].mxu1 }
 0x65e   : > { %v8892_v63 = vpop.f32.mrb[190].mxu1  ;;  %v9174_v16 = vld [vmem:[#allocation4 + $0x50] sm:$0xff] }
 0x65f   : > { %8933 = vst.msk [vmem:[#allocation4 + $0x60] sm:$0xff] %vm7930_vm9, %v8920_v12  ;;  %v14414_v20 = vpop.f32.mrb[191].mxu1  ;;  %v9187_v30 = vadd.f32 %v9174_v16, %v18096_v25 }
 0x660   : > { %v9175_v27 = vld [vmem:[#allocation4 + $0x58] sm:$0xff]  ;;  %v9441_v16 = vld [vmem:[#allocation4 + $0x40] sm:$0xff] }
 0x661   : > { %9200 = vst.msk [vmem:[#allocation4 + $0x50] sm:$0xff] %vm7930_vm9, %v9187_v30  ;;  %v9188_v17 = vadd.f32 %v9175_v27, %v18099_v29 }
 0x663   : > { %9201 = vst.msk [vmem:[#allocation4 + $0x58] sm:$0xff] %vm7930_vm9, %v9188_v17  ;;  %v9442_v17 = vld [vmem:[#allocation4 + $0x48] sm:$0xff] }
 0x664   : > { %v9379_v54 = vpop.f32.mrb[192].mxu1 }
 0x665   : > { %v9446_v25 = vadd.f32 %v9433_v24, %v9379_v54  ;;  %v14453_v28 = vpop.f32.mrb[193].mxu1 }
 0x666   : > { %v9382_v58 = vpop.f32.mrb[194].mxu1  ;;  %v9176_v29 = vld [vmem:[#allocation4 + $0x60] sm:$0xff] }
 0x667   : > { %9459 = vst.msk [vmem:[#allocation4] sm:$0xff] %vm7930_vm9, %v9446_v25  ;;  %v9447_v6 = vadd.f32 %v9434_v43, %v9382_v58  ;;  %v14454_v31 = vpop.f32.mrb[195].mxu1  ;;  %v9189_v50 = vadd.f32 %v9176_v29, %v18105_v38 }
 0x668   : > { %v9443_v28 = vld [vmem:[#allocation4 + $0x50] sm:$0xff] }
 0x669   : > { %9460 = vst.msk [vmem:[#allocation4 + $0x8] sm:$0xff] %vm7930_vm9, %v9447_v6  ;;  %9202 = vst.msk [vmem:[#allocation4 + $0x60] sm:$0xff] %vm7930_vm9, %v9189_v50 }
 0x66a   : > { %v9444_v6 = vld [vmem:[#allocation4 + $0x58] sm:$0xff] }
 0x66c   : > { %v9387_v0 = vpop.f32.mrb[196].mxu1 }
 0x66d   : > { %v9448_v36 = vadd.f32 %v9435_v32, %v9387_v0  ;;  %v14457_v37 = vpop.f32.mrb[197].mxu1 }
 0x66e   : > { %v9390_v51 = vpop.f32.mrb[198].mxu1  ;;  %v9660_v10 = vld [vmem:[#allocation4] sm:$0xff] }
 0x66f   : > { %9461 = vst.msk [vmem:[#allocation4 + $0x10] sm:$0xff] %vm7930_vm9, %v9448_v36  ;;  %v9449_v41 = vadd.f32 %v9436_v53, %v9390_v51  ;;  %v14458_v42 = vpop.f32.mrb[199].mxu1  ;;  %v9673_v38 = vadd.f32 %v9660_v10, %v18110_v57 }
 0x670   : > { %v9661_v8 = vld [vmem:[#allocation4 + $0x8] sm:$0xff]  ;;  %v9445_v37 = vld [vmem:[#allocation4 + $0x60] sm:$0xff] }
 0x671   : > { %9462 = vst.msk [vmem:[#allocation4 + $0x18] sm:$0xff] %vm7930_vm9, %v9449_v41  ;;  %9686 = vst.msk [vmem:[#allocation4] sm:$0xff] %vm7930_vm9, %v9673_v38  ;;  %v9674_v44 = vadd.f32 %v9661_v8, %v18113_v9 }
 0x673   : > { %9687 = vst.msk [vmem:[#allocation4 + $0x8] sm:$0xff] %vm7930_vm9, %v9674_v44 }
 0x674   : > { %v9395_v49 = vpop.f32.mrb[200].mxu1 }
 0x675   : > { %v9450_v14 = vadd.f32 %v9437_v45, %v9395_v49  ;;  %v14461_v48 = vpop.f32.mrb[201].mxu1 }
 0x676   : > { %v9398_v2 = vpop.f32.mrb[202].mxu1  ;;  %v9662_v55 = vld [vmem:[#allocation4 + $0x10] sm:$0xff] }
 0x677   : > { %9463 = vst.msk [vmem:[#allocation4 + $0x20] sm:$0xff] %vm7930_vm9, %v9450_v14  ;;  %v9451_v39 = vadd.f32 %v9438_v52, %v9398_v2  ;;  %v14462_v57 = vpop.f32.mrb[203].mxu1  ;;  %v9675_v11 = vadd.f32 %v9662_v55, %v18120_v26 }
 0x678   : > { %v9663_v56 = vld [vmem:[#allocation4 + $0x18] sm:$0xff]  ;;  %v9936_v44 = vld [vmem:[#allocation4] sm:$0xff] }
 0x679   : > { %9464 = vst.msk [vmem:[#allocation4 + $0x28] sm:$0xff] %vm7930_vm9, %v9451_v39  ;;  %9688 = vst.msk [vmem:[#allocation4 + $0x10] sm:$0xff] %vm7930_vm9, %v9675_v11  ;;  %v9676_v9 = vadd.f32 %v9663_v56, %v18123_v35 }
 0x67a   : > { %v9937_v2 = vld [vmem:[#allocation4 + $0x8] sm:$0xff] }
 0x67b   : > { %9689 = vst.msk [vmem:[#allocation4 + $0x18] sm:$0xff] %vm7930_vm9, %v9676_v9 }
 0x67c   : > { %v9403_v62 = vpop.f32.mrb[204].mxu1 }
 0x67d   : > { %v9452_v18 = vadd.f32 %v9439_v33, %v9403_v62  ;;  %v14465_v3 = vpop.f32.mrb[205].mxu1 }
 0x67e   : > { %v9406_v40 = vpop.f32.mrb[206].mxu1  ;;  %v9664_v7 = vld [vmem:[#allocation4 + $0x20] sm:$0xff] }
 0x67f   : > { %9465 = vst.msk [vmem:[#allocation4 + $0x30] sm:$0xff] %vm7930_vm9, %v9452_v18  ;;  %v9453_v5 = vadd.f32 %v9440_v4, %v9406_v40  ;;  %v14466_v26 = vpop.f32.mrb[207].mxu1  ;;  %v9677_v12 = vadd.f32 %v9664_v7, %v18130_v46 }
 0x680   : > { %v9665_v60 = vld [vmem:[#allocation4 + $0x28] sm:$0xff]  ;;  %v9938_v39 = vld [vmem:[#allocation4 + $0x10] sm:$0xff] }
 0x681   : > { %9466 = vst.msk [vmem:[#allocation4 + $0x38] sm:$0xff] %vm7930_vm9, %v9453_v5  ;;  %9690 = vst.msk [vmem:[#allocation4 + $0x20] sm:$0xff] %vm7930_vm9, %v9677_v12  ;;  %v9678_v35 = vadd.f32 %v9665_v60, %v18133_v59 }
 0x682   : > { %v9939_v9 = vld [vmem:[#allocation4 + $0x18] sm:$0xff] }
 0x683   : > { %9691 = vst.msk [vmem:[#allocation4 + $0x28] sm:$0xff] %vm7930_vm9, %v9678_v35 }
 0x684   : > { %v9411_v63 = vpop.f32.mrb[208].mxu1 }
 0x685   : > { %v9454_v20 = vadd.f32 %v9441_v16, %v9411_v63  ;;  %v14469_v30 = vpop.f32.mrb[209].mxu1 }
 0x686   : > { %v9414_v27 = vpop.f32.mrb[210].mxu1  ;;  %v9666_v13 = vld [vmem:[#allocation4 + $0x30] sm:$0xff] }
 0x687   : > { %9467 = vst.msk [vmem:[#allocation4 + $0x40] sm:$0xff] %vm7930_vm9, %v9454_v20  ;;  %v9455_v21 = vadd.f32 %v9442_v17, %v9414_v27  ;;  %v14470_v46 = vpop.f32.mrb[211].mxu1  ;;  %v9679_v54 = vadd.f32 %v9666_v13, %v18140_v15  ;;  %v18282_v20 = vld [vmem:[%s18730_s4] ss:$0 sm:$0xff] }
 0x688   : > { %v9667_v24 = vld [vmem:[#allocation4 + $0x38] sm:$0xff] }
 0x689   : > { %9468 = vst.msk [vmem:[#allocation4 + $0x48] sm:$0xff] %vm7930_vm9, %v9455_v21  ;;  %9692 = vst.msk [vmem:[#allocation4 + $0x30] sm:$0xff] %vm7930_vm9, %v9679_v54  ;;  %v9680_v59 = vadd.f32 %v9667_v24, %v18143_v19 }
 0x68a   : > { %v9941_v12 = vld [vmem:[#allocation4 + $0x28] sm:$0xff] }
 0x68b   : > { %9693 = vst.msk [vmem:[#allocation4 + $0x38] sm:$0xff] %vm7930_vm9, %v9680_v59 }
 0x68c   : > { %v9419_v25 = vpop.f32.mrb[212].mxu1 }
 0x68d   : > { %v9456_v58 = vadd.f32 %v9443_v28, %v9419_v25  ;;  %v14473_v43 = vpop.f32.mrb[213].mxu1 }
 0x68e   : > { %v9422_v29 = vpop.f32.mrb[214].mxu1  ;;  %v9668_v31 = vld [vmem:[#allocation4 + $0x40] sm:$0xff] }
 0x68f   : > { %9469 = vst.msk [vmem:[#allocation4 + $0x50] sm:$0xff] %vm7930_vm9, %v9456_v58  ;;  %v9457_v50 = vadd.f32 %v9444_v6, %v9422_v29  ;;  %v14474_v15 = vpop.f32.mrb[215].mxu1  ;;  %v9681_v0 = vadd.f32 %v9668_v31, %v18150_v22 }
 0x690   : > { %v9669_v32 = vld [vmem:[#allocation4 + $0x48] sm:$0xff]  ;;  %v9942_v13 = vld [vmem:[#allocation4 + $0x30] sm:$0xff] }
 0x691   : > { %9470 = vst.msk [vmem:[#allocation4 + $0x58] sm:$0xff] %vm7930_vm9, %v9457_v50  ;;  %9694 = vst.msk [vmem:[#allocation4 + $0x40] sm:$0xff] %vm7930_vm9, %v9681_v0  ;;  %v9682_v19 = vadd.f32 %v9669_v32, %v18153_v47 }
 0x692   : > { %v9943_v58 = vld [vmem:[#allocation4 + $0x38] sm:$0xff] }
 0x693   : > { %9695 = vst.msk [vmem:[#allocation4 + $0x48] sm:$0xff] %vm7930_vm9, %v9682_v19  ;;  %v10012_v19 = vld [vmem:[#allocation5 + $0x8] sm:$0x8] }
 0x694   : > { %v9427_v36 = vpop.f32.mrb[216].mxu1 }
 0x695   : > { %v9458_v51 = vadd.f32 %v9445_v37, %v9427_v36  ;;  %v14477_v53 = vpop.f32.mrb[217].mxu1 }
 0x696   : > { %v9430_v10 = vpop.f32.mrb[218].mxu1  ;;  %v9670_v41 = vld [vmem:[#allocation4 + $0x50] sm:$0xff] }
 0x697   : > { %9471 = vst.msk [vmem:[#allocation4 + $0x60] sm:$0xff] %vm7930_vm9, %v9458_v51  ;;  %v14478_v42 = vpop.f32.mrb[219].mxu1  ;;  %v9683_v22 = vadd.f32 %v9670_v41, %v18160_v1 }
 0x698   : > { %v9671_v38 = vld [vmem:[#allocation4 + $0x58] sm:$0xff]  ;;  %v9944_v37 = vld [vmem:[#allocation4 + $0x40] sm:$0xff] }
 0x699   : > { %9696 = vst.msk [vmem:[#allocation4 + $0x50] sm:$0xff] %vm7930_vm9, %v9683_v22  ;;  %v9684_v8 = vadd.f32 %v9671_v38, %v18163_v23 }
 0x69b   : > { %9697 = vst.msk [vmem:[#allocation4 + $0x58] sm:$0xff] %vm7930_vm9, %v9684_v8  ;;  %v9945_v8 = vld [vmem:[#allocation4 + $0x48] sm:$0xff] }
 0x69c   : > { %v9882_v47 = vpop.f32.mrb[220].mxu1 }
 0x69d   : > { %v9949_v49 = vadd.f32 %v9936_v44, %v9882_v47  ;;  %v14517_v45 = vpop.f32.mrb[221].mxu1 }
 0x69e   : > { %v9672_v14 = vld [vmem:[#allocation4 + $0x60] sm:$0xff]  ;;  %v9885_v48 = vpop.f32.mrb[222].mxu1 }
 0x69f   : > { %9962 = vst.msk [vmem:[#allocation4] sm:$0xff] %vm7930_vm9, %v9949_v49  ;;  %v9685_v52 = vadd.f32 %v9672_v14, %v18169_v61  ;;  %v9950_v55 = vadd.f32 %v9937_v2, %v9885_v48  ;;  %v14518_v1 = vpop.f32.mrb[223].mxu1  ;;  %v9940_v61 = vld [vmem:[#allocation4 + $0x20] sm:$0xff]  ;;  %v10017_v48 = vld [vmem:[#allocation5 + $0xc] sm:$0x3] }
 0x6a1   : > { %9698 = vst.msk [vmem:[#allocation4 + $0x60] sm:$0xff] %vm7930_vm9, %v9685_v52  ;;  %9963 = vst.msk [vmem:[#allocation4 + $0x8] sm:$0xff] %vm7930_vm9, %v9950_v55 }
 0x6a4   : > { %v9890_v23 = vpop.f32.mrb[224].mxu1 }
 0x6a5   : > { %v9951_v57 = vadd.f32 %v9938_v39, %v9890_v23  ;;  %v14521_v11 = vpop.f32.mrb[225].mxu1 }
 0x6a6   : > { %v9893_v56 = vpop.f32.mrb[226].mxu1  ;;  %v9946_v11 = vld [vmem:[#allocation4 + $0x50] sm:$0xff] }
 0x6a7   : > { %9964 = vst.msk [vmem:[#allocation4 + $0x10] sm:$0xff] %vm7930_vm9, %v9951_v57  ;;  %v9952_v62 = vadd.f32 %v9939_v9, %v9893_v56  ;;  %v14522_v33 = vpop.f32.mrb[227].mxu1 }
 0x6a9   : > { %9965 = vst.msk [vmem:[#allocation4 + $0x18] sm:$0xff] %vm7930_vm9, %v9952_v62 }
 0x6ac   : > { %v9898_v18 = vpop.f32.mrb[228].mxu1 }
 0x6ad   : > { %v9953_v3 = vadd.f32 %v9940_v61, %v9898_v18  ;;  %v14525_v40 = vpop.f32.mrb[229].mxu1 }
 0x6ae   : > { %v9977_v4 = vld [vmem:[#allocation4 + $0xb] ss:$2 sm:$0xf]  ;;  %v9979_v7 = vld [vmem:[#allocation4 + $0xc] ss:$2 sm:$0xf] }
 0x6af   : > { %v9980_v5 = vmax.f32 %v9977_v4, %v9979_v7  ;;  %9966 = vst.msk [vmem:[#allocation4 + $0x20] sm:$0xff] %vm7930_vm9, %v9953_v3  ;;  %v9901_v26 = vpop.f32.mrb[230].mxu1 }
 0x6b0   : > { %v9982_v60 = vld [vmem:[#allocation4 + $0x15] ss:$2 sm:$0xf]  ;;  %v9954_v35 = vadd.f32 %v9941_v12, %v9901_v26  ;;  %v14526_v16 = vpop.f32.mrb[231].mxu1 }
 0x6b1   : > { %v9983_v63 = vmax.f32 %v9980_v5, %v9982_v60  ;;  %v9985_v30 = vld [vmem:[#allocation4 + $0x16] ss:$2 sm:$0xf] }
 0x6b2   : > { %9967 = vst.msk [vmem:[#allocation4 + $0x28] sm:$0xff] %vm7930_vm9, %v9954_v35  ;;  %v9947_v5 = vld [vmem:[#allocation4 + $0x58] sm:$0xff]  ;;  %v10050_v26 = vld [vmem:[#allocation5 + $0xc] sm:$0xc] }
 0x6b3   : > { %v9986_v27 = vmax.f32 %v9983_v63, %v9985_v30 }
 0x6b4   : > { %v9906_v17 = vpop.f32.mrb[232].mxu1 }
 0x6b5   : > { %v9993_v21 = vadd.f32 %v18282_v20, %v9986_v27  ;;  %v9955_v46 = vadd.f32 %v9942_v13, %v9906_v17  ;;  %v14529_v54 = vpop.f32.mrb[233].mxu1  ;;  %v10055_v17 = vld [vmem:[#allocation5 + $0x10] sm:$0x1] }
 0x6b6   : > { %v10021_v24 = vld [vmem:[#allocation4 + $0x1f] ss:$2 sm:$0xf]  ;;  %v10023_v59 = vld [vmem:[#allocation4 + $0x20] ss:$2 sm:$0xf] }
 0x6b7   : > { %v9994_v25 = vmax.f32 %v9993_v21, 0.0  ;;  %9968 = vst.msk [vmem:[#allocation4 + $0x30] sm:$0xff] %vm7930_vm9, %v9955_v46  ;;  %v9909_v28 = vpop.f32.mrb[234].mxu1  ;;  %v10024_v31 = vmax.f32 %v10021_v24, %v10023_v59  ;;  %v9948_v59 = vld [vmem:[#allocation4 + $0x60] sm:$0xff] }
 0x6b8   : > { %v9956_v43 = vadd.f32 %v9943_v58, %v9909_v28  ;;  %v14530_v29 = vpop.f32.mrb[235].mxu1 }
 0x6b9   : > { %v13091_v6 = vpack.c.bf16 %v9994_v25, %v9994_v25  ;;  %v10026_v50 = vld [vmem:[#allocation4 + $0x29] ss:$2 sm:$0xf] }
 0x6ba   : > { %9969 = vst.msk [vmem:[#allocation4 + $0x38] sm:$0xff] %vm7930_vm9, %v9956_v43  ;;  %v10027_v10 = vmax.f32 %v10024_v31, %v10026_v50 }
 0x6bb   : > { %v10000_v15 = vshll.u32 %v13091_v6, 16  ;;  %v10003_v0 = vshrl.u32 %v13091_v6, 16 }
 0x6bc   : > { %v9914_v36 = vpop.f32.mrb[236].mxu1 }
 0x6bd   : > { %v10002_v51 = vrot.slane %v10000_v15, 5  ;;  %v10005_v53 = vrot.slane %v10003_v0, 4  ;;  %v9957_v41 = vadd.f32 %v9944_v37, %v9914_v36  ;;  %v14533_v42 = vpop.f32.mrb[237].mxu1 }
 0x6be   : > { %v10029_v22 = vld [vmem:[#allocation4 + $0x2a] ss:$2 sm:$0xf]  ;;  %v9917_v38 = vpop.f32.mrb[238].mxu1 }
 0x6bf   : > { %v10006_v47 = vor.u32 %v10005_v53, %v10002_v51  ;;  %v10013_v44 = vsel %vm18289_vm10, %v10002_v51, %v10012_v19  ;;  %v10030_v49 = vmax.f32 %v10027_v10, %v10029_v22  ;;  %9970 = vst.msk [vmem:[#allocation4 + $0x40] sm:$0xff] %vm7930_vm9, %v9957_v41  ;;  %v9958_v45 = vadd.f32 %v9945_v8, %v9917_v38  ;;  %v14534_v14 = vpop.f32.mrb[239].mxu1  ;;  %v10087_v10 = vld [vmem:[#allocation5 + $0x10] sm:$0xe] }
 0x6c0   : > { %10014 = vst [vmem:[#allocation5 + $0x8] sm:$0x8] %v10013_v44  ;;  %vm10115_vm10 = vcmask 518144  }
 0x6c1   : > { %v10007_v2 = vrot.slane %v10006_v47, 4  ;;  %v10031_v52 = vadd.f32 %v18282_v20, %v10030_v49  ;;  %9971 = vst.msk [vmem:[#allocation4 + $0x48] sm:$0xff] %vm7930_vm9, %v9958_v45  ;;  %v10059_v55 = vld [vmem:[#allocation4 + $0x33] ss:$2 sm:$0xf] }
 0x6c2   : > { %v10061_v1 = vld [vmem:[#allocation4 + $0x34] ss:$2 sm:$0xf] }
 0x6c3   : > { %v10018_v23 = vsel %vm10016_vm15, %v10007_v2, %v10017_v48  ;;  %v10032_v39 = vmax.f32 %v10031_v52, 0.0  ;;  %v10062_v9 = vmax.f32 %v10059_v55, %v10061_v1  ;;  %vm10117_vm15 = vmand %vm10115_vm10, %vm10116_vm14  ;;  %v10118_v48 = vld [vmem:[#allocation5 + $0x14] sm:$0x7] }
 0x6c4   : > { %10019 = vst [vmem:[#allocation5 + $0xc] sm:$0x3] %v10018_v23  ;;  %v9922_v57 = vpop.f32.mrb[240].mxu1 }
 0x6c5   : > { %v13092_v56 = vpack.c.bf16 %v10032_v39, %v10032_v39  ;;  %v9959_v62 = vadd.f32 %v9946_v11, %v9922_v57  ;;  %v14537_v33 = vpop.f32.mrb[241].mxu1  ;;  %v15151_v11 = vld [vmem:[%s18731_s5 + $0x20] sm:$0xff]  }
 0x6c6   : > { %v10064_v18 = vld [vmem:[#allocation4 + $0x3d] ss:$2 sm:$0xf]  ;;  %v10067_v61 = vld [vmem:[#allocation4 + $0x3e] ss:$2 sm:$0xf] }
 0x6c7   : > { %v10038_v3 = vshrl.u32 %v13092_v56, 16  ;;  %v10041_v40 = vshll.u32 %v13092_v56, 16  ;;  %v10065_v4 = vmax.f32 %v10062_v9, %v10064_v18  ;;  %9972 = vst.msk [vmem:[#allocation4 + $0x50] sm:$0xff] %vm7930_vm9, %v9959_v62  ;;  %v9925_v7 = vpop.f32.mrb[242].mxu1  ;;  %v15149_v8 = vld [vmem:[#allocation5 + $0x4] sm:$0xff]   ;;  %v15152_v9 = vld [vmem:[%s18731_s5 + $0x28] sm:$0xff]  }
 0x6c8   : > { %v10091_v12 = vld [vmem:[#allocation4 + $0x47] ss:$2 sm:$0xf]  ;;  %v10093_v60 = vld [vmem:[#allocation4 + $0x48] ss:$2 sm:$0xf]  ;;  %v9960_v35 = vadd.f32 %v9947_v5, %v9925_v7 }
 0x6c9   : > { %v10040_v63 = vrot.slane %v10038_v3, 5  ;;  %v10043_v16 = vrot.slane %v10041_v40, 6  ;;  %v10068_v30 = vmax.f32 %v10065_v4, %v10067_v61  ;;  %v14538_v27 = vpop.f32.mrb[243].mxu1  ;;  %v10094_v54 = vmax.f32 %v10091_v12, %v10093_v60  ;;  %v15154_v40 = vld [vmem:[%s18731_s5 + $0x30] sm:$0xff]   ;;  %v15155_v7 = vld [vmem:[%s18731_s5 + $0x38] sm:$0xff]  }
 0x6ca   : > { %9973 = vst.msk [vmem:[#allocation4 + $0x58] sm:$0xff] %vm7930_vm9, %v9960_v35  ;;  %v10153_v49 = vshll.u32 %v15149_v8, 16  ;;  %v15156_v60 = vld [vmem:[#allocation5 + $0x4] sm:$0xfe]  }
 0x6cb   : > { %v10044_v13 = vor.u32 %v10043_v16, %v10040_v63  ;;  %v10045_v21 = vrot.slane %v10040_v63, 4  ;;  %v10069_v46 = vadd.f32 %v18282_v20, %v10068_v30  ;;  %v10297_v63 = vrot.slane %v15156_v60, 1  ;;  %v15158_v16 = vld [vmem:[%s18731_s5 + $0x40] sm:$0xff]  }
 0x6cc   : > { %v9930_v24 = vpop.f32.mrb[244].mxu1  ;;  %v10155_v55 = vrot.slane %v10153_v49, 1 }
 0x6cd   : > { %v10051_v25 = vsel %vm10049_vm11, %v10044_v13, %v10050_v26  ;;  %v10056_v28 = vsel %vm10054_vm6, %v10045_v21, %v10055_v17  ;;  %v10070_v58 = vmax.f32 %v10069_v46, 0.0  ;;  %v9961_v43 = vadd.f32 %v9948_v59, %v9930_v24  ;;  %v14541_v29 = vpop.f32.mrb[245].mxu1  ;;  %v15159_v17 = vld [vmem:[%s18731_s5 + $0x48] sm:$0xff]   ;;  %v15161_v21 = vld [vmem:[%s18731_s5 + $0x50] sm:$0xff]   ;;  %vm18802_vm11 = vmmov %vm18801_vm13 }
 0x6ce   : > { %10052 = vst [vmem:[#allocation5 + $0xc] sm:$0xc] %v10051_v25  ;;  %10057 = vst [vmem:[#allocation5 + $0x10] sm:$0x1] %v10056_v28  ;;  %v9933_v15 = vpop.f32.mrb[246].mxu1  ;;  %v15162_v24 = vld [vmem:[%s18731_s5 + $0x58] sm:$0xff]  }
 0x6cf   : > { %v10096_v6 = vld [vmem:[#allocation4 + $0x51] ss:$2 sm:$0xf]  ;;  %v13093_v31 = vpack.c.bf16 %v10070_v58, %v10070_v58  ;;  %9974 = vst.msk [vmem:[#allocation4 + $0x60] sm:$0xff] %vm7930_vm9, %v9961_v43  ;;  %v14542_v37 = vpop.f32.mrb[247].mxu1 }
 0x6d0   : > { %v10097_v50 = vmax.f32 %v10094_v54, %v10096_v6  ;;  %v15163_v59 = vld [vmem:[#allocation5 + $0x4] sm:$0xfe]   ;;  %v15165_v37 = vld [vmem:[%s18731_s5 + $0x60] sm:$0xff]   ;;  %vm18803_vm6 = vsmask.f32 6400 }
 0x6d1   : > { %v10076_v0 = vshrl.u32 %v13093_v31, 16  ;;  %v10079_v32 = vshll.u32 %v13093_v31, 16  ;;  %v10099_v19 = vld [vmem:[#allocation4 + $0x52] ss:$2 sm:$0xf]  ;;  %v10437_v58 = vshrl.u32 %v15163_v59, 16  ;;  %vm18804_vm3 = vmmov %vm18803_vm6 }
 0x6d2   : > { %v10100_v36 = vmax.f32 %v10097_v50, %v10099_v19  ;;  %v10440_v43 = vshll.u32 %v15163_v59, 16  ;;  %v15186_v59 = vld [vmem:[%s18731_s5 + $0xc0] sm:$0xff]  }
 0x6d3   : > { %v10078_v51 = vrot.slane %v10076_v0, 6  ;;  %v10081_v53 = vrot.slane %v10079_v32, 7  ;;  %v10439_v50 = vrot.slane %v10437_v58, 1  ;;  %v15187_v58 = vld [vmem:[%s18731_s5 + $0xc8] sm:$0xff]  }
 0x6d4   : > { %v10101_v41 = vadd.f32 %v18282_v20, %v10100_v36  ;;  %v10151_v20 = vshrl.u32 %v15149_v8, 16  ;;  %v10442_v15 = vrot.slane %v10440_v43, 2 }
 0x6d5   : > { %v10082_v42 = vor.u32 %v10081_v53, %v10078_v51 }
 0x6d6   : > { %v10102_v22 = vmax.f32 %v10101_v41, 0.0  ;;  %v10156_v39 = vor.u32 %v10155_v55, %v10151_v20  ;;  %v10443_v36 = vor.u32 %v10442_v15, %v10439_v50  ;;  %v15166_v41 = vld [vmem:[%s18731_s5 + $0x68] sm:$0xff]  }
 0x6d7   : > { %v10088_v38 = vsel %vm10086_vm7, %v10082_v42, %v10087_v10  ;;  %vm18806_vm7 = vmmov %vm18799_vm0 }
 0x6d8   : > { %10089 = vst [vmem:[#allocation5 + $0x10] sm:$0xe] %v10088_v38  ;;  %v13094_v47 = vpack.c.bf16 %v10102_v22, %v10102_v22  ;;  %v15168_v22 = vld [vmem:[%s18731_s5 + $0x70] sm:$0xff]  }
 0x6da   : > { %v10108_v44 = vshrl.u32 %v13094_v47, 16  ;;  %v10111_v14 = vshll.u32 %v13094_v47, 16  ;;  %v15169_v47 = vld [vmem:[%s18731_s5 + $0x78] sm:$0xff]  }
 0x6dc   : > { %v10110_v45 = vrot.slane %v10108_v44, 7  ;;  %v15170_v44 = vld [vmem:[#allocation5 + $0x4] sm:$0xf8]  }
 0x6de   : > { %v10113_v2 = vor.u32 %v10111_v14, %v10110_v45  ;;  %v10597_v14 = vshrl.u32 %v15170_v44, 16 }
 0x6df   : > { %v15150_v52 = vld [vmem:[#allocation5 + $0xc] sm:$0xff]  }
 0x6e0   : > { %v10119_v1 = vsel %vm10117_vm15, %v10113_v2, %v10118_v48  ;;  %v10158_v23 = vshll.u32 %v15150_v52, 16  ;;  %v10162_v33 = vshrl.u32 %v15150_v52, 16  ;;  %v15157_v12 = vld [vmem:[#allocation5 + $0xc] sm:$0xff]   ;;  %v10600_v48 = vshll.u32 %v15170_v44, 16 }
 0x6e1   : > { %10120 = vst [vmem:[#allocation5 + $0x14] sm:$0x7] %v10119_v1  ;;  %v10298_v35 = vrot.slane %v15157_v12, 1  ;;  %v15164_v54 = vld [vmem:[#allocation5 + $0xc] sm:$0xff]   ;;  %v10599_v1 = vrot.slane %v10597_v14, 3  ;;  %v15181_v12 = vld [vmem:[%s18731_s5 + $0xb0] sm:$0xff]  }
 0x6e2   : > { %v10160_v57 = vrot.slane %v10158_v23, 1  ;;  %v10445_v25 = vshrl.u32 %v15164_v54, 16  ;;  %v10448_v28 = vshll.u32 %v15164_v54, 16  ;;  %v15171_v8 = vld [vmem:[#allocation5 + $0xc] sm:$0xff]   ;;  %v10602_v20 = vrot.slane %v10600_v48, 4 }
 0x6e3   : > { %v10299_v30 = vsel %vm18801_vm13, %v10297_v63, %v10298_v35  ;;  %v10605_v49 = vshrl.u32 %v15171_v8, 16  ;;  %v10608_v45 = vshll.u32 %v15171_v8, 16  ;;  %v15184_v63 = vld [vmem:[#allocation5 + $0x8] sm:$0xff]   ;;  %v15188_v54 = vld [vmem:[#allocation5 + $0x18] sm:$0x1f]  }
 0x6e4   : > { %v10161_v56 = vsel %vm18799_vm0, %v10156_v39, %v10160_v57  ;;  %v10164_v61 = vor.u32 %v10162_v33, %v10160_v57  ;;  %v10447_v29 = vrot.slane %v10445_v25, 1  ;;  %v10450_v6 = vrot.slane %v10448_v28, 2  ;;  %v15193_v14 = vld [vmem:[%s18731_s5 + $0xe0] sm:$0xff]  }
 0x6e5   : > { %14552 = vmatmul.mubr.msk.bf16.vlgmr.msra.gmra.mrb[248].mxu0 %vm7930_vm9, %v10161_v56  ;;  %v10607_v2 = vrot.slane %v10605_v49, 3  ;;  %v10610_v52 = vrot.slane %v10608_v45, 4  ;;  %v15172_v56 = vld [vmem:[%s18731_s5 + $0x80] sm:$0xff]   ;;  %v10903_v28 = vshll.u32 %v15188_v54, 16 }
 0x6e6   : > { %14564 = vmatpush3.bf16.msra.mxu0 %v15151_v11  ;;  %14555 = vmatprep.mubr.msk.bf16.mxu0 %vm15307_vm1, %v15306_v34  ;;  %v10451_v0 = vor.u32 %v10450_v6, %v10447_v29  ;;  %v10603_v11 = vor.u32 %v10602_v20, %v10599_v1  ;;  %v15196_v20 = vld [vmem:[%s18731_s5 + $0xf0] sm:$0xff]  }
 0x6e7   : > { %14565 = vmatprep.subr.bf16.mxu0 %v15306_v34  ;;  %v10611_v23 = vor.u32 %v10610_v52, %v10607_v2  ;;  %v10905_v6 = vrot.slane %v10903_v28, 1 }
 0x6e8   : > { %v15153_v62 = vld [vmem:[#allocation5 + $0x14] sm:$0x1f]   ;;  %v10452_v51 = vsel %vm18803_vm6, %v10443_v36, %v10451_v0 }
 0x6e9   : > { %v10166_v18 = vshll.u32 %v15153_v62, 16  ;;  %v10170_v5 = vshrl.u32 %v15153_v62, 16  ;;  %v15160_v27 = vld [vmem:[#allocation5 + $0x14] sm:$0x1f]  }
 0x6ea   : > { %14566 = vmatpush3.bf16.msra.mxu0 %v15152_v9  ;;  %v10300_v13 = vrot.slane %v15160_v27, 1  ;;  %v15167_v31 = vld [vmem:[#allocation5 + $0x14] sm:$0x3f]   ;;  %v10612_v9 = vsel %vm2837_vm5, %v10603_v11, %v10611_v23  ;;  %v10890_v27 = vshll.u32 %v15184_v63, 16  ;;  %v15198_v11 = vld [vmem:[#allocation5 + $0x8] sm:$0xf8]  }
 0x6eb   : > { %v10168_v3 = vrot.slane %v10166_v18, 1  ;;  %14567 = vmatprep.subr.bf16.mxu0 %v15306_v34  ;;  %v10454_v32 = vshrl.u32 %v15167_v31, 16  ;;  %v10457_v19 = vshll.u32 %v15167_v31, 16  ;;  %v15174_v55 = vld [vmem:[#allocation5 + $0x14] sm:$0xff]   ;;  %v15189_v31 = vld [vmem:[%s18731_s5 + $0xd0] sm:$0xff]  }
 0x6ec   : > { %v10301_v46 = vsel %vm18802_vm11, %v10298_v35, %v10300_v13  ;;  %v10614_v39 = vshrl.u32 %v15174_v55, 16  ;;  %v10617_v57 = vshll.u32 %v15174_v55, 16  ;;  %v15173_v18 = vld [vmem:[%s18731_s5 + $0x88] sm:$0xff]   ;;  %v15183_v35 = vld [vmem:[%s18731_s5 + $0xb8] sm:$0xff]  }
 0x6ed   : > { %v10169_v4 = vsel %vm18800_vm12, %v10164_v61, %v10168_v3  ;;  %v10172_v26 = vor.u32 %v10170_v5, %v10168_v3  ;;  %v10456_v53 = vrot.slane %v10454_v32, 1  ;;  %v10459_v10 = vrot.slane %v10457_v19, 2  ;;  %v15175_v3 = vld [vmem:[%s18731_s5 + $0x90] sm:$0xff]   ;;  %v15177_v5 = vld [vmem:[#allocation5 + $0x8] sm:$0xff]   ;;  %v15180_v60 = vld [vmem:[#allocation5 + $0x10] sm:$0xff]  }
 0x6ee   : > { %14556 = vmatmul.mubr.msk.bf16.gmra.mrb[252].mxu0 %vm7930_vm9, %v10169_v4  ;;  %v10616_v62 = vrot.slane %v10614_v39, 3  ;;  %v10619_v33 = vrot.slane %v10617_v57, 4  ;;  %v15176_v4 = vld [vmem:[%s18731_s5 + $0x98] sm:$0xff]   ;;  %v15192_v15 = vld [vmem:[#allocation5 + $0x10] sm:$0xff]  }
 0x6ef   : > { %14568 = vmatpush3.bf16.msra.mxu0 %v15154_v40  ;;  %14559 = vmatprep.mubr.msk.bf16.mxu0 %vm15307_vm1, %v15306_v34  ;;  %v10460_v42 = vor.u32 %v10459_v10, %v10456_v53  ;;  %v15190_v32 = vld [vmem:[%s18731_s5 + $0xd8] sm:$0xff]   ;;  %v11053_v36 = vshrl.u32 %v15192_v15, 16  ;;  %v15194_v55 = vld [vmem:[%s18731_s5 + $0xe8] sm:$0xff]  }
 0x6f0   : > { %14569 = vmatprep.subr.bf16.mxu0 %v15306_v34  ;;  %v10620_v61 = vor.u32 %v10619_v33, %v10616_v62  ;;  %v15191_v19 = vld [vmem:[#allocation5 + $0x8] sm:$0xfc]   ;;  %v15199_v57 = vld [vmem:[#allocation5 + $0x10] sm:$0xff]  }
 0x6f1   : > { %v10461_v38 = vsel %vm18804_vm3, %v10451_v0, %v10460_v42  ;;  %v10907_v0 = vshrl.u32 %v15188_v54, 16  ;;  %v11045_v53 = vshrl.u32 %v15191_v19, 16  ;;  %v11048_v10 = vshll.u32 %v15191_v19, 16  ;;  %v15197_v39 = vld [vmem:[%s18731_s5 + $0xf8] sm:$0xff]   ;;  %v15200_v62 = vld [vmem:[%s18731_s5 + $0x100] sm:$0xff]  }
 0x6f2   : > { %v10621_v40 = vsel %vm2837_vm5, %v10611_v23, %v10620_v61 }
 0x6f3   : > { %14570 = vmatpush3.bf16.msra.mxu0 %v15155_v7  ;;  %v15178_v7 = vld [vmem:[%s18731_s5 + $0xa0] sm:$0xff]   ;;  %v11050_v8 = vrot.slane %v11048_v10, 3 }
 0x6f4   : > { %14583 = vmatprep.subr.bf16.mxu0 %v15306_v34 }
 0x6f6   : > { %14560 = vmatmul.mubr.msk.bf16.gmra.mrb[0].mxu0 %vm7930_vm9, %v10172_v26  ;;  %v15179_v26 = vld [vmem:[%s18731_s5 + $0xa8] sm:$0xff]  }
 0x6f7   : > { %14571 = vmatprep.mubr.msk.bf16.mxu0 %vm15307_vm1, %v15306_v34 }
 0x6fe   : > { %14572 = vmatmul.mubr.msk.bf16.vlgmr.msra.gmra.mrb[248].mxu0 %vm7930_vm9, %v10299_v30  ;;  %v15182_v30 = vld [vmem:[#allocation5 + $0x18] ss:$0 sps:$4 sm:$0xff]  }
 0x6ff   : > { %14584 = vmatpush3.bf16.msra.mxu0 %v15158_v16  ;;  %14575 = vmatprep.mubr.msk.bf16.mxu0 %vm15307_vm1, %v15306_v34  ;;  %v15185_v16 = vld [vmem:[#allocation5 + $0x10] sm:$0xff]  }
 0x700   : > { %14585 = vmatprep.subr.bf16.mxu0 %v15306_v34  ;;  %v10899_v43 = vshrl.u32 %v15185_v16, 16 }
 0x703   : > { %14586 = vmatpush3.bf16.msra.mxu0 %v15159_v17  ;;  %v10895_v17 = vshll.u32 %v15185_v16, 16 }
 0x704   : > { %14587 = vmatprep.subr.bf16.mxu0 %v15306_v34 }
 0x706   : > { %14576 = vmatmul.mubr.msk.bf16.gmra.mrb[252].mxu0 %vm7930_vm9, %v10301_v46  ;;  %v10897_v46 = vrot.slane %v10895_v17, 1 }
 0x707   : > { %14588 = vmatpush3.bf16.msra.mxu0 %v15161_v21  ;;  %14579 = vmatprep.mubr.msk.bf16.mxu0 %vm15307_vm1, %v15306_v34  ;;  %v10888_v21 = vshrl.u32 %v15184_v63, 16 }
 0x708   : > { %14589 = vmatprep.subr.bf16.mxu0 %v15306_v34  ;;  %v10901_v29 = vor.u32 %v10899_v43, %v10897_v46 }
 0x70a   : > { %v10906_v50 = vsel %vm18806_vm7, %v10901_v29, %v10905_v6 }
 0x70b   : > { %14590 = vmatpush3.bf16.msra.mxu0 %v15162_v24 }
 0x70c   : > { %14603 = vmatprep.subr.bf16.mxu0 %v15306_v34 }
 0x70e   : > { %14580 = vmatmul.mubr.msk.bf16.gmra.mrb[0].mxu0 %vm7930_vm9, %v10300_v13  ;;  %v10892_v13 = vrot.slane %v10890_v27, 1  ;;  %v15207_v27 = vld [vmem:[#allocation5 + $0x18] sm:$0xff]  }
 0x70f   : > { %14591 = vmatprep.mubr.msk.bf16.mxu0 %vm15307_vm1, %v15306_v34  ;;  %v11364_v54 = vshll.u32 %v15207_v27, 16 }
 0x710   : > { %v10893_v24 = vor.u32 %v10892_v13, %v10888_v21 }
 0x711   : > { %v11366_v28 = vrot.slane %v11364_v54, 4  ;;  %v11525_v54 = vld [vmem:[#allocation7 + $0x3] sm:$0x1] }
 0x712   : > { %v10898_v25 = vsel %vm18805_vm4, %v10893_v24, %v10897_v46  ;;  %v11361_v46 = vshrl.u32 %v15207_v27, 16 }
 0x716   : > { %14592 = vmatmul.mubr.msk.bf16.vlgmr.msra.gmra.mrb[248].mxu0 %vm7930_vm9, %v10452_v51  ;;  %v10909_v51 = vor.u32 %v10907_v0, %v10905_v6 }
 0x717   : > { %14604 = vmatpush3.bf16.msra.mxu0 %v15165_v37  ;;  %14595 = vmatprep.mubr.msk.bf16.mxu0 %vm15307_vm1, %v15306_v34  ;;  %v11056_v37 = vshll.u32 %v15192_v15, 16 }
 0x718   : > { %14605 = vmatprep.subr.bf16.mxu0 %v15306_v34 }
 0x71b   : > { %14606 = vmatpush3.bf16.msra.mxu0 %v15166_v41  ;;  %v11055_v41 = vrot.slane %v11053_v36, 2 }
 0x71c   : > { %14607 = vmatprep.subr.bf16.mxu0 %v15306_v34 }
 0x71e   : > { %14596 = vmatmul.mubr.msk.bf16.gmra.mrb[252].mxu0 %vm7930_vm9, %v10461_v38  ;;  %v11047_v38 = vrot.slane %v11045_v53, 2 }
 0x71f   : > { %14608 = vmatpush3.bf16.msra.mxu0 %v15168_v22  ;;  %14599 = vmatprep.mubr.msk.bf16.mxu0 %vm15307_vm1, %v15306_v34  ;;  %v15195_v22 = vld [vmem:[#allocation5 + $0x18] sm:$0x7f]  }
 0x720   : > { %14609 = vmatprep.subr.bf16.mxu0 %v15306_v34  ;;  %v11062_v44 = vshrl.u32 %v15195_v22, 16  ;;  %v11065_v49 = vshll.u32 %v15195_v22, 16  ;;  %v11051_v45 = vor.u32 %v11050_v8, %v11047_v38  ;;  %v11473_v22 = vld [vmem:[%s18732_s6] sm:$0x1] }
 0x722   : > { %v11064_v2 = vrot.slane %v11062_v44, 2  ;;  %v11067_v52 = vrot.slane %v11065_v49, 3 }
 0x723   : > { %14610 = vmatpush3.bf16.msra.mxu0 %v15169_v47 }
 0x724   : > { %14623 = vmatprep.subr.bf16.mxu0 %v15306_v34  ;;  %v11068_v1 = vor.u32 %v11067_v52, %v11064_v2 }
 0x726   : > { %14600 = vmatmul.mubr.msk.bf16.gmra.mrb[0].mxu0 %vm7930_vm9, %v10460_v42  ;;  %v11058_v42 = vrot.slane %v11056_v37, 3 }
 0x727   : > { %14611 = vmatprep.mubr.msk.bf16.mxu0 %vm15307_vm1, %v15306_v34 }
 0x728   : > { %v11059_v47 = vor.u32 %v11058_v42, %v11055_v41 }
 0x72a   : > { %v11060_v48 = vsel %vm1609_vm2, %v11051_v45, %v11059_v47  ;;  %v11069_v23 = vsel %vm1609_vm2, %v11059_v47, %v11068_v1  ;;  %vm18807_vm2 = vcmask 1044480  }
 0x72b   : > { %vm18808_vm10 = vmmov %vm18807_vm2 }
 0x72e   : > { %14612 = vmatmul.mubr.msk.bf16.vlgmr.msra.gmra.mrb[248].mxu0 %vm7930_vm9, %v10612_v9  ;;  %v11204_v9 = vrot.slane %v15198_v11, 3  ;;  %v11486_v11 = vld [vmem:[#allocation7] sm:$0x1] }
 0x72f   : > { %14624 = vmatpush3.bf16.msra.mxu0 %v15172_v56  ;;  %14615 = vmatprep.mubr.msk.bf16.mxu0 %vm15307_vm1, %v15306_v34  ;;  %v11205_v56 = vrot.slane %v15199_v57, 3 }
 0x730   : > { %14625 = vmatprep.subr.bf16.mxu0 %v15306_v34 }
 0x731   : > { %v11206_v33 = vsel %vm18807_vm2, %v11204_v9, %v11205_v56 }
 0x733   : > { %14626 = vmatpush3.bf16.msra.mxu0 %v15173_v18  ;;  %v15202_v18 = vld [vmem:[#allocation5 + $0x18] sm:$0x7f]  }
 0x734   : > { %14627 = vmatprep.subr.bf16.mxu0 %v15306_v34 }
 0x736   : > { %14616 = vmatmul.mubr.msk.bf16.gmra.mrb[252].mxu0 %vm7930_vm9, %v10621_v40  ;;  %v15203_v40 = vld [vmem:[%s18731_s5 + $0x110] sm:$0xff]  }
 0x737   : > { %14628 = vmatpush3.bf16.msra.mxu0 %v15175_v3  ;;  %14619 = vmatprep.mubr.msk.bf16.mxu0 %vm15307_vm1, %v15306_v34  ;;  %v11207_v3 = vrot.slane %v15202_v18, 3 }
 0x738   : > { %14629 = vmatprep.subr.bf16.mxu0 %v15306_v34 }
 0x73b   : > { %14630 = vmatpush3.bf16.msra.mxu0 %v15176_v4  ;;  %v11208_v4 = vsel %vm18808_vm10, %v11205_v56, %v11207_v3 }
 0x73c   : > { %14643 = vmatprep.subr.bf16.mxu0 %v15306_v34 }
 0x73e   : > { %14620 = vmatmul.mubr.msk.bf16.gmra.mrb[0].mxu0 %vm7930_vm9, %v10620_v61  ;;  %v15201_v61 = vld [vmem:[%s18731_s5 + $0x108] sm:$0xff]  }
 0x73f   : > { %14631 = vmatprep.mubr.msk.bf16.mxu0 %vm15307_vm1, %v15306_v34 }
 0x746   : > { %14632 = vmatmul.mubr.msk.bf16.vlgmr.msra.gmra.mrb[248].mxu0 %vm7930_vm9, %v15177_v5  ;;  %v15204_v5 = vld [vmem:[%s18731_s5 + $0x118] sm:$0xff]  }
 0x747   : > { %14644 = vmatpush3.bf16.msra.mxu0 %v15178_v7  ;;  %14635 = vmatprep.mubr.msk.bf16.mxu0 %vm15307_vm1, %v15306_v34  ;;  %v15206_v7 = vld [vmem:[#allocation5 + $0x10] sm:$0xff]  }
 0x748   : > { %14645 = vmatprep.subr.bf16.mxu0 %v15306_v34 }
 0x74b   : > { %14646 = vmatpush3.bf16.msra.mxu0 %v15179_v26  ;;  %v15205_v26 = vld [vmem:[#allocation5 + $0x8] sm:$0xf8]  }
 0x74c   : > { %14647 = vmatprep.subr.bf16.mxu0 %v15306_v34  ;;  %v11347_v63 = vshll.u32 %v15205_v26, 16 }
 0x74e   : > { %14636 = vmatmul.mubr.msk.bf16.gmra.mrb[252].mxu0 %vm7930_vm9, %v15180_v60  ;;  %v11355_v60 = vshll.u32 %v15206_v7, 16  ;;  %v11349_v13 = vrot.slane %v11347_v63, 4 }
 0x74f   : > { %14648 = vmatpush3.bf16.msra.mxu0 %v15181_v12  ;;  %14639 = vmatprep.mubr.msk.bf16.mxu0 %vm15307_vm1, %v15306_v34  ;;  %v11352_v12 = vshrl.u32 %v15206_v7, 16 }
 0x750   : > { %14649 = vmatprep.subr.bf16.mxu0 %v15306_v34 }
 0x751   : > { %v11354_v16 = vrot.slane %v11352_v12, 3 }
 0x753   : > { %14650 = vmatpush3.bf16.msra.mxu0 %v15183_v35  ;;  %v11344_v35 = vshrl.u32 %v15205_v26, 16 }
 0x754   : > { %14663 = vmatprep.subr.bf16.mxu0 %v15306_v34 }
 0x755   : > { %v11346_v17 = vrot.slane %v11344_v35, 3 }
 0x756   : > { %14640 = vmatmul.mubr.msk.bf16.gmra.mrb[0].mxu0 %vm7930_vm9, %v15182_v30  ;;  %v11357_v30 = vrot.slane %v11355_v60, 4 }
 0x757   : > { %14651 = vmatprep.mubr.msk.bf16.mxu0 %vm15307_vm1, %v15306_v34  ;;  %v11350_v24 = vor.u32 %v11349_v13, %v11346_v17 }
 0x758   : > { %v11358_v21 = vor.u32 %v11357_v30, %v11354_v16 }
 0x75e   : > { %14652 = vmatmul.mubr.msk.bf16.vlgmr.msra.gmra.mrb[248].mxu0 %vm7930_vm9, %v10898_v25  ;;  %v11363_v25 = vrot.slane %v11361_v46, 3  ;;  %v11512_v46 = vld [vmem:[#allocation7 + $0x2] sm:$0x1] }
 0x75f   : > { %14664 = vmatpush3.bf16.msra.mxu0 %v15186_v59  ;;  %14655 = vmatprep.mubr.msk.bf16.mxu0 %vm15307_vm1, %v15306_v34  ;;  %v11359_v59 = vsel %vm2837_vm5, %v11350_v24, %v11358_v21 }
 0x760   : > { %14665 = vmatprep.subr.bf16.mxu0 %v15306_v34 }
 0x763   : > { %14666 = vmatpush3.bf16.msra.mxu0 %v15187_v58  ;;  %v11367_v58 = vor.u32 %v11366_v28, %v11363_v25 }
 0x764   : > { %14667 = vmatprep.subr.bf16.mxu0 %v15306_v34 }
 0x765   : > { %v11368_v43 = vsel %vm2837_vm5, %v11358_v21, %v11367_v58 }
 0x766   : > { %14656 = vmatmul.mubr.msk.bf16.gmra.mrb[252].mxu0 %vm7930_vm9, %v10906_v50 }
 0x767   : > { %14668 = vmatpush3.bf16.msra.mxu0 %v15189_v31  ;;  %14659 = vmatprep.mubr.msk.bf16.mxu0 %vm15307_vm1, %v15306_v34 }
 0x768   : > { %14669 = vmatprep.subr.bf16.mxu0 %v15306_v34 }
 0x76b   : > { %14670 = vmatpush3.bf16.msra.mxu0 %v15190_v32 }
 0x76c   : > { %14683 = vmatprep.subr.bf16.mxu0 %v15306_v34 }
 0x76e   : > { %14660 = vmatmul.mubr.msk.bf16.gmra.mrb[0].mxu0 %vm7930_vm9, %v10909_v51 }
 0x76f   : > { %14671 = vmatprep.mubr.msk.bf16.mxu0 %vm15307_vm1, %v15306_v34 }
 0x776   : > { %14672 = vmatmul.mubr.msk.bf16.vlgmr.msra.gmra.mrb[248].mxu0 %vm7930_vm9, %v11060_v48 }
 0x777   : > { %14684 = vmatpush3.bf16.msra.mxu0 %v15193_v14  ;;  %14675 = vmatprep.mubr.msk.bf16.mxu0 %vm15307_vm1, %v15306_v34 }
 0x778   : > { %14685 = vmatprep.subr.bf16.mxu0 %v15306_v34 }
 0x77b   : > { %14686 = vmatpush3.bf16.msra.mxu0 %v15194_v55 }
 0x77c   : > { %14687 = vmatprep.subr.bf16.mxu0 %v15306_v34 }
 0x77e   : > { %14676 = vmatmul.mubr.msk.bf16.gmra.mrb[252].mxu0 %vm7930_vm9, %v11069_v23 }
 0x77f   : > { %14688 = vmatpush3.bf16.msra.mxu0 %v15196_v20  ;;  %14679 = vmatprep.mubr.msk.bf16.mxu0 %vm15307_vm1, %v15306_v34 }
 0x780   : > { %14689 = vmatprep.subr.bf16.mxu0 %v15306_v34 }
 0x783   : > { %14690 = vmatpush3.bf16.msra.mxu0 %v15197_v39 }
 0x784   : > { %14703 = vmatprep.subr.bf16.mxu0 %v15306_v34 }
 0x786   : > { %14680 = vmatmul.mubr.msk.bf16.gmra.mrb[0].mxu0 %vm7930_vm9, %v11068_v1 }
 0x787   : > { %14691 = vmatprep.mubr.msk.bf16.mxu0 %vm15307_vm1, %v15306_v34 }
 0x78e   : > { %14692 = vmatmul.mubr.msk.bf16.vlgmr.msra.gmra.mrb[248].mxu0 %vm7930_vm9, %v11206_v33 }
 0x78f   : > { %14704 = vmatpush3.bf16.msra.mxu0 %v15200_v62  ;;  %14695 = vmatprep.mubr.msk.bf16.mxu0 %vm15307_vm1, %v15306_v34 }
 0x790   : > { %14705 = vmatprep.subr.bf16.mxu0 %v15306_v34 }
 0x793   : > { %14706 = vmatpush3.bf16.msra.mxu0 %v15201_v61 }
 0x794   : > { %14707 = vmatprep.subr.bf16.mxu0 %v15306_v34 }
 0x796   : > { %14696 = vmatmul.mubr.msk.bf16.gmra.mrb[252].mxu0 %vm7930_vm9, %v11208_v4 }
 0x797   : > { %14708 = vmatpush3.bf16.msra.mxu0 %v15203_v40  ;;  %14699 = vmatprep.mubr.msk.bf16.mxu0 %vm15307_vm1, %v15306_v34 }
 0x798   : > { %14709 = vmatprep.subr.bf16.mxu0 %v15306_v34 }
 0x79b   : > { %14710 = vmatpush3.bf16.msra.mxu0 %v15204_v5  ;;  %v11499_v5 = vld [vmem:[#allocation7 + $0x1] sm:$0x1] }
 0x79e   : > { %14700 = vmatmul.mubr.msk.bf16.gmra.mrb[0].mxu0 %vm7930_vm9, %v11207_v3 }
 0x79f   : > { %14711 = vmatprep.mubr.msk.bf16.mxu0 %vm15307_vm1, %v15306_v34 }
 0x7a6   : > { %14712 = vmatmul.mubr.msk.bf16.vlgmr.msra.gmra.mrb[248].mxu0 %vm7930_vm9, %v11359_v59 }
 0x7a7   : > { %14715 = vmatprep.mubr.msk.bf16.mxu0 %vm15307_vm1, %v15306_v34 }
 0x7ae   : > { %14716 = vmatmul.mubr.msk.bf16.gmra.mrb[252].mxu0 %vm7930_vm9, %v11368_v43 }
 0x7af   : > { %14719 = vmatprep.mubr.msk.bf16.mxu0 %vm15307_vm1, %v15306_v34  ;;  %vm11484_vm1 = vcmask 1040384  }
 0x7b0   : > { %vm18535_vm5 = vmand %vm11484_vm1, %vm7554_vm8 }
 0x7b6   : > { %14720 = vmatmul.mubr.msk.bf16.gmra.mrb[0].mxu0 %vm7930_vm9, %v11367_v58 }
 0x879   : > { %v11436_v29 = vpop.f32.mrb[248].mxu0 }
 0x87a   : > { %11468 = vst [vmem:[#allocation6] sm:$0xff] %v11436_v29  ;;  %v14713_v6 = vpop.f32.mrb[249].mxu0 }
 0x87b   : > { %v11439_v31 = vpop.f32.mrb[250].mxu0 }
 0x87c   : > { %11469 = vst [vmem:[#allocation6 + $0x8] sm:$0xff] %v11439_v31  ;;  %v14714_v50 = vpop.f32.mrb[251].mxu0 }
 0x881   : > { %v11444_v15 = vpop.f32.mrb[252].mxu0  ;;  %v11474_v32 = vld [vmem:[#allocation6 + $0x7] sm:$0x1] }
 0x882   : > { %11470 = vst [vmem:[#allocation6 + $0x10] sm:$0xff] %v11444_v15  ;;  %v14717_v0 = vpop.f32.mrb[253].mxu0 }
 0x883   : > { %v11475_v19 = vld [vmem:[#allocation6 + $0x8] sm:$0x1]  ;;  %v11489_v37 = vld [vmem:[#allocation6 + $0x9] sm:$0x1]  ;;  %v11490_v51 = vld [vmem:[#allocation6 + $0xa] sm:$0x1] }
 0x884   : > { %v11476_v36 = vmax.f32 %v11474_v32, %v11475_v19  ;;  %v11477_v53 = vld [vmem:[#allocation6 + $0xd] sm:$0x1]  ;;  %v11491_v10 = vmax.f32 %v11489_v37, %v11490_v51  ;;  %v11447_v41 = vpop.f32.mrb[254].mxu0  ;;  %v11479_v38 = vld [vmem:[#allocation6 + $0xe] sm:$0x1] }
 0x885   : > { %11471 = vst [vmem:[#allocation6 + $0x18] sm:$0xff] %v11447_v41  ;;  %v14718_v42 = vpop.f32.mrb[255].mxu0  ;;  %v11492_v8 = vld [vmem:[#allocation6 + $0xf] sm:$0x1] }
 0x886   : > { %v11478_v34 = vmax.f32 %v11476_v36, %v11477_v53  ;;  %v11493_v44 = vmax.f32 %v11491_v10, %v11492_v8 }
 0x888   : > { %v11480_v47 = vmax.f32 %v11478_v34, %v11479_v38 }
 0x889   : > { %v11494_v49 = vld [vmem:[#allocation6 + $0x10] sm:$0x1]  ;;  %v11502_v45 = vld [vmem:[#allocation6 + $0x13] sm:$0x1]  ;;  %v11503_v14 = vld [vmem:[#allocation6 + $0x14] sm:$0x1] }
 0x88a   : > { %v11481_v48 = vadd.f32 %v11480_v47, %v11473_v22  ;;  %v11495_v2 = vmax.f32 %v11493_v44, %v11494_v49  ;;  %v11504_v52 = vmax.f32 %v11502_v45, %v11503_v14  ;;  %v11515_v55 = vld [vmem:[#allocation6 + $0x15] sm:$0x1]  ;;  %v11516_v1 = vld [vmem:[#allocation6 + $0x16] sm:$0x1]  ;;  %v11452_v20 = vpop.f32.mrb[0].mxu0 }
 0x88b   : > { %v11517_v23 = vmax.f32 %v11515_v55, %v11516_v1  ;;  %v14721_v39 = vpop.f32.mrb[1].mxu0 }
 0x88c   : > { %v11482_v57 = vmax.f32 %v11481_v48, 0.0  ;;  %v11496_v56 = vadd.f32 %v11495_v2, %v11473_v22  ;;  %v11455_v9 = vpop.f32.mrb[2].mxu0  ;;  %v11505_v33 = vld [vmem:[#allocation6 + $0x19] sm:$0x1]  ;;  %v11518_v18 = vld [vmem:[#allocation6 + $0x1b] sm:$0x1] }
 0x88d   : > { %v11506_v40 = vmax.f32 %v11504_v52, %v11505_v33  ;;  %v11519_v4 = vmax.f32 %v11517_v23, %v11518_v18  ;;  %v14722_v7 = vpop.f32.mrb[3].mxu0  ;;  %v11507_v26 = vld [vmem:[#allocation6 + $0x1a] sm:$0x1]  ;;  %v11520_v12 = vld [vmem:[#allocation6 + $0x1c] sm:$0x1] }
 0x88e   : > { %v11483_v61 = vpack.c.bf16 %v11482_v57, %v11482_v57  ;;  %v11497_v3 = vmax.f32 %v11496_v56, 0.0 }
 0x88f   : > { %v11508_v63 = vmax.f32 %v11506_v40, %v11507_v26  ;;  %v11521_v16 = vmax.f32 %v11519_v4, %v11520_v12 }
 0x890   : > { %v11487_v60 = vsel %vm18535_vm5, %v11483_v61, %v11486_v11  ;;  %v11498_v35 = vpack.c.bf16 %v11497_v3, %v11497_v3 }
 0x891   : > { %11488 = vst [vmem:[#allocation7] sm:$0x1] %v11487_v60  ;;  %v11509_v27 = vadd.f32 %v11508_v63, %v11473_v22  ;;  %v11522_v17 = vadd.f32 %v11521_v16, %v11473_v22 }
 0x892   : > { %v11500_v30 = vsel %vm18535_vm5, %v11498_v35, %v11499_v5 }
 0x893   : > { %11501 = vst [vmem:[#allocation7 + $0x1] sm:$0x1] %v11500_v30  ;;  %v11510_v13 = vmax.f32 %v11509_v27, 0.0  ;;  %v11523_v21 = vmax.f32 %v11522_v17, 0.0 }
 0x895   : > { %v11511_v24 = vpack.c.bf16 %v11510_v13, %v11510_v13  ;;  %v11524_v59 = vpack.c.bf16 %v11523_v21, %v11523_v21 }
 0x897   : > { %v11513_v25 = vsel %vm18535_vm5, %v11511_v24, %v11512_v46  ;;  %v11526_v28 = vsel %vm18535_vm5, %v11524_v59, %v11525_v54 }
 0x898   : > { %11514 = vst [vmem:[#allocation7 + $0x2] sm:$0x1] %v11513_v25  ;;  %11527 = vst [vmem:[#allocation7 + $0x3] sm:$0x1] %v11526_v28 }
 0x899   : > { %15284 = dma.done.wait [#allocation9], 16384 }
 0x89a   : > { %15285 = vsyncadd [#allocation9], 4294950912  ;;  %v11534_v58 = vld [vmem:[#allocation8 + $0x8] sm:$0xff]  ;;  %v11533_v43 = vld [vmem:[#allocation8] sm:$0xff]  ;;  %v15309_v6 = vmov 1966171168   ;;  %v11674_v50 = vlaneseq }
 0x89b   : > { %v11538_v29 = vld [vmem:[#allocation8 + $0x28] sm:$0xff]  ;;  %11712 = vmatprep.subr.bf16.mxu1 %v11534_v58  ;;  %v11672_v31 = vunpack.c.l.s4 %v15309_v6  ;;  %v11537_v15 = vld [vmem:[#allocation8 + $0x20] sm:$0xff]  ;;  %s13079_s22 = sshll.u32 %s15392_s21, 4  ;;  %s12236_s24 = sshll.u32 %s16104_s15, 4  ;;  %vm12221_vm8 = vcmask 24576   ;;  %s18683_s24 = int_to_ptr.vmem [resolvable:$true] %s12236_s24 }
 0x89c   : > { %11713 = vmatpush1.bf16.msra.mxu1 %v11533_v43  ;;  %v11542_v0 = vld [vmem:[#allocation8 + $0x48] sm:$0xff]  ;;  %v18547_v19 = vshrl.u32 %v11674_v50, 7  ;;  %v11541_v36 = vld [vmem:[#allocation8 + $0x40] sm:$0xff]  ;;  %s18681_s30 = scalar_lea.hbm %s18737_s11, %s13079_s22  ;;  %s18811_s13 = sand.u32 1, %s15296_s18  }
 0x89d   : > { %11714 = vmatprep.subr.bf16.mxu1 %v11538_v29  ;;  %v11673_v32 = vunpack.c.0.s8 %v11672_v31  ;;  %v11546_v37 = vld [vmem:[#allocation8 + $0x68] sm:$0xff]  ;;  %v11545_v10 = vld [vmem:[#allocation8 + $0x60] sm:$0xff]  ;;  %s12224_s21 = scalar_lea.sflag [#allocation11], %s18811_s13  ;;  %s15240_s14 = scalar_lea.vmem %s18683_s24, 16 }
 0x89e   : > { %v11550_v34 = vld [vmem:[#allocation8 + $0x88] sm:$0xff]  ;;  %v11549_v22 = vld [vmem:[#allocation8 + $0x80] sm:$0xff]  ;;  %p15241_p11 = scmp.ne.s32.totalorder %s18683_s24, %s15240_s14  ;;  %s15310_s26 = smov [#allocation10]  }
 0x89f   : > { %v11676_v51 = vsub.s32 %v11673_v32, %v18547_v19  ;;  %v13046_v53 = vld.sshfl [vmem:[#allocation7] sm:$0x33 pattern:$0x75316420]  ;;  %v11554_v38 = vld [vmem:[#allocation8 + $0xa8] sm:$0xff]  ;;  %v11553_v8 = vld [vmem:[#allocation8 + $0xa0] sm:$0xff] }
 0x8a0   : > { %11715 = vmatpush1.bf16.msra.mxu1 %v11537_v15  ;;  %v11670_v41 = vcombine.high %v13046_v53, %v13046_v53  ;;  %v11558_v47 = vld [vmem:[#allocation8 + $0xc8] sm:$0xff]  ;;  %v11557_v44 = vld [vmem:[#allocation8 + $0xc0] sm:$0xff]  ;;  %p15242_p12 = pnand %p15241_p11, %p15409_p5  ;;  %s15244_s16 = sshll.u32 %s15310_s26, 4  ;;  %s15245_s16 = int_to_ptr.vmem [resolvable:$false] %s15244_s16 }
 0x8a1   : > { %11716 = vmatprep.subr.bf16.mxu1 %v11542_v0  ;;  %v11562_v49 = vld [vmem:[#allocation8 + $0xe8] sm:$0xff]  ;;  %v11561_v45 = vld [vmem:[#allocation8 + $0xe0] sm:$0xff]  ;;  %v18553_v3 = vrot.slane %v13046_v53, %v11676_v51  ;;  %s15246_s29 = scalar_lea.vmem %s15245_s16, 32  ;;  %p15247_p0 = scmp.lt.s32.totalorder %s18683_s24, %s15245_s16 }
 0x8a2   : > { %v18550_v42 = vrot.slane %v11670_v41, %v11676_v51  ;;  %v11566_v14 = vld [vmem:[#allocation8 + $0x108] sm:$0xff]  ;;  %v11565_v48 = vld [vmem:[#allocation8 + $0x100] sm:$0xff]  ;;  %v11536_v51 = vld [vmem:[#allocation8 + $0x18] sm:$0xff]  ;;  %p15243_p13 = pneg %p15242_p12  ;;  %p15248_p1 = scmp.lt.s32.totalorder %s15246_s29, %s15240_s14 }
 0x8a3   : > { %v11570_v2 = vld [vmem:[#allocation8 + $0x128] sm:$0xff]  ;;  %v11569_v52 = vld [vmem:[#allocation8 + $0x120] sm:$0xff]  ;;  %v18563_v53 = vcombine.high %v18553_v3, %v18553_v3  ;;  %v11540_v41 = vld [vmem:[#allocation8 + $0x38] sm:$0xff] }
 0x8a4   : > { %11717 = vmatpush1.bf16.msra.mxu1 %v11541_v36  ;;  %11744 = vmatprep.mubr.bf16.mxu1 %v18550_v42  ;;  %v11574_v55 = vld [vmem:[#allocation8 + $0x148] sm:$0xff]  ;;  %v11573_v1 = vld [vmem:[#allocation8 + $0x140] sm:$0xff]  ;;  %v18557_v40 = vcombine.high %v18550_v42, %v18550_v42  ;;  %p15249_p2 = por %p15248_p1, %p15247_p0 }
 0x8a5   : > { %11718 = vmatprep.subr.bf16.mxu1 %v11546_v37  ;;  %v11578_v20 = vld [vmem:[#allocation8 + $0x168] sm:$0xff]  ;;  %v11577_v23 = vld [vmem:[#allocation8 + $0x160] sm:$0xff] }
 0x8a6   : > { %v11582_v39 = vld [vmem:[#allocation8 + $0x188] sm:$0xff]  ;;  %v11581_v57 = vld [vmem:[#allocation8 + $0x180] sm:$0xff]  ;;  %p15250_p3 = pnand %p15249_p2, %p15243_p13 }
 0x8a7   : > { %v11586_v11 = vld [vmem:[#allocation8 + $0x1a8] sm:$0xff]  ;;  %v11585_v56 = vld [vmem:[#allocation8 + $0x1a0] sm:$0xff] }
 0x8a8   : > { %11719 = vmatpush1.bf16.msra.mxu1 %v11545_v10  ;;  %v11590_v9 = vld [vmem:[#allocation8 + $0x1c8] sm:$0xff]  ;;  %v11589_v62 = vld [vmem:[#allocation8 + $0x1c0] sm:$0xff]  ;;  %v11535_v10 = vld [vmem:[#allocation8 + $0x10] sm:$0xff] }
 0x8a9   : > { %11720 = vmatprep.subr.bf16.mxu1 %v11550_v34  ;;  %v11594_v33 = vld [vmem:[#allocation8 + $0x1e8] sm:$0xff]  ;;  %v11593_v18 = vld [vmem:[#allocation8 + $0x1e0] sm:$0xff] }
 0x8aa   : > { %v11598_v61 = vld [vmem:[#allocation8 + $0x208] sm:$0xff]  ;;  %v11597_v4 = vld [vmem:[#allocation8 + $0x200] sm:$0xff] }
 0x8ab   : > { %v11602_v7 = vld [vmem:[#allocation8 + $0x228] sm:$0xff]  ;;  %v11601_v5 = vld [vmem:[#allocation8 + $0x220] sm:$0xff] }
 0x8ac   : > { %11721 = vmatpush1.bf16.msra.mxu1 %v11549_v22  ;;  %v11606_v26 = vld [vmem:[#allocation8 + $0x248] sm:$0xff]  ;;  %v11605_v12 = vld [vmem:[#allocation8 + $0x240] sm:$0xff] }
 0x8ad   : > { %11722 = vmatprep.subr.bf16.mxu1 %v11554_v38  ;;  %v11610_v60 = vld [vmem:[#allocation8 + $0x268] sm:$0xff]  ;;  %v11609_v35 = vld [vmem:[#allocation8 + $0x260] sm:$0xff] }
 0x8ae   : > { %v11614_v63 = vld [vmem:[#allocation8 + $0x288] sm:$0xff]  ;;  %v11613_v16 = vld [vmem:[#allocation8 + $0x280] sm:$0xff] }
 0x8af   : > { %v11618_v30 = vld [vmem:[#allocation8 + $0x2a8] sm:$0xff]  ;;  %v11617_v27 = vld [vmem:[#allocation8 + $0x2a0] sm:$0xff] }
 0x8b0   : > { %11723 = vmatpush1.bf16.msra.mxu1 %v11553_v8  ;;  %v11622_v17 = vld [vmem:[#allocation8 + $0x2c8] sm:$0xff]  ;;  %v11621_v13 = vld [vmem:[#allocation8 + $0x2c0] sm:$0xff]  ;;  %v11539_v8 = vld [vmem:[#allocation8 + $0x30] sm:$0xff] }
 0x8b1   : > { %11724 = vmatprep.subr.bf16.mxu1 %v11558_v47  ;;  %v11626_v21 = vld [vmem:[#allocation8 + $0x2e8] sm:$0xff]  ;;  %v11625_v46 = vld [vmem:[#allocation8 + $0x2e0] sm:$0xff]  ;;  %v11544_v47 = vld [vmem:[#allocation8 + $0x58] sm:$0xff] }
 0x8b2   : > { %v11630_v54 = vld [vmem:[#allocation8 + $0x308] sm:$0xff]  ;;  %v11629_v24 = vld [vmem:[#allocation8 + $0x300] sm:$0xff] }
 0x8b3   : > { %v11634_v59 = vld [vmem:[#allocation8 + $0x328] sm:$0xff]  ;;  %v11633_v25 = vld [vmem:[#allocation8 + $0x320] sm:$0xff] }
 0x8b4   : > { %11725 = vmatpush1.bf16.msra.mxu1 %v11557_v44  ;;  %v11638_v28 = vld [vmem:[#allocation8 + $0x348] sm:$0xff]  ;;  %v11637_v58 = vld [vmem:[#allocation8 + $0x340] sm:$0xff] }
 0x8b5   : > { %11726 = vmatprep.subr.bf16.mxu1 %v11562_v49  ;;  %v11642_v43 = vld [vmem:[#allocation8 + $0x368] sm:$0xff]  ;;  %v11641_v29 = vld [vmem:[#allocation8 + $0x360] sm:$0xff] }
 0x8b6   : > { %v11646_v6 = vld [vmem:[#allocation8 + $0x388] sm:$0xff]  ;;  %v11645_v31 = vld [vmem:[#allocation8 + $0x380] sm:$0xff] }
 0x8b7   : > { %v11650_v50 = vld [vmem:[#allocation8 + $0x3a8] sm:$0xff]  ;;  %v11649_v15 = vld [vmem:[#allocation8 + $0x3a0] sm:$0xff] }
 0x8b8   : > { %11727 = vmatpush1.bf16.msra.mxu1 %v11561_v45  ;;  %v11654_v0 = vld [vmem:[#allocation8 + $0x3c8] sm:$0xff]  ;;  %v11653_v32 = vld [vmem:[#allocation8 + $0x3c0] sm:$0xff]  ;;  %v11543_v45 = vld [vmem:[#allocation8 + $0x50] sm:$0xff] }
 0x8b9   : > { %11728 = vmatprep.subr.bf16.mxu1 %v11566_v14  ;;  %v11658_v36 = vld [vmem:[#allocation8 + $0x3e8] sm:$0xff]  ;;  %v11657_v37 = vld [vmem:[#allocation8 + $0x3e0] sm:$0xff]  ;;  %v11548_v14 = vld [vmem:[#allocation8 + $0x78] sm:$0xff] }
 0x8ba   : > { %v15208_v34 = vld [vmem:[%s18735_s9 + $0x40] sm:$0xff]   ;;  %v15210_v38 = vld [vmem:[%s18735_s9 + $0x48] sm:$0xff]   ;;  %v15212_v49 = vld [vmem:[%s18735_s9 + $0x50] sm:$0xff]  }
 0x8bb   : > { %v15209_v22 = vld [vmem:[%s18735_s9] sm:$0xff]   ;;  %13437 = vmatprep.subr.bf16.mxu0 %v15208_v34  ;;  %v15211_v44 = vld [vmem:[%s18735_s9 + $0x8] sm:$0xff]   ;;  %v11631_v34 = vld [vmem:[#allocation8 + $0x310] sm:$0xff] }
 0x8bc   : > { %11729 = vmatpush1.bf16.msra.mxu1 %v11565_v48  ;;  %13438 = vmatpush3.bf16.msra.mxu0 %v15209_v22  ;;  %v15214_v48 = vld [vmem:[%s18735_s9 + $0x58] sm:$0xff]  }
 0x8bd   : > { %11730 = vmatprep.subr.bf16.mxu1 %v11570_v2  ;;  %13439 = vmatprep.subr.bf16.mxu0 %v15210_v38  ;;  %v11547_v2 = vld [vmem:[#allocation8 + $0x70] sm:$0xff]  ;;  %v11636_v22 = vld [vmem:[#allocation8 + $0x338] sm:$0xff] }
 0x8be   : > { %v11635_v38 = vld [vmem:[#allocation8 + $0x330] sm:$0xff] }
 0x8c0   : > { %11731 = vmatpush1.bf16.msra.mxu1 %v11569_v52  ;;  %13440 = vmatpush3.bf16.msra.mxu0 %v15211_v44  ;;  %v11552_v52 = vld [vmem:[#allocation8 + $0x98] sm:$0xff] }
 0x8c1   : > { %11732 = vmatprep.subr.bf16.mxu1 %v11574_v55  ;;  %13441 = vmatprep.subr.bf16.mxu0 %v15212_v49  ;;  %v15215_v55 = vld [vmem:[%s18735_s9 + $0x18] sm:$0xff]  }
 0x8c2   : > { %v11644_v44 = vld [vmem:[#allocation8 + $0x378] sm:$0xff]  ;;  %v11643_v49 = vld [vmem:[#allocation8 + $0x370] sm:$0xff] }
 0x8c4   : > { %11733 = vmatpush1.bf16.msra.mxu1 %v11573_v1  ;;  %v15216_v1 = vld [vmem:[%s18735_s9 + $0x60] sm:$0xff]  }
 0x8c5   : > { %11734 = vmatprep.subr.bf16.mxu1 %v11578_v20  ;;  %v11551_v20 = vld [vmem:[#allocation8 + $0x90] sm:$0xff] }
 0x8c8   : > { %11735 = vmatpush1.bf16.msra.mxu1 %v11577_v23  ;;  %v11556_v23 = vld [vmem:[#allocation8 + $0xb8] sm:$0xff] }
 0x8c9   : > { %11736 = vmatprep.subr.bf16.mxu1 %v11582_v39  ;;  %v15217_v39 = vld [vmem:[%s18735_s9 + $0x20] sm:$0xff]  }
 0x8cc   : > { %11737 = vmatpush1.bf16.msra.mxu1 %v11581_v57  ;;  %v15218_v57 = vld [vmem:[%s18735_s9 + $0x68] sm:$0xff]  }
 0x8cd   : > { %11738 = vmatprep.subr.bf16.mxu1 %v11586_v11  ;;  %v11555_v11 = vld [vmem:[#allocation8 + $0xb0] sm:$0xff] }
 0x8d0   : > { %11739 = vmatpush1.bf16.msra.mxu1 %v11585_v56  ;;  %v11560_v56 = vld [vmem:[#allocation8 + $0xd8] sm:$0xff] }
 0x8d1   : > { %11740 = vmatprep.subr.bf16.mxu1 %v11590_v9  ;;  %v15219_v9 = vld [vmem:[%s18735_s9 + $0x28] sm:$0xff]  }
 0x8d4   : > { %11741 = vmatpush1.bf16.msra.mxu1 %v11589_v62  ;;  %v11559_v62 = vld [vmem:[#allocation8 + $0xd0] sm:$0xff] }
 0x8d5   : > { %11742 = vmatprep.subr.bf16.mxu1 %v11594_v33  ;;  %v11564_v33 = vld [vmem:[#allocation8 + $0xf8] sm:$0xff] }
 0x8d8   : > { %11743 = vmatpush1.bf16.msra.mxu1 %v11593_v18  ;;  %v11563_v18 = vld [vmem:[#allocation8 + $0xf0] sm:$0xff] }
 0x8d9   : > { %11753 = vmatprep.subr.bf16.mxu1 %v11598_v61  ;;  %v11568_v61 = vld [vmem:[#allocation8 + $0x118] sm:$0xff] }
 0x8db   : > { %11745 = vmatmul.mubr.bf16.vlgmr.msra.gmra.mrb[248].mxu1 %v18553_v3 }
 0x8dc   : > { %11754 = vmatpush1.bf16.msra.mxu1 %v11597_v4  ;;  %11785 = vmatprep.mubr.bf16.mxu1 %v18557_v40  ;;  %v11567_v4 = vld [vmem:[#allocation8 + $0x110] sm:$0xff] }
 0x8dd   : > { %11755 = vmatprep.subr.bf16.mxu1 %v11602_v7  ;;  %v11572_v7 = vld [vmem:[#allocation8 + $0x138] sm:$0xff] }
 0x8e0   : > { %11756 = vmatpush1.bf16.msra.mxu1 %v11601_v5  ;;  %v11571_v5 = vld [vmem:[#allocation8 + $0x130] sm:$0xff] }
 0x8e1   : > { %11757 = vmatprep.subr.bf16.mxu1 %v11606_v26  ;;  %v11576_v26 = vld [vmem:[#allocation8 + $0x158] sm:$0xff] }
 0x8e4   : > { %11758 = vmatpush1.bf16.msra.mxu1 %v11605_v12  ;;  %v11575_v12 = vld [vmem:[#allocation8 + $0x150] sm:$0xff] }
 0x8e5   : > { %11759 = vmatprep.subr.bf16.mxu1 %v11610_v60  ;;  %v11580_v60 = vld [vmem:[#allocation8 + $0x178] sm:$0xff] }
 0x8e8   : > { %11760 = vmatpush1.bf16.msra.mxu1 %v11609_v35  ;;  %v11579_v35 = vld [vmem:[#allocation8 + $0x170] sm:$0xff] }
 0x8e9   : > { %11761 = vmatprep.subr.bf16.mxu1 %v11614_v63  ;;  %v11584_v63 = vld [vmem:[#allocation8 + $0x198] sm:$0xff] }
 0x8ec   : > { %11762 = vmatpush1.bf16.msra.mxu1 %v11613_v16  ;;  %v11583_v16 = vld [vmem:[#allocation8 + $0x190] sm:$0xff] }
 0x8ed   : > { %11763 = vmatprep.subr.bf16.mxu1 %v11618_v30  ;;  %v11588_v30 = vld [vmem:[#allocation8 + $0x1b8] sm:$0xff] }
 0x8f0   : > { %11764 = vmatpush1.bf16.msra.mxu1 %v11617_v27  ;;  %v11587_v27 = vld [vmem:[#allocation8 + $0x1b0] sm:$0xff] }
 0x8f1   : > { %11765 = vmatprep.subr.bf16.mxu1 %v11622_v17  ;;  %v11592_v17 = vld [vmem:[#allocation8 + $0x1d8] sm:$0xff] }
 0x8f4   : > { %11766 = vmatpush1.bf16.msra.mxu1 %v11621_v13  ;;  %v11591_v13 = vld [vmem:[#allocation8 + $0x1d0] sm:$0xff] }
 0x8f5   : > { %11767 = vmatprep.subr.bf16.mxu1 %v11626_v21  ;;  %v11596_v21 = vld [vmem:[#allocation8 + $0x1f8] sm:$0xff] }
 0x8f8   : > { %11768 = vmatpush1.bf16.msra.mxu1 %v11625_v46  ;;  %v11595_v46 = vld [vmem:[#allocation8 + $0x1f0] sm:$0xff] }
 0x8f9   : > { %11769 = vmatprep.subr.bf16.mxu1 %v11630_v54  ;;  %v11600_v54 = vld [vmem:[#allocation8 + $0x218] sm:$0xff] }
 0x8fc   : > { %11770 = vmatpush1.bf16.msra.mxu1 %v11629_v24  ;;  %v11599_v24 = vld [vmem:[#allocation8 + $0x210] sm:$0xff] }
 0x8fd   : > { %11771 = vmatprep.subr.bf16.mxu1 %v11634_v59  ;;  %v11604_v59 = vld [vmem:[#allocation8 + $0x238] sm:$0xff] }
 0x900   : > { %11772 = vmatpush1.bf16.msra.mxu1 %v11633_v25  ;;  %v11603_v25 = vld [vmem:[#allocation8 + $0x230] sm:$0xff] }
 0x901   : > { %11773 = vmatprep.subr.bf16.mxu1 %v11638_v28  ;;  %v11608_v28 = vld [vmem:[#allocation8 + $0x258] sm:$0xff] }
 0x904   : > { %11774 = vmatpush1.bf16.msra.mxu1 %v11637_v58  ;;  %v11607_v58 = vld [vmem:[#allocation8 + $0x250] sm:$0xff] }
 0x905   : > { %11775 = vmatprep.subr.bf16.mxu1 %v11642_v43  ;;  %v11612_v43 = vld [vmem:[#allocation8 + $0x278] sm:$0xff] }
 0x908   : > { %11776 = vmatpush1.bf16.msra.mxu1 %v11641_v29  ;;  %v11611_v29 = vld [vmem:[#allocation8 + $0x270] sm:$0xff] }
 0x909   : > { %11777 = vmatprep.subr.bf16.mxu1 %v11646_v6  ;;  %v11616_v6 = vld [vmem:[#allocation8 + $0x298] sm:$0xff] }
 0x90c   : > { %11778 = vmatpush1.bf16.msra.mxu1 %v11645_v31  ;;  %v11615_v31 = vld [vmem:[#allocation8 + $0x290] sm:$0xff] }
 0x90d   : > { %11779 = vmatprep.subr.bf16.mxu1 %v11650_v50  ;;  %v11620_v50 = vld [vmem:[#allocation8 + $0x2b8] sm:$0xff] }
 0x910   : > { %11780 = vmatpush1.bf16.msra.mxu1 %v11649_v15  ;;  %v11624_v15 = vld [vmem:[#allocation8 + $0x2d8] sm:$0xff] }
 0x911   : > { %11781 = vmatprep.subr.bf16.mxu1 %v11654_v0  ;;  %v15221_v0 = vld [vmem:[%s18735_s9 + $0x30] sm:$0xff]  }
 0x914   : > { %11782 = vmatpush1.bf16.msra.mxu1 %v11653_v32  ;;  %v11623_v32 = vld [vmem:[#allocation8 + $0x2d0] sm:$0xff] }
 0x915   : > { %11783 = vmatprep.subr.bf16.mxu1 %v11658_v36  ;;  %v15222_v36 = vld [vmem:[%s18735_s9 + $0x78] sm:$0xff]  }
 0x918   : > { %11784 = vmatpush1.bf16.msra.mxu1 %v11657_v37  ;;  %v11628_v37 = vld [vmem:[#allocation8 + $0x2f8] sm:$0xff] }
 0x919   : > { %11794 = vmatprep.subr.bf16.mxu1 %v11536_v51  ;;  %v15223_v51 = vld [vmem:[%s18735_s9 + $0x38] sm:$0xff]  }
 0x91b   : > { %11786 = vmatmul.mubr.bf16.vlgmr.msra.gmra.mrb[248].mxu1 %v18563_v53 }
 0x91c   : > { %11795 = vmatpush1.bf16.msra.mxu1 %v11535_v10  ;;  %11826 = vmatprep.mubr.bf16.mxu1 %v18550_v42  ;;  %v15213_v42 = vld [vmem:[%s18735_s9 + $0x10] sm:$0xff]  }
 0x91d   : > { %11796 = vmatprep.subr.bf16.mxu1 %v11540_v41  ;;  %13442 = vmatpush3.bf16.msra.mxu0 %v15213_v42  ;;  %v11627_v10 = vld [vmem:[#allocation8 + $0x2f0] sm:$0xff]  ;;  %v11632_v41 = vld [vmem:[#allocation8 + $0x318] sm:$0xff] }
 0x91e   : > { %13443 = vmatprep.subr.bf16.mxu0 %v15214_v48  ;;  %v11652_v42 = vld [vmem:[#allocation8 + $0x3b8] sm:$0xff]  ;;  %v11651_v48 = vld [vmem:[#allocation8 + $0x3b0] sm:$0xff] }
 0x920   : > { %11797 = vmatpush1.bf16.msra.mxu1 %v11539_v8  ;;  %v11640_v8 = vld [vmem:[#allocation8 + $0x358] sm:$0xff] }
 0x921   : > { %11798 = vmatprep.subr.bf16.mxu1 %v11544_v47  ;;  %13444 = vmatpush3.bf16.msra.mxu0 %v15215_v55  ;;  %v11639_v47 = vld [vmem:[#allocation8 + $0x350] sm:$0xff]  ;;  %v11660_v55 = vld [vmem:[#allocation8 + $0x3f8] sm:$0xff] }
 0x922   : > { %13445 = vmatprep.subr.bf16.mxu0 %v15216_v1  ;;  %v11659_v1 = vld [vmem:[#allocation8 + $0x3f0] sm:$0xff] }
 0x924   : > { %11799 = vmatpush1.bf16.msra.mxu1 %v11543_v45  ;;  %v11648_v45 = vld [vmem:[#allocation8 + $0x398] sm:$0xff] }
 0x925   : > { %11800 = vmatprep.subr.bf16.mxu1 %v11548_v14  ;;  %13446 = vmatpush3.bf16.msra.mxu0 %v15217_v39  ;;  %v11647_v14 = vld [vmem:[#allocation8 + $0x390] sm:$0xff]  ;;  %v15226_v39 = vld [vmem:[%s18735_s9 + $0xc8] sm:$0xff]  }
 0x926   : > { %13447 = vmatprep.subr.bf16.mxu0 %v15218_v57  ;;  %v15227_v57 = vld [vmem:[%s18735_s9 + $0x88] sm:$0xff]  }
 0x928   : > { %11801 = vmatpush1.bf16.msra.mxu1 %v11547_v2  ;;  %v11656_v2 = vld [vmem:[#allocation8 + $0x3d8] sm:$0xff] }
 0x929   : > { %11802 = vmatprep.subr.bf16.mxu1 %v11552_v52  ;;  %13448 = vmatpush3.bf16.msra.mxu0 %v15219_v9  ;;  %v11655_v52 = vld [vmem:[#allocation8 + $0x3d0] sm:$0xff] }
 0x92a   : > { %v15231_v9 = vld [vmem:[%s18735_s9 + $0x98] sm:$0xff]  }
 0x92c   : > { %11803 = vmatpush1.bf16.msra.mxu1 %v11551_v20  ;;  %v15224_v20 = vld [vmem:[%s18735_s9 + $0xc0] sm:$0xff]  }
 0x92d   : > { %11804 = vmatprep.subr.bf16.mxu1 %v11556_v23  ;;  %v15225_v23 = vld [vmem:[%s18735_s9 + $0x80] sm:$0xff]  }
 0x930   : > { %11805 = vmatpush1.bf16.msra.mxu1 %v11555_v11  ;;  %v15228_v11 = vld [vmem:[%s18735_s9 + $0xd0] sm:$0xff]  }
 0x931   : > { %11806 = vmatprep.subr.bf16.mxu1 %v11560_v56  ;;  %v15229_v56 = vld [vmem:[%s18735_s9 + $0x90] sm:$0xff]  }
 0x934   : > { %11807 = vmatpush1.bf16.msra.mxu1 %v11559_v62  ;;  %v15232_v62 = vld [vmem:[%s18735_s9 + $0xe0] sm:$0xff]  }
 0x935   : > { %11808 = vmatprep.subr.bf16.mxu1 %v11564_v33  ;;  %v15233_v33 = vld [vmem:[%s18735_s9 + $0xa0] sm:$0xff]  }
 0x938   : > { %11809 = vmatpush1.bf16.msra.mxu1 %v11563_v18  ;;  %v15234_v18 = vld [vmem:[%s18735_s9 + $0xe8] sm:$0xff]  }
 0x939   : > { %11810 = vmatprep.subr.bf16.mxu1 %v11568_v61  ;;  %v15235_v61 = vld [vmem:[%s18735_s9 + $0xa8] sm:$0xff]  }
 0x93c   : > { %11811 = vmatpush1.bf16.msra.mxu1 %v11567_v4  ;;  %v11694_v4 = vsub.s32 0, %v18547_v19 }
 0x93d   : > { %11812 = vmatprep.subr.bf16.mxu1 %v11572_v7  ;;  %v11661_v7 = vld [vmem:[%s18734_s8] sm:$0xf] }
 0x940   : > { %11813 = vmatpush1.bf16.msra.mxu1 %v11571_v5  ;;  %v11698_v5 = vsub.s32 1, %v18547_v19 }
 0x941   : > { %11814 = vmatprep.subr.bf16.mxu1 %v11576_v26  ;;  %v11695_v26 = vrot.slane %v11661_v7, %v11694_v4 }
 0x944   : > { %11815 = vmatpush1.bf16.msra.mxu1 %v11575_v12  ;;  %v11699_v12 = vrot.slane %v11661_v7, %v11698_v5 }
 0x945   : > { %11816 = vmatprep.subr.bf16.mxu1 %v11580_v60  ;;  %v15236_v60 = vld [vmem:[%s18735_s9 + $0xf0] sm:$0xff]  }
 0x948   : > { %11817 = vmatpush1.bf16.msra.mxu1 %v11579_v35 }
 0x949   : > { %11818 = vmatprep.subr.bf16.mxu1 %v11584_v63  ;;  %v15237_v63 = vld [vmem:[%s18735_s9 + $0xb0] sm:$0xff]  }
 0x94c   : > { %11819 = vmatpush1.bf16.msra.mxu1 %v11583_v16 }
 0x94d   : > { %11820 = vmatprep.subr.bf16.mxu1 %v11588_v30 }
 0x950   : > { %11821 = vmatpush1.bf16.msra.mxu1 %v11587_v27 }
 0x951   : > { %11822 = vmatprep.subr.bf16.mxu1 %v11592_v17 }
 0x954   : > { %11823 = vmatpush1.bf16.msra.mxu1 %v11591_v13 }
 0x955   : > { %11824 = vmatprep.subr.bf16.mxu1 %v11596_v21 }
 0x958   : > { %11825 = vmatpush1.bf16.msra.mxu1 %v11595_v46  ;;  %v15238_v46 = vld [vmem:[%s18735_s9 + $0xf8] sm:$0xff]  }
 0x959   : > { %11835 = vmatprep.subr.bf16.mxu1 %v11600_v54 }
 0x95b   : > { %11827 = vmatmul.mubr.bf16.vlgmr.msra.gmra.mrb[252].mxu1 %v18553_v3  ;;  %v11619_v3 = vld [vmem:[#allocation8 + $0x2b0] sm:$0xff] }
 0x95c   : > { %11836 = vmatpush1.bf16.msra.mxu1 %v11599_v24  ;;  %11867 = vmatprep.mubr.bf16.mxu1 %v18557_v40  ;;  %v15220_v40 = vld [vmem:[%s18735_s9 + $0x70] sm:$0xff]   ;;  %v15239_v24 = vld [vmem:[%s18735_s9 + $0xb8] sm:$0xff]  }
 0x95d   : > { %11837 = vmatprep.subr.bf16.mxu1 %v11604_v59  ;;  %13449 = vmatprep.subr.bf16.mxu0 %v15220_v40 }
 0x95e   : > { %13450 = vmatpush3.bf16.msra.mxu0 %v15221_v0 }
 0x95f   : > { %13451 = vmatprep.subr.bf16.mxu0 %v15222_v36 }
 0x960   : > { %11838 = vmatpush1.bf16.msra.mxu1 %v11603_v25 }
 0x961   : > { %11839 = vmatprep.subr.bf16.mxu1 %v11608_v28  ;;  %v11702_v28 = vsub.s32 2, %v18547_v19 }
 0x962   : > { %13452 = vmatpush3.bf16.msra.mxu0 %v15223_v51 }
 0x964   : > { %11840 = vmatpush1.bf16.msra.mxu1 %v11607_v58  ;;  %v11706_v58 = vsub.s32 3, %v18547_v19 }
 0x965   : > { %11841 = vmatprep.subr.bf16.mxu1 %v11612_v43  ;;  %v11703_v43 = vrot.slane %v11661_v7, %v11702_v28 }
 0x968   : > { %11842 = vmatpush1.bf16.msra.mxu1 %v11611_v29  ;;  %v11707_v29 = vrot.slane %v11661_v7, %v11706_v58 }
 0x969   : > { %11843 = vmatprep.subr.bf16.mxu1 %v11616_v6 }
 0x96c   : > { %11844 = vmatpush1.bf16.msra.mxu1 %v11615_v31 }
 0x96d   : > { %11845 = vmatprep.subr.bf16.mxu1 %v11620_v50 }
 0x970   : > { %11846 = vmatpush1.bf16.msra.mxu1 %v11619_v3 }
 0x971   : > { %11847 = vmatprep.subr.bf16.mxu1 %v11624_v15 }
 0x974   : > { %11848 = vmatpush1.bf16.msra.mxu1 %v11623_v32 }
 0x975   : > { %11849 = vmatprep.subr.bf16.mxu1 %v11628_v37 }
 0x978   : > { %11850 = vmatpush1.bf16.msra.mxu1 %v11627_v10 }
 0x979   : > { %11851 = vmatprep.subr.bf16.mxu1 %v11632_v41 }
 0x97c   : > { %11852 = vmatpush1.bf16.msra.mxu1 %v11631_v34 }
 0x97d   : > { %11853 = vmatprep.subr.bf16.mxu1 %v11636_v22  ;;  %v11948_v22 = vld [vmem:[%s18736_s10] sm:$0x1] }
 0x980   : > { %11854 = vmatpush1.bf16.msra.mxu1 %v11635_v38 }
 0x981   : > { %11855 = vmatprep.subr.bf16.mxu1 %v11640_v8 }
 0x984   : > { %11856 = vmatpush1.bf16.msra.mxu1 %v11639_v47 }
 0x985   : > { %11857 = vmatprep.subr.bf16.mxu1 %v11644_v44 }
 0x988   : > { %11858 = vmatpush1.bf16.msra.mxu1 %v11643_v49 }
 0x989   : > { %11859 = vmatprep.subr.bf16.mxu1 %v11648_v45 }
 0x98c   : > { %11860 = vmatpush1.bf16.msra.mxu1 %v11647_v14 }
 0x98d   : > { %11861 = vmatprep.subr.bf16.mxu1 %v11652_v42 }
 0x990   : > { %11862 = vmatpush1.bf16.msra.mxu1 %v11651_v48 }
 0x991   : > { %11863 = vmatprep.subr.bf16.mxu1 %v11656_v2 }
 0x994   : > { %11864 = vmatpush1.bf16.msra.mxu1 %v11655_v52 }
 0x995   : > { %11865 = vmatprep.subr.bf16.mxu1 %v11660_v55 }
 0x998   : > { %11866 = vmatpush1.bf16.msra.mxu1 %v11659_v1 }
 0x999   : > { %13459 = vmatprep.subr.bf16.mxu1 %v15224_v20 }
 0x99b   : > { %11868 = vmatmul.mubr.bf16.vlgmr.msra.gmra.mrb[252].mxu1 %v18563_v53  ;;  %v15230_v53 = vld [vmem:[%s18735_s9 + $0xd8] sm:$0xff]  }
 0x99c   : > { %13460 = vmatpush3.bf16.msra.mxu1 %v15225_v23 }
 0x99d   : > { %13461 = vmatprep.subr.bf16.mxu1 %v15226_v39 }
 0x9a0   : > { %13462 = vmatpush3.bf16.msra.mxu1 %v15227_v57 }
 0x9a1   : > { %13463 = vmatprep.subr.bf16.mxu1 %v15228_v11 }
 0x9a4   : > { %13464 = vmatpush3.bf16.msra.mxu1 %v15229_v56 }
 0x9a5   : > { %13465 = vmatprep.subr.bf16.mxu1 %v15230_v53 }
 0x9a8   : > { %13466 = vmatpush3.bf16.msra.mxu1 %v15231_v9 }
 0x9a9   : > { %13467 = vmatprep.subr.bf16.mxu1 %v15232_v62 }
 0x9ac   : > { %13468 = vmatpush3.bf16.msra.mxu1 %v15233_v33 }
 0x9ad   : > { %13469 = vmatprep.subr.bf16.mxu1 %v15234_v18 }
 0x9b0   : > { %13470 = vmatpush3.bf16.msra.mxu1 %v15235_v61 }
 0x9b1   : > { %13471 = vmatprep.subr.bf16.mxu1 %v15236_v60 }
 0x9b4   : > { %13472 = vmatpush3.bf16.msra.mxu1 %v15237_v63 }
 0x9b5   : > { %13473 = vmatprep.subr.bf16.mxu1 %v15238_v46 }
 0x9b8   : > { %13474 = vmatpush3.bf16.msra.mxu1 %v15239_v24 }
 0x9ee   : > { %v11787_v35 = vpop.f32.mrb[248].mxu1 }
 0x9ef   : > { %v14723_v16 = vadd.f32 %v11787_v35, %v11695_v26  ;;  %v11789_v30 = vpop.f32.mrb[249].mxu1 }
 0x9f0   : > { %v14724_v27 = vadd.f32 %v11789_v30, %v11699_v12  ;;  %v11791_v17 = vpop.f32.mrb[250].mxu1 }
 0x9f1   : > { %v11876_v13 = vmax.f32 %v14723_v16, 0.0  ;;  %v11792_v21 = vpop.f32.mrb[251].mxu1 }
 0x9f2   : > { %v11877_v54 = vmax.f32 %v14724_v27, 0.0 }
 0x9f3   : > { %v11880_v25 = vpack.c.bf16 %v11876_v13, %v11876_v13 }
 0x9f4   : > { %v11881_v59 = vpack.c.bf16 %v11877_v54, %v11877_v54 }
 0x9f6   : > { %12173 = vmatprep.mubr.bf16.mxu0 %v11881_v59 }
 0x9f7   : > { %12174 = vmatmul.mubr.bf16.vlgmr.msra.gmra.mrb[4].mxu0 %v11880_v25 }
 0xa6e   : > { %v11869_v6 = vpop.f32.mrb[252].mxu1 }
 0xa6f   : > { %v14725_v31 = vadd.f32 %v11869_v6, %v11703_v43  ;;  %v11871_v50 = vpop.f32.mrb[253].mxu1 }
 0xa70   : > { %v14726_v3 = vadd.f32 %v11871_v50, %v11707_v29  ;;  %v11873_v40 = vpop.f32.mrb[254].mxu1 }
 0xa71   : > { %v11878_v15 = vmax.f32 %v14725_v31, 0.0  ;;  %v11874_v0 = vpop.f32.mrb[255].mxu1 }
 0xa72   : > { %v11879_v32 = vmax.f32 %v14726_v3, 0.0 }
 0xa73   : > { %v11882_v37 = vpack.c.bf16 %v11878_v15, %v11878_v15 }
 0xa74   : > { %v11883_v36 = vpack.c.bf16 %v11879_v32, %v11879_v32 }
 0xa76   : > { %12213 = vmatprep.mubr.bf16.mxu1 %v11883_v36 }
 0xa77   : > { %12214 = vmatmul.mubr.bf16.vlgmr.msra.gmra.mrb[0].mxu1 %v11882_v37 }
 0xaca   : > { %v13453_v51 = vpop.f32.mrb[4].mxu0 }
 0xacb   : > { %v13454_v10 = vpop.f32.mrb[5].mxu0 }
 0xacc   : > { %v13455_v41 = vadd.f32 %v13454_v10, %v13453_v51  ;;  %v13456_v19 = vpop.f32.mrb[6].mxu0 }
 0xacd   : > { %v13457_v34 = vpop.f32.mrb[7].mxu0 }
 0xace   : > { %v12176_v47 = vadd.f32 %v13455_v41, %v11948_v22 }
 0xb4a   : > { %v13475_v38 = vpop.f32.mrb[0].mxu1 }
 0xb4b   : > { %v13476_v8 = vpop.f32.mrb[1].mxu1 }
 0xb4c   : > { %v13477_v44 = vadd.f32 %v13476_v8, %v13475_v38  ;;  %v13478_v49 = vpop.f32.mrb[2].mxu1 }
 0xb4d   : > { %v13479_v45 = vpop.f32.mrb[3].mxu1 }
 0xb4e   : > { %v12216_v14 = vadd.f32 %v13477_v44, %v12176_v47 }
 0xb50   : > { %12222 = vst.msk [vmem:[%s16104_s15] sm:$0x1] %vm12221_vm8, %v12216_v14 }
 0xb51   : > { %15253 = shalt.err (!%p15250_p3)
}
 0xb52   : > { %s15254_s15 = scalar_lea.hbm %s18681_s30, 16  ;;  %s15258_s12 = scalar_lea.hbm %s18737_s11, 32 }
 0xb53   : > { %p15255_p4 = scmp.ne.s32.totalorder %s18681_s30, %s15254_s15  ;;  %p15259_p9 = scmp.lt.u32.totalorder %s18681_s30, %s18737_s11 }
 0xb54   : > { %p15260_p10 = scmp.lt.u32.totalorder %s15258_s12, %s15254_s15  ;;  %p15262_p12 = scmp.lt.u32.totalorder %s15254_s15, %s18681_s30 }
 0xb55   : > { %p15256_p7 = pnand %p15255_p4, %p15409_p5 }
 0xb56   : > { %p15261_p11 = por %p15260_p10, %p15259_p9 }
 0xb57   : > { %p15257_p8 = pneg %p15256_p7 }
 0xb58   : > { %p15263_p13 = por %p15262_p12, %p15261_p11 }
 0xb5a   : > { %p15264_p0 = pnand %p15263_p13, %p15257_p8 }
 0xb5c   : > { %15267 = shalt.err (!%p15264_p0)
}
 0xb5d   : > { %14832 = dma.vmem_to_hbm [thread:$0]  (%p15409_p5), %s18683_s24, 16, %s18681_s30, %s12224_s21  }
 0xb5e PF: > { %p14838_p1 = scmp.ge.s32.totalorder %s15304_s20, 2  ;;  %s12248_s14 = sand.u32 1, %s15292_s17  }
 0xb5f   : > { %s12249_s16 = scalar_lea.sflag [#allocation11], %s12248_s14 }
 0xb60   : > { %p14835_p2 = pnand %p14838_p1, %p15413_p6 }
 0xb62   : > { %15287 = dma.done.wait (!%p14835_p2), %s12249_s16, 16  }
 0xb63   : > { %15289 = vsyncadd (!%p14835_p2), %s12249_s16, 4294967280  ;;  %s18812_s29 = sld [smem:[#allocation15_spill]]  ;;  %p21_p3 = scmp.ge.s32.totalorder %s15396_s23, 4  }
 0xb64   : > { %s18813_s17 = smov %s15296_s18  ;;  %s18814_s18 = smov %s15300_s19 }
 0xb65   : > { %s18816_s20 = smov %s15396_s23  ;;  %23 = sbr.rel (!%p21_p3) target bundleno = 3 (0x3), region = 218 }
 0xb69   : > { %s18815_s19 = smov %s18812_s29 }
 0xb6c   :  { %12253 = vsyncpa [#allocation11], 1 }
 0xb6d   :  { %12255 = vsyncpa [#allocation11 + $0x1], 1 }
 0xb6e   :  { %12256 = vsyncmov [#allocation9] }
 0xb71   :  { %s12257_s20 = vpop.sfrf %12256 }
 0xb72   :  { %p13082_p5 = scmp.ne.s32.totalorder %s12257_s20, 0 }
 0xb74   :  { %12261 = shalt.err (%p13082_p5)  }

</bundles_post_ra>
